<compile_context>
chip_gen: v6e
topology: v6e:2x2x1
jax: 0.10.0
libtpu: 0.0.40
codegen_flags: <defaults>
</compile_context>

<pallas_src>
import jax
import jax.numpy as jnp
from jax.experimental import pallas as pl
from jax.experimental.pallas import tpu as pltpu

_HP = 128  # one f32 lane tile per gate


# ----------------------------------------------------------------------------
# Fused kernel factory (all LSTM layers + time loop + FC head, one invocation)
# ----------------------------------------------------------------------------
def _make_fused_kernel(T, B, D, HP, O, num_layers):
    D_pad = ((D + 7) // 8) * 8  # Whh block starts on a sublane-aligned row

    def kernel(*refs):
        x_ref = refs[0]                      # (B, T, D)
        slab_refs = refs[1:1 + num_layers]   # per-layer weight slabs
        fc_ref = refs[1 + num_layers]        # (HP + 1, O)
        out_ref = refs[2 + num_layers]       # (B, O)

        f32 = jnp.float32

        # ---- layer 0 weights (slab rows: [Wih | Whh | bias]) ---------------
        wih0 = slab_refs[0][0:D, :]                        # (D, 4*HP)
        whh0 = slab_refs[0][D_pad:D_pad + HP, :]           # (HP, 4*HP)
        b0 = slab_refs[0][D_pad + HP:D_pad + HP + 1, :]    # (1, 4*HP)

        # Hoisted layer-0 input projections: independent of the recurrence,
        # so the scheduler overlaps them with the serial h-chain for free.
        p0 = [jnp.dot(x_ref[:, t, :], wih0, preferred_element_type=f32) + b0
              for t in range(T)]

        # ---- layers >= 1: stacked [Wih; Whh] for one fused matmul per step --
        w_st, b_st = [], []
        for l in range(1, num_layers):
            w_st.append(slab_refs[l][0:2 * HP, :])            # (2*HP, 4*HP)
            b_st.append(slab_refs[l][2 * HP:2 * HP + 1, :])   # (1, 4*HP)

        def cell(g, c_prev):
            # g: (B, 4*HP) pre-activations; every gate slab is a full 128-lane
            # tile, so all slices below are lane-tile aligned (no XLU rotates).
            sig = jax.nn.sigmoid(g[:, :3 * HP])               # i, f, o at once
            i_g = sig[:, 0 * HP:1 * HP]
            f_g = sig[:, 1 * HP:2 * HP]
            o_g = sig[:, 2 * HP:3 * HP]
            g_g = jnp.tanh(g[:, 3 * HP:4 * HP])
            c_new = f_g * c_prev + i_g * g_g
            h_new = o_g * jnp.tanh(c_new)
            return h_new, c_new

        h = [jnp.zeros((B, HP), f32) for _ in range(num_layers)]
        c = [jnp.zeros((B, HP), f32) for _ in range(num_layers)]

        for t in range(T):          # static T -> fully unrolled recurrence
            # layer 0: only h @ Whh0 is on the serial critical path
            g0 = p0[t] + jnp.dot(h[0], whh0, preferred_element_type=f32)
            h[0], c[0] = cell(g0, c[0])
            # deeper layers: single fused (B, 2*HP) @ (2*HP, 4*HP) MXU push,
            # issued as soon as h_{l-1,t} exists (wavefront over layers)
            for l in range(1, num_layers):
                inp = jnp.concatenate([h[l - 1], h[l]], axis=1)   # (B, 2*HP)
                g = jnp.dot(inp, w_st[l - 1], preferred_element_type=f32)
                g = g + b_st[l - 1]
                h[l], c[l] = cell(g, c[l])

        # ---- FC head on the final hidden state of the last layer -----------
        fc_w = fc_ref[0:HP, :]                                # (HP, O)
        fc_b = fc_ref[HP:HP + 1, :]                           # (1, O)
        out_ref[...] = jnp.dot(h[-1], fc_w, preferred_element_type=f32) + fc_b

    return kernel


# ----------------------------------------------------------------------------
# Wrapper
# ----------------------------------------------------------------------------
@jax.jit
def lstm_model_forward(x, params):
    """x: (B, T, input_size), batch_first like the PyTorch module."""
    B, T, D = x.shape
    slabs = params["slabs"]
    fc_slab = params["fc_slab"]
    num_layers = len(slabs)
    HP = slabs[0].shape[1] // 4
    O = fc_slab.shape[1]

    inputs = [x] + list(slabs) + [fc_slab]
    in_specs = [pl.BlockSpec((B, T, D), lambda i: (0, 0, 0))]
    in_specs += [pl.BlockSpec(s.shape, lambda i: (0, 0)) for s in slabs]
    in_specs += [pl.BlockSpec(fc_slab.shape, lambda i: (0, 0))]

    kernel = _make_fused_kernel(T, B, D, HP, O, num_layers)

    return pl.pallas_call(
        kernel,
        out_shape=jax.ShapeDtypeStruct((B, O), jnp.float32),
        grid_spec=pltpu.PrefetchScalarGridSpec(
            num_scalar_prefetch=0,
            grid=(1,),
            in_specs=in_specs,
            out_specs=pl.BlockSpec((B, O), lambda i: (0, 0)),
        ),
        compiler_params=pltpu.CompilerParams(
            dimension_semantics=("arbitrary",)),
    )(*inputs)


# ----------------------------------------------------------------------------
# Deterministic parameter init (mirrors torch.nn.LSTM / nn.Linear layouts),
# plus packing into the padded kernel slabs (done ONCE here, not per call).
# ----------------------------------------------------------------------------
_TORCH_GATE_ROWS = {"i": 0, "f": 1, "g": 2, "o": 3}             # torch row order
_PACKED_GATE_SLOTS = (("i", 0), ("f", 1), ("o", 2), ("g", 3))   # kernel col slot


def _pad_gate_cols(w, H, HP):
    """(4H, d_in) torch layout -> (d_in, 4*HP); gate k valid in cols [k*HP, k*HP+H)."""
    d_in = w.shape[1]
    out = jnp.zeros((d_in, 4 * HP), jnp.float32)
    for name, slot in _PACKED_GATE_SLOTS:
        r = _TORCH_GATE_ROWS[name]
        out = out.at[:, slot * HP:slot * HP + H].set(w[r * H:(r + 1) * H, :].T)
    return out


def _pad_bias(b_ih, b_hh, H, HP):
    b = b_ih + b_hh
    out = jnp.zeros((1, 4 * HP), jnp.float32)
    for name, slot in _PACKED_GATE_SLOTS:
        r = _TORCH_GATE_ROWS[name]
        out = out.at[0, slot * HP:slot * HP + H].set(b[r * H:(r + 1) * H])
    return out


def _pad_rows(w, rows):
    return jnp.zeros((rows, w.shape[1]), jnp.float32).at[:w.shape[0], :].set(w)


def init_params(key, input_size, hidden_size, output_size, num_layers, HP=_HP):
    H = hidden_size
    assert H <= HP
    D_pad = ((input_size + 7) // 8) * 8
    bound = 1.0 / jnp.sqrt(H)
    slabs, raw = [], []
    for l in range(num_layers):
        d_in = input_size if l == 0 else H
        key, k1, k2, k3, k4 = jax.random.split(key, 5)
        w_ih = jax.random.uniform(k1, (4 * H, d_in), jnp.float32, -bound, bound)
        w_hh = jax.random.uniform(k2, (4 * H, H), jnp.float32, -bound, bound)
        b_ih = jax.random.uniform(k3, (4 * H,), jnp.float32, -bound, bound)
        b_hh = jax.random.uniform(k4, (4 * H,), jnp.float32, -bound, bound)
        raw.append({"w_ih": w_ih, "w_hh": w_hh, "b_ih": b_ih, "b_hh": b_hh})

        whh_p = _pad_rows(_pad_gate_cols(w_hh, H, HP), HP)          # (HP, 4*HP)
        bias = _pad_bias(b_ih, b_hh, H, HP)                         # (1, 4*HP)
        if l == 0:
            wih_p = _pad_rows(_pad_gate_cols(w_ih, H, HP), D_pad)   # (D_pad, 4*HP)
        else:
            wih_p = _pad_rows(_pad_gate_cols(w_ih, H, HP), HP)      # (HP, 4*HP)
        slabs.append(jnp.concatenate([wih_p, whh_p, bias], axis=0))

    key, k5, k6 = jax.random.split(key, 3)
    fb = 1.0 / jnp.sqrt(H)
    fc_w = jax.random.uniform(k5, (output_size, H), jnp.float32, -fb, fb)
    fc_b = jax.random.uniform(k6, (output_size,), jnp.float32, -fb, fb)
    fc_slab = jnp.concatenate(
        [_pad_rows(fc_w.T, HP), fc_b.reshape(1, -1)], axis=0)       # (HP+1, O)
    return {"slabs": slabs, "fc_slab": fc_slab,
            "raw": raw, "fc_w": fc_w, "fc_b": fc_b}


# ----------------------------------------------------------------------------
# Pure-JAX reference using the RAW torch-layout weights (validates packing too)
# ----------------------------------------------------------------------------
def reference_forward(x, params):
    seq = jnp.transpose(x, (1, 0, 2))  # (T, B, D)
    for layer in params["raw"]:
        w_ih, w_hh = layer["w_ih"], layer["w_hh"]
        b = layer["b_ih"] + layer["b_hh"]
        B = seq.shape[1]
        H = w_hh.shape[1]

        def step(carry, xt, w_ih=w_ih, w_hh=w_hh, b=b, H=H):
            h, c = carry
            gates = xt @ w_ih.T + h @ w_hh.T + b          # torch order i, f, g, o
            i = jax.nn.sigmoid(gates[:, 0 * H:1 * H])
            f = jax.nn.sigmoid(gates[:, 1 * H:2 * H])
            g = jnp.tanh(gates[:, 2 * H:3 * H])
            o = jax.nn.sigmoid(gates[:, 3 * H:4 * H])
            c = f * c + i * g
            h = o * jnp.tanh(c)
            return (h, c), h

        init = (jnp.zeros((B, H), jnp.float32), jnp.zeros((B, H), jnp.float32))
        _, seq = jax.lax.scan(step, init, seq)
    return seq[-1] @ params["fc_w"].T + params["fc_b"]


# ----------------------------------------------------------------------------
if __name__ == "__main__":
    B, T = 2, 8
    input_size, hidden_size, output_size, num_layers = 16, 32, 8, 2

    key = jax.random.PRNGKey(0)
    key, kx, kp = jax.random.split(key, 3)
    x = jax.random.normal(kx, (B, T, input_size), jnp.float32)
    params = init_params(kp, input_size, hidden_size, output_size, num_layers)

    out = jax.block_until_ready(lstm_model_forward(x, params))
    ref = reference_forward(x, params)

    assert out.shape == (B, output_size)
    assert jnp.allclose(out, ref, atol=1e-4, rtol=1e-4), "mismatch vs reference"

    print("KERNEL_OK")
</pallas_src>

<mosaic_0001>
module attributes {stable_mosaic.version = 11 : i64} {
  func.func @kernel(%arg0: i32, %arg1: memref<2x8x16xf32, #tpu.memory_space<vmem>>, %arg2: memref<145x512xf32, #tpu.memory_space<vmem>>, %arg3: memref<257x512xf32, #tpu.memory_space<vmem>>, %arg4: memref<129x8xf32, #tpu.memory_space<vmem>>, %arg5: memref<2x8xf32, #tpu.memory_space<vmem>>) attributes {dimension_semantics = [#tpu.dimension_semantics<arbitrary>], iteration_bounds = array<i64: 1>, scalar_prefetch = 0 : i64, scratch_operands = 0 : i64, tpu.core_type = #tpu.core_type<tc>, window_params = [{pipeline_mode = #tpu.pipeline_mode<synchronous>, transform_indices = @transform_0, window_bounds = array<i64: 2, 8, 16>}, {pipeline_mode = #tpu.pipeline_mode<synchronous>, transform_indices = @transform_1, window_bounds = array<i64: 145, 512>}, {pipeline_mode = #tpu.pipeline_mode<synchronous>, transform_indices = @transform_2, window_bounds = array<i64: 257, 512>}, {pipeline_mode = #tpu.pipeline_mode<synchronous>, transform_indices = @transform_3, window_bounds = array<i64: 129, 8>}, {pipeline_mode = #tpu.pipeline_mode<synchronous>, transform_indices = @transform_4, window_bounds = array<i64: 2, 8>}]} {
    %c0 = arith.constant 0 : index
    %c0_0 = arith.constant 0 : index
    %0 = vector.load %arg2[%c0, %c0_0] : memref<145x512xf32, #tpu.memory_space<vmem>>, vector<16x512xf32>
    %c16 = arith.constant 16 : index
    %c0_1 = arith.constant 0 : index
    %1 = vector.load %arg2[%c16, %c0_1] : memref<145x512xf32, #tpu.memory_space<vmem>>, vector<128x512xf32>
    %c144 = arith.constant 144 : index
    %c0_2 = arith.constant 0 : index
    %2 = vector.load %arg2[%c144, %c0_2] : memref<145x512xf32, #tpu.memory_space<vmem>>, vector<1x512xf32>
    %c0_3 = arith.constant 0 : index
    %c0_4 = arith.constant 0 : index
    %c0_5 = arith.constant 0 : index
    %3 = vector.load %arg1[%c0_3, %c0_4, %c0_5] : memref<2x8x16xf32, #tpu.memory_space<vmem>>, vector<2x1x16xf32>
    %4 = vector.shape_cast %3 : vector<2x1x16xf32> to vector<2x16xf32>
    %cst = arith.constant dense<0.000000e+00> : vector<2x512xf32>
    %5 = tpu.matmul %4, %0, %cst {dimension_numbers = #tpu.dot_dimension_numbers<[1], [0], [0], [1], [0, 0, 1, 1], [], []>} : vector<2x16xf32>, vector<16x512xf32>, vector<2x512xf32> -> vector<2x512xf32>
    %6 = vector.broadcast %2 : vector<1x512xf32> to vector<2x512xf32>
    %7 = arith.addf %5, %6 : vector<2x512xf32>
    %c0_6 = arith.constant 0 : index
    %c1 = arith.constant 1 : index
    %c0_7 = arith.constant 0 : index
    %8 = vector.load %arg1[%c0_6, %c1, %c0_7] : memref<2x8x16xf32, #tpu.memory_space<vmem>>, vector<2x1x16xf32>
    %9 = vector.shape_cast %8 : vector<2x1x16xf32> to vector<2x16xf32>
    %cst_8 = arith.constant dense<0.000000e+00> : vector<2x512xf32>
    %10 = tpu.matmul %9, %0, %cst_8 {dimension_numbers = #tpu.dot_dimension_numbers<[1], [0], [0], [1], [0, 0, 1, 1], [], []>} : vector<2x16xf32>, vector<16x512xf32>, vector<2x512xf32> -> vector<2x512xf32>
    %11 = vector.broadcast %2 : vector<1x512xf32> to vector<2x512xf32>
    %12 = arith.addf %10, %11 : vector<2x512xf32>
    %c0_9 = arith.constant 0 : index
    %c2 = arith.constant 2 : index
    %c0_10 = arith.constant 0 : index
    %13 = vector.load %arg1[%c0_9, %c2, %c0_10] : memref<2x8x16xf32, #tpu.memory_space<vmem>>, vector<2x1x16xf32>
    %14 = vector.shape_cast %13 : vector<2x1x16xf32> to vector<2x16xf32>
    %cst_11 = arith.constant dense<0.000000e+00> : vector<2x512xf32>
    %15 = tpu.matmul %14, %0, %cst_11 {dimension_numbers = #tpu.dot_dimension_numbers<[1], [0], [0], [1], [0, 0, 1, 1], [], []>} : vector<2x16xf32>, vector<16x512xf32>, vector<2x512xf32> -> vector<2x512xf32>
    %16 = vector.broadcast %2 : vector<1x512xf32> to vector<2x512xf32>
    %17 = arith.addf %15, %16 : vector<2x512xf32>
    %c0_12 = arith.constant 0 : index
    %c3 = arith.constant 3 : index
    %c0_13 = arith.constant 0 : index
    %18 = vector.load %arg1[%c0_12, %c3, %c0_13] : memref<2x8x16xf32, #tpu.memory_space<vmem>>, vector<2x1x16xf32>
    %19 = vector.shape_cast %18 : vector<2x1x16xf32> to vector<2x16xf32>
    %cst_14 = arith.constant dense<0.000000e+00> : vector<2x512xf32>
    %20 = tpu.matmul %19, %0, %cst_14 {dimension_numbers = #tpu.dot_dimension_numbers<[1], [0], [0], [1], [0, 0, 1, 1], [], []>} : vector<2x16xf32>, vector<16x512xf32>, vector<2x512xf32> -> vector<2x512xf32>
    %21 = vector.broadcast %2 : vector<1x512xf32> to vector<2x512xf32>
    %22 = arith.addf %20, %21 : vector<2x512xf32>
    %c0_15 = arith.constant 0 : index
    %c4 = arith.constant 4 : index
    %c0_16 = arith.constant 0 : index
    %23 = vector.load %arg1[%c0_15, %c4, %c0_16] : memref<2x8x16xf32, #tpu.memory_space<vmem>>, vector<2x1x16xf32>
    %24 = vector.shape_cast %23 : vector<2x1x16xf32> to vector<2x16xf32>
    %cst_17 = arith.constant dense<0.000000e+00> : vector<2x512xf32>
    %25 = tpu.matmul %24, %0, %cst_17 {dimension_numbers = #tpu.dot_dimension_numbers<[1], [0], [0], [1], [0, 0, 1, 1], [], []>} : vector<2x16xf32>, vector<16x512xf32>, vector<2x512xf32> -> vector<2x512xf32>
    %26 = vector.broadcast %2 : vector<1x512xf32> to vector<2x512xf32>
    %27 = arith.addf %25, %26 : vector<2x512xf32>
    %c0_18 = arith.constant 0 : index
    %c5 = arith.constant 5 : index
    %c0_19 = arith.constant 0 : index
    %28 = vector.load %arg1[%c0_18, %c5, %c0_19] : memref<2x8x16xf32, #tpu.memory_space<vmem>>, vector<2x1x16xf32>
    %29 = vector.shape_cast %28 : vector<2x1x16xf32> to vector<2x16xf32>
    %cst_20 = arith.constant dense<0.000000e+00> : vector<2x512xf32>
    %30 = tpu.matmul %29, %0, %cst_20 {dimension_numbers = #tpu.dot_dimension_numbers<[1], [0], [0], [1], [0, 0, 1, 1], [], []>} : vector<2x16xf32>, vector<16x512xf32>, vector<2x512xf32> -> vector<2x512xf32>
    %31 = vector.broadcast %2 : vector<1x512xf32> to vector<2x512xf32>
    %32 = arith.addf %30, %31 : vector<2x512xf32>
    %c0_21 = arith.constant 0 : index
    %c6 = arith.constant 6 : index
    %c0_22 = arith.constant 0 : index
    %33 = vector.load %arg1[%c0_21, %c6, %c0_22] : memref<2x8x16xf32, #tpu.memory_space<vmem>>, vector<2x1x16xf32>
    %34 = vector.shape_cast %33 : vector<2x1x16xf32> to vector<2x16xf32>
    %cst_23 = arith.constant dense<0.000000e+00> : vector<2x512xf32>
    %35 = tpu.matmul %34, %0, %cst_23 {dimension_numbers = #tpu.dot_dimension_numbers<[1], [0], [0], [1], [0, 0, 1, 1], [], []>} : vector<2x16xf32>, vector<16x512xf32>, vector<2x512xf32> -> vector<2x512xf32>
    %36 = vector.broadcast %2 : vector<1x512xf32> to vector<2x512xf32>
    %37 = arith.addf %35, %36 : vector<2x512xf32>
    %c0_24 = arith.constant 0 : index
    %c7 = arith.constant 7 : index
    %c0_25 = arith.constant 0 : index
    %38 = vector.load %arg1[%c0_24, %c7, %c0_25] : memref<2x8x16xf32, #tpu.memory_space<vmem>>, vector<2x1x16xf32>
    %39 = vector.shape_cast %38 : vector<2x1x16xf32> to vector<2x16xf32>
    %cst_26 = arith.constant dense<0.000000e+00> : vector<2x512xf32>
    %40 = tpu.matmul %39, %0, %cst_26 {dimension_numbers = #tpu.dot_dimension_numbers<[1], [0], [0], [1], [0, 0, 1, 1], [], []>} : vector<2x16xf32>, vector<16x512xf32>, vector<2x512xf32> -> vector<2x512xf32>
    %41 = vector.broadcast %2 : vector<1x512xf32> to vector<2x512xf32>
    %42 = arith.addf %40, %41 : vector<2x512xf32>
    %c0_27 = arith.constant 0 : index
    %c0_28 = arith.constant 0 : index
    %43 = vector.load %arg3[%c0_27, %c0_28] : memref<257x512xf32, #tpu.memory_space<vmem>>, vector<256x512xf32>
    %c256 = arith.constant 256 : index
    %c0_29 = arith.constant 0 : index
    %44 = vector.load %arg3[%c256, %c0_29] : memref<257x512xf32, #tpu.memory_space<vmem>>, vector<1x512xf32>
    %cst_30 = arith.constant 0.000000e+00 : f32
    %45 = vector.broadcast %cst_30 : f32 to vector<2x128xf32>
    %cst_31 = arith.constant 0.000000e+00 : f32
    %46 = vector.broadcast %cst_31 : f32 to vector<2x128xf32>
    %cst_32 = arith.constant 0.000000e+00 : f32
    %47 = vector.broadcast %cst_32 : f32 to vector<2x128xf32>
    %cst_33 = arith.constant 0.000000e+00 : f32
    %48 = vector.broadcast %cst_33 : f32 to vector<2x128xf32>
    %cst_34 = arith.constant dense<0.000000e+00> : vector<2x512xf32>
    %49 = tpu.matmul %45, %1, %cst_34 {dimension_numbers = #tpu.dot_dimension_numbers<[1], [0], [0], [1], [0, 0, 1, 1], [], []>} : vector<2x128xf32>, vector<128x512xf32>, vector<2x512xf32> -> vector<2x512xf32>
    %50 = arith.addf %7, %49 : vector<2x512xf32>
    %51 = vector.extract_strided_slice %50 {offsets = [0, 0], sizes = [2, 384], strides = [1, 1]} : vector<2x512xf32> to vector<2x384xf32>
    %52 = arith.negf %51 : vector<2x384xf32>
    %53 = math.exp %52 : vector<2x384xf32>
    %cst_35 = arith.constant 1.000000e+00 : f32
    %54 = vector.broadcast %cst_35 : f32 to vector<2x384xf32>
    %55 = arith.addf %54, %53 : vector<2x384xf32>
    %56 = arith.divf %54, %55 : vector<2x384xf32>
    %57 = vector.extract_strided_slice %56 {offsets = [0, 0], sizes = [2, 128], strides = [1, 1]} : vector<2x384xf32> to vector<2x128xf32>
    %58 = vector.extract_strided_slice %56 {offsets = [0, 128], sizes = [2, 128], strides = [1, 1]} : vector<2x384xf32> to vector<2x128xf32>
    %59 = vector.extract_strided_slice %56 {offsets = [0, 256], sizes = [2, 128], strides = [1, 1]} : vector<2x384xf32> to vector<2x128xf32>
    %60 = vector.extract_strided_slice %50 {offsets = [0, 384], sizes = [2, 128], strides = [1, 1]} : vector<2x512xf32> to vector<2x128xf32>
    %61 = math.tanh %60 : vector<2x128xf32>
    %62 = arith.mulf %58, %47 : vector<2x128xf32>
    %63 = arith.mulf %57, %61 : vector<2x128xf32>
    %64 = arith.addf %62, %63 : vector<2x128xf32>
    %65 = math.tanh %64 : vector<2x128xf32>
    %66 = arith.mulf %59, %65 : vector<2x128xf32>
    %67 = tpu.concatenate %66, %46 in 1 : vector<2x128xf32>, vector<2x128xf32> -> vector<2x256xf32>
    %cst_36 = arith.constant dense<0.000000e+00> : vector<2x512xf32>
    %68 = tpu.matmul %67, %43, %cst_36 {dimension_numbers = #tpu.dot_dimension_numbers<[1], [0], [0], [1], [0, 0, 1, 1], [], []>} : vector<2x256xf32>, vector<256x512xf32>, vector<2x512xf32> -> vector<2x512xf32>
    %69 = vector.broadcast %44 : vector<1x512xf32> to vector<2x512xf32>
    %70 = arith.addf %68, %69 : vector<2x512xf32>
    %71 = vector.extract_strided_slice %70 {offsets = [0, 0], sizes = [2, 384], strides = [1, 1]} : vector<2x512xf32> to vector<2x384xf32>
    %72 = arith.negf %71 : vector<2x384xf32>
    %73 = math.exp %72 : vector<2x384xf32>
    %cst_37 = arith.constant 1.000000e+00 : f32
    %74 = vector.broadcast %cst_37 : f32 to vector<2x384xf32>
    %75 = arith.addf %74, %73 : vector<2x384xf32>
    %76 = arith.divf %74, %75 : vector<2x384xf32>
    %77 = vector.extract_strided_slice %76 {offsets = [0, 0], sizes = [2, 128], strides = [1, 1]} : vector<2x384xf32> to vector<2x128xf32>
    %78 = vector.extract_strided_slice %76 {offsets = [0, 128], sizes = [2, 128], strides = [1, 1]} : vector<2x384xf32> to vector<2x128xf32>
    %79 = vector.extract_strided_slice %76 {offsets = [0, 256], sizes = [2, 128], strides = [1, 1]} : vector<2x384xf32> to vector<2x128xf32>
    %80 = vector.extract_strided_slice %70 {offsets = [0, 384], sizes = [2, 128], strides = [1, 1]} : vector<2x512xf32> to vector<2x128xf32>
    %81 = math.tanh %80 : vector<2x128xf32>
    %82 = arith.mulf %78, %48 : vector<2x128xf32>
    %83 = arith.mulf %77, %81 : vector<2x128xf32>
    %84 = arith.addf %82, %83 : vector<2x128xf32>
    %85 = math.tanh %84 : vector<2x128xf32>
    %86 = arith.mulf %79, %85 : vector<2x128xf32>
    %cst_38 = arith.constant dense<0.000000e+00> : vector<2x512xf32>
    %87 = tpu.matmul %66, %1, %cst_38 {dimension_numbers = #tpu.dot_dimension_numbers<[1], [0], [0], [1], [0, 0, 1, 1], [], []>} : vector<2x128xf32>, vector<128x512xf32>, vector<2x512xf32> -> vector<2x512xf32>
    %88 = arith.addf %12, %87 : vector<2x512xf32>
    %89 = vector.extract_strided_slice %88 {offsets = [0, 0], sizes = [2, 384], strides = [1, 1]} : vector<2x512xf32> to vector<2x384xf32>
    %90 = arith.negf %89 : vector<2x384xf32>
    %91 = math.exp %90 : vector<2x384xf32>
    %cst_39 = arith.constant 1.000000e+00 : f32
    %92 = vector.broadcast %cst_39 : f32 to vector<2x384xf32>
    %93 = arith.addf %92, %91 : vector<2x384xf32>
    %94 = arith.divf %92, %93 : vector<2x384xf32>
    %95 = vector.extract_strided_slice %94 {offsets = [0, 0], sizes = [2, 128], strides = [1, 1]} : vector<2x384xf32> to vector<2x128xf32>
    %96 = vector.extract_strided_slice %94 {offsets = [0, 128], sizes = [2, 128], strides = [1, 1]} : vector<2x384xf32> to vector<2x128xf32>
    %97 = vector.extract_strided_slice %94 {offsets = [0, 256], sizes = [2, 128], strides = [1, 1]} : vector<2x384xf32> to vector<2x128xf32>
    %98 = vector.extract_strided_slice %88 {offsets = [0, 384], sizes = [2, 128], strides = [1, 1]} : vector<2x512xf32> to vector<2x128xf32>
    %99 = math.tanh %98 : vector<2x128xf32>
    %100 = arith.mulf %96, %64 : vector<2x128xf32>
    %101 = arith.mulf %95, %99 : vector<2x128xf32>
    %102 = arith.addf %100, %101 : vector<2x128xf32>
    %103 = math.tanh %102 : vector<2x128xf32>
    %104 = arith.mulf %97, %103 : vector<2x128xf32>
    %105 = tpu.concatenate %104, %86 in 1 : vector<2x128xf32>, vector<2x128xf32> -> vector<2x256xf32>
    %cst_40 = arith.constant dense<0.000000e+00> : vector<2x512xf32>
    %106 = tpu.matmul %105, %43, %cst_40 {dimension_numbers = #tpu.dot_dimension_numbers<[1], [0], [0], [1], [0, 0, 1, 1], [], []>} : vector<2x256xf32>, vector<256x512xf32>, vector<2x512xf32> -> vector<2x512xf32>
    %107 = vector.broadcast %44 : vector<1x512xf32> to vector<2x512xf32>
    %108 = arith.addf %106, %107 : vector<2x512xf32>
    %109 = vector.extract_strided_slice %108 {offsets = [0, 0], sizes = [2, 384], strides = [1, 1]} : vector<2x512xf32> to vector<2x384xf32>
    %110 = arith.negf %109 : vector<2x384xf32>
    %111 = math.exp %110 : vector<2x384xf32>
    %cst_41 = arith.constant 1.000000e+00 : f32
    %112 = vector.broadcast %cst_41 : f32 to vector<2x384xf32>
    %113 = arith.addf %112, %111 : vector<2x384xf32>
    %114 = arith.divf %112, %113 : vector<2x384xf32>
    %115 = vector.extract_strided_slice %114 {offsets = [0, 0], sizes = [2, 128], strides = [1, 1]} : vector<2x384xf32> to vector<2x128xf32>
    %116 = vector.extract_strided_slice %114 {offsets = [0, 128], sizes = [2, 128], strides = [1, 1]} : vector<2x384xf32> to vector<2x128xf32>
    %117 = vector.extract_strided_slice %114 {offsets = [0, 256], sizes = [2, 128], strides = [1, 1]} : vector<2x384xf32> to vector<2x128xf32>
    %118 = vector.extract_strided_slice %108 {offsets = [0, 384], sizes = [2, 128], strides = [1, 1]} : vector<2x512xf32> to vector<2x128xf32>
    %119 = math.tanh %118 : vector<2x128xf32>
    %120 = arith.mulf %116, %84 : vector<2x128xf32>
    %121 = arith.mulf %115, %119 : vector<2x128xf32>
    %122 = arith.addf %120, %121 : vector<2x128xf32>
    %123 = math.tanh %122 : vector<2x128xf32>
    %124 = arith.mulf %117, %123 : vector<2x128xf32>
    %cst_42 = arith.constant dense<0.000000e+00> : vector<2x512xf32>
    %125 = tpu.matmul %104, %1, %cst_42 {dimension_numbers = #tpu.dot_dimension_numbers<[1], [0], [0], [1], [0, 0, 1, 1], [], []>} : vector<2x128xf32>, vector<128x512xf32>, vector<2x512xf32> -> vector<2x512xf32>
    %126 = arith.addf %17, %125 : vector<2x512xf32>
    %127 = vector.extract_strided_slice %126 {offsets = [0, 0], sizes = [2, 384], strides = [1, 1]} : vector<2x512xf32> to vector<2x384xf32>
    %128 = arith.negf %127 : vector<2x384xf32>
    %129 = math.exp %128 : vector<2x384xf32>
    %cst_43 = arith.constant 1.000000e+00 : f32
    %130 = vector.broadcast %cst_43 : f32 to vector<2x384xf32>
    %131 = arith.addf %130, %129 : vector<2x384xf32>
    %132 = arith.divf %130, %131 : vector<2x384xf32>
    %133 = vector.extract_strided_slice %132 {offsets = [0, 0], sizes = [2, 128], strides = [1, 1]} : vector<2x384xf32> to vector<2x128xf32>
    %134 = vector.extract_strided_slice %132 {offsets = [0, 128], sizes = [2, 128], strides = [1, 1]} : vector<2x384xf32> to vector<2x128xf32>
    %135 = vector.extract_strided_slice %132 {offsets = [0, 256], sizes = [2, 128], strides = [1, 1]} : vector<2x384xf32> to vector<2x128xf32>
    %136 = vector.extract_strided_slice %126 {offsets = [0, 384], sizes = [2, 128], strides = [1, 1]} : vector<2x512xf32> to vector<2x128xf32>
    %137 = math.tanh %136 : vector<2x128xf32>
    %138 = arith.mulf %134, %102 : vector<2x128xf32>
    %139 = arith.mulf %133, %137 : vector<2x128xf32>
    %140 = arith.addf %138, %139 : vector<2x128xf32>
    %141 = math.tanh %140 : vector<2x128xf32>
    %142 = arith.mulf %135, %141 : vector<2x128xf32>
    %143 = tpu.concatenate %142, %124 in 1 : vector<2x128xf32>, vector<2x128xf32> -> vector<2x256xf32>
    %cst_44 = arith.constant dense<0.000000e+00> : vector<2x512xf32>
    %144 = tpu.matmul %143, %43, %cst_44 {dimension_numbers = #tpu.dot_dimension_numbers<[1], [0], [0], [1], [0, 0, 1, 1], [], []>} : vector<2x256xf32>, vector<256x512xf32>, vector<2x512xf32> -> vector<2x512xf32>
    %145 = vector.broadcast %44 : vector<1x512xf32> to vector<2x512xf32>
    %146 = arith.addf %144, %145 : vector<2x512xf32>
    %147 = vector.extract_strided_slice %146 {offsets = [0, 0], sizes = [2, 384], strides = [1, 1]} : vector<2x512xf32> to vector<2x384xf32>
    %148 = arith.negf %147 : vector<2x384xf32>
    %149 = math.exp %148 : vector<2x384xf32>
    %cst_45 = arith.constant 1.000000e+00 : f32
    %150 = vector.broadcast %cst_45 : f32 to vector<2x384xf32>
    %151 = arith.addf %150, %149 : vector<2x384xf32>
    %152 = arith.divf %150, %151 : vector<2x384xf32>
    %153 = vector.extract_strided_slice %152 {offsets = [0, 0], sizes = [2, 128], strides = [1, 1]} : vector<2x384xf32> to vector<2x128xf32>
    %154 = vector.extract_strided_slice %152 {offsets = [0, 128], sizes = [2, 128], strides = [1, 1]} : vector<2x384xf32> to vector<2x128xf32>
    %155 = vector.extract_strided_slice %152 {offsets = [0, 256], sizes = [2, 128], strides = [1, 1]} : vector<2x384xf32> to vector<2x128xf32>
    %156 = vector.extract_strided_slice %146 {offsets = [0, 384], sizes = [2, 128], strides = [1, 1]} : vector<2x512xf32> to vector<2x128xf32>
    %157 = math.tanh %156 : vector<2x128xf32>
    %158 = arith.mulf %154, %122 : vector<2x128xf32>
    %159 = arith.mulf %153, %157 : vector<2x128xf32>
    %160 = arith.addf %158, %159 : vector<2x128xf32>
    %161 = math.tanh %160 : vector<2x128xf32>
    %162 = arith.mulf %155, %161 : vector<2x128xf32>
    %cst_46 = arith.constant dense<0.000000e+00> : vector<2x512xf32>
    %163 = tpu.matmul %142, %1, %cst_46 {dimension_numbers = #tpu.dot_dimension_numbers<[1], [0], [0], [1], [0, 0, 1, 1], [], []>} : vector<2x128xf32>, vector<128x512xf32>, vector<2x512xf32> -> vector<2x512xf32>
    %164 = arith.addf %22, %163 : vector<2x512xf32>
    %165 = vector.extract_strided_slice %164 {offsets = [0, 0], sizes = [2, 384], strides = [1, 1]} : vector<2x512xf32> to vector<2x384xf32>
    %166 = arith.negf %165 : vector<2x384xf32>
    %167 = math.exp %166 : vector<2x384xf32>
    %cst_47 = arith.constant 1.000000e+00 : f32
    %168 = vector.broadcast %cst_47 : f32 to vector<2x384xf32>
    %169 = arith.addf %168, %167 : vector<2x384xf32>
    %170 = arith.divf %168, %169 : vector<2x384xf32>
    %171 = vector.extract_strided_slice %170 {offsets = [0, 0], sizes = [2, 128], strides = [1, 1]} : vector<2x384xf32> to vector<2x128xf32>
    %172 = vector.extract_strided_slice %170 {offsets = [0, 128], sizes = [2, 128], strides = [1, 1]} : vector<2x384xf32> to vector<2x128xf32>
    %173 = vector.extract_strided_slice %170 {offsets = [0, 256], sizes = [2, 128], strides = [1, 1]} : vector<2x384xf32> to vector<2x128xf32>
    %174 = vector.extract_strided_slice %164 {offsets = [0, 384], sizes = [2, 128], strides = [1, 1]} : vector<2x512xf32> to vector<2x128xf32>
    %175 = math.tanh %174 : vector<2x128xf32>
    %176 = arith.mulf %172, %140 : vector<2x128xf32>
    %177 = arith.mulf %171, %175 : vector<2x128xf32>
    %178 = arith.addf %176, %177 : vector<2x128xf32>
    %179 = math.tanh %178 : vector<2x128xf32>
    %180 = arith.mulf %173, %179 : vector<2x128xf32>
    %181 = tpu.concatenate %180, %162 in 1 : vector<2x128xf32>, vector<2x128xf32> -> vector<2x256xf32>
    %cst_48 = arith.constant dense<0.000000e+00> : vector<2x512xf32>
    %182 = tpu.matmul %181, %43, %cst_48 {dimension_numbers = #tpu.dot_dimension_numbers<[1], [0], [0], [1], [0, 0, 1, 1], [], []>} : vector<2x256xf32>, vector<256x512xf32>, vector<2x512xf32> -> vector<2x512xf32>
    %183 = vector.broadcast %44 : vector<1x512xf32> to vector<2x512xf32>
    %184 = arith.addf %182, %183 : vector<2x512xf32>
    %185 = vector.extract_strided_slice %184 {offsets = [0, 0], sizes = [2, 384], strides = [1, 1]} : vector<2x512xf32> to vector<2x384xf32>
    %186 = arith.negf %185 : vector<2x384xf32>
    %187 = math.exp %186 : vector<2x384xf32>
    %cst_49 = arith.constant 1.000000e+00 : f32
    %188 = vector.broadcast %cst_49 : f32 to vector<2x384xf32>
    %189 = arith.addf %188, %187 : vector<2x384xf32>
    %190 = arith.divf %188, %189 : vector<2x384xf32>
    %191 = vector.extract_strided_slice %190 {offsets = [0, 0], sizes = [2, 128], strides = [1, 1]} : vector<2x384xf32> to vector<2x128xf32>
    %192 = vector.extract_strided_slice %190 {offsets = [0, 128], sizes = [2, 128], strides = [1, 1]} : vector<2x384xf32> to vector<2x128xf32>
    %193 = vector.extract_strided_slice %190 {offsets = [0, 256], sizes = [2, 128], strides = [1, 1]} : vector<2x384xf32> to vector<2x128xf32>
    %194 = vector.extract_strided_slice %184 {offsets = [0, 384], sizes = [2, 128], strides = [1, 1]} : vector<2x512xf32> to vector<2x128xf32>
    %195 = math.tanh %194 : vector<2x128xf32>
    %196 = arith.mulf %192, %160 : vector<2x128xf32>
    %197 = arith.mulf %191, %195 : vector<2x128xf32>
    %198 = arith.addf %196, %197 : vector<2x128xf32>
    %199 = math.tanh %198 : vector<2x128xf32>
    %200 = arith.mulf %193, %199 : vector<2x128xf32>
    %cst_50 = arith.constant dense<0.000000e+00> : vector<2x512xf32>
    %201 = tpu.matmul %180, %1, %cst_50 {dimension_numbers = #tpu.dot_dimension_numbers<[1], [0], [0], [1], [0, 0, 1, 1], [], []>} : vector<2x128xf32>, vector<128x512xf32>, vector<2x512xf32> -> vector<2x512xf32>
    %202 = arith.addf %27, %201 : vector<2x512xf32>
    %203 = vector.extract_strided_slice %202 {offsets = [0, 0], sizes = [2, 384], strides = [1, 1]} : vector<2x512xf32> to vector<2x384xf32>
    %204 = arith.negf %203 : vector<2x384xf32>
    %205 = math.exp %204 : vector<2x384xf32>
    %cst_51 = arith.constant 1.000000e+00 : f32
    %206 = vector.broadcast %cst_51 : f32 to vector<2x384xf32>
    %207 = arith.addf %206, %205 : vector<2x384xf32>
    %208 = arith.divf %206, %207 : vector<2x384xf32>
    %209 = vector.extract_strided_slice %208 {offsets = [0, 0], sizes = [2, 128], strides = [1, 1]} : vector<2x384xf32> to vector<2x128xf32>
    %210 = vector.extract_strided_slice %208 {offsets = [0, 128], sizes = [2, 128], strides = [1, 1]} : vector<2x384xf32> to vector<2x128xf32>
    %211 = vector.extract_strided_slice %208 {offsets = [0, 256], sizes = [2, 128], strides = [1, 1]} : vector<2x384xf32> to vector<2x128xf32>
    %212 = vector.extract_strided_slice %202 {offsets = [0, 384], sizes = [2, 128], strides = [1, 1]} : vector<2x512xf32> to vector<2x128xf32>
    %213 = math.tanh %212 : vector<2x128xf32>
    %214 = arith.mulf %210, %178 : vector<2x128xf32>
    %215 = arith.mulf %209, %213 : vector<2x128xf32>
    %216 = arith.addf %214, %215 : vector<2x128xf32>
    %217 = math.tanh %216 : vector<2x128xf32>
    %218 = arith.mulf %211, %217 : vector<2x128xf32>
    %219 = tpu.concatenate %218, %200 in 1 : vector<2x128xf32>, vector<2x128xf32> -> vector<2x256xf32>
    %cst_52 = arith.constant dense<0.000000e+00> : vector<2x512xf32>
    %220 = tpu.matmul %219, %43, %cst_52 {dimension_numbers = #tpu.dot_dimension_numbers<[1], [0], [0], [1], [0, 0, 1, 1], [], []>} : vector<2x256xf32>, vector<256x512xf32>, vector<2x512xf32> -> vector<2x512xf32>
    %221 = vector.broadcast %44 : vector<1x512xf32> to vector<2x512xf32>
    %222 = arith.addf %220, %221 : vector<2x512xf32>
    %223 = vector.extract_strided_slice %222 {offsets = [0, 0], sizes = [2, 384], strides = [1, 1]} : vector<2x512xf32> to vector<2x384xf32>
    %224 = arith.negf %223 : vector<2x384xf32>
    %225 = math.exp %224 : vector<2x384xf32>
    %cst_53 = arith.constant 1.000000e+00 : f32
    %226 = vector.broadcast %cst_53 : f32 to vector<2x384xf32>
    %227 = arith.addf %226, %225 : vector<2x384xf32>
    %228 = arith.divf %226, %227 : vector<2x384xf32>
    %229 = vector.extract_strided_slice %228 {offsets = [0, 0], sizes = [2, 128], strides = [1, 1]} : vector<2x384xf32> to vector<2x128xf32>
    %230 = vector.extract_strided_slice %228 {offsets = [0, 128], sizes = [2, 128], strides = [1, 1]} : vector<2x384xf32> to vector<2x128xf32>
    %231 = vector.extract_strided_slice %228 {offsets = [0, 256], sizes = [2, 128], strides = [1, 1]} : vector<2x384xf32> to vector<2x128xf32>
    %232 = vector.extract_strided_slice %222 {offsets = [0, 384], sizes = [2, 128], strides = [1, 1]} : vector<2x512xf32> to vector<2x128xf32>
    %233 = math.tanh %232 : vector<2x128xf32>
    %234 = arith.mulf %230, %198 : vector<2x128xf32>
    %235 = arith.mulf %229, %233 : vector<2x128xf32>
    %236 = arith.addf %234, %235 : vector<2x128xf32>
    %237 = math.tanh %236 : vector<2x128xf32>
    %238 = arith.mulf %231, %237 : vector<2x128xf32>
    %cst_54 = arith.constant dense<0.000000e+00> : vector<2x512xf32>
    %239 = tpu.matmul %218, %1, %cst_54 {dimension_numbers = #tpu.dot_dimension_numbers<[1], [0], [0], [1], [0, 0, 1, 1], [], []>} : vector<2x128xf32>, vector<128x512xf32>, vector<2x512xf32> -> vector<2x512xf32>
    %240 = arith.addf %32, %239 : vector<2x512xf32>
    %241 = vector.extract_strided_slice %240 {offsets = [0, 0], sizes = [2, 384], strides = [1, 1]} : vector<2x512xf32> to vector<2x384xf32>
    %242 = arith.negf %241 : vector<2x384xf32>
    %243 = math.exp %242 : vector<2x384xf32>
    %cst_55 = arith.constant 1.000000e+00 : f32
    %244 = vector.broadcast %cst_55 : f32 to vector<2x384xf32>
    %245 = arith.addf %244, %243 : vector<2x384xf32>
    %246 = arith.divf %244, %245 : vector<2x384xf32>
    %247 = vector.extract_strided_slice %246 {offsets = [0, 0], sizes = [2, 128], strides = [1, 1]} : vector<2x384xf32> to vector<2x128xf32>
    %248 = vector.extract_strided_slice %246 {offsets = [0, 128], sizes = [2, 128], strides = [1, 1]} : vector<2x384xf32> to vector<2x128xf32>
    %249 = vector.extract_strided_slice %246 {offsets = [0, 256], sizes = [2, 128], strides = [1, 1]} : vector<2x384xf32> to vector<2x128xf32>
    %250 = vector.extract_strided_slice %240 {offsets = [0, 384], sizes = [2, 128], strides = [1, 1]} : vector<2x512xf32> to vector<2x128xf32>
    %251 = math.tanh %250 : vector<2x128xf32>
    %252 = arith.mulf %248, %216 : vector<2x128xf32>
    %253 = arith.mulf %247, %251 : vector<2x128xf32>
    %254 = arith.addf %252, %253 : vector<2x128xf32>
    %255 = math.tanh %254 : vector<2x128xf32>
    %256 = arith.mulf %249, %255 : vector<2x128xf32>
    %257 = tpu.concatenate %256, %238 in 1 : vector<2x128xf32>, vector<2x128xf32> -> vector<2x256xf32>
    %cst_56 = arith.constant dense<0.000000e+00> : vector<2x512xf32>
    %258 = tpu.matmul %257, %43, %cst_56 {dimension_numbers = #tpu.dot_dimension_numbers<[1], [0], [0], [1], [0, 0, 1, 1], [], []>} : vector<2x256xf32>, vector<256x512xf32>, vector<2x512xf32> -> vector<2x512xf32>
    %259 = vector.broadcast %44 : vector<1x512xf32> to vector<2x512xf32>
    %260 = arith.addf %258, %259 : vector<2x512xf32>
    %261 = vector.extract_strided_slice %260 {offsets = [0, 0], sizes = [2, 384], strides = [1, 1]} : vector<2x512xf32> to vector<2x384xf32>
    %262 = arith.negf %261 : vector<2x384xf32>
    %263 = math.exp %262 : vector<2x384xf32>
    %cst_57 = arith.constant 1.000000e+00 : f32
    %264 = vector.broadcast %cst_57 : f32 to vector<2x384xf32>
    %265 = arith.addf %264, %263 : vector<2x384xf32>
    %266 = arith.divf %264, %265 : vector<2x384xf32>
    %267 = vector.extract_strided_slice %266 {offsets = [0, 0], sizes = [2, 128], strides = [1, 1]} : vector<2x384xf32> to vector<2x128xf32>
    %268 = vector.extract_strided_slice %266 {offsets = [0, 128], sizes = [2, 128], strides = [1, 1]} : vector<2x384xf32> to vector<2x128xf32>
    %269 = vector.extract_strided_slice %266 {offsets = [0, 256], sizes = [2, 128], strides = [1, 1]} : vector<2x384xf32> to vector<2x128xf32>
    %270 = vector.extract_strided_slice %260 {offsets = [0, 384], sizes = [2, 128], strides = [1, 1]} : vector<2x512xf32> to vector<2x128xf32>
    %271 = math.tanh %270 : vector<2x128xf32>
    %272 = arith.mulf %268, %236 : vector<2x128xf32>
    %273 = arith.mulf %267, %271 : vector<2x128xf32>
    %274 = arith.addf %272, %273 : vector<2x128xf32>
    %275 = math.tanh %274 : vector<2x128xf32>
    %276 = arith.mulf %269, %275 : vector<2x128xf32>
    %cst_58 = arith.constant dense<0.000000e+00> : vector<2x512xf32>
    %277 = tpu.matmul %256, %1, %cst_58 {dimension_numbers = #tpu.dot_dimension_numbers<[1], [0], [0], [1], [0, 0, 1, 1], [], []>} : vector<2x128xf32>, vector<128x512xf32>, vector<2x512xf32> -> vector<2x512xf32>
    %278 = arith.addf %37, %277 : vector<2x512xf32>
    %279 = vector.extract_strided_slice %278 {offsets = [0, 0], sizes = [2, 384], strides = [1, 1]} : vector<2x512xf32> to vector<2x384xf32>
    %280 = arith.negf %279 : vector<2x384xf32>
    %281 = math.exp %280 : vector<2x384xf32>
    %cst_59 = arith.constant 1.000000e+00 : f32
    %282 = vector.broadcast %cst_59 : f32 to vector<2x384xf32>
    %283 = arith.addf %282, %281 : vector<2x384xf32>
    %284 = arith.divf %282, %283 : vector<2x384xf32>
    %285 = vector.extract_strided_slice %284 {offsets = [0, 0], sizes = [2, 128], strides = [1, 1]} : vector<2x384xf32> to vector<2x128xf32>
    %286 = vector.extract_strided_slice %284 {offsets = [0, 128], sizes = [2, 128], strides = [1, 1]} : vector<2x384xf32> to vector<2x128xf32>
    %287 = vector.extract_strided_slice %284 {offsets = [0, 256], sizes = [2, 128], strides = [1, 1]} : vector<2x384xf32> to vector<2x128xf32>
    %288 = vector.extract_strided_slice %278 {offsets = [0, 384], sizes = [2, 128], strides = [1, 1]} : vector<2x512xf32> to vector<2x128xf32>
    %289 = math.tanh %288 : vector<2x128xf32>
    %290 = arith.mulf %286, %254 : vector<2x128xf32>
    %291 = arith.mulf %285, %289 : vector<2x128xf32>
    %292 = arith.addf %290, %291 : vector<2x128xf32>
    %293 = math.tanh %292 : vector<2x128xf32>
    %294 = arith.mulf %287, %293 : vector<2x128xf32>
    %295 = tpu.concatenate %294, %276 in 1 : vector<2x128xf32>, vector<2x128xf32> -> vector<2x256xf32>
    %cst_60 = arith.constant dense<0.000000e+00> : vector<2x512xf32>
    %296 = tpu.matmul %295, %43, %cst_60 {dimension_numbers = #tpu.dot_dimension_numbers<[1], [0], [0], [1], [0, 0, 1, 1], [], []>} : vector<2x256xf32>, vector<256x512xf32>, vector<2x512xf32> -> vector<2x512xf32>
    %297 = vector.broadcast %44 : vector<1x512xf32> to vector<2x512xf32>
    %298 = arith.addf %296, %297 : vector<2x512xf32>
    %299 = vector.extract_strided_slice %298 {offsets = [0, 0], sizes = [2, 384], strides = [1, 1]} : vector<2x512xf32> to vector<2x384xf32>
    %300 = arith.negf %299 : vector<2x384xf32>
    %301 = math.exp %300 : vector<2x384xf32>
    %cst_61 = arith.constant 1.000000e+00 : f32
    %302 = vector.broadcast %cst_61 : f32 to vector<2x384xf32>
    %303 = arith.addf %302, %301 : vector<2x384xf32>
    %304 = arith.divf %302, %303 : vector<2x384xf32>
    %305 = vector.extract_strided_slice %304 {offsets = [0, 0], sizes = [2, 128], strides = [1, 1]} : vector<2x384xf32> to vector<2x128xf32>
    %306 = vector.extract_strided_slice %304 {offsets = [0, 128], sizes = [2, 128], strides = [1, 1]} : vector<2x384xf32> to vector<2x128xf32>
    %307 = vector.extract_strided_slice %304 {offsets = [0, 256], sizes = [2, 128], strides = [1, 1]} : vector<2x384xf32> to vector<2x128xf32>
    %308 = vector.extract_strided_slice %298 {offsets = [0, 384], sizes = [2, 128], strides = [1, 1]} : vector<2x512xf32> to vector<2x128xf32>
    %309 = math.tanh %308 : vector<2x128xf32>
    %310 = arith.mulf %306, %274 : vector<2x128xf32>
    %311 = arith.mulf %305, %309 : vector<2x128xf32>
    %312 = arith.addf %310, %311 : vector<2x128xf32>
    %313 = math.tanh %312 : vector<2x128xf32>
    %314 = arith.mulf %307, %313 : vector<2x128xf32>
    %cst_62 = arith.constant dense<0.000000e+00> : vector<2x512xf32>
    %315 = tpu.matmul %294, %1, %cst_62 {dimension_numbers = #tpu.dot_dimension_numbers<[1], [0], [0], [1], [0, 0, 1, 1], [], []>} : vector<2x128xf32>, vector<128x512xf32>, vector<2x512xf32> -> vector<2x512xf32>
    %316 = arith.addf %42, %315 : vector<2x512xf32>
    %317 = vector.extract_strided_slice %316 {offsets = [0, 0], sizes = [2, 384], strides = [1, 1]} : vector<2x512xf32> to vector<2x384xf32>
    %318 = arith.negf %317 : vector<2x384xf32>
    %319 = math.exp %318 : vector<2x384xf32>
    %cst_63 = arith.constant 1.000000e+00 : f32
    %320 = vector.broadcast %cst_63 : f32 to vector<2x384xf32>
    %321 = arith.addf %320, %319 : vector<2x384xf32>
    %322 = arith.divf %320, %321 : vector<2x384xf32>
    %323 = vector.extract_strided_slice %322 {offsets = [0, 0], sizes = [2, 128], strides = [1, 1]} : vector<2x384xf32> to vector<2x128xf32>
    %324 = vector.extract_strided_slice %322 {offsets = [0, 128], sizes = [2, 128], strides = [1, 1]} : vector<2x384xf32> to vector<2x128xf32>
    %325 = vector.extract_strided_slice %322 {offsets = [0, 256], sizes = [2, 128], strides = [1, 1]} : vector<2x384xf32> to vector<2x128xf32>
    %326 = vector.extract_strided_slice %316 {offsets = [0, 384], sizes = [2, 128], strides = [1, 1]} : vector<2x512xf32> to vector<2x128xf32>
    %327 = math.tanh %326 : vector<2x128xf32>
    %328 = arith.mulf %324, %292 : vector<2x128xf32>
    %329 = arith.mulf %323, %327 : vector<2x128xf32>
    %330 = arith.addf %328, %329 : vector<2x128xf32>
    %331 = math.tanh %330 : vector<2x128xf32>
    %332 = arith.mulf %325, %331 : vector<2x128xf32>
    %333 = tpu.concatenate %332, %314 in 1 : vector<2x128xf32>, vector<2x128xf32> -> vector<2x256xf32>
    %cst_64 = arith.constant dense<0.000000e+00> : vector<2x512xf32>
    %334 = tpu.matmul %333, %43, %cst_64 {dimension_numbers = #tpu.dot_dimension_numbers<[1], [0], [0], [1], [0, 0, 1, 1], [], []>} : vector<2x256xf32>, vector<256x512xf32>, vector<2x512xf32> -> vector<2x512xf32>
    %335 = vector.broadcast %44 : vector<1x512xf32> to vector<2x512xf32>
    %336 = arith.addf %334, %335 : vector<2x512xf32>
    %337 = vector.extract_strided_slice %336 {offsets = [0, 0], sizes = [2, 384], strides = [1, 1]} : vector<2x512xf32> to vector<2x384xf32>
    %338 = arith.negf %337 : vector<2x384xf32>
    %339 = math.exp %338 : vector<2x384xf32>
    %cst_65 = arith.constant 1.000000e+00 : f32
    %340 = vector.broadcast %cst_65 : f32 to vector<2x384xf32>
    %341 = arith.addf %340, %339 : vector<2x384xf32>
    %342 = arith.divf %340, %341 : vector<2x384xf32>
    %343 = vector.extract_strided_slice %342 {offsets = [0, 0], sizes = [2, 128], strides = [1, 1]} : vector<2x384xf32> to vector<2x128xf32>
    %344 = vector.extract_strided_slice %342 {offsets = [0, 128], sizes = [2, 128], strides = [1, 1]} : vector<2x384xf32> to vector<2x128xf32>
    %345 = vector.extract_strided_slice %342 {offsets = [0, 256], sizes = [2, 128], strides = [1, 1]} : vector<2x384xf32> to vector<2x128xf32>
    %346 = vector.extract_strided_slice %336 {offsets = [0, 384], sizes = [2, 128], strides = [1, 1]} : vector<2x512xf32> to vector<2x128xf32>
    %347 = math.tanh %346 : vector<2x128xf32>
    %348 = arith.mulf %344, %312 : vector<2x128xf32>
    %349 = arith.mulf %343, %347 : vector<2x128xf32>
    %350 = arith.addf %348, %349 : vector<2x128xf32>
    %351 = math.tanh %350 : vector<2x128xf32>
    %352 = arith.mulf %345, %351 : vector<2x128xf32>
    %c0_66 = arith.constant 0 : index
    %c0_67 = arith.constant 0 : index
    %353 = vector.load %arg4[%c0_66, %c0_67] : memref<129x8xf32, #tpu.memory_space<vmem>>, vector<128x8xf32>
    %c128 = arith.constant 128 : index
    %c0_68 = arith.constant 0 : index
    %354 = vector.load %arg4[%c128, %c0_68] : memref<129x8xf32, #tpu.memory_space<vmem>>, vector<1x8xf32>
    %cst_69 = arith.constant dense<0.000000e+00> : vector<2x8xf32>
    %355 = tpu.matmul %352, %353, %cst_69 {dimension_numbers = #tpu.dot_dimension_numbers<[1], [0], [0], [1], [0, 0, 1, 1], [], []>} : vector<2x128xf32>, vector<128x8xf32>, vector<2x8xf32> -> vector<2x8xf32>
    %356 = vector.broadcast %354 : vector<1x8xf32> to vector<2x8xf32>
    %357 = arith.addf %355, %356 : vector<2x8xf32>
    %c0_70 = arith.constant 0 : index
    %c0_71 = arith.constant 0 : index
    %358 = vector.load %arg5[%c0_70, %c0_71] : memref<2x8xf32, #tpu.memory_space<vmem>>, vector<2x8xf32>
    tpu.vector_store %arg5[%c0_70, %c0_71], %357 {strides = array<i32>} : memref<2x8xf32, #tpu.memory_space<vmem>>, vector<2x8xf32>,
    return
  }
  func.func @transform_0(%arg0: i32) -> (i32, i32, i32) {
    %c0_i32 = arith.constant 0 : i32
    %c0_i32_0 = arith.constant 0 : i32
    %c0_i32_1 = arith.constant 0 : i32
    %c0_i32_2 = arith.constant 0 : i32
    return %c0_i32, %c0_i32_0, %c0_i32_1 : i32, i32, i32
  }
  func.func @transform_1(%arg0: i32) -> (i32, i32) {
    %c0_i32 = arith.constant 0 : i32
    %c0_i32_0 = arith.constant 0 : i32
    %c0_i32_1 = arith.constant 0 : i32
    return %c0_i32, %c0_i32_0 : i32, i32
  }
  func.func @transform_2(%arg0: i32) -> (i32, i32) {
    %c0_i32 = arith.constant 0 : i32
    %c0_i32_0 = arith.constant 0 : i32
    %c0_i32_1 = arith.constant 0 : i32
    return %c0_i32, %c0_i32_0 : i32, i32
  }
  func.func @transform_3(%arg0: i32) -> (i32, i32) {
    %c0_i32 = arith.constant 0 : i32
    %c0_i32_0 = arith.constant 0 : i32
    %c0_i32_1 = arith.constant 0 : i32
    return %c0_i32, %c0_i32_0 : i32, i32
  }
  func.func @transform_4(%arg0: i32) -> (i32, i32) {
    %c0_i32 = arith.constant 0 : i32
    %c0_i32_0 = arith.constant 0 : i32
    %c0_i32_1 = arith.constant 0 : i32
    return %c0_i32, %c0_i32_0 : i32, i32
  }
}

</mosaic_0001>

<bundles_post_ra>
// kernel: lstm_model_forward.1
= control target key start
LH: loop header
LB: loop body
LE: loop exit
PB: predicated region body
PF: predicated region fallthrough
CT: control target
= control target key end

     0   :  { %9 = vsyncpa [#allocation3], 0  ;;  %s8893_s0 = inlined_call_operand.vmem [shape: f32[2,8,16], index: 0, kind: input, shape index: {}]   ;;  %s8894_s1 = inlined_call_operand.hbm [shape: f32[145,512], index: 1, kind: input, shape index: {}]   ;;  %s8895_s2 = inlined_call_operand.hbm [shape: f32[257,512], index: 2, kind: input, shape index: {}]   ;;  %s8896_s3 = inlined_call_operand.vmem [shape: f32[129,8], index: 3, kind: input, shape index: {}]   ;;  %s8897_s4 = inlined_call_operand.hbm [shape: f32[2,8], index: 4, kind: output, shape index: {}]  }
   0x1   :  { %10 = vsyncpa [#allocation6], 0 }
   0x2   :  { %11 = vsyncpa [#allocation4], 0  ;;  %s5340_s15 = smov [#allocation2]  }
   0x3   :  { %s19_s16 = sshll.u32 %s5340_s15, 4  ;;  %s20_s16 = int_to_ptr.vmem [resolvable:$true] %s19_s16 }
   0x4   :  { %s5282_s17 = scalar_lea.vmem %s20_s16, 9728  ;;  %p5287_p1 = scmp.lt.s32.totalorder %s20_s16, %s20_s16 }
   0x5   :  { %p5283_p0 = scmp.ne.s32.totalorder %s20_s16, %s5282_s17  ;;  %p5288_p2 = scmp.lt.s32.totalorder %s5282_s17, %s5282_s17 }
   0x7   :  { %p5289_p3 = por %p5288_p2, %p5287_p1 }
   0x9   :  { %p5290_p4 = pnand %p5289_p3, %p5283_p0 }
   0xb   :  { %5293 = shalt.err (!%p5290_p4)
}
   0xc   :  { %s5341_s18 = smov 512   ;;  %s5342_s19 = smov 32  }
   0xd   :  { %25 = dma.hbm_to_vmem [thread:$0]  %s8894_s1, 9728, %s20_s16, [#allocation3], %s5341_s18, %s5341_s18, %s5342_s19  }
   0xe   :  { %s5343_s22 = smov [#allocation5]  }
   0xf   :  { %s31_s23 = sshll.u32 %s5343_s22, 4  ;;  %s32_s23 = int_to_ptr.vmem [resolvable:$true] %s31_s23 }
  0x10   :  { %s5302_s24 = scalar_lea.vmem %s32_s23, 16896  ;;  %p5307_p6 = scmp.lt.s32.totalorder %s32_s23, %s32_s23 }
  0x11   :  { %p5303_p5 = scmp.ne.s32.totalorder %s32_s23, %s5302_s24  ;;  %p5308_p7 = scmp.lt.s32.totalorder %s5302_s24, %s5302_s24 }
  0x13   :  { %p5309_p8 = por %p5308_p7, %p5307_p6 }
  0x15   :  { %p5310_p9 = pnand %p5309_p8, %p5303_p5 }
  0x17   :  { %5313 = shalt.err (!%p5310_p9)
}
  0x18   :  { %37 = dma.hbm_to_vmem [thread:$0]  %s8895_s2, 16896, %s32_s23, [#allocation6], %s5341_s18, %s5341_s18, %s5342_s19  }
  0x19   :  { %5334 = dma.done.wait [#allocation3], 9728  }
  0x1a   :  { %5335 = vsyncadd [#allocation3], 4294957568 }
  0x1b   :  { %5336 = dma.done.wait [#allocation6], 16896  }
  0x1c   :  { %5337 = vsyncadd [#allocation6], 4294950400  ;;  %v8898_v0 = vmov 0.0   ;;  %v5380_v1 = vld [vmem:[#allocation2 + $0x28] sm:$0xff]  ;;  %v5382_v2 = vld [vmem:[#allocation2 + $0x20] sm:$0xff]  ;;  %vm146_vm0 = vcmask 1041409  }
  0x1d   :  { %215 = vmatprep.mubr.f32.mxu1 %v8898_v0  ;;  %815 = vmatprep.mubr.f32.mxu0 %v8898_v0  ;;  %v5384_v3 = vld [vmem:[#allocation2 + $0x8] sm:$0xff]  ;;  %v5388_v4 = vld [vmem:[#allocation2] sm:$0xff]  ;;  %vm148_vm1 = vcmask 130048   ;;  %v5398_v8 = vld [vmem:[#allocation2 + $0x38] sm:$0xff]  ;;  %vm5345_vm2 = vmmov 0   ;;  %s5346_s7 = smov [#allocation7]  }
  0x1e   :  { %179 = vmatprep.subr.mxu1 %v5380_v1  ;;  %779 = vmatprep.subr.mxu0 %v5380_v1  ;;  %v120_v5 = vld [vmem:[%s8893_s0] sm:$0x1]  ;;  %v121_v6 = vld [vmem:[%s8893_s0 + $0x8] sm:$0x1]  ;;  %v5402_v9 = vld [vmem:[#allocation2 + $0x30] sm:$0xff]  ;;  %s4281_s8 = sshll.u32 %s5346_s7, 4  ;;  %s4282_s8 = int_to_ptr.vmem [resolvable:$true] %s4281_s8 }
  0x1f   :  { %180 = vmatpush1.msra.mxu1 %v5382_v2  ;;  %780 = vmatpush1.msra.mxu0 %v5382_v2  ;;  %v145_v7 = vrot.slane %v121_v6, 7  ;;  %v743_v10 = vld [vmem:[%s8893_s0 + $0x4] sm:$0x1]  ;;  %v744_v11 = vld [vmem:[%s8893_s0 + $0xc] sm:$0x1]  ;;  %v5413_v14 = vld [vmem:[#allocation2 + $0x18] sm:$0xff]  ;;  %p5319_p11 = scmp.lt.s32.totalorder %s4282_s8, %s4282_s8 }
  0x20   :  { %181 = vmatprep.subr.mxu1 %v5384_v3  ;;  %781 = vmatprep.subr.mxu0 %v5384_v3  ;;  %v747_v13 = vrot.slane %v744_v11, 7  ;;  %v894_v15 = vld [vmem:[%s8893_s0 + $0xd] sm:$0x1]  ;;  %v5420_v16 = vld [vmem:[#allocation2 + $0x10] sm:$0xff]  ;;  %v294_v19 = vld [vmem:[%s8893_s0 + $0x9] sm:$0x1] }
  0x21   :  { %182 = vmatpush1.msra.mxu1 %v5388_v4  ;;  %782 = vmatpush1.msra.mxu0 %v5388_v4  ;;  %v147_v12 = vsel %vm146_vm0, %v145_v7, %v120_v5  ;;  %v897_v18 = vrot.slane %v894_v15, 7  ;;  %v893_v20 = vld [vmem:[%s8893_s0 + $0x5] sm:$0x1]  ;;  %v297_v21 = vrot.slane %v294_v19, 7  ;;  %v1044_v22 = vld [vmem:[%s8893_s0 + $0xe] sm:$0x1] }
  0x22   :  { %4291 = vmatmul.mubr.msk.f32.vlgmr.msra.gmra.mxu1 %vm148_vm1, %v147_v12  ;;  %250 = vmatprep.subr.mxu1 %v5398_v8  ;;  %v5425_v17 = vsel %vm146_vm0, %v747_v13, %v743_v10  ;;  %v293_v24 = vld [vmem:[%s8893_s0 + $0x1] sm:$0x1]  ;;  %v1047_v25 = vrot.slane %v1044_v22, 7  ;;  %v1043_v27 = vld [vmem:[%s8893_s0 + $0x6] sm:$0x1]  ;;  %v5491_v33 = vld [vmem:[#allocation2 + $0x228] sm:$0xff] }
  0x23   :  { %929 = vmatprep.subr.mxu0 %v5380_v1  ;;  %251 = vmatpush1.msra.mxu1 %v5402_v9  ;;  %v5446_v23 = vsel %vm146_vm0, %v897_v18, %v893_v20  ;;  %v298_v26 = vsel %vm146_vm0, %v297_v21, %v293_v24  ;;  %v1194_v28 = vld [vmem:[%s8893_s0 + $0xf] sm:$0x1]  ;;  %v444_v31 = vld [vmem:[%s8893_s0 + $0xa] sm:$0x1]  ;;  %v1193_v32 = vld [vmem:[%s8893_s0 + $0x7] sm:$0x1] }
  0x24   :  { %4299 = vmatmul.mubr.msk.f32.vlgmr.msra.gmra.mxu0 %vm148_vm1, %v5425_v17  ;;  %252 = vmatprep.subr.mxu1 %v5413_v14  ;;  %v5472_v29 = vsel %vm146_vm0, %v1047_v25, %v1043_v27  ;;  %v1197_v30 = vrot.slane %v1194_v28, 7  ;;  %v447_v34 = vrot.slane %v444_v31, 7  ;;  %v443_v36 = vld [vmem:[%s8893_s0 + $0x2] sm:$0x1]  ;;  %v111_v38 = vld [vmem:[#allocation2 + $0x208] sm:$0xff]  ;;  %v5586_v13 = vld [vmem:[#allocation2 + $0x210] sm:$0xff] }
  0x25   :  { %930 = vmatpush1.msra.mxu0 %v5382_v2  ;;  %253 = vmatpush1.msra.mxu1 %v5420_v16  ;;  %v114_v37 = vld [vmem:[#allocation2 + $0x220] sm:$0xff]  ;;  %v107_v41 = vld [vmem:[#allocation2 + $0x1e8] sm:$0xff]  ;;  %v5594_v15 = vld [vmem:[#allocation2 + $0x1f0] sm:$0xff]  ;;  %vm4273_vm3 = vcmask 58368   ;;  %s5314_s9 = scalar_lea.vmem %s4282_s8, 32 }
  0x26   :  { %931 = vmatprep.subr.mxu0 %v5384_v3  ;;  %286 = vmatprep.mubr.f32.mxu1 %v8898_v0  ;;  %v5496_v35 = vsel %vm146_vm0, %v1197_v30, %v1193_v32  ;;  %v110_v39 = vld [vmem:[#allocation2 + $0x200] sm:$0xff]  ;;  %v448_v40 = vsel %vm146_vm0, %v447_v34, %v443_v36  ;;  %v103_v43 = vld [vmem:[#allocation2 + $0x1c8] sm:$0xff]  ;;  %v5603_v18 = vld [vmem:[#allocation2 + $0x1b8] sm:$0xff]  ;;  %p5315_p10 = scmp.ne.s32.totalorder %s4282_s8, %s5314_s9  ;;  %p5320_p12 = scmp.lt.s32.totalorder %s5314_s9, %s5314_s9 }
  0x27   :  { %932 = vmatpush1.msra.mxu0 %v5388_v4  ;;  %4292 = vmatmul.mubr.msk.f32.vlgmr.msra.gmra.mxu1 %vm148_vm1, %v147_v12  ;;  %v106_v42 = vld [vmem:[#allocation2 + $0x1e0] sm:$0xff]  ;;  %v594_v44 = vld [vmem:[%s8893_s0 + $0xb] sm:$0x1]  ;;  %v5574_v12 = vld [vmem:[#allocation2 + $0x238] sm:$0xff] }
  0x28   :  { %329 = vmatprep.subr.mxu1 %v5380_v1  ;;  %965 = vmatprep.mubr.f32.mxu0 %v8898_v0  ;;  %v102_v45 = vld [vmem:[#allocation2 + $0x1c0] sm:$0xff]  ;;  %v99_v46 = vld [vmem:[#allocation2 + $0x1a8] sm:$0xff]  ;;  %v597_v47 = vrot.slane %v594_v44, 7  ;;  %v5606_v19 = vld [vmem:[#allocation2 + $0x1b0] sm:$0xff]  ;;  %p5321_p13 = por %p5320_p12, %p5319_p11 }
  0x29   :  { %1079 = vmatprep.subr.mxu0 %v5380_v1  ;;  %330 = vmatpush1.msra.mxu1 %v5382_v2  ;;  %v98_v48 = vld [vmem:[#allocation2 + $0x1a0] sm:$0xff]  ;;  %v95_v50 = vld [vmem:[#allocation2 + $0x188] sm:$0xff]  ;;  %v5609_v20 = vld [vmem:[#allocation2 + $0x198] sm:$0xff] }
  0x2a   :  { %4301 = vmatmul.mubr.msk.f32.vlgmr.msra.gmra.mxu0 %vm148_vm1, %v5446_v23  ;;  %331 = vmatprep.subr.mxu1 %v5384_v3  ;;  %v593_v49 = vld [vmem:[%s8893_s0 + $0x3] sm:$0x1]  ;;  %v91_v53 = vld [vmem:[#allocation2 + $0x168] sm:$0xff]  ;;  %v5612_v21 = vld [vmem:[#allocation2 + $0x190] sm:$0xff]  ;;  %p5322_p0 = pnand %p5321_p13, %p5315_p10 }
  0x2b   :  { %1080 = vmatpush1.msra.mxu0 %v5382_v2  ;;  %332 = vmatpush1.msra.mxu1 %v5388_v4  ;;  %v94_v51 = vld [vmem:[#allocation2 + $0x180] sm:$0xff]  ;;  %v598_v52 = vsel %vm146_vm0, %v597_v47, %v593_v49  ;;  %v87_v55 = vld [vmem:[#allocation2 + $0x148] sm:$0xff]  ;;  %v5615_v22 = vld [vmem:[#allocation2 + $0x178] sm:$0xff] }
  0x2c   :  { %1081 = vmatprep.subr.mxu0 %v5384_v3  ;;  %365 = vmatprep.mubr.f32.mxu1 %v8898_v0  ;;  %v90_v54 = vld [vmem:[#allocation2 + $0x160] sm:$0xff]  ;;  %v83_v57 = vld [vmem:[#allocation2 + $0x128] sm:$0xff]  ;;  %v5621_v24 = vld [vmem:[#allocation2 + $0x158] sm:$0xff] }
  0x2d   :  { %1082 = vmatpush1.msra.mxu0 %v5388_v4  ;;  %4293 = vmatmul.mubr.msk.f32.vlgmr.msra.gmra.mxu1 %vm148_vm1, %v298_v26  ;;  %v86_v56 = vld [vmem:[#allocation2 + $0x140] sm:$0xff]  ;;  %v79_v59 = vld [vmem:[#allocation2 + $0x108] sm:$0xff]  ;;  %v5624_v25 = vld [vmem:[#allocation2 + $0x150] sm:$0xff] }
  0x2e   :  { %400 = vmatprep.subr.mxu1 %v5398_v8  ;;  %1115 = vmatprep.mubr.f32.mxu0 %v8898_v0  ;;  %v82_v58 = vld [vmem:[#allocation2 + $0x120] sm:$0xff]  ;;  %v75_v61 = vld [vmem:[#allocation2 + $0xe8] sm:$0xff]  ;;  %v5630_v27 = vld [vmem:[#allocation2 + $0x130] sm:$0xff] }
  0x2f   :  { %1229 = vmatprep.subr.mxu0 %v5380_v1  ;;  %401 = vmatpush1.msra.mxu1 %v5402_v9  ;;  %v78_v60 = vld [vmem:[#allocation2 + $0x100] sm:$0xff]  ;;  %v71_v63 = vld [vmem:[#allocation2 + $0xc8] sm:$0xff]  ;;  %v5633_v28 = vld [vmem:[#allocation2 + $0x118] sm:$0xff] }
  0x30   :  { %4303 = vmatmul.mubr.msk.f32.vlgmr.msra.gmra.mxu0 %vm148_vm1, %v5472_v29  ;;  %402 = vmatprep.subr.mxu1 %v5413_v14  ;;  %v74_v62 = vld [vmem:[#allocation2 + $0xe0] sm:$0xff]  ;;  %v5554_v6 = vld [vmem:[#allocation2 + $0x68] sm:$0xff]  ;;  %v5639_v30 = vld [vmem:[#allocation2 + $0xf8] sm:$0xff] }
  0x31   :  { %1230 = vmatpush1.msra.mxu0 %v5382_v2  ;;  %403 = vmatpush1.msra.mxu1 %v5420_v16  ;;  %v62_v5 = vld [vmem:[#allocation2 + $0x80] sm:$0xff]  ;;  %v5562_v10 = vld [vmem:[#allocation2 + $0x48] sm:$0xff]  ;;  %v5642_v31 = vld [vmem:[#allocation2 + $0xf0] sm:$0xff] }
  0x32   :  { %1231 = vmatprep.subr.mxu0 %v5384_v3  ;;  %436 = vmatprep.mubr.f32.mxu1 %v8898_v0  ;;  %v5558_v7 = vld [vmem:[#allocation2 + $0x60] sm:$0xff]  ;;  %v5645_v32 = vld [vmem:[#allocation2 + $0xd8] sm:$0xff]  ;;  %v5648_v34 = vld [vmem:[#allocation2 + $0xd0] sm:$0xff] }
  0x33   :  { %1232 = vmatpush1.msra.mxu0 %v5388_v4  ;;  %4294 = vmatmul.mubr.msk.f32.vlgmr.msra.gmra.mxu1 %vm148_vm1, %v298_v26  ;;  %v5568_v11 = vld [vmem:[#allocation2 + $0x40] sm:$0xff]  ;;  %v5627_v26 = vld [vmem:[#allocation2 + $0x138] sm:$0xff]  ;;  %v5654_v36 = vld [vmem:[#allocation2 + $0xb0] sm:$0xff] }
  0x34   :  { %479 = vmatprep.subr.mxu1 %v5380_v1  ;;  %1265 = vmatprep.mubr.f32.mxu0 %v8898_v0  ;;  %v5681_v44 = vld [vmem:[#allocation5 + $0x1f8] sm:$0xff]  ;;  %v5691_v47 = vld [vmem:[#allocation5 + $0x1c8] sm:$0xff]  ;;  %v5697_v49 = vld [vmem:[#allocation5 + $0x1c0] sm:$0xff] }
  0x35   :  { %1473 = vmatprep.subr.mxu0 %v5491_v33  ;;  %480 = vmatpush1.msra.mxu1 %v5382_v2  ;;  %9410 = vst [vmem:[#allocation12_spill] sm:$0xff] %v5697_v49 }
  0x36   :  { %4305 = vmatmul.mubr.msk.f32.vlgmr.msra.gmra.mxu0 %vm148_vm1, %v5496_v35  ;;  %481 = vmatprep.subr.mxu1 %v5384_v3 }
  0x37   :  { %1474 = vmatpush1.msra.mxu0 %v114_v37  ;;  %482 = vmatpush1.msra.mxu1 %v5388_v4  ;;  %v5657_v37 = vld [vmem:[#allocation2 + $0x98] sm:$0xff] }
  0x38   :  { %1475 = vmatprep.subr.mxu0 %v111_v38  ;;  %515 = vmatprep.mubr.f32.mxu1 %v8898_v0  ;;  %v5660_v38 = vld [vmem:[#allocation2 + $0x90] sm:$0xff] }
  0x39   :  { %1476 = vmatpush1.msra.mxu0 %v110_v39  ;;  %4295 = vmatmul.mubr.msk.f32.vlgmr.msra.gmra.mxu1 %vm148_vm1, %v448_v40  ;;  %v5663_v39 = vld [vmem:[#allocation2 + $0x78] sm:$0xff] }
  0x3a   :  { %550 = vmatprep.subr.mxu1 %v5398_v8  ;;  %1477 = vmatprep.subr.mxu0 %v107_v41  ;;  %v5669_v41 = vld [vmem:[#allocation2 + $0x58] sm:$0xff] }
  0x3b   :  { %551 = vmatpush1.msra.mxu1 %v5402_v9  ;;  %1478 = vmatpush1.msra.mxu0 %v106_v42  ;;  %v5672_v42 = vld [vmem:[#allocation2 + $0x50] sm:$0xff] }
  0x3c   :  { %552 = vmatprep.subr.mxu1 %v5413_v14  ;;  %1479 = vmatprep.subr.mxu0 %v103_v43  ;;  %v5679_v43 = vld [vmem:[#allocation5 + $0x1e8] sm:$0xff] }
  0x3d   :  { %553 = vmatpush1.msra.mxu1 %v5420_v16  ;;  %586 = vmatprep.mubr.f32.mxu1 %v8898_v0 }
  0x3e   :  { %1480 = vmatpush1.msra.mxu0 %v102_v45  ;;  %4296 = vmatmul.mubr.msk.f32.vlgmr.msra.gmra.mxu1 %vm148_vm1, %v448_v40  ;;  %v5666_v40 = vld [vmem:[#allocation2 + $0x70] sm:$0xff]  ;;  %v5685_v45 = vld [vmem:[#allocation5 + $0x1e0] sm:$0xff] }
  0x3f   :  { %629 = vmatprep.subr.mxu1 %v5380_v1  ;;  %1481 = vmatprep.subr.mxu0 %v99_v46  ;;  %v70_v1 = vld [vmem:[#allocation2 + $0xc0] sm:$0xff]  ;;  %v5687_v46 = vld [vmem:[#allocation5 + $0x1f0] sm:$0xff] }
  0x40   :  { %630 = vmatpush1.msra.mxu1 %v5382_v2  ;;  %1482 = vmatpush1.msra.mxu0 %v98_v48  ;;  %v67_v2 = vld [vmem:[#allocation2 + $0xa8] sm:$0xff]  ;;  %v5693_v48 = vld [vmem:[#allocation5 + $0x1d8] sm:$0xff] }
  0x41   :  { %631 = vmatprep.subr.mxu1 %v5384_v3  ;;  %1483 = vmatprep.subr.mxu0 %v95_v50  ;;  %v66_v3 = vld [vmem:[#allocation2 + $0xa0] sm:$0xff]  ;;  %9409 = vst [vmem:[#allocation11_spill] sm:$0xff] %v5693_v48  ;;  %v5699_v50 = vld [vmem:[#allocation5 + $0x1d0] sm:$0xff] }
  0x42   :  { %632 = vmatpush1.msra.mxu1 %v5388_v4  ;;  %665 = vmatprep.mubr.f32.mxu1 %v8898_v0  ;;  %v63_v4 = vld [vmem:[#allocation2 + $0x88] sm:$0xff]  ;;  %9411 = vst [vmem:[#allocation13_spill] sm:$0xff] %v5699_v50 }
  0x43   :  { %1484 = vmatpush1.msra.mxu0 %v94_v51  ;;  %4297 = vmatmul.mubr.msk.f32.vlgmr.msra.gmra.mxu1 %vm148_vm1, %v598_v52  ;;  %v5703_v51 = vld [vmem:[#allocation5 + $0x1a8] sm:$0xff] }
  0x44   :  { %700 = vmatprep.subr.mxu1 %v5398_v8  ;;  %1485 = vmatprep.subr.mxu0 %v91_v53  ;;  %9412 = vst [vmem:[#allocation14_spill] sm:$0xff] %v5703_v51  ;;  %v5709_v53 = vld [vmem:[#allocation5 + $0x1a0] sm:$0xff] }
  0x45   :  { %701 = vmatpush1.msra.mxu1 %v5402_v9  ;;  %1486 = vmatpush1.msra.mxu0 %v90_v54  ;;  %9414 = vst [vmem:[#allocation16_spill] sm:$0xff] %v5709_v53  ;;  %v5711_v54 = vld [vmem:[#allocation5 + $0x1b0] sm:$0xff] }
  0x46   :  { %702 = vmatprep.subr.mxu1 %v5413_v14  ;;  %1487 = vmatprep.subr.mxu0 %v87_v55  ;;  %9415 = vst [vmem:[#allocation17_spill] sm:$0xff] %v5711_v54  ;;  %v5715_v55 = vld [vmem:[#allocation5 + $0x188] sm:$0xff] }
  0x47   :  { %703 = vmatpush1.msra.mxu1 %v5420_v16  ;;  %736 = vmatprep.mubr.f32.mxu1 %v8898_v0  ;;  %9416 = vst [vmem:[#allocation18_spill] sm:$0xff] %v5715_v55 }
  0x48   :  { %1488 = vmatpush1.msra.mxu0 %v86_v56  ;;  %4298 = vmatmul.mubr.msk.f32.vlgmr.msra.gmra.mxu1 %vm148_vm1, %v598_v52  ;;  %v5705_v52 = vld [vmem:[#allocation5 + $0x1b8] sm:$0xff] }
  0x49   :  { %850 = vmatprep.subr.mxu1 %v5398_v8  ;;  %1489 = vmatprep.subr.mxu0 %v83_v57  ;;  %9413 = vst [vmem:[#allocation15_spill] sm:$0xff] %v5705_v52  ;;  %v5717_v56 = vld [vmem:[#allocation5 + $0x198] sm:$0xff]  ;;  %v5721_v57 = vld [vmem:[#allocation5 + $0x180] sm:$0xff] }
  0x4a   :  { %851 = vmatpush1.msra.mxu1 %v5402_v9  ;;  %1490 = vmatpush1.msra.mxu0 %v82_v58  ;;  %9417 = vst [vmem:[#allocation19_spill] sm:$0xff] %v5717_v56  ;;  %9418 = vst [vmem:[#allocation20_spill] sm:$0xff] %v5721_v57  ;;  %v5723_v58 = vld [vmem:[#allocation5 + $0x190] sm:$0xff] }
  0x4b   :  { %852 = vmatprep.subr.mxu1 %v5413_v14  ;;  %1491 = vmatprep.subr.mxu0 %v79_v59  ;;  %9419 = vst [vmem:[#allocation21_spill] sm:$0xff] %v5723_v58  ;;  %v5727_v59 = vld [vmem:[#allocation5 + $0x168] sm:$0xff] }
  0x4c   :  { %853 = vmatpush1.msra.mxu1 %v5420_v16  ;;  %886 = vmatprep.mubr.f32.mxu1 %v8898_v0  ;;  %9420 = vst [vmem:[#allocation22_spill] sm:$0xff] %v5727_v59 }
  0x4d   :  { %1492 = vmatpush1.msra.mxu0 %v78_v60  ;;  %4300 = vmatmul.mubr.msk.f32.vlgmr.msra.gmra.mxu1 %vm148_vm1, %v5425_v17  ;;  %v5600_v17 = vld [vmem:[#allocation2 + $0x1d0] sm:$0xff]  ;;  %v5729_v60 = vld [vmem:[#allocation5 + $0x178] sm:$0xff] }
  0x4e   :  { %1000 = vmatprep.subr.mxu1 %v5398_v8  ;;  %1493 = vmatprep.subr.mxu0 %v75_v61  ;;  %9421 = vst [vmem:[#allocation23_spill] sm:$0xff] %v5729_v60  ;;  %v5733_v61 = vld [vmem:[#allocation5 + $0x160] sm:$0xff] }
  0x4f   :  { %1001 = vmatpush1.msra.mxu1 %v5402_v9  ;;  %1494 = vmatpush1.msra.mxu0 %v74_v62  ;;  %9422 = vst [vmem:[#allocation24_spill] sm:$0xff] %v5733_v61  ;;  %v5735_v62 = vld [vmem:[#allocation5 + $0x170] sm:$0xff] }
  0x50   :  { %1002 = vmatprep.subr.mxu1 %v5413_v14  ;;  %1495 = vmatprep.subr.mxu0 %v71_v63  ;;  %9423 = vst [vmem:[#allocation25_spill] sm:$0xff] %v5735_v62  ;;  %v5739_v63 = vld [vmem:[#allocation5 + $0x148] sm:$0xff] }
  0x51   :  { %1003 = vmatpush1.msra.mxu1 %v5420_v16  ;;  %1036 = vmatprep.mubr.f32.mxu1 %v8898_v0  ;;  %9424 = vst [vmem:[#allocation26_spill] sm:$0xff] %v5739_v63 }
  0x52   :  { %1496 = vmatpush1.msra.mxu0 %v70_v1  ;;  %4302 = vmatmul.mubr.msk.f32.vlgmr.msra.gmra.mxu1 %vm148_vm1, %v5446_v23  ;;  %v5618_v23 = vld [vmem:[#allocation2 + $0x170] sm:$0xff]  ;;  %v5741_v1 = vld [vmem:[#allocation5 + $0x158] sm:$0xff] }
  0x53   :  { %1150 = vmatprep.subr.mxu1 %v5398_v8  ;;  %1497 = vmatprep.subr.mxu0 %v67_v2  ;;  %9425 = vst [vmem:[#allocation27_spill] sm:$0xff] %v5741_v1  ;;  %v5745_v2 = vld [vmem:[#allocation5 + $0x140] sm:$0xff] }
  0x54   :  { %1151 = vmatpush1.msra.mxu1 %v5402_v9  ;;  %1498 = vmatpush1.msra.mxu0 %v66_v3  ;;  %9426 = vst [vmem:[#allocation28_spill] sm:$0xff] %v5745_v2  ;;  %v5747_v3 = vld [vmem:[#allocation5 + $0x150] sm:$0xff] }
  0x55   :  { %1152 = vmatprep.subr.mxu1 %v5413_v14  ;;  %1499 = vmatprep.subr.mxu0 %v63_v4  ;;  %9427 = vst [vmem:[#allocation29_spill] sm:$0xff] %v5747_v3  ;;  %v5751_v4 = vld [vmem:[#allocation5 + $0x128] sm:$0xff] }
  0x56   :  { %1153 = vmatpush1.msra.mxu1 %v5420_v16  ;;  %1186 = vmatprep.mubr.f32.mxu1 %v8898_v0  ;;  %9428 = vst [vmem:[#allocation30_spill] sm:$0xff] %v5751_v4 }
  0x57   :  { %1500 = vmatpush1.msra.mxu0 %v62_v5  ;;  %4304 = vmatmul.mubr.msk.f32.vlgmr.msra.gmra.mxu1 %vm148_vm1, %v5472_v29  ;;  %v5636_v29 = vld [vmem:[#allocation2 + $0x110] sm:$0xff]  ;;  %v5753_v5 = vld [vmem:[#allocation5 + $0x138] sm:$0xff] }
  0x58   :  { %1300 = vmatprep.subr.mxu1 %v5398_v8  ;;  %1501 = vmatprep.subr.mxu0 %v5554_v6  ;;  %v5578_v8 = vld [vmem:[#allocation2 + $0x230] sm:$0xff]  ;;  %9429 = vst [vmem:[#allocation31_spill] sm:$0xff] %v5753_v5 }
  0x59   :  { %1301 = vmatpush1.msra.mxu1 %v5402_v9  ;;  %1502 = vmatpush1.msra.mxu0 %v5558_v7  ;;  %v5583_v9 = vld [vmem:[#allocation2 + $0x218] sm:$0xff] }
  0x5a   :  { %1302 = vmatprep.subr.mxu1 %v5413_v14  ;;  %1503 = vmatprep.subr.mxu0 %v5562_v10  ;;  %v5590_v14 = vld [vmem:[#allocation2 + $0x1f8] sm:$0xff] }
  0x5b   :  { %1303 = vmatpush1.msra.mxu1 %v5420_v16  ;;  %1336 = vmatprep.mubr.f32.mxu1 %v8898_v0  ;;  %v5597_v16 = vld [vmem:[#allocation2 + $0x1d8] sm:$0xff] }
  0x5c   :  { %1504 = vmatpush1.msra.mxu0 %v5568_v11  ;;  %1537 = vmatprep.mubr.f32.mxu0 %v8898_v0 }
  0x5d   :  { %4306 = vmatmul.mubr.msk.f32.vlgmr.msra.gmra.mxu1 %vm148_vm1, %v5496_v35  ;;  %1538 = vmatmul.mubr.f32.vlgmr.msra.gmra.mxu0 %v8898_v0  ;;  %v5651_v35 = vld [vmem:[#allocation2 + $0xb8] sm:$0xff] }
  0x5e   :  { %1544 = vmatprep.subr.mxu1 %v5574_v12  ;;  %1608 = vmatprep.mubr.f32.mxu1 %v8898_v0 }
  0x5f   :  { %1545 = vmatpush1.msra.mxu1 %v5578_v8  ;;  %1728 = vmatprep.mubr.f32.mxu0 %v8898_v0 }
  0x60   :  { %1546 = vmatprep.subr.mxu1 %v5583_v9  ;;  %1664 = vmatprep.subr.mxu0 %v5679_v43 }
  0x61   :  { %1547 = vmatpush1.msra.mxu1 %v5586_v13  ;;  %1665 = vmatpush1.msra.mxu0 %v5685_v45 }
  0x62   :  { %1548 = vmatprep.subr.mxu1 %v5590_v14  ;;  %1666 = vmatprep.subr.mxu0 %v5691_v47 }
  0x63   :  { %1549 = vmatpush1.msra.mxu1 %v5594_v15  ;;  %1667 = vmatpush1.msra.mxu0 %v5697_v49 }
  0x64   :  { %1550 = vmatprep.subr.mxu1 %v5597_v16  ;;  %1668 = vmatprep.subr.mxu0 %v5703_v51 }
  0x65   :  { %1551 = vmatpush1.msra.mxu1 %v5600_v17  ;;  %1669 = vmatpush1.msra.mxu0 %v5709_v53 }
  0x66   :  { %1552 = vmatprep.subr.mxu1 %v5603_v18  ;;  %1670 = vmatprep.subr.mxu0 %v5715_v55 }
  0x67   :  { %1553 = vmatpush1.msra.mxu1 %v5606_v19  ;;  %1671 = vmatpush1.msra.mxu0 %v5721_v57  ;;  %v119_v57 = vld [vmem:[#allocation2 + $0x240] ss:$8 sm:$0xf] }
  0x68   :  { %1554 = vmatprep.subr.mxu1 %v5609_v20  ;;  %1672 = vmatprep.subr.mxu0 %v5727_v59  ;;  %v6007_v59 = vld [vmem:[#allocation5 + $0x290] sm:$0xff] }
  0x69   :  { %1555 = vmatpush1.msra.mxu1 %v5612_v21  ;;  %1673 = vmatpush1.msra.mxu0 %v5733_v61  ;;  %v5991_v61 = vld [vmem:[#allocation5 + $0x2b8] sm:$0xff]  ;;  %9515 = vst [vmem:[#allocation117_spill] sm:$0xff] %v6007_v59 }
  0x6a   :  { %1556 = vmatprep.subr.mxu1 %v5615_v22  ;;  %1674 = vmatprep.subr.mxu0 %v5739_v63  ;;  %v5759_v63 = vld [vmem:[#allocation5 + $0x130] sm:$0xff]  ;;  %9509 = vst [vmem:[#allocation111_spill] sm:$0xff] %v5991_v61 }
  0x6b   :  { %1557 = vmatpush1.msra.mxu1 %v5618_v23  ;;  %1675 = vmatpush1.msra.mxu0 %v5745_v2  ;;  %9431 = vst [vmem:[#allocation33_spill] sm:$0xff] %v5759_v63  ;;  %v5765_v2 = vld [vmem:[#allocation5 + $0x118] sm:$0xff] }
  0x6c   :  { %1558 = vmatprep.subr.mxu1 %v5621_v24  ;;  %1676 = vmatprep.subr.mxu0 %v5751_v4  ;;  %9433 = vst [vmem:[#allocation35_spill] sm:$0xff] %v5765_v2  ;;  %v5771_v4 = vld [vmem:[#allocation5 + $0x110] sm:$0xff] }
  0x6d   :  { %1559 = vmatpush1.msra.mxu1 %v5624_v25  ;;  %9435 = vst [vmem:[#allocation37_spill] sm:$0xff] %v5771_v4 }
  0x6e   :  { %1560 = vmatprep.subr.mxu1 %v5627_v26 }
  0x6f   :  { %1561 = vmatpush1.msra.mxu1 %v5630_v27 }
  0x70   :  { %1562 = vmatprep.subr.mxu1 %v5633_v28 }
  0x71   :  { %1563 = vmatpush1.msra.mxu1 %v5636_v29 }
  0x72   :  { %1564 = vmatprep.subr.mxu1 %v5639_v30 }
  0x73   :  { %1565 = vmatpush1.msra.mxu1 %v5642_v31 }
  0x74   :  { %1566 = vmatprep.subr.mxu1 %v5645_v32 }
  0x75   :  { %1567 = vmatpush1.msra.mxu1 %v5648_v34 }
  0x76   :  { %1568 = vmatprep.subr.mxu1 %v5651_v35 }
  0x77   :  { %1569 = vmatpush1.msra.mxu1 %v5654_v36 }
  0x78   :  { %1570 = vmatprep.subr.mxu1 %v5657_v37 }
  0x79   :  { %1571 = vmatpush1.msra.mxu1 %v5660_v38 }
  0x7a   :  { %1572 = vmatprep.subr.mxu1 %v5663_v39 }
  0x7b   :  { %1573 = vmatpush1.msra.mxu1 %v5666_v40 }
  0x7c   :  { %1574 = vmatprep.subr.mxu1 %v5669_v41 }
  0x7d   :  { %1575 = vmatpush1.msra.mxu1 %v5672_v42 }
  0x7e   :  { %1609 = vmatmul.mubr.f32.vlgmr.msra.gmra.mxu1 %v8898_v0  ;;  %1735 = vmatprep.subr.mxu1 %v5681_v44 }
  0x7f   :  { %1799 = vmatprep.mubr.f32.mxu1 %v8898_v0  ;;  %1736 = vmatpush1.msra.mxu1 %v5687_v46  ;;  %v5757_v0 = vld [vmem:[#allocation5 + $0x120] sm:$0xff] }
  0x80   :  { %1737 = vmatprep.subr.mxu1 %v5693_v48  ;;  %9430 = vst [vmem:[#allocation32_spill] sm:$0xff] %v5757_v0  ;;  %1677 = vmatpush1.msra.mxu0 %v5757_v0  ;;  %v5777_v0 = vld [vmem:[#allocation5 + $0xf8] sm:$0xff] }
  0x81   :  { %1738 = vmatpush1.msra.mxu1 %v5699_v50  ;;  %9437 = vst [vmem:[#allocation39_spill] sm:$0xff] %v5777_v0 }
  0x82   :  { %1739 = vmatprep.subr.mxu1 %v5705_v52 }
  0x83   :  { %1740 = vmatpush1.msra.mxu1 %v5711_v54 }
  0x84   :  { %1741 = vmatprep.subr.mxu1 %v5717_v56 }
  0x85   :  { %1742 = vmatpush1.msra.mxu1 %v5723_v58 }
  0x86   :  { %1743 = vmatprep.subr.mxu1 %v5729_v60  ;;  %v5999_v60 = vld [vmem:[#allocation5 + $0x288] sm:$0xff] }
  0x87   :  { %1744 = vmatpush1.msra.mxu1 %v5735_v62  ;;  %v123_v62 = vlaneseq  ;;  %9512 = vst [vmem:[#allocation114_spill] sm:$0xff] %v5999_v60 }
  0x88   :  { %1745 = vmatprep.subr.mxu1 %v5741_v1  ;;  %v5763_v1 = vld [vmem:[#allocation5 + $0x108] sm:$0xff] }
  0x89   :  { %1746 = vmatpush1.msra.mxu1 %v5747_v3  ;;  %9432 = vst [vmem:[#allocation34_spill] sm:$0xff] %v5763_v1  ;;  %1678 = vmatprep.subr.mxu0 %v5763_v1  ;;  %v5769_v3 = vld [vmem:[#allocation5 + $0x100] sm:$0xff]  ;;  %v5783_v1 = vld [vmem:[#allocation5 + $0xf0] sm:$0xff]  ;;  %v6015_v58 = vshrl.u32 %v123_v62, 7 }
  0x8a   :  { %1747 = vmatprep.subr.mxu1 %v5753_v5  ;;  %9434 = vst [vmem:[#allocation36_spill] sm:$0xff] %v5769_v3  ;;  %1679 = vmatpush1.msra.mxu0 %v5769_v3  ;;  %v5775_v5 = vld [vmem:[#allocation5 + $0xe8] sm:$0xff]  ;;  %9439 = vst [vmem:[#allocation41_spill] sm:$0xff] %v5783_v1  ;;  %v5789_v3 = vld [vmem:[#allocation5 + $0xd8] sm:$0xff] }
  0x8b   :  { %1748 = vmatpush1.msra.mxu1 %v5759_v63  ;;  %9436 = vst [vmem:[#allocation38_spill] sm:$0xff] %v5775_v5  ;;  %1680 = vmatprep.subr.mxu0 %v5775_v5  ;;  %v5781_v63 = vld [vmem:[#allocation5 + $0xe0] sm:$0xff]  ;;  %9441 = vst [vmem:[#allocation43_spill] sm:$0xff] %v5789_v3  ;;  %v5795_v5 = vld [vmem:[#allocation5 + $0xd0] sm:$0xff] }
  0x8c   :  { %1749 = vmatprep.subr.mxu1 %v5765_v2  ;;  %9438 = vst [vmem:[#allocation40_spill] sm:$0xff] %v5781_v63  ;;  %1681 = vmatpush1.msra.mxu0 %v5781_v63  ;;  %v5787_v2 = vld [vmem:[#allocation5 + $0xc8] sm:$0xff]  ;;  %9443 = vst [vmem:[#allocation45_spill] sm:$0xff] %v5795_v5  ;;  %v5801_v63 = vld [vmem:[#allocation5 + $0xb8] sm:$0xff] }
  0x8d   :  { %1750 = vmatpush1.msra.mxu1 %v5771_v4  ;;  %9440 = vst [vmem:[#allocation42_spill] sm:$0xff] %v5787_v2  ;;  %1682 = vmatprep.subr.mxu0 %v5787_v2  ;;  %v5793_v4 = vld [vmem:[#allocation5 + $0xc0] sm:$0xff]  ;;  %9445 = vst [vmem:[#allocation47_spill] sm:$0xff] %v5801_v63  ;;  %v5807_v2 = vld [vmem:[#allocation5 + $0xb0] sm:$0xff] }
  0x8e   :  { %1751 = vmatprep.subr.mxu1 %v5777_v0  ;;  %9442 = vst [vmem:[#allocation44_spill] sm:$0xff] %v5793_v4  ;;  %1683 = vmatpush1.msra.mxu0 %v5793_v4  ;;  %v5799_v0 = vld [vmem:[#allocation5 + $0xa8] sm:$0xff]  ;;  %9447 = vst [vmem:[#allocation49_spill] sm:$0xff] %v5807_v2  ;;  %v5813_v4 = vld [vmem:[#allocation5 + $0x98] sm:$0xff] }
  0x8f   :  { %1752 = vmatpush1.msra.mxu1 %v5783_v1  ;;  %9444 = vst [vmem:[#allocation46_spill] sm:$0xff] %v5799_v0  ;;  %1684 = vmatprep.subr.mxu0 %v5799_v0  ;;  %v5805_v1 = vld [vmem:[#allocation5 + $0xa0] sm:$0xff]  ;;  %9449 = vst [vmem:[#allocation51_spill] sm:$0xff] %v5813_v4  ;;  %v5819_v0 = vld [vmem:[#allocation5 + $0x90] sm:$0xff] }
  0x90   :  { %1753 = vmatprep.subr.mxu1 %v5789_v3  ;;  %9446 = vst [vmem:[#allocation48_spill] sm:$0xff] %v5805_v1  ;;  %1685 = vmatpush1.msra.mxu0 %v5805_v1  ;;  %v5811_v3 = vld [vmem:[#allocation5 + $0x88] sm:$0xff]  ;;  %9451 = vst [vmem:[#allocation53_spill] sm:$0xff] %v5819_v0  ;;  %v5825_v1 = vld [vmem:[#allocation5 + $0x78] sm:$0xff] }
  0x91   :  { %1754 = vmatpush1.msra.mxu1 %v5795_v5  ;;  %9448 = vst [vmem:[#allocation50_spill] sm:$0xff] %v5811_v3  ;;  %1686 = vmatprep.subr.mxu0 %v5811_v3  ;;  %v5817_v5 = vld [vmem:[#allocation5 + $0x80] sm:$0xff]  ;;  %9453 = vst [vmem:[#allocation55_spill] sm:$0xff] %v5825_v1  ;;  %v5831_v3 = vld [vmem:[#allocation5 + $0x70] sm:$0xff] }
  0x92   :  { %1755 = vmatprep.subr.mxu1 %v5801_v63  ;;  %9450 = vst [vmem:[#allocation52_spill] sm:$0xff] %v5817_v5  ;;  %1687 = vmatpush1.msra.mxu0 %v5817_v5  ;;  %v5823_v63 = vld [vmem:[#allocation5 + $0x68] sm:$0xff]  ;;  %9455 = vst [vmem:[#allocation57_spill] sm:$0xff] %v5831_v3  ;;  %v5837_v5 = vld [vmem:[#allocation5 + $0x58] sm:$0xff] }
  0x93   :  { %1756 = vmatpush1.msra.mxu1 %v5807_v2  ;;  %9452 = vst [vmem:[#allocation54_spill] sm:$0xff] %v5823_v63  ;;  %1688 = vmatprep.subr.mxu0 %v5823_v63  ;;  %v5829_v2 = vld [vmem:[#allocation5 + $0x60] sm:$0xff]  ;;  %9457 = vst [vmem:[#allocation59_spill] sm:$0xff] %v5837_v5  ;;  %v5843_v63 = vld [vmem:[#allocation5 + $0x50] sm:$0xff] }
  0x94   :  { %1757 = vmatprep.subr.mxu1 %v5813_v4  ;;  %9454 = vst [vmem:[#allocation56_spill] sm:$0xff] %v5829_v2  ;;  %1689 = vmatpush1.msra.mxu0 %v5829_v2  ;;  %v5835_v4 = vld [vmem:[#allocation5 + $0x48] sm:$0xff]  ;;  %9459 = vst [vmem:[#allocation61_spill] sm:$0xff] %v5843_v63  ;;  %v5849_v2 = vld [vmem:[#allocation5 + $0x38] sm:$0xff] }
  0x95   :  { %1758 = vmatpush1.msra.mxu1 %v5819_v0  ;;  %9456 = vst [vmem:[#allocation58_spill] sm:$0xff] %v5835_v4  ;;  %1690 = vmatprep.subr.mxu0 %v5835_v4  ;;  %v5841_v0 = vld [vmem:[#allocation5 + $0x40] sm:$0xff]  ;;  %9461 = vst [vmem:[#allocation63_spill] sm:$0xff] %v5849_v2  ;;  %v5855_v4 = vld [vmem:[#allocation5 + $0x30] sm:$0xff] }
  0x96   :  { %1759 = vmatprep.subr.mxu1 %v5825_v1  ;;  %9458 = vst [vmem:[#allocation60_spill] sm:$0xff] %v5841_v0  ;;  %1691 = vmatpush1.msra.mxu0 %v5841_v0  ;;  %v5847_v1 = vld [vmem:[#allocation5 + $0x28] sm:$0xff]  ;;  %9463 = vst [vmem:[#allocation65_spill] sm:$0xff] %v5855_v4  ;;  %v5861_v0 = vld [vmem:[#allocation5 + $0x18] sm:$0xff] }
  0x97   :  { %1760 = vmatpush1.msra.mxu1 %v5831_v3  ;;  %9460 = vst [vmem:[#allocation62_spill] sm:$0xff] %v5847_v1  ;;  %1692 = vmatprep.subr.mxu0 %v5847_v1  ;;  %v5853_v3 = vld [vmem:[#allocation5 + $0x20] sm:$0xff]  ;;  %9465 = vst [vmem:[#allocation67_spill] sm:$0xff] %v5861_v0  ;;  %v5867_v1 = vld [vmem:[#allocation5 + $0x10] sm:$0xff] }
  0x98   :  { %1761 = vmatprep.subr.mxu1 %v5837_v5  ;;  %9462 = vst [vmem:[#allocation64_spill] sm:$0xff] %v5853_v3  ;;  %1693 = vmatpush1.msra.mxu0 %v5853_v3  ;;  %v5859_v5 = vld [vmem:[#allocation5 + $0x8] sm:$0xff]  ;;  %9467 = vst [vmem:[#allocation69_spill] sm:$0xff] %v5867_v1  ;;  %v5873_v3 = vld [vmem:[#allocation5 + $0x3f8] sm:$0xff] }
  0x99   :  { %1762 = vmatpush1.msra.mxu1 %v5843_v63  ;;  %9464 = vst [vmem:[#allocation66_spill] sm:$0xff] %v5859_v5  ;;  %1694 = vmatprep.subr.mxu0 %v5859_v5  ;;  %v5865_v63 = vld [vmem:[#allocation5] sm:$0xff]  ;;  %9469 = vst [vmem:[#allocation71_spill] sm:$0xff] %v5873_v3  ;;  %v5879_v5 = vld [vmem:[#allocation5 + $0x3f0] sm:$0xff] }
  0x9a   :  { %1763 = vmatprep.subr.mxu1 %v5849_v2  ;;  %9466 = vst [vmem:[#allocation68_spill] sm:$0xff] %v5865_v63  ;;  %1695 = vmatpush1.msra.mxu0 %v5865_v63  ;;  %v5871_v2 = vld [vmem:[#allocation5 + $0x3e8] sm:$0xff]  ;;  %9471 = vst [vmem:[#allocation73_spill] sm:$0xff] %v5879_v5  ;;  %v5885_v63 = vld [vmem:[#allocation5 + $0x3d8] sm:$0xff] }
  0x9b   :  { %1764 = vmatpush1.msra.mxu1 %v5855_v4  ;;  %9468 = vst [vmem:[#allocation70_spill] sm:$0xff] %v5871_v2  ;;  %1696 = vmatprep.subr.mxu0 %v5871_v2  ;;  %v5877_v4 = vld [vmem:[#allocation5 + $0x3e0] sm:$0xff]  ;;  %9473 = vst [vmem:[#allocation75_spill] sm:$0xff] %v5885_v63  ;;  %v5891_v2 = vld [vmem:[#allocation5 + $0x3d0] sm:$0xff] }
  0x9c   :  { %1765 = vmatprep.subr.mxu1 %v5861_v0  ;;  %9470 = vst [vmem:[#allocation72_spill] sm:$0xff] %v5877_v4  ;;  %1697 = vmatpush2.msra.mxu0 %v5877_v4  ;;  %v5883_v0 = vld [vmem:[#allocation5 + $0x3c8] sm:$0xff]  ;;  %9475 = vst [vmem:[#allocation77_spill] sm:$0xff] %v5891_v2  ;;  %v5897_v4 = vld [vmem:[#allocation5 + $0x3b8] sm:$0xff] }
  0x9d   :  { %1766 = vmatpush1.msra.mxu1 %v5867_v1  ;;  %9472 = vst [vmem:[#allocation74_spill] sm:$0xff] %v5883_v0  ;;  %1698 = vmatprep.subr.mxu0 %v5883_v0  ;;  %v5889_v1 = vld [vmem:[#allocation5 + $0x3c0] sm:$0xff]  ;;  %9477 = vst [vmem:[#allocation79_spill] sm:$0xff] %v5897_v4  ;;  %v5903_v0 = vld [vmem:[#allocation5 + $0x3b0] sm:$0xff] }
  0x9e   :  { %1767 = vmatprep.subr.mxu1 %v5873_v3  ;;  %9474 = vst [vmem:[#allocation76_spill] sm:$0xff] %v5889_v1  ;;  %1699 = vmatpush2.msra.mxu0 %v5889_v1  ;;  %v5895_v3 = vld [vmem:[#allocation5 + $0x3a8] sm:$0xff]  ;;  %9479 = vst [vmem:[#allocation81_spill] sm:$0xff] %v5903_v0  ;;  %v5909_v1 = vld [vmem:[#allocation5 + $0x398] sm:$0xff] }
  0x9f   :  { %1768 = vmatpush2.msra.mxu1 %v5879_v5  ;;  %9476 = vst [vmem:[#allocation78_spill] sm:$0xff] %v5895_v3  ;;  %1700 = vmatprep.subr.mxu0 %v5895_v3  ;;  %v5901_v5 = vld [vmem:[#allocation5 + $0x3a0] sm:$0xff]  ;;  %9481 = vst [vmem:[#allocation83_spill] sm:$0xff] %v5909_v1  ;;  %v5915_v3 = vld [vmem:[#allocation5 + $0x390] sm:$0xff] }
  0xa0   :  { %1769 = vmatprep.subr.mxu1 %v5885_v63  ;;  %9478 = vst [vmem:[#allocation80_spill] sm:$0xff] %v5901_v5  ;;  %1701 = vmatpush2.msra.mxu0 %v5901_v5  ;;  %v5907_v63 = vld [vmem:[#allocation5 + $0x388] sm:$0xff]  ;;  %9483 = vst [vmem:[#allocation85_spill] sm:$0xff] %v5915_v3  ;;  %v5921_v5 = vld [vmem:[#allocation5 + $0x378] sm:$0xff] }
  0xa1   :  { %1770 = vmatpush2.msra.mxu1 %v5891_v2  ;;  %9480 = vst [vmem:[#allocation82_spill] sm:$0xff] %v5907_v63  ;;  %1702 = vmatprep.subr.mxu0 %v5907_v63  ;;  %v5913_v2 = vld [vmem:[#allocation5 + $0x380] sm:$0xff]  ;;  %9485 = vst [vmem:[#allocation87_spill] sm:$0xff] %v5921_v5  ;;  %v5927_v63 = vld [vmem:[#allocation5 + $0x370] sm:$0xff] }
  0xa2   :  { %1771 = vmatprep.subr.mxu1 %v5897_v4  ;;  %9482 = vst [vmem:[#allocation84_spill] sm:$0xff] %v5913_v2  ;;  %1703 = vmatpush2.msra.mxu0 %v5913_v2  ;;  %v5919_v4 = vld [vmem:[#allocation5 + $0x368] sm:$0xff]  ;;  %9487 = vst [vmem:[#allocation89_spill] sm:$0xff] %v5927_v63  ;;  %v5933_v2 = vld [vmem:[#allocation5 + $0x358] sm:$0xff] }
  0xa3   :  { %1772 = vmatpush2.msra.mxu1 %v5903_v0  ;;  %9484 = vst [vmem:[#allocation86_spill] sm:$0xff] %v5919_v4  ;;  %1704 = vmatprep.subr.mxu0 %v5919_v4  ;;  %v5925_v0 = vld [vmem:[#allocation5 + $0x360] sm:$0xff]  ;;  %9489 = vst [vmem:[#allocation91_spill] sm:$0xff] %v5933_v2  ;;  %v5939_v4 = vld [vmem:[#allocation5 + $0x350] sm:$0xff] }
  0xa4   :  { %1773 = vmatprep.subr.mxu1 %v5909_v1  ;;  %9486 = vst [vmem:[#allocation88_spill] sm:$0xff] %v5925_v0  ;;  %1705 = vmatpush2.msra.mxu0 %v5925_v0  ;;  %v5931_v1 = vld [vmem:[#allocation5 + $0x348] sm:$0xff]  ;;  %9491 = vst [vmem:[#allocation93_spill] sm:$0xff] %v5939_v4  ;;  %v5945_v0 = vld [vmem:[#allocation5 + $0x338] sm:$0xff] }
  0xa5   :  { %1774 = vmatpush2.msra.mxu1 %v5915_v3  ;;  %9488 = vst [vmem:[#allocation90_spill] sm:$0xff] %v5931_v1  ;;  %1706 = vmatprep.subr.mxu0 %v5931_v1  ;;  %v5937_v3 = vld [vmem:[#allocation5 + $0x340] sm:$0xff]  ;;  %9493 = vst [vmem:[#allocation95_spill] sm:$0xff] %v5945_v0  ;;  %v5951_v1 = vld [vmem:[#allocation5 + $0x330] sm:$0xff] }
  0xa6   :  { %1775 = vmatprep.subr.mxu1 %v5921_v5  ;;  %9490 = vst [vmem:[#allocation92_spill] sm:$0xff] %v5937_v3  ;;  %1707 = vmatpush2.msra.mxu0 %v5937_v3  ;;  %v5943_v5 = vld [vmem:[#allocation5 + $0x328] sm:$0xff]  ;;  %9495 = vst [vmem:[#allocation97_spill] sm:$0xff] %v5951_v1  ;;  %v5957_v3 = vld [vmem:[#allocation5 + $0x318] sm:$0xff] }
  0xa7   :  { %1776 = vmatpush2.msra.mxu1 %v5927_v63  ;;  %9492 = vst [vmem:[#allocation94_spill] sm:$0xff] %v5943_v5  ;;  %1708 = vmatprep.subr.mxu0 %v5943_v5  ;;  %v5949_v63 = vld [vmem:[#allocation5 + $0x320] sm:$0xff]  ;;  %9497 = vst [vmem:[#allocation99_spill] sm:$0xff] %v5957_v3  ;;  %v5963_v5 = vld [vmem:[#allocation5 + $0x310] sm:$0xff] }
  0xa8   :  { %1777 = vmatprep.subr.mxu1 %v5933_v2  ;;  %9494 = vst [vmem:[#allocation96_spill] sm:$0xff] %v5949_v63  ;;  %1709 = vmatpush2.msra.mxu0 %v5949_v63  ;;  %v5955_v2 = vld [vmem:[#allocation5 + $0x308] sm:$0xff]  ;;  %9499 = vst [vmem:[#allocation101_spill] sm:$0xff] %v5963_v5  ;;  %v5969_v63 = vld [vmem:[#allocation5 + $0x2f8] sm:$0xff] }
  0xa9   :  { %1778 = vmatpush2.msra.mxu1 %v5939_v4  ;;  %9496 = vst [vmem:[#allocation98_spill] sm:$0xff] %v5955_v2  ;;  %1710 = vmatprep.subr.mxu0 %v5955_v2  ;;  %v5961_v4 = vld [vmem:[#allocation5 + $0x300] sm:$0xff]  ;;  %9501 = vst [vmem:[#allocation103_spill] sm:$0xff] %v5969_v63  ;;  %v5975_v2 = vld [vmem:[#allocation5 + $0x2f0] sm:$0xff] }
  0xaa   :  { %1779 = vmatprep.subr.mxu1 %v5945_v0  ;;  %9498 = vst [vmem:[#allocation100_spill] sm:$0xff] %v5961_v4  ;;  %1711 = vmatpush2.msra.mxu0 %v5961_v4  ;;  %v5967_v0 = vld [vmem:[#allocation5 + $0x2e8] sm:$0xff]  ;;  %9503 = vst [vmem:[#allocation105_spill] sm:$0xff] %v5975_v2  ;;  %v5981_v4 = vld [vmem:[#allocation5 + $0x2d8] sm:$0xff] }
  0xab   :  { %1780 = vmatpush2.msra.mxu1 %v5951_v1  ;;  %9500 = vst [vmem:[#allocation102_spill] sm:$0xff] %v5967_v0  ;;  %1712 = vmatprep.subr.mxu0 %v5967_v0  ;;  %v5973_v1 = vld [vmem:[#allocation5 + $0x2e0] sm:$0xff]  ;;  %9505 = vst [vmem:[#allocation107_spill] sm:$0xff] %v5981_v4  ;;  %v5989_v0 = vld [vmem:[#allocation5 + $0x2a8] sm:$0xff] }
  0xac   :  { %1781 = vmatprep.subr.mxu1 %v5957_v3  ;;  %9502 = vst [vmem:[#allocation104_spill] sm:$0xff] %v5973_v1  ;;  %1713 = vmatpush2.msra.mxu0 %v5973_v1  ;;  %v5979_v3 = vld [vmem:[#allocation5 + $0x2c8] sm:$0xff]  ;;  %9508 = vst [vmem:[#allocation110_spill] sm:$0xff] %v5989_v0  ;;  %v5997_v1 = vld [vmem:[#allocation5 + $0x2b0] sm:$0xff] }
  0xad   :  { %1782 = vmatpush2.msra.mxu1 %v5963_v5  ;;  %9504 = vst [vmem:[#allocation106_spill] sm:$0xff] %v5979_v3  ;;  %v5983_v5 = vld [vmem:[#allocation5 + $0x2c0] sm:$0xff]  ;;  %1714 = vmatprep.subr.mxu0 %v5979_v3  ;;  %9511 = vst [vmem:[#allocation113_spill] sm:$0xff] %v5997_v1 }
  0xae   :  { %1783 = vmatprep.subr.mxu1 %v5969_v63  ;;  %9506 = vst [vmem:[#allocation108_spill] sm:$0xff] %v5983_v5  ;;  %v5987_v63 = vld [vmem:[#allocation5 + $0x2d0] sm:$0xff]  ;;  %1715 = vmatpush2.msra.mxu0 %v5983_v5  ;;  %v6005_v3 = vld [vmem:[#allocation5 + $0x280] sm:$0xff]  ;;  %v6013_v5 = vld [vmem:[#allocation5 + $0x278] sm:$0xff] }
  0xaf   :  { %1784 = vmatpush2.msra.mxu1 %v5975_v2  ;;  %9507 = vst [vmem:[#allocation109_spill] sm:$0xff] %v5987_v63  ;;  %v5995_v2 = vld [vmem:[#allocation5 + $0x2a0] sm:$0xff]  ;;  %1716 = vmatprep.subr.mxu0 %v5989_v0  ;;  %9514 = vst [vmem:[#allocation116_spill] sm:$0xff] %v6005_v3  ;;  %v6021_v0 = vld [vmem:[#allocation5 + $0x270] sm:$0xff] }
  0xb0   :  { %1785 = vmatprep.subr.mxu1 %v5981_v4  ;;  %9510 = vst [vmem:[#allocation112_spill] sm:$0xff] %v5995_v2  ;;  %v6003_v4 = vld [vmem:[#allocation5 + $0x298] sm:$0xff]  ;;  %1717 = vmatpush2.msra.mxu0 %v5995_v2  ;;  %9517 = vst [vmem:[#allocation119_spill] sm:$0xff] %v6013_v5  ;;  %v6025_v2 = vld [vmem:[#allocation5 + $0x248] sm:$0xff] }
  0xb1   :  { %1786 = vmatpush2.msra.mxu1 %v5987_v63  ;;  %9513 = vst [vmem:[#allocation115_spill] sm:$0xff] %v6003_v4  ;;  %v6011_v63 = vld [vmem:[#allocation5 + $0x268] sm:$0xff]  ;;  %9518 = vst [vmem:[#allocation120_spill] sm:$0xff] %v6015_v58  ;;  %1718 = vmatprep.subr.mxu0 %v5999_v60  ;;  %v6031_v62 = vld [vmem:[#allocation5 + $0x240] sm:$0xff] }
  0xb2   :  { %1787 = vmatprep.subr.mxu1 %v5991_v61  ;;  %9516 = vst [vmem:[#allocation118_spill] sm:$0xff] %v6011_v63  ;;  %v6019_v61 = vld [vmem:[#allocation5 + $0x260] sm:$0xff]  ;;  %9520 = vst [vmem:[#allocation122_spill] sm:$0xff] %v6021_v0  ;;  %1719 = vmatpush2.msra.mxu0 %v6005_v3  ;;  %v6033_v60 = vld [vmem:[#allocation5 + $0x250] sm:$0xff] }
  0xb3   :  { %1788 = vmatpush2.msra.mxu1 %v5997_v1  ;;  %9519 = vst [vmem:[#allocation121_spill] sm:$0xff] %v6019_v61  ;;  %9521 = vst [vmem:[#allocation123_spill] sm:$0xff] %v6025_v2  ;;  %v6027_v1 = vld [vmem:[#allocation5 + $0x258] sm:$0xff]  ;;  %1720 = vmatprep.subr.mxu0 %v6011_v63  ;;  %v6044_v63 = vld [vmem:[#allocation5 + $0x220] sm:$0xff] }
  0xb4   :  { %1789 = vmatprep.subr.mxu1 %v6003_v4  ;;  %9522 = vst [vmem:[#allocation124_spill] sm:$0xff] %v6027_v1  ;;  %9523 = vst [vmem:[#allocation125_spill] sm:$0xff] %v6031_v62  ;;  %1721 = vmatpush2.msra.mxu0 %v6019_v61  ;;  %v6037_v4 = vld [vmem:[#allocation5 + $0x228] sm:$0xff]  ;;  %v6039_v3 = vld [vmem:[#allocation5 + $0x238] sm:$0xff] }
  0xb5   :  { %1790 = vmatpush2.msra.mxu1 %v6007_v59  ;;  %9524 = vst [vmem:[#allocation126_spill] sm:$0xff] %v6033_v60  ;;  %9525 = vst [vmem:[#allocation127_spill] sm:$0xff] %v6037_v4  ;;  %1722 = vmatprep.subr.mxu0 %v6025_v2  ;;  %v6052_v61 = vld [vmem:[#allocation5 + $0x218] sm:$0xff]  ;;  %v6057_v59 = vld [vmem:[#allocation5 + $0x200] sm:$0xff] }
  0xb6   :  { %1791 = vmatprep.subr.mxu1 %v6013_v5  ;;  %9526 = vst [vmem:[#allocation128_spill] sm:$0xff] %v6039_v3  ;;  %9527 = vst [vmem:[#allocation129_spill] sm:$0xff] %v6044_v63  ;;  %v6046_v5 = vld [vmem:[#allocation5 + $0x230] sm:$0xff]  ;;  %1723 = vmatpush2.msra.mxu0 %v6031_v62 }
  0xb7   :  { %1792 = vmatpush2.msra.mxu1 %v6021_v0  ;;  %9528 = vst [vmem:[#allocation130_spill] sm:$0xff] %v6046_v5  ;;  %v6050_v0 = vld [vmem:[#allocation5 + $0x208] sm:$0xff]  ;;  %9530 = vst [vmem:[#allocation132_spill] sm:$0xff] %v6052_v61  ;;  %1724 = vmatprep.subr.mxu0 %v6037_v4  ;;  %v9534_v4 = vsub.s32 1, %v6015_v58 }
  0xb8   :  { %1793 = vmatprep.subr.mxu1 %v6027_v1  ;;  %9529 = vst [vmem:[#allocation131_spill] sm:$0xff] %v6050_v0  ;;  %9531 = vst [vmem:[#allocation133_spill] sm:$0xff] %v6057_v59  ;;  %v6059_v1 = vld [vmem:[#allocation5 + $0x210] sm:$0xff]  ;;  %1725 = vmatpush2.msra.mxu0 %v6044_v63 }
  0xb9   :  { %1794 = vmatpush2.msra.mxu1 %v6033_v60  ;;  %9532 = vst [vmem:[#allocation134_spill] sm:$0xff] %v6059_v1  ;;  %v9533_v60 = vsub.s32 0, %v6015_v58  ;;  %1726 = vmatprep.subr.mxu0 %v6050_v0  ;;  %v6077_v63 = vrot.slane %v119_v57, %v9534_v4 }
  0xba   :  { %1795 = vmatprep.subr.mxu1 %v6039_v3  ;;  %1727 = vmatpush2.msra.mxu0 %v6057_v59 }
  0xbb   :  { %1796 = vmatpush2.msra.mxu1 %v6046_v5  ;;  %v6067_v62 = vrot.slane %v119_v57, %v9533_v60  ;;  %1830 = vmatprep.subr.mxu0 %v5491_v33  ;;  %v9021_v33 = vsub.s32 2, %v6015_v58 }
  0xbc   :  { %1797 = vmatprep.subr.mxu1 %v6052_v61 }
  0xbd   :  { %1798 = vmatpush2.msra.mxu1 %v6059_v1 }
  0xbe   :  { %1901 = vmatprep.subr.mxu1 %v5574_v12 }
  0xe2   :  { %v6061_v2 = vpop.f32.mrf.mxu1 }
  0xe4   :  { %v6071_v56 = vpop.f32.mrf.mxu1  ;;  %v817_v3 = vpop.f32.mrf.mxu0 }
  0xe5   :  { %v6080_v5 = vadd.f32 %v817_v3, %v6067_v62 }
  0xe6   :  { %v819_v60 = vpop.f32.mrf.mxu0 }
  0xe7   :  { %9535 = vst [vmem:[#allocation135_spill] sm:$0xff] %v6080_v5  ;;  %v6084_v61 = vpop.f32.mrf.mxu1  ;;  %v6087_v0 = vadd.f32 %v819_v60, %v6077_v63  ;;  %v9022_v60 = vsub.s32 3, %v6015_v58 }
  0xe9   :  { %9536 = vst [vmem:[#allocation136_spill] sm:$0xff] %v6087_v0  ;;  %v6089_v59 = vpop.f32.mrf.mxu1 }
  0xea   :  { %v967_v1 = vpop.f32.mrf.mxu0 }
  0xeb   :  { %v6092_v55 = vadd.f32 %v967_v1, %v6067_v62 }
  0xec   :  { %v969_v4 = vpop.f32.mrf.mxu0 }
  0xed   :  { %9537 = vst [vmem:[#allocation137_spill] sm:$0xff] %v6092_v55  ;;  %v367_v54 = vpop.f32.mrf.mxu1  ;;  %v6095_v3 = vadd.f32 %v969_v4, %v6077_v63  ;;  %v134_v55 = vrot.slane %v119_v57, %v9021_v33 }
  0xee   :  { %v6099_v12 = vadd.f32 %v367_v54, %v6067_v62  ;;  %v138_v54 = vrot.slane %v119_v57, %v9022_v60 }
  0xef   :  { %9538 = vst [vmem:[#allocation138_spill] sm:$0xff] %v6095_v3  ;;  %v369_v5 = vpop.f32.mrf.mxu1 }
  0xf0   :  { %9539 = vst [vmem:[#allocation139_spill] sm:$0xff] %v6099_v12  ;;  %v6103_v0 = vadd.f32 %v369_v5, %v6077_v63  ;;  %v1117_v53 = vpop.f32.mrf.mxu0 }
  0xf1   :  { %v6106_v1 = vadd.f32 %v1117_v53, %v6067_v62 }
  0xf2   :  { %9540 = vst [vmem:[#allocation140_spill] sm:$0xff] %v6103_v0  ;;  %v1119_v4 = vpop.f32.mrf.mxu0 }
  0xf3   :  { %9541 = vst [vmem:[#allocation141_spill] sm:$0xff] %v6106_v1  ;;  %v438_v3 = vpop.f32.mrf.mxu1  ;;  %v6111_v52 = vadd.f32 %v1119_v4, %v6077_v63 }
  0xf4   :  { %v6115_v12 = vadd.f32 %v438_v3, %v134_v55 }
  0xf5   :  { %9542 = vst [vmem:[#allocation142_spill] sm:$0xff] %v6111_v52  ;;  %v440_v51 = vpop.f32.mrf.mxu1 }
  0xf6   :  { %9543 = vst [vmem:[#allocation143_spill] sm:$0xff] %v6115_v12  ;;  %v6117_v5 = vadd.f32 %v440_v51, %v138_v54  ;;  %v1267_v0 = vpop.f32.mrf.mxu0 }
  0xf7   :  { %v6120_v53 = vadd.f32 %v1267_v0, %v6067_v62 }
  0xf8   :  { %9544 = vst [vmem:[#allocation144_spill] sm:$0xff] %v6117_v5  ;;  %v1269_v1 = vpop.f32.mrf.mxu0 }
  0xf9   :  { %9545 = vst [vmem:[#allocation145_spill] sm:$0xff] %v6120_v53  ;;  %v517_v50 = vpop.f32.mrf.mxu1  ;;  %v6123_v33 = vadd.f32 %v1269_v1, %v6077_v63 }
  0xfa   :  { %v6126_v4 = vadd.f32 %v517_v50, %v6067_v62 }
  0xfb   :  { %9546 = vst [vmem:[#allocation146_spill] sm:$0xff] %v6123_v33  ;;  %v519_v52 = vpop.f32.mrf.mxu1 }
  0xfc   :  { %9547 = vst [vmem:[#allocation147_spill] sm:$0xff] %v6126_v4  ;;  %v6129_v57 = vadd.f32 %v519_v52, %v6077_v63 }
  0xfe   :  { %9548 = vst [vmem:[#allocation148_spill] sm:$0xff] %v6129_v57  ;;  %v588_v3 = vpop.f32.mrf.mxu1 }
  0xff   :  { %v6131_v60 = vadd.f32 %v588_v3, %v134_v55 }
 0x100   :  { %v590_v51 = vpop.f32.mrf.mxu1 }
 0x101   :  { %9549 = vst [vmem:[#allocation149_spill] sm:$0xff] %v6131_v60  ;;  %v6133_v5 = vadd.f32 %v590_v51, %v138_v54 }
 0x103   :  { %9550 = vst [vmem:[#allocation150_spill] sm:$0xff] %v6133_v5  ;;  %v667_v0 = vpop.f32.mrf.mxu1 }
 0x104   :  { %v6136_v53 = vadd.f32 %v667_v0, %v6067_v62 }
 0x105   :  { %v669_v12 = vpop.f32.mrf.mxu1 }
 0x106   :  { %9551 = vst [vmem:[#allocation151_spill] sm:$0xff] %v6136_v53  ;;  %v6139_v1 = vadd.f32 %v669_v12, %v6077_v63 }
 0x108   :  { %9552 = vst [vmem:[#allocation152_spill] sm:$0xff] %v6139_v1  ;;  %v738_v50 = vpop.f32.mrf.mxu1 }
 0x109   :  { %v6141_v33 = vadd.f32 %v738_v50, %v134_v55 }
 0x10a   :  { %v740_v4 = vpop.f32.mrf.mxu1 }
 0x10b   :  { %9553 = vst [vmem:[#allocation153_spill] sm:$0xff] %v6141_v33  ;;  %v6143_v52 = vadd.f32 %v740_v4, %v138_v54 }
 0x10d   :  { %9554 = vst [vmem:[#allocation154_spill] sm:$0xff] %v6143_v52  ;;  %v888_v57 = vpop.f32.mrf.mxu1 }
 0x10e   :  { %v6145_v3 = vadd.f32 %v888_v57, %v134_v55 }
 0x10f   :  { %v890_v60 = vpop.f32.mrf.mxu1 }
 0x110   :  { %9555 = vst [vmem:[#allocation155_spill] sm:$0xff] %v6145_v3  ;;  %v6147_v51 = vadd.f32 %v890_v60, %v138_v54  ;;  %v218_v60 = vadd.f32 %v6061_v2, %v6067_v62 }
 0x112   :  { %9556 = vst [vmem:[#allocation156_spill] sm:$0xff] %v6147_v51  ;;  %v1038_v5 = vpop.f32.mrf.mxu1  ;;  %v291_v51 = vadd.f32 %v6089_v59, %v138_v54 }
 0x113   :  { %v6149_v58 = vadd.f32 %v1038_v5, %v134_v55 }
 0x114   :  { %v1040_v0 = vpop.f32.mrf.mxu1 }
 0x115   :  { %9557 = vst [vmem:[#allocation157_spill] sm:$0xff] %v6149_v58  ;;  %v6151_v53 = vadd.f32 %v1040_v0, %v138_v54  ;;  %v220_v0 = vadd.f32 %v6071_v56, %v6077_v63 }
 0x117   :  { %9558 = vst [vmem:[#allocation158_spill] sm:$0xff] %v6151_v53  ;;  %v1188_v12 = vpop.f32.mrf.mxu1 }
 0x118   :  { %v6153_v1 = vadd.f32 %v1188_v12, %v134_v55 }
 0x119   :  { %v1190_v50 = vpop.f32.mrf.mxu1 }
 0x11a   :  { %9559 = vst [vmem:[#allocation159_spill] sm:$0xff] %v6153_v1  ;;  %v6155_v33 = vadd.f32 %v1190_v50, %v138_v54 }
 0x11c   :  { %9560 = vst [vmem:[#allocation160_spill] sm:$0xff] %v6155_v33 }
 0x11d   :  { %v1338_v4 = vpop.f32.mrf.mxu1  ;;  %v1539_v57 = vpop.f32.mrf.mxu0 }
 0x11e   :  { %v6157_v52 = vadd.f32 %v1338_v4, %v134_v55  ;;  %v1615_v53 = vadd.f32 %v1539_v57, %v218_v60 }
 0x11f   :  { %v1340_v3 = vpop.f32.mrf.mxu1  ;;  %v1541_v5 = vpop.f32.mrf.mxu0 }
 0x120   :  { %9561 = vst [vmem:[#allocation161_spill] sm:$0xff] %v6157_v52  ;;  %v6159_v49 = vadd.f32 %v1340_v3, %v138_v54  ;;  %v1616_v12 = vadd.f32 %v1541_v5, %v220_v0  ;;  %v4307_v1 = vmul.f32 -1.442695, %v1615_v53  ;;  %v289_v52 = vadd.f32 %v6084_v61, %v134_v55  ;;  %v6178_v54 = vld [vmem:[#allocation2 + $0x208] sm:$0xff]  ;;  %v6190_v5 = vld [vmem:[#allocation2 + $0x1e0] sm:$0xff] }
 0x121   :  { %v9581_v0 = vld [vmem:[#allocation28_spill] sm:$0xff] }
 0x122   :  { %9562 = vst [vmem:[#allocation162_spill] sm:$0xff] %v6159_v49  ;;  %v4308_v58 = vmul.f32 -1.442695, %v1616_v12  ;;  %4415 = vpow2.f32 %v4307_v1  ;;  %v9582_v12 = vld [vmem:[#allocation29_spill] sm:$0xff] }
 0x124   :  { %4417 = vpow2.f32 %v4308_v58 }
 0x12f   :  { %v4416_v50 = vpop.eup %4415 }
 0x130   :  { %v1628_v33 = vadd.f32 1.0, %v4416_v50  ;;  %v9583_v50 = vld [vmem:[#allocation30_spill] sm:$0xff] }
 0x131   :  { %v4418_v4 = vpop.eup %4417 }
 0x132   :  { %v1629_v3 = vadd.f32 1.0, %v4418_v4  ;;  %4419 = vrcp.f32 %v1628_v33  ;;  %v9584_v4 = vld [vmem:[#allocation31_spill] sm:$0xff] }
 0x134   :  { %4421 = vrcp.f32 %v1629_v3  ;;  %v9585_v3 = vld [vmem:[#allocation32_spill] sm:$0xff] }
 0x13e   :  { %v1610_v49 = vpop.f32.mrf.mxu1 }
 0x13f   :  { %v1617_v2 = vadd.f32 %v1610_v49, %v289_v52  ;;  %v4420_v63 = vpop.eup %4419  ;;  %v6182_v52 = vld [vmem:[#allocation2 + $0x200] sm:$0xff] }
 0x140   :  { %v1612_v62 = vpop.f32.mrf.mxu1 }
 0x141   :  { %v4309_v48 = vmul.f32 -1.442695, %v1617_v2  ;;  %v1618_v56 = vadd.f32 %v1612_v62, %v291_v51  ;;  %v4422_v53 = vpop.eup %4421  ;;  %v6186_v51 = vld [vmem:[#allocation2 + $0x1e8] sm:$0xff]  ;;  %v9586_v2 = vld [vmem:[#allocation33_spill] sm:$0xff]  ;;  %v9587_v62 = vld [vmem:[#allocation34_spill] sm:$0xff] }
 0x142   :  { %v1638_v60 = vmul.f32 0.0, %v4422_v53  ;;  %v9590_v53 = vld [vmem:[#allocation37_spill] sm:$0xff] }
 0x143   :  { %4423 = vpow2.f32 %v4309_v48  ;;  %v6174_v48 = vld [vmem:[#allocation2 + $0x220] sm:$0xff] }
 0x144   :  { %4425 = vtanh.f32 %v1618_v56  ;;  %v9588_v56 = vld [vmem:[#allocation35_spill] sm:$0xff] }
 0x150   :  { %v4424_v58 = vpop.eup %4423 }
 0x151   :  { %v4426_v1 = vpop.eup %4425  ;;  %v1630_v57 = vadd.f32 1.0, %v4424_v58  ;;  %v9591_v58 = vld [vmem:[#allocation38_spill] sm:$0xff] }
 0x152   :  { %v1639_v55 = vmul.f32 %v4426_v1, %v4420_v63  ;;  %v9589_v63 = vld [vmem:[#allocation36_spill] sm:$0xff]  ;;  %v9592_v1 = vld [vmem:[#allocation39_spill] sm:$0xff] }
 0x153   :  { %4427 = vrcp.f32 %v1630_v57  ;;  %v9593_v57 = vld [vmem:[#allocation40_spill] sm:$0xff] }
 0x154   :  { %v6167_v61 = vadd.f32 %v1639_v55, %v1638_v60  ;;  %v9594_v60 = vld [vmem:[#allocation41_spill] sm:$0xff]  ;;  %v9595_v55 = vld [vmem:[#allocation42_spill] sm:$0xff] }
 0x156   :  { %4429 = vtanh.f32 %v6167_v61 }
 0x160   :  { %v4428_v49 = vpop.eup %4427 }
 0x163   :  { %v4430_v59 = vpop.eup %4429 }
 0x164   :  { %v6170_v33 = vmul.f32 %v4430_v59, %v4428_v49  ;;  %v9596_v49 = vld [vmem:[#allocation43_spill] sm:$0xff]  ;;  %v9597_v59 = vld [vmem:[#allocation44_spill] sm:$0xff] }
 0x166   :  { %1729 = vmatmul.mubr.f32.vlgmr.msra.gmra.mxu0 %v6170_v33  ;;  %1800 = vmatmul.mubr.f32.vlgmr.msra.gmra.mxu1 %v6170_v33 }
 0x167   :  { %1831 = vmatpush1.msra.mxu0 %v6174_v48  ;;  %1902 = vmatpush1.msra.mxu1 %v5578_v8  ;;  %v6194_v8 = vld [vmem:[#allocation2 + $0x1c8] sm:$0xff] }
 0x168   :  { %1832 = vmatprep.subr.mxu0 %v6178_v54  ;;  %1903 = vmatprep.subr.mxu1 %v5583_v9  ;;  %v6198_v9 = vld [vmem:[#allocation2 + $0x1c0] sm:$0xff] }
 0x169   :  { %1833 = vmatpush1.msra.mxu0 %v6182_v52  ;;  %1904 = vmatpush1.msra.mxu1 %v5586_v13  ;;  %v6202_v13 = vld [vmem:[#allocation2 + $0x1a8] sm:$0xff] }
 0x16a   :  { %1834 = vmatprep.subr.mxu0 %v6186_v51  ;;  %1905 = vmatprep.subr.mxu1 %v5590_v14  ;;  %v6206_v14 = vld [vmem:[#allocation2 + $0x1a0] sm:$0xff] }
 0x16b   :  { %1835 = vmatpush1.msra.mxu0 %v6190_v5  ;;  %1906 = vmatpush1.msra.mxu1 %v5594_v15  ;;  %v6210_v15 = vld [vmem:[#allocation2 + $0x188] sm:$0xff] }
 0x16c   :  { %1836 = vmatprep.subr.mxu0 %v6194_v8  ;;  %1907 = vmatprep.subr.mxu1 %v5597_v16  ;;  %v6214_v16 = vld [vmem:[#allocation2 + $0x180] sm:$0xff] }
 0x16d   :  { %1837 = vmatpush1.msra.mxu0 %v6198_v9  ;;  %1908 = vmatpush1.msra.mxu1 %v5600_v17  ;;  %v6218_v17 = vld [vmem:[#allocation2 + $0x168] sm:$0xff] }
 0x16e   :  { %1838 = vmatprep.subr.mxu0 %v6202_v13  ;;  %1909 = vmatprep.subr.mxu1 %v5603_v18  ;;  %v6222_v18 = vld [vmem:[#allocation2 + $0x160] sm:$0xff] }
 0x16f   :  { %1839 = vmatpush1.msra.mxu0 %v6206_v14  ;;  %1910 = vmatpush1.msra.mxu1 %v5606_v19  ;;  %v6226_v19 = vld [vmem:[#allocation2 + $0x148] sm:$0xff] }
 0x170   :  { %1840 = vmatprep.subr.mxu0 %v6210_v15  ;;  %1911 = vmatprep.subr.mxu1 %v5609_v20  ;;  %v6230_v20 = vld [vmem:[#allocation2 + $0x140] sm:$0xff] }
 0x171   :  { %1841 = vmatpush1.msra.mxu0 %v6214_v16  ;;  %1912 = vmatpush1.msra.mxu1 %v5612_v21  ;;  %v6234_v21 = vld [vmem:[#allocation2 + $0x128] sm:$0xff] }
 0x172   :  { %1842 = vmatprep.subr.mxu0 %v6218_v17  ;;  %1913 = vmatprep.subr.mxu1 %v5615_v22  ;;  %v6238_v22 = vld [vmem:[#allocation2 + $0x120] sm:$0xff] }
 0x173   :  { %1843 = vmatpush1.msra.mxu0 %v6222_v18  ;;  %1914 = vmatpush1.msra.mxu1 %v5618_v23  ;;  %v6242_v23 = vld [vmem:[#allocation2 + $0x108] sm:$0xff] }
 0x174   :  { %1844 = vmatprep.subr.mxu0 %v6226_v19  ;;  %1915 = vmatprep.subr.mxu1 %v5621_v24  ;;  %v6246_v24 = vld [vmem:[#allocation2 + $0x100] sm:$0xff] }
 0x175   :  { %1845 = vmatpush1.msra.mxu0 %v6230_v20  ;;  %1916 = vmatpush1.msra.mxu1 %v5624_v25  ;;  %v6250_v25 = vld [vmem:[#allocation2 + $0xe8] sm:$0xff] }
 0x176   :  { %1846 = vmatprep.subr.mxu0 %v6234_v21  ;;  %1917 = vmatprep.subr.mxu1 %v5627_v26  ;;  %v6254_v26 = vld [vmem:[#allocation2 + $0xe0] sm:$0xff] }
 0x177   :  { %1847 = vmatpush1.msra.mxu0 %v6238_v22  ;;  %1918 = vmatpush1.msra.mxu1 %v5630_v27  ;;  %v6258_v27 = vld [vmem:[#allocation2 + $0xc8] sm:$0xff] }
 0x178   :  { %1848 = vmatprep.subr.mxu0 %v6242_v23  ;;  %1919 = vmatprep.subr.mxu1 %v5633_v28  ;;  %v6262_v28 = vld [vmem:[#allocation2 + $0xc0] sm:$0xff] }
 0x179   :  { %1849 = vmatpush1.msra.mxu0 %v6246_v24  ;;  %1920 = vmatpush1.msra.mxu1 %v5636_v29  ;;  %v6266_v29 = vld [vmem:[#allocation2 + $0xa8] sm:$0xff] }
 0x17a   :  { %1850 = vmatprep.subr.mxu0 %v6250_v25  ;;  %1921 = vmatprep.subr.mxu1 %v5639_v30  ;;  %v6270_v30 = vld [vmem:[#allocation2 + $0xa0] sm:$0xff] }
 0x17b   :  { %1851 = vmatpush1.msra.mxu0 %v6254_v26  ;;  %1922 = vmatpush1.msra.mxu1 %v5642_v31  ;;  %v6274_v31 = vld [vmem:[#allocation2 + $0x88] sm:$0xff] }
 0x17c   :  { %1852 = vmatprep.subr.mxu0 %v6258_v27  ;;  %1923 = vmatprep.subr.mxu1 %v5645_v32  ;;  %v6278_v32 = vld [vmem:[#allocation2 + $0x80] sm:$0xff] }
 0x17d   :  { %1853 = vmatpush1.msra.mxu0 %v6262_v28  ;;  %1924 = vmatpush1.msra.mxu1 %v5648_v34  ;;  %v9563_v34 = vmov 0.0  }
 0x17e   :  { %1854 = vmatprep.subr.mxu0 %v6266_v29  ;;  %1925 = vmatprep.subr.mxu1 %v5651_v35  ;;  %v9568_v35 = vld [vmem:[#allocation15_spill] sm:$0xff] }
 0x17f   :  { %1855 = vmatpush1.msra.mxu0 %v6270_v30  ;;  %1926 = vmatpush1.msra.mxu1 %v5654_v36  ;;  %v9569_v36 = vld [vmem:[#allocation16_spill] sm:$0xff] }
 0x180   :  { %1856 = vmatprep.subr.mxu0 %v6274_v31  ;;  %1927 = vmatprep.subr.mxu1 %v5657_v37  ;;  %v9570_v37 = vld [vmem:[#allocation17_spill] sm:$0xff] }
 0x181   :  { %1857 = vmatpush1.msra.mxu0 %v6278_v32  ;;  %1928 = vmatpush1.msra.mxu1 %v5660_v38  ;;  %v9571_v38 = vld [vmem:[#allocation18_spill] sm:$0xff] }
 0x182   :  { %1858 = vmatprep.subr.mxu0 %v5554_v6  ;;  %1929 = vmatprep.subr.mxu1 %v5663_v39  ;;  %v9564_v6 = vld [vmem:[#allocation11_spill] sm:$0xff] }
 0x183   :  { %1859 = vmatpush1.msra.mxu0 %v5558_v7  ;;  %1930 = vmatpush1.msra.mxu1 %v5666_v40  ;;  %v9565_v7 = vld [vmem:[#allocation12_spill] sm:$0xff]  ;;  %v9572_v39 = vld [vmem:[#allocation19_spill] sm:$0xff] }
 0x184   :  { %1860 = vmatprep.subr.mxu0 %v5562_v10  ;;  %1931 = vmatprep.subr.mxu1 %v5669_v41  ;;  %v9566_v10 = vld [vmem:[#allocation13_spill] sm:$0xff]  ;;  %v9573_v40 = vld [vmem:[#allocation20_spill] sm:$0xff] }
 0x185   :  { %1861 = vmatpush1.msra.mxu0 %v5568_v11  ;;  %1894 = vmatprep.mubr.f32.mxu0 %v9563_v34  ;;  %v9567_v11 = vld [vmem:[#allocation14_spill] sm:$0xff]  ;;  %v9574_v41 = vld [vmem:[#allocation21_spill] sm:$0xff] }
 0x186   :  { %1932 = vmatpush1.msra.mxu1 %v5672_v42  ;;  %1965 = vmatprep.mubr.f32.mxu1 %v9563_v34  ;;  %v9575_v42 = vld [vmem:[#allocation22_spill] sm:$0xff] }
 0x187   :  { %1895 = vmatmul.mubr.f32.vlgmr.msra.gmra.mxu0 %v6170_v33  ;;  %1966 = vmatmul.mubr.f32.vlgmr.msra.gmra.mxu1 %v6170_v33  ;;  %v9598_v33 = vld [vmem:[#allocation45_spill] sm:$0xff] }
 0x188   :  { %2000 = vmatprep.subr.mxu0 %v5679_v43  ;;  %2071 = vmatprep.subr.mxu1 %v5681_v44  ;;  %v9576_v43 = vld [vmem:[#allocation23_spill] sm:$0xff]  ;;  %v9577_v44 = vld [vmem:[#allocation24_spill] sm:$0xff] }
 0x189   :  { %2001 = vmatpush1.msra.mxu0 %v5685_v45  ;;  %2072 = vmatpush1.msra.mxu1 %v5687_v46  ;;  %v9578_v45 = vld [vmem:[#allocation25_spill] sm:$0xff]  ;;  %v9579_v46 = vld [vmem:[#allocation26_spill] sm:$0xff] }
 0x18a   :  { %2002 = vmatprep.subr.mxu0 %v5691_v47  ;;  %2073 = vmatprep.subr.mxu1 %v9564_v6  ;;  %v9580_v47 = vld [vmem:[#allocation27_spill] sm:$0xff]  ;;  %v9599_v6 = vld [vmem:[#allocation46_spill] sm:$0xff] }
 0x18b   :  { %2003 = vmatpush1.msra.mxu0 %v9565_v7  ;;  %2074 = vmatpush1.msra.mxu1 %v9566_v10  ;;  %v9600_v7 = vld [vmem:[#allocation47_spill] sm:$0xff]  ;;  %v9601_v10 = vld [vmem:[#allocation48_spill] sm:$0xff] }
 0x18c   :  { %2004 = vmatprep.subr.mxu0 %v9567_v11  ;;  %2075 = vmatprep.subr.mxu1 %v9568_v35  ;;  %v9602_v11 = vld [vmem:[#allocation49_spill] sm:$0xff]  ;;  %v9603_v35 = vld [vmem:[#allocation50_spill] sm:$0xff] }
 0x18d   :  { %2005 = vmatpush1.msra.mxu0 %v9569_v36  ;;  %2076 = vmatpush1.msra.mxu1 %v9570_v37  ;;  %v9604_v36 = vld [vmem:[#allocation51_spill] sm:$0xff]  ;;  %v9605_v37 = vld [vmem:[#allocation52_spill] sm:$0xff] }
 0x18e   :  { %2006 = vmatprep.subr.mxu0 %v9571_v38  ;;  %2077 = vmatprep.subr.mxu1 %v9572_v39  ;;  %v9606_v38 = vld [vmem:[#allocation53_spill] sm:$0xff]  ;;  %v9607_v39 = vld [vmem:[#allocation54_spill] sm:$0xff] }
 0x18f   :  { %2007 = vmatpush1.msra.mxu0 %v9573_v40  ;;  %2078 = vmatpush1.msra.mxu1 %v9574_v41  ;;  %v9608_v40 = vld [vmem:[#allocation55_spill] sm:$0xff]  ;;  %v9609_v41 = vld [vmem:[#allocation56_spill] sm:$0xff] }
 0x190   :  { %2008 = vmatprep.subr.mxu0 %v9575_v42  ;;  %2079 = vmatprep.subr.mxu1 %v9576_v43  ;;  %v9610_v42 = vld [vmem:[#allocation57_spill] sm:$0xff]  ;;  %v9611_v43 = vld [vmem:[#allocation58_spill] sm:$0xff] }
 0x191   :  { %2009 = vmatpush1.msra.mxu0 %v9577_v44  ;;  %2080 = vmatpush1.msra.mxu1 %v9578_v45  ;;  %v9612_v44 = vld [vmem:[#allocation59_spill] sm:$0xff]  ;;  %v9613_v45 = vld [vmem:[#allocation60_spill] sm:$0xff] }
 0x192   :  { %2010 = vmatprep.subr.mxu0 %v9579_v46  ;;  %2081 = vmatprep.subr.mxu1 %v9580_v47  ;;  %v9614_v46 = vld [vmem:[#allocation61_spill] sm:$0xff]  ;;  %v9615_v47 = vld [vmem:[#allocation62_spill] sm:$0xff] }
 0x193   :  { %2011 = vmatpush1.msra.mxu0 %v9581_v0  ;;  %2082 = vmatpush1.msra.mxu1 %v9582_v12  ;;  %v9616_v0 = vld [vmem:[#allocation63_spill] sm:$0xff]  ;;  %v9617_v12 = vld [vmem:[#allocation64_spill] sm:$0xff] }
 0x194   :  { %2012 = vmatprep.subr.mxu0 %v9583_v50  ;;  %2083 = vmatprep.subr.mxu1 %v9584_v4  ;;  %v9618_v50 = vld [vmem:[#allocation65_spill] sm:$0xff]  ;;  %v9619_v4 = vld [vmem:[#allocation66_spill] sm:$0xff] }
 0x195   :  { %2013 = vmatpush1.msra.mxu0 %v9585_v3  ;;  %2084 = vmatpush1.msra.mxu1 %v9586_v2  ;;  %v9620_v3 = vld [vmem:[#allocation67_spill] sm:$0xff]  ;;  %v9621_v2 = vld [vmem:[#allocation68_spill] sm:$0xff] }
 0x196   :  { %2014 = vmatprep.subr.mxu0 %v9587_v62  ;;  %2085 = vmatprep.subr.mxu1 %v9588_v56  ;;  %v9622_v62 = vld [vmem:[#allocation69_spill] sm:$0xff]  ;;  %v9623_v56 = vld [vmem:[#allocation70_spill] sm:$0xff] }
 0x197   :  { %2015 = vmatpush1.msra.mxu0 %v9589_v63  ;;  %2086 = vmatpush1.msra.mxu1 %v9590_v53  ;;  %v9624_v63 = vld [vmem:[#allocation71_spill] sm:$0xff]  ;;  %v9625_v53 = vld [vmem:[#allocation72_spill] sm:$0xff] }
 0x198   :  { %2016 = vmatprep.subr.mxu0 %v9591_v58  ;;  %2087 = vmatprep.subr.mxu1 %v9592_v1  ;;  %v9626_v58 = vld [vmem:[#allocation73_spill] sm:$0xff]  ;;  %v9627_v1 = vld [vmem:[#allocation74_spill] sm:$0xff] }
 0x199   :  { %2017 = vmatpush1.msra.mxu0 %v9593_v57  ;;  %2088 = vmatpush1.msra.mxu1 %v9594_v60  ;;  %v9628_v57 = vld [vmem:[#allocation75_spill] sm:$0xff]  ;;  %v9629_v60 = vld [vmem:[#allocation76_spill] sm:$0xff] }
 0x19a   :  { %2018 = vmatprep.subr.mxu0 %v9595_v55  ;;  %2089 = vmatprep.subr.mxu1 %v9596_v49  ;;  %v9630_v55 = vld [vmem:[#allocation77_spill] sm:$0xff]  ;;  %v9631_v49 = vld [vmem:[#allocation78_spill] sm:$0xff] }
 0x19b   :  { %2019 = vmatpush1.msra.mxu0 %v9597_v59  ;;  %2090 = vmatpush1.msra.mxu1 %v9598_v33  ;;  %v9632_v59 = vld [vmem:[#allocation79_spill] sm:$0xff]  ;;  %v9633_v33 = vld [vmem:[#allocation80_spill] sm:$0xff] }
 0x19c   :  { %2020 = vmatprep.subr.mxu0 %v9599_v6  ;;  %2091 = vmatprep.subr.mxu1 %v9600_v7  ;;  %v9634_v6 = vld [vmem:[#allocation81_spill] sm:$0xff]  ;;  %v9635_v7 = vld [vmem:[#allocation82_spill] sm:$0xff] }
 0x19d   :  { %2021 = vmatpush1.msra.mxu0 %v9601_v10  ;;  %2092 = vmatpush1.msra.mxu1 %v9602_v11  ;;  %v9636_v10 = vld [vmem:[#allocation83_spill] sm:$0xff]  ;;  %v9637_v11 = vld [vmem:[#allocation84_spill] sm:$0xff] }
 0x19e   :  { %2022 = vmatprep.subr.mxu0 %v9603_v35  ;;  %2093 = vmatprep.subr.mxu1 %v9604_v36  ;;  %v9638_v35 = vld [vmem:[#allocation85_spill] sm:$0xff]  ;;  %v9639_v36 = vld [vmem:[#allocation86_spill] sm:$0xff] }
 0x19f   :  { %2023 = vmatpush1.msra.mxu0 %v9605_v37  ;;  %2094 = vmatpush1.msra.mxu1 %v9606_v38  ;;  %v9640_v37 = vld [vmem:[#allocation87_spill] sm:$0xff]  ;;  %v9641_v38 = vld [vmem:[#allocation88_spill] sm:$0xff] }
 0x1a0   :  { %2024 = vmatprep.subr.mxu0 %v9607_v39  ;;  %2095 = vmatprep.subr.mxu1 %v9608_v40  ;;  %v9642_v39 = vld [vmem:[#allocation89_spill] sm:$0xff]  ;;  %v9643_v40 = vld [vmem:[#allocation90_spill] sm:$0xff] }
 0x1a1   :  { %2025 = vmatpush1.msra.mxu0 %v9609_v41  ;;  %2096 = vmatpush1.msra.mxu1 %v9610_v42  ;;  %v9644_v41 = vld [vmem:[#allocation91_spill] sm:$0xff]  ;;  %v9645_v42 = vld [vmem:[#allocation92_spill] sm:$0xff] }
 0x1a2   :  { %2026 = vmatprep.subr.mxu0 %v9611_v43  ;;  %2097 = vmatprep.subr.mxu1 %v9612_v44  ;;  %v9646_v43 = vld [vmem:[#allocation93_spill] sm:$0xff]  ;;  %v9647_v44 = vld [vmem:[#allocation94_spill] sm:$0xff] }
 0x1a3   :  { %2027 = vmatpush1.msra.mxu0 %v9613_v45  ;;  %2098 = vmatpush1.msra.mxu1 %v9614_v46  ;;  %v9648_v45 = vld [vmem:[#allocation95_spill] sm:$0xff]  ;;  %v9649_v46 = vld [vmem:[#allocation96_spill] sm:$0xff] }
 0x1a4   :  { %2028 = vmatprep.subr.mxu0 %v9615_v47  ;;  %2099 = vmatprep.subr.mxu1 %v9616_v0  ;;  %v9650_v47 = vld [vmem:[#allocation97_spill] sm:$0xff]  ;;  %v9651_v0 = vld [vmem:[#allocation98_spill] sm:$0xff] }
 0x1a5   :  { %2029 = vmatpush1.msra.mxu0 %v9617_v12  ;;  %2100 = vmatpush1.msra.mxu1 %v9618_v50  ;;  %v9652_v12 = vld [vmem:[#allocation99_spill] sm:$0xff]  ;;  %v9653_v50 = vld [vmem:[#allocation100_spill] sm:$0xff] }
 0x1a6   :  { %2030 = vmatprep.subr.mxu0 %v9619_v4  ;;  %2101 = vmatprep.subr.mxu1 %v9620_v3  ;;  %v9654_v4 = vld [vmem:[#allocation101_spill] sm:$0xff]  ;;  %v9655_v3 = vld [vmem:[#allocation102_spill] sm:$0xff] }
 0x1a7   :  { %2031 = vmatpush1.msra.mxu0 %v9621_v2  ;;  %2102 = vmatpush1.msra.mxu1 %v9622_v62  ;;  %v9656_v2 = vld [vmem:[#allocation103_spill] sm:$0xff]  ;;  %v9657_v62 = vld [vmem:[#allocation104_spill] sm:$0xff] }
 0x1a8   :  { %2032 = vmatprep.subr.mxu0 %v9623_v56  ;;  %2103 = vmatprep.subr.mxu1 %v9624_v63  ;;  %v9658_v56 = vld [vmem:[#allocation105_spill] sm:$0xff]  ;;  %v9659_v63 = vld [vmem:[#allocation106_spill] sm:$0xff] }
 0x1a9   :  { %2033 = vmatpush2.msra.mxu0 %v9625_v53  ;;  %2104 = vmatpush2.msra.mxu1 %v9626_v58  ;;  %v9660_v53 = vld [vmem:[#allocation107_spill] sm:$0xff]  ;;  %v9661_v58 = vld [vmem:[#allocation108_spill] sm:$0xff] }
 0x1aa   :  { %2034 = vmatprep.subr.mxu0 %v9627_v1  ;;  %2105 = vmatprep.subr.mxu1 %v9628_v57  ;;  %v9662_v1 = vld [vmem:[#allocation109_spill] sm:$0xff]  ;;  %v9663_v57 = vld [vmem:[#allocation110_spill] sm:$0xff] }
 0x1ab   :  { %2035 = vmatpush2.msra.mxu0 %v9629_v60  ;;  %2106 = vmatpush2.msra.mxu1 %v9630_v55  ;;  %v9664_v60 = vld [vmem:[#allocation111_spill] sm:$0xff]  ;;  %v9665_v55 = vld [vmem:[#allocation112_spill] sm:$0xff] }
 0x1ac   :  { %2036 = vmatprep.subr.mxu0 %v9631_v49  ;;  %2107 = vmatprep.subr.mxu1 %v9632_v59  ;;  %v9666_v49 = vld [vmem:[#allocation113_spill] sm:$0xff]  ;;  %v9667_v59 = vld [vmem:[#allocation114_spill] sm:$0xff] }
 0x1ad   :  { %2037 = vmatpush2.msra.mxu0 %v9633_v33  ;;  %2108 = vmatpush2.msra.mxu1 %v9634_v6  ;;  %v9668_v33 = vld [vmem:[#allocation115_spill] sm:$0xff]  ;;  %v9669_v6 = vld [vmem:[#allocation116_spill] sm:$0xff] }
 0x1ae   :  { %2038 = vmatprep.subr.mxu0 %v9635_v7  ;;  %2109 = vmatprep.subr.mxu1 %v9636_v10  ;;  %v9670_v7 = vld [vmem:[#allocation117_spill] sm:$0xff]  ;;  %v9671_v10 = vld [vmem:[#allocation118_spill] sm:$0xff] }
 0x1af   :  { %2039 = vmatpush2.msra.mxu0 %v9637_v11  ;;  %2110 = vmatpush2.msra.mxu1 %v9638_v35  ;;  %v9672_v11 = vld [vmem:[#allocation119_spill] sm:$0xff]  ;;  %v9673_v35 = vld [vmem:[#allocation121_spill] sm:$0xff] }
 0x1b0   :  { %2040 = vmatprep.subr.mxu0 %v9639_v36  ;;  %2111 = vmatprep.subr.mxu1 %v9640_v37  ;;  %v9674_v36 = vld [vmem:[#allocation122_spill] sm:$0xff]  ;;  %v9675_v37 = vld [vmem:[#allocation123_spill] sm:$0xff] }
 0x1b1   :  { %2041 = vmatpush2.msra.mxu0 %v9641_v38  ;;  %2112 = vmatpush2.msra.mxu1 %v9642_v39  ;;  %v9676_v38 = vld [vmem:[#allocation124_spill] sm:$0xff]  ;;  %v9677_v39 = vld [vmem:[#allocation125_spill] sm:$0xff] }
 0x1b2   :  { %2042 = vmatprep.subr.mxu0 %v9643_v40  ;;  %2113 = vmatprep.subr.mxu1 %v9644_v41  ;;  %v9678_v40 = vld [vmem:[#allocation126_spill] sm:$0xff]  ;;  %v9679_v41 = vld [vmem:[#allocation127_spill] sm:$0xff] }
 0x1b3   :  { %2043 = vmatpush2.msra.mxu0 %v9645_v42  ;;  %2114 = vmatpush2.msra.mxu1 %v9646_v43  ;;  %v9680_v42 = vld [vmem:[#allocation128_spill] sm:$0xff]  ;;  %v9681_v43 = vld [vmem:[#allocation129_spill] sm:$0xff] }
 0x1b4   :  { %2044 = vmatprep.subr.mxu0 %v9647_v44  ;;  %2115 = vmatprep.subr.mxu1 %v9648_v45  ;;  %v9682_v44 = vld [vmem:[#allocation130_spill] sm:$0xff]  ;;  %v9683_v45 = vld [vmem:[#allocation131_spill] sm:$0xff] }
 0x1b5   :  { %2045 = vmatpush2.msra.mxu0 %v9649_v46  ;;  %2116 = vmatpush2.msra.mxu1 %v9650_v47  ;;  %v9684_v46 = vld [vmem:[#allocation132_spill] sm:$0xff]  ;;  %v9685_v47 = vld [vmem:[#allocation133_spill] sm:$0xff] }
 0x1b6   :  { %2046 = vmatprep.subr.mxu0 %v9651_v0  ;;  %2117 = vmatprep.subr.mxu1 %v9652_v12  ;;  %v9686_v0 = vld [vmem:[#allocation134_spill] sm:$0xff]  ;;  %v6422_v12 = vld [vmem:[#allocation2 + $0x228] sm:$0xff] }
 0x1b7   :  { %2047 = vmatpush2.msra.mxu0 %v9653_v50  ;;  %2118 = vmatpush2.msra.mxu1 %v9654_v4  ;;  %v6425_v50 = vld [vmem:[#allocation2 + $0x238] sm:$0xff] }
 0x1b8   :  { %2048 = vmatprep.subr.mxu0 %v9655_v3  ;;  %2119 = vmatprep.subr.mxu1 %v9656_v2  ;;  %v1472_v4 = vld [vmem:[#allocation5 + $0x400] ss:$8 sm:$0xf] }
 0x1b9   :  { %2049 = vmatpush2.msra.mxu0 %v9657_v62  ;;  %2120 = vmatpush2.msra.mxu1 %v9658_v56  ;;  %v9687_v3 = vld [vmem:[#allocation120_spill] sm:$0xff] }
 0x1ba   :  { %2050 = vmatprep.subr.mxu0 %v9659_v63  ;;  %2121 = vmatprep.subr.mxu1 %v9660_v53  ;;  %v9688_v2 = vsub.s32 0, %v9687_v3  ;;  %v9690_v56 = vsub.s32 1, %v9687_v3 }
 0x1bb   :  { %2051 = vmatpush2.msra.mxu0 %v9661_v58  ;;  %2122 = vmatpush2.msra.mxu1 %v9662_v1 }
 0x1bc   :  { %2052 = vmatprep.subr.mxu0 %v9663_v57  ;;  %2123 = vmatprep.subr.mxu1 %v9664_v60  ;;  %v6430_v62 = vrot.slane %v1472_v4, %v9688_v2  ;;  %v6434_v63 = vrot.slane %v1472_v4, %v9690_v56 }
 0x1bd   :  { %2053 = vmatpush2.msra.mxu0 %v9665_v55  ;;  %2124 = vmatpush2.msra.mxu1 %v9666_v49  ;;  %v9692_v49 = vsub.s32 2, %v9687_v3 }
 0x1be   :  { %2054 = vmatprep.subr.mxu0 %v9667_v59  ;;  %2125 = vmatprep.subr.mxu1 %v9668_v33  ;;  %9689 = vst [vmem:[#allocation11_spill] sm:$0xff] %v6430_v62  ;;  %9691 = vst [vmem:[#allocation12_spill] sm:$0xff] %v6434_v63 }
 0x1bf   :  { %2055 = vmatpush2.msra.mxu0 %v9669_v6  ;;  %2126 = vmatpush2.msra.mxu1 %v9670_v7  ;;  %v6440_v59 = vrot.slane %v1472_v4, %v9692_v49  ;;  %v9694_v7 = vsub.s32 3, %v9687_v3  ;;  %v9697_v3 = vld [vmem:[#allocation140_spill] sm:$0xff] }
 0x1c0   :  { %2056 = vmatprep.subr.mxu0 %v9671_v10  ;;  %2127 = vmatprep.subr.mxu1 %v9672_v11 }
 0x1c1   :  { %2057 = vmatpush2.msra.mxu0 %v9673_v35  ;;  %2128 = vmatpush2.msra.mxu1 %v9674_v36  ;;  %9693 = vst [vmem:[#allocation13_spill] sm:$0xff] %v6440_v59  ;;  %v6445_v10 = vrot.slane %v1472_v4, %v9694_v7  ;;  %v9699_v7 = vld [vmem:[#allocation144_spill] sm:$0xff] }
 0x1c2   :  { %2058 = vmatprep.subr.mxu0 %v9675_v37  ;;  %2129 = vmatprep.subr.mxu1 %v9676_v38 }
 0x1c3   :  { %2059 = vmatpush2.msra.mxu0 %v9677_v39  ;;  %2130 = vmatpush2.msra.mxu1 %v9678_v40  ;;  %9695 = vst [vmem:[#allocation14_spill] sm:$0xff] %v6445_v10 }
 0x1c4   :  { %2060 = vmatprep.subr.mxu0 %v9679_v41  ;;  %2131 = vmatprep.subr.mxu1 %v9680_v42 }
 0x1c5   :  { %2061 = vmatpush2.msra.mxu0 %v9681_v43  ;;  %2132 = vmatpush2.msra.mxu1 %v9682_v44  ;;  %v9696_v44 = vld [vmem:[#allocation139_spill] sm:$0xff] }
 0x1c6   :  { %2062 = vmatprep.subr.mxu0 %v9683_v45  ;;  %2133 = vmatprep.subr.mxu1 %v9684_v46 }
 0x1c7   :  { %2063 = vmatpush2.msra.mxu0 %v9685_v47  ;;  %2134 = vmatpush2.msra.mxu1 %v9686_v0 }
 0x1c8   :  { %2166 = vmatprep.subr.mxu0 %v6422_v12  ;;  %2237 = vmatprep.subr.mxu1 %v6425_v50 }
 0x226   :  { %v1730_v53 = vpop.f32.mrf.mxu0  ;;  %v1801_v33 = vpop.f32.mrf.mxu1 }
 0x227   :  { %v1731_v58 = vadd.f32 %v1730_v53, %v6430_v62  ;;  %v1802_v6 = vadd.f32 %v1801_v33, %v6440_v59 }
 0x228   :  { %v1732_v1 = vpop.f32.mrf.mxu0  ;;  %v1803_v11 = vpop.f32.mrf.mxu1 }
 0x229   :  { %v4310_v57 = vmul.f32 -1.442695, %v1731_v58  ;;  %v1733_v60 = vadd.f32 %v1732_v1, %v6434_v63  ;;  %v4312_v35 = vmul.f32 -1.442695, %v1802_v6  ;;  %v1804_v37 = vadd.f32 %v1803_v11, %v6445_v10 }
 0x22b   :  { %4431 = vpow2.f32 %v4310_v57  ;;  %v4311_v55 = vmul.f32 -1.442695, %v1733_v60 }
 0x22d   :  { %4433 = vpow2.f32 %v4311_v55  ;;  %v9698_v55 = vld [vmem:[#allocation143_spill] sm:$0xff] }
 0x22e   :  { %4435 = vpow2.f32 %v4312_v35 }
 0x238   :  { %v4432_v36 = vpop.eup %4431 }
 0x239   :  { %v1815_v38 = vadd.f32 1.0, %v4432_v36 }
 0x23a   :  { %v4434_v39 = vpop.eup %4433 }
 0x23b   :  { %4437 = vrcp.f32 %v1815_v38  ;;  %v1816_v40 = vadd.f32 1.0, %v4434_v39  ;;  %v4436_v41 = vpop.eup %4435 }
 0x23c   :  { %4439 = vtanh.f32 %v1804_v37  ;;  %v1817_v56 = vadd.f32 1.0, %v4436_v41 }
 0x23d   :  { %4441 = vrcp.f32 %v1816_v40 }
 0x247   :  { %v1896_v42 = vpop.f32.mrf.mxu0  ;;  %v1967_v60 = vpop.f32.mrf.mxu1 }
 0x248   :  { %v4438_v43 = vpop.eup %4437  ;;  %v1972_v45 = vadd.f32 %v1896_v42, %v9696_v44  ;;  %v1974_v49 = vadd.f32 %v1967_v60, %v9698_v55  ;;  %v6577_v60 = vld [vmem:[#allocation2 + $0x60] sm:$0xff]  ;;  %v6586_v55 = vld [vmem:[#allocation2 + $0x58] sm:$0xff] }
 0x249   :  { %v4440_v46 = vpop.eup %4439  ;;  %v1898_v47 = vpop.f32.mrf.mxu0 }
 0x24a   :  { %v4442_v0 = vpop.eup %4441  ;;  %v4313_v4 = vmul.f32 -1.442695, %v1972_v45  ;;  %v1973_v2 = vadd.f32 %v1898_v47, %v9697_v3  ;;  %v1826_v58 = vmul.f32 %v4440_v46, %v4438_v43  ;;  %v1969_v33 = vpop.f32.mrf.mxu1  ;;  %v4315_v6 = vmul.f32 -1.442695, %v1974_v49  ;;  %v6589_v49 = vld [vmem:[#allocation2 + $0x40] sm:$0xff] }
 0x24b   :  { %v1825_v53 = vmul.f32 0.0, %v4442_v0  ;;  %v1975_v11 = vadd.f32 %v1969_v33, %v9699_v7  ;;  %v6593_v33 = vld [vmem:[#allocation2 + $0x50] sm:$0xff]  ;;  %v6602_v7 = vld [vmem:[#allocation5 + $0x1f8] sm:$0xff] }
 0x24c   :  { %4443 = vpow2.f32 %v4313_v4  ;;  %v4314_v1 = vmul.f32 -1.442695, %v1973_v2 }
 0x24d   :  { %v6450_v57 = vadd.f32 %v1826_v58, %v1825_v53  ;;  %v6464_v53 = vld [vmem:[#allocation2 + $0x230] sm:$0xff] }
 0x24e   :  { %4445 = vpow2.f32 %v4314_v1  ;;  %v6472_v58 = vld [vmem:[#allocation2 + $0x210] sm:$0xff]  ;;  %v6476_v1 = vld [vmem:[#allocation2 + $0x1f8] sm:$0xff] }
 0x24f   :  { %4447 = vrcp.f32 %v1817_v56 }
 0x250   :  { %4449 = vtanh.f32 %v6450_v57 }
 0x251   :  { %4451 = vpow2.f32 %v4315_v6  ;;  %v6599_v6 = vld [vmem:[#allocation5 + $0x1e8] sm:$0xff] }
 0x252   :  { %4453 = vtanh.f32 %v1975_v11  ;;  %v6605_v11 = vld [vmem:[#allocation5 + $0x1e0] sm:$0xff] }
 0x259   :  { %v4444_v35 = vpop.eup %4443 }
 0x25a   :  { %v1985_v36 = vadd.f32 1.0, %v4444_v35  ;;  %v6608_v35 = vld [vmem:[#allocation5 + $0x1f0] sm:$0xff] }
 0x25b   :  { %v4446_v37 = vpop.eup %4445 }
 0x25c   :  { %v4448_v38 = vpop.eup %4447  ;;  %4455 = vrcp.f32 %v1985_v36  ;;  %v1986_v39 = vadd.f32 1.0, %v4446_v37  ;;  %v6611_v36 = vld [vmem:[#allocation5 + $0x1c8] sm:$0xff]  ;;  %v6614_v37 = vld [vmem:[#allocation5 + $0x1d8] sm:$0xff] }
 0x25d   :  { %v4450_v40 = vpop.eup %4449 }
 0x25e   :  { %4457 = vrcp.f32 %v1986_v39  ;;  %v1829_v41 = vmul.f32 %v4450_v40, %v4448_v38  ;;  %v4452_v42 = vpop.eup %4451  ;;  %v6617_v38 = vld [vmem:[#allocation5 + $0x1c0] sm:$0xff]  ;;  %v6620_v39 = vld [vmem:[#allocation5 + $0x1d0] sm:$0xff]  ;;  %v6623_v40 = vld [vmem:[#allocation5 + $0x1a8] sm:$0xff] }
 0x25f   :  { %v4454_v43 = vpop.eup %4453  ;;  %v1987_v47 = vadd.f32 1.0, %v4452_v42  ;;  %9700 = vst [vmem:[#allocation15_spill] sm:$0xff] %v6617_v38  ;;  %9701 = vst [vmem:[#allocation16_spill] sm:$0xff] %v6620_v39  ;;  %v6629_v42 = vld [vmem:[#allocation5 + $0x1a0] sm:$0xff] }
 0x260   :  { %2064 = vmatprep.mubr.f32.mxu0 %v1829_v41  ;;  %2135 = vmatprep.mubr.f32.mxu1 %v1829_v41  ;;  %9702 = vst [vmem:[#allocation17_spill] sm:$0xff] %v6623_v40  ;;  %v6626_v41 = vld [vmem:[#allocation5 + $0x1b8] sm:$0xff]  ;;  %9704 = vst [vmem:[#allocation19_spill] sm:$0xff] %v6629_v42 }
 0x261   :  { %4459 = vrcp.f32 %v1987_v47  ;;  %9703 = vst [vmem:[#allocation18_spill] sm:$0xff] %v6626_v41  ;;  %v6644_v47 = vld [vmem:[#allocation5 + $0x190] sm:$0xff] }
 0x262   :  { %9709 = vst [vmem:[#allocation24_spill] sm:$0xff] %v6644_v47 }
 0x269   :  { %v4456_v44 = vpop.eup %4455 }
 0x26a   :  { %v1996_v45 = vmul.f32 %v4456_v44, %v4454_v43  ;;  %v6632_v43 = vld [vmem:[#allocation5 + $0x1b0] sm:$0xff]  ;;  %v6635_v44 = vld [vmem:[#allocation5 + $0x188] sm:$0xff] }
 0x26b   :  { %v4458_v46 = vpop.eup %4457  ;;  %9705 = vst [vmem:[#allocation20_spill] sm:$0xff] %v6632_v43  ;;  %9706 = vst [vmem:[#allocation21_spill] sm:$0xff] %v6635_v44 }
 0x26c   :  { %v1995_v0 = vmul.f32 %v4458_v46, %v6167_v61  ;;  %v6468_v61 = vld [vmem:[#allocation2 + $0x218] sm:$0xff]  ;;  %v6641_v46 = vld [vmem:[#allocation5 + $0x180] sm:$0xff] }
 0x26d   :  { %9708 = vst [vmem:[#allocation23_spill] sm:$0xff] %v6641_v46 }
 0x26e   :  { %v6456_v4 = vadd.f32 %v1996_v45, %v1995_v0  ;;  %v4460_v3 = vpop.eup %4459  ;;  %v6638_v45 = vld [vmem:[#allocation5 + $0x198] sm:$0xff]  ;;  %v6647_v0 = vld [vmem:[#allocation5 + $0x168] sm:$0xff] }
 0x26f   :  { %9707 = vst [vmem:[#allocation22_spill] sm:$0xff] %v6638_v45  ;;  %9710 = vst [vmem:[#allocation25_spill] sm:$0xff] %v6647_v0 }
 0x270   :  { %4461 = vtanh.f32 %v6456_v4 }
 0x27d   :  { %v4462_v2 = vpop.eup %4461 }
 0x27e   :  { %v6459_v56 = vmul.f32 %v4462_v2, %v4460_v3  ;;  %v6650_v3 = vld [vmem:[#allocation5 + $0x178] sm:$0xff]  ;;  %v6653_v2 = vld [vmem:[#allocation5 + $0x160] sm:$0xff] }
 0x27f   :  { %9711 = vst [vmem:[#allocation26_spill] sm:$0xff] %v6650_v3  ;;  %9712 = vst [vmem:[#allocation27_spill] sm:$0xff] %v6653_v2 }
 0x280   :  { %2065 = vmatmul.mubr.f32.vlgmr.msra.gmra.mxu0 %v6459_v56  ;;  %2136 = vmatmul.mubr.f32.vlgmr.msra.gmra.mxu1 %v6459_v56 }
 0x281   :  { %2167 = vmatpush1.msra.mxu0 %v6174_v48  ;;  %2238 = vmatpush1.msra.mxu1 %v6464_v53  ;;  %v6480_v48 = vld [vmem:[#allocation2 + $0x1f0] sm:$0xff] }
 0x282   :  { %2168 = vmatprep.subr.mxu0 %v6178_v54  ;;  %2239 = vmatprep.subr.mxu1 %v6468_v61  ;;  %v6484_v54 = vld [vmem:[#allocation2 + $0x1d8] sm:$0xff] }
 0x283   :  { %2169 = vmatpush1.msra.mxu0 %v6182_v52  ;;  %2240 = vmatpush1.msra.mxu1 %v6472_v58  ;;  %v6488_v52 = vld [vmem:[#allocation2 + $0x1d0] sm:$0xff] }
 0x284   :  { %2170 = vmatprep.subr.mxu0 %v6186_v51  ;;  %2241 = vmatprep.subr.mxu1 %v6476_v1  ;;  %v6492_v51 = vld [vmem:[#allocation2 + $0x1b8] sm:$0xff] }
 0x285   :  { %2171 = vmatpush1.msra.mxu0 %v6190_v5  ;;  %2242 = vmatpush1.msra.mxu1 %v6480_v48  ;;  %v6496_v5 = vld [vmem:[#allocation2 + $0x1b0] sm:$0xff] }
 0x286   :  { %2172 = vmatprep.subr.mxu0 %v6194_v8  ;;  %2243 = vmatprep.subr.mxu1 %v6484_v54  ;;  %v6500_v8 = vld [vmem:[#allocation2 + $0x198] sm:$0xff] }
 0x287   :  { %2173 = vmatpush1.msra.mxu0 %v6198_v9  ;;  %2244 = vmatpush1.msra.mxu1 %v6488_v52  ;;  %v6504_v9 = vld [vmem:[#allocation2 + $0x190] sm:$0xff] }
 0x288   :  { %2174 = vmatprep.subr.mxu0 %v6202_v13  ;;  %2245 = vmatprep.subr.mxu1 %v6492_v51  ;;  %v6508_v13 = vld [vmem:[#allocation2 + $0x178] sm:$0xff] }
 0x289   :  { %2175 = vmatpush1.msra.mxu0 %v6206_v14  ;;  %2246 = vmatpush1.msra.mxu1 %v6496_v5  ;;  %v6512_v14 = vld [vmem:[#allocation2 + $0x170] sm:$0xff] }
 0x28a   :  { %2176 = vmatprep.subr.mxu0 %v6210_v15  ;;  %2247 = vmatprep.subr.mxu1 %v6500_v8  ;;  %v6516_v15 = vld [vmem:[#allocation2 + $0x158] sm:$0xff] }
 0x28b   :  { %2177 = vmatpush1.msra.mxu0 %v6214_v16  ;;  %2248 = vmatpush1.msra.mxu1 %v6504_v9  ;;  %v6520_v16 = vld [vmem:[#allocation2 + $0x150] sm:$0xff] }
 0x28c   :  { %2178 = vmatprep.subr.mxu0 %v6218_v17  ;;  %2249 = vmatprep.subr.mxu1 %v6508_v13  ;;  %v6524_v17 = vld [vmem:[#allocation2 + $0x138] sm:$0xff] }
 0x28d   :  { %2179 = vmatpush1.msra.mxu0 %v6222_v18  ;;  %2250 = vmatpush1.msra.mxu1 %v6512_v14  ;;  %v6528_v18 = vld [vmem:[#allocation2 + $0x130] sm:$0xff] }
 0x28e   :  { %2180 = vmatprep.subr.mxu0 %v6226_v19  ;;  %2251 = vmatprep.subr.mxu1 %v6516_v15  ;;  %v6532_v19 = vld [vmem:[#allocation2 + $0x118] sm:$0xff] }
 0x28f   :  { %2181 = vmatpush1.msra.mxu0 %v6230_v20  ;;  %2252 = vmatpush1.msra.mxu1 %v6520_v16  ;;  %v6536_v20 = vld [vmem:[#allocation2 + $0x110] sm:$0xff] }
 0x290   :  { %2182 = vmatprep.subr.mxu0 %v6234_v21  ;;  %2253 = vmatprep.subr.mxu1 %v6524_v17  ;;  %v6540_v21 = vld [vmem:[#allocation2 + $0xf8] sm:$0xff] }
 0x291   :  { %2183 = vmatpush1.msra.mxu0 %v6238_v22  ;;  %2254 = vmatpush1.msra.mxu1 %v6528_v18  ;;  %v6544_v22 = vld [vmem:[#allocation2 + $0xf0] sm:$0xff] }
 0x292   :  { %2184 = vmatprep.subr.mxu0 %v6242_v23  ;;  %2255 = vmatprep.subr.mxu1 %v6532_v19  ;;  %v6548_v23 = vld [vmem:[#allocation2 + $0xd8] sm:$0xff] }
 0x293   :  { %2185 = vmatpush1.msra.mxu0 %v6246_v24  ;;  %2256 = vmatpush1.msra.mxu1 %v6536_v20  ;;  %v6552_v24 = vld [vmem:[#allocation2 + $0xd0] sm:$0xff] }
 0x294   :  { %2186 = vmatprep.subr.mxu0 %v6250_v25  ;;  %2257 = vmatprep.subr.mxu1 %v6540_v21  ;;  %v6556_v25 = vld [vmem:[#allocation2 + $0xb8] sm:$0xff] }
 0x295   :  { %2187 = vmatpush1.msra.mxu0 %v6254_v26  ;;  %2258 = vmatpush1.msra.mxu1 %v6544_v22  ;;  %v6560_v26 = vld [vmem:[#allocation2 + $0xb0] sm:$0xff] }
 0x296   :  { %2188 = vmatprep.subr.mxu0 %v6258_v27  ;;  %2259 = vmatprep.subr.mxu1 %v6548_v23  ;;  %v6564_v27 = vld [vmem:[#allocation2 + $0x98] sm:$0xff] }
 0x297   :  { %2189 = vmatpush1.msra.mxu0 %v6262_v28  ;;  %2260 = vmatpush1.msra.mxu1 %v6552_v24  ;;  %v6568_v28 = vld [vmem:[#allocation2 + $0x90] sm:$0xff] }
 0x298   :  { %2190 = vmatprep.subr.mxu0 %v6266_v29  ;;  %2261 = vmatprep.subr.mxu1 %v6556_v25  ;;  %v6571_v29 = vld [vmem:[#allocation2 + $0x68] sm:$0xff] }
 0x299   :  { %2191 = vmatpush1.msra.mxu0 %v6270_v30  ;;  %2262 = vmatpush1.msra.mxu1 %v6560_v26  ;;  %v6574_v30 = vld [vmem:[#allocation2 + $0x78] sm:$0xff] }
 0x29a   :  { %2192 = vmatprep.subr.mxu0 %v6274_v31  ;;  %2263 = vmatprep.subr.mxu1 %v6564_v27  ;;  %v6580_v31 = vld [vmem:[#allocation2 + $0x70] sm:$0xff] }
 0x29b   :  { %2193 = vmatpush1.msra.mxu0 %v6278_v32  ;;  %2264 = vmatpush1.msra.mxu1 %v6568_v28  ;;  %v6583_v32 = vld [vmem:[#allocation2 + $0x48] sm:$0xff] }
 0x29c   :  { %2194 = vmatprep.subr.mxu0 %v6571_v29  ;;  %2265 = vmatprep.subr.mxu1 %v6574_v30 }
 0x29d   :  { %2195 = vmatpush1.msra.mxu0 %v6577_v60  ;;  %2266 = vmatpush1.msra.mxu1 %v6580_v31 }
 0x29e   :  { %2196 = vmatprep.subr.mxu0 %v6583_v32  ;;  %2267 = vmatprep.subr.mxu1 %v6586_v55 }
 0x29f   :  { %2197 = vmatpush1.msra.mxu0 %v6589_v49  ;;  %2230 = vmatprep.mubr.f32.mxu0 %v9563_v34 }
 0x2a0   :  { %2268 = vmatpush1.msra.mxu1 %v6593_v33  ;;  %2301 = vmatprep.mubr.f32.mxu1 %v9563_v34 }
 0x2a1   :  { %2231 = vmatmul.mubr.f32.vlgmr.msra.gmra.mxu0 %v6459_v56  ;;  %2302 = vmatmul.mubr.f32.vlgmr.msra.gmra.mxu1 %v6459_v56  ;;  %v6656_v56 = vld [vmem:[#allocation5 + $0x170] sm:$0xff] }
 0x2a2   :  { %2336 = vmatprep.subr.mxu0 %v6599_v6  ;;  %2407 = vmatprep.subr.mxu1 %v6602_v7  ;;  %9713 = vst [vmem:[#allocation28_spill] sm:$0xff] %v6656_v56 }
 0x2a3   :  { %2337 = vmatpush1.msra.mxu0 %v6605_v11  ;;  %2408 = vmatpush1.msra.mxu1 %v6608_v35 }
 0x2a4   :  { %2338 = vmatprep.subr.mxu0 %v6611_v36  ;;  %2409 = vmatprep.subr.mxu1 %v6614_v37 }
 0x2a5   :  { %2339 = vmatpush1.msra.mxu0 %v6617_v38  ;;  %2410 = vmatpush1.msra.mxu1 %v6620_v39 }
 0x2a6   :  { %2340 = vmatprep.subr.mxu0 %v6623_v40  ;;  %2411 = vmatprep.subr.mxu1 %v6626_v41 }
 0x2a7   :  { %2341 = vmatpush1.msra.mxu0 %v6629_v42  ;;  %2412 = vmatpush1.msra.mxu1 %v6632_v43 }
 0x2a8   :  { %2342 = vmatprep.subr.mxu0 %v6635_v44  ;;  %2413 = vmatprep.subr.mxu1 %v6638_v45 }
 0x2a9   :  { %2343 = vmatpush1.msra.mxu0 %v6641_v46  ;;  %2414 = vmatpush1.msra.mxu1 %v6644_v47  ;;  %v6659_v46 = vld [vmem:[#allocation5 + $0x148] sm:$0xff]  ;;  %v6662_v47 = vld [vmem:[#allocation5 + $0x158] sm:$0xff] }
 0x2aa   :  { %2344 = vmatprep.subr.mxu0 %v6647_v0  ;;  %2415 = vmatprep.subr.mxu1 %v6650_v3  ;;  %9714 = vst [vmem:[#allocation29_spill] sm:$0xff] %v6659_v46  ;;  %9715 = vst [vmem:[#allocation30_spill] sm:$0xff] %v6662_v47  ;;  %v6665_v0 = vld [vmem:[#allocation5 + $0x140] sm:$0xff]  ;;  %v6668_v3 = vld [vmem:[#allocation5 + $0x150] sm:$0xff] }
 0x2ab   :  { %2345 = vmatpush1.msra.mxu0 %v6653_v2  ;;  %2416 = vmatpush1.msra.mxu1 %v6656_v56  ;;  %9716 = vst [vmem:[#allocation31_spill] sm:$0xff] %v6665_v0  ;;  %9717 = vst [vmem:[#allocation32_spill] sm:$0xff] %v6668_v3  ;;  %v6671_v2 = vld [vmem:[#allocation5 + $0x128] sm:$0xff]  ;;  %v6674_v56 = vld [vmem:[#allocation5 + $0x138] sm:$0xff] }
 0x2ac   :  { %2346 = vmatprep.subr.mxu0 %v6659_v46  ;;  %2417 = vmatprep.subr.mxu1 %v6662_v47  ;;  %9718 = vst [vmem:[#allocation33_spill] sm:$0xff] %v6671_v2  ;;  %9719 = vst [vmem:[#allocation34_spill] sm:$0xff] %v6674_v56  ;;  %v6677_v46 = vld [vmem:[#allocation5 + $0x120] sm:$0xff]  ;;  %v6680_v47 = vld [vmem:[#allocation5 + $0x130] sm:$0xff] }
 0x2ad   :  { %2347 = vmatpush1.msra.mxu0 %v6665_v0  ;;  %2418 = vmatpush1.msra.mxu1 %v6668_v3  ;;  %9720 = vst [vmem:[#allocation35_spill] sm:$0xff] %v6677_v46  ;;  %9721 = vst [vmem:[#allocation36_spill] sm:$0xff] %v6680_v47  ;;  %v6683_v0 = vld [vmem:[#allocation5 + $0x108] sm:$0xff]  ;;  %v6686_v3 = vld [vmem:[#allocation5 + $0x118] sm:$0xff] }
 0x2ae   :  { %2348 = vmatprep.subr.mxu0 %v6671_v2  ;;  %2419 = vmatprep.subr.mxu1 %v6674_v56  ;;  %9722 = vst [vmem:[#allocation37_spill] sm:$0xff] %v6683_v0  ;;  %9723 = vst [vmem:[#allocation38_spill] sm:$0xff] %v6686_v3  ;;  %v6689_v2 = vld [vmem:[#allocation5 + $0x100] sm:$0xff]  ;;  %v6692_v56 = vld [vmem:[#allocation5 + $0x110] sm:$0xff] }
 0x2af   :  { %2349 = vmatpush1.msra.mxu0 %v6677_v46  ;;  %2420 = vmatpush1.msra.mxu1 %v6680_v47  ;;  %9724 = vst [vmem:[#allocation39_spill] sm:$0xff] %v6689_v2  ;;  %9725 = vst [vmem:[#allocation40_spill] sm:$0xff] %v6692_v56  ;;  %v6695_v46 = vld [vmem:[#allocation5 + $0xe8] sm:$0xff]  ;;  %v6698_v47 = vld [vmem:[#allocation5 + $0xf8] sm:$0xff] }
 0x2b0   :  { %2350 = vmatprep.subr.mxu0 %v6683_v0  ;;  %2421 = vmatprep.subr.mxu1 %v6686_v3  ;;  %9726 = vst [vmem:[#allocation41_spill] sm:$0xff] %v6695_v46  ;;  %9727 = vst [vmem:[#allocation42_spill] sm:$0xff] %v6698_v47  ;;  %v6701_v0 = vld [vmem:[#allocation5 + $0xe0] sm:$0xff]  ;;  %v6704_v3 = vld [vmem:[#allocation5 + $0xf0] sm:$0xff] }
 0x2b1   :  { %2351 = vmatpush1.msra.mxu0 %v6689_v2  ;;  %2422 = vmatpush1.msra.mxu1 %v6692_v56  ;;  %9728 = vst [vmem:[#allocation43_spill] sm:$0xff] %v6701_v0  ;;  %9729 = vst [vmem:[#allocation44_spill] sm:$0xff] %v6704_v3  ;;  %v6707_v2 = vld [vmem:[#allocation5 + $0xc8] sm:$0xff]  ;;  %v6710_v56 = vld [vmem:[#allocation5 + $0xd8] sm:$0xff] }
 0x2b2   :  { %2352 = vmatprep.subr.mxu0 %v6695_v46  ;;  %2423 = vmatprep.subr.mxu1 %v6698_v47  ;;  %9730 = vst [vmem:[#allocation45_spill] sm:$0xff] %v6707_v2  ;;  %9731 = vst [vmem:[#allocation46_spill] sm:$0xff] %v6710_v56  ;;  %v6713_v46 = vld [vmem:[#allocation5 + $0xc0] sm:$0xff]  ;;  %v6716_v47 = vld [vmem:[#allocation5 + $0xd0] sm:$0xff] }
 0x2b3   :  { %2353 = vmatpush1.msra.mxu0 %v6701_v0  ;;  %2424 = vmatpush1.msra.mxu1 %v6704_v3  ;;  %9732 = vst [vmem:[#allocation47_spill] sm:$0xff] %v6713_v46  ;;  %9733 = vst [vmem:[#allocation48_spill] sm:$0xff] %v6716_v47  ;;  %v6719_v0 = vld [vmem:[#allocation5 + $0xa8] sm:$0xff]  ;;  %v6722_v3 = vld [vmem:[#allocation5 + $0xb8] sm:$0xff] }
 0x2b4   :  { %2354 = vmatprep.subr.mxu0 %v6707_v2  ;;  %2425 = vmatprep.subr.mxu1 %v6710_v56  ;;  %9734 = vst [vmem:[#allocation49_spill] sm:$0xff] %v6719_v0  ;;  %9735 = vst [vmem:[#allocation50_spill] sm:$0xff] %v6722_v3  ;;  %v6725_v2 = vld [vmem:[#allocation5 + $0xa0] sm:$0xff]  ;;  %v6728_v56 = vld [vmem:[#allocation5 + $0xb0] sm:$0xff] }
 0x2b5   :  { %2355 = vmatpush1.msra.mxu0 %v6713_v46  ;;  %2426 = vmatpush1.msra.mxu1 %v6716_v47  ;;  %9736 = vst [vmem:[#allocation51_spill] sm:$0xff] %v6725_v2  ;;  %9737 = vst [vmem:[#allocation52_spill] sm:$0xff] %v6728_v56  ;;  %v6731_v46 = vld [vmem:[#allocation5 + $0x88] sm:$0xff]  ;;  %v6734_v47 = vld [vmem:[#allocation5 + $0x98] sm:$0xff] }
 0x2b6   :  { %2356 = vmatprep.subr.mxu0 %v6719_v0  ;;  %2427 = vmatprep.subr.mxu1 %v6722_v3  ;;  %9738 = vst [vmem:[#allocation53_spill] sm:$0xff] %v6731_v46  ;;  %9739 = vst [vmem:[#allocation54_spill] sm:$0xff] %v6734_v47  ;;  %v6737_v0 = vld [vmem:[#allocation5 + $0x80] sm:$0xff]  ;;  %v6740_v3 = vld [vmem:[#allocation5 + $0x90] sm:$0xff] }
 0x2b7   :  { %2357 = vmatpush1.msra.mxu0 %v6725_v2  ;;  %2428 = vmatpush1.msra.mxu1 %v6728_v56  ;;  %9740 = vst [vmem:[#allocation55_spill] sm:$0xff] %v6737_v0  ;;  %9741 = vst [vmem:[#allocation56_spill] sm:$0xff] %v6740_v3  ;;  %v6743_v2 = vld [vmem:[#allocation5 + $0x68] sm:$0xff]  ;;  %v6746_v56 = vld [vmem:[#allocation5 + $0x78] sm:$0xff] }
 0x2b8   :  { %2358 = vmatprep.subr.mxu0 %v6731_v46  ;;  %2429 = vmatprep.subr.mxu1 %v6734_v47  ;;  %9742 = vst [vmem:[#allocation57_spill] sm:$0xff] %v6743_v2  ;;  %9743 = vst [vmem:[#allocation58_spill] sm:$0xff] %v6746_v56  ;;  %v6749_v46 = vld [vmem:[#allocation5 + $0x60] sm:$0xff]  ;;  %v6752_v47 = vld [vmem:[#allocation5 + $0x70] sm:$0xff] }
 0x2b9   :  { %2359 = vmatpush1.msra.mxu0 %v6737_v0  ;;  %2430 = vmatpush1.msra.mxu1 %v6740_v3  ;;  %9744 = vst [vmem:[#allocation59_spill] sm:$0xff] %v6749_v46  ;;  %9745 = vst [vmem:[#allocation60_spill] sm:$0xff] %v6752_v47  ;;  %v6755_v0 = vld [vmem:[#allocation5 + $0x48] sm:$0xff]  ;;  %v6758_v3 = vld [vmem:[#allocation5 + $0x58] sm:$0xff] }
 0x2ba   :  { %2360 = vmatprep.subr.mxu0 %v6743_v2  ;;  %2431 = vmatprep.subr.mxu1 %v6746_v56  ;;  %9746 = vst [vmem:[#allocation61_spill] sm:$0xff] %v6755_v0  ;;  %9747 = vst [vmem:[#allocation62_spill] sm:$0xff] %v6758_v3  ;;  %v6761_v2 = vld [vmem:[#allocation5 + $0x40] sm:$0xff]  ;;  %v6764_v56 = vld [vmem:[#allocation5 + $0x50] sm:$0xff] }
 0x2bb   :  { %2361 = vmatpush1.msra.mxu0 %v6749_v46  ;;  %2432 = vmatpush1.msra.mxu1 %v6752_v47  ;;  %9748 = vst [vmem:[#allocation63_spill] sm:$0xff] %v6761_v2  ;;  %9749 = vst [vmem:[#allocation64_spill] sm:$0xff] %v6764_v56  ;;  %v6767_v46 = vld [vmem:[#allocation5 + $0x28] sm:$0xff]  ;;  %v6770_v47 = vld [vmem:[#allocation5 + $0x38] sm:$0xff] }
 0x2bc   :  { %2362 = vmatprep.subr.mxu0 %v6755_v0  ;;  %2433 = vmatprep.subr.mxu1 %v6758_v3  ;;  %9750 = vst [vmem:[#allocation65_spill] sm:$0xff] %v6767_v46  ;;  %9751 = vst [vmem:[#allocation66_spill] sm:$0xff] %v6770_v47  ;;  %v6773_v0 = vld [vmem:[#allocation5 + $0x20] sm:$0xff]  ;;  %v6776_v3 = vld [vmem:[#allocation5 + $0x30] sm:$0xff] }
 0x2bd   :  { %2363 = vmatpush1.msra.mxu0 %v6761_v2  ;;  %2434 = vmatpush1.msra.mxu1 %v6764_v56  ;;  %9752 = vst [vmem:[#allocation67_spill] sm:$0xff] %v6773_v0  ;;  %9753 = vst [vmem:[#allocation68_spill] sm:$0xff] %v6776_v3  ;;  %v6779_v2 = vld [vmem:[#allocation5 + $0x8] sm:$0xff]  ;;  %v6782_v56 = vld [vmem:[#allocation5 + $0x18] sm:$0xff] }
 0x2be   :  { %2364 = vmatprep.subr.mxu0 %v6767_v46  ;;  %2435 = vmatprep.subr.mxu1 %v6770_v47  ;;  %9754 = vst [vmem:[#allocation69_spill] sm:$0xff] %v6779_v2  ;;  %9755 = vst [vmem:[#allocation70_spill] sm:$0xff] %v6782_v56  ;;  %v6785_v46 = vld [vmem:[#allocation5] sm:$0xff]  ;;  %v6788_v47 = vld [vmem:[#allocation5 + $0x10] sm:$0xff] }
 0x2bf   :  { %2365 = vmatpush1.msra.mxu0 %v6773_v0  ;;  %2436 = vmatpush1.msra.mxu1 %v6776_v3  ;;  %9756 = vst [vmem:[#allocation71_spill] sm:$0xff] %v6785_v46  ;;  %9757 = vst [vmem:[#allocation72_spill] sm:$0xff] %v6788_v47  ;;  %v6791_v0 = vld [vmem:[#allocation5 + $0x3e8] sm:$0xff]  ;;  %v6794_v3 = vld [vmem:[#allocation5 + $0x3f8] sm:$0xff] }
 0x2c0   :  { %2366 = vmatprep.subr.mxu0 %v6779_v2  ;;  %2437 = vmatprep.subr.mxu1 %v6782_v56  ;;  %9758 = vst [vmem:[#allocation73_spill] sm:$0xff] %v6791_v0  ;;  %9759 = vst [vmem:[#allocation74_spill] sm:$0xff] %v6794_v3  ;;  %v6797_v2 = vld [vmem:[#allocation5 + $0x3e0] sm:$0xff]  ;;  %v6800_v56 = vld [vmem:[#allocation5 + $0x3f0] sm:$0xff] }
 0x2c1   :  { %2367 = vmatpush1.msra.mxu0 %v6785_v46  ;;  %2438 = vmatpush1.msra.mxu1 %v6788_v47  ;;  %9760 = vst [vmem:[#allocation75_spill] sm:$0xff] %v6797_v2  ;;  %9761 = vst [vmem:[#allocation76_spill] sm:$0xff] %v6800_v56  ;;  %v6803_v46 = vld [vmem:[#allocation5 + $0x3c8] sm:$0xff]  ;;  %v6806_v47 = vld [vmem:[#allocation5 + $0x3d8] sm:$0xff] }
 0x2c2   :  { %2368 = vmatprep.subr.mxu0 %v6791_v0  ;;  %2439 = vmatprep.subr.mxu1 %v6794_v3  ;;  %9762 = vst [vmem:[#allocation77_spill] sm:$0xff] %v6803_v46  ;;  %9763 = vst [vmem:[#allocation78_spill] sm:$0xff] %v6806_v47  ;;  %v6809_v0 = vld [vmem:[#allocation5 + $0x3c0] sm:$0xff]  ;;  %v6812_v3 = vld [vmem:[#allocation5 + $0x3d0] sm:$0xff] }
 0x2c3   :  { %2369 = vmatpush2.msra.mxu0 %v6797_v2  ;;  %2440 = vmatpush2.msra.mxu1 %v6800_v56  ;;  %9764 = vst [vmem:[#allocation79_spill] sm:$0xff] %v6809_v0  ;;  %9765 = vst [vmem:[#allocation80_spill] sm:$0xff] %v6812_v3  ;;  %v6815_v2 = vld [vmem:[#allocation5 + $0x3a8] sm:$0xff]  ;;  %v6818_v56 = vld [vmem:[#allocation5 + $0x3b8] sm:$0xff] }
 0x2c4   :  { %2370 = vmatprep.subr.mxu0 %v6803_v46  ;;  %2441 = vmatprep.subr.mxu1 %v6806_v47  ;;  %9766 = vst [vmem:[#allocation81_spill] sm:$0xff] %v6815_v2  ;;  %9767 = vst [vmem:[#allocation82_spill] sm:$0xff] %v6818_v56  ;;  %v6821_v46 = vld [vmem:[#allocation5 + $0x3a0] sm:$0xff]  ;;  %v6824_v47 = vld [vmem:[#allocation5 + $0x3b0] sm:$0xff] }
 0x2c5   :  { %2371 = vmatpush2.msra.mxu0 %v6809_v0  ;;  %2442 = vmatpush2.msra.mxu1 %v6812_v3  ;;  %9768 = vst [vmem:[#allocation83_spill] sm:$0xff] %v6821_v46  ;;  %9769 = vst [vmem:[#allocation84_spill] sm:$0xff] %v6824_v47  ;;  %v6827_v0 = vld [vmem:[#allocation5 + $0x388] sm:$0xff]  ;;  %v6830_v3 = vld [vmem:[#allocation5 + $0x398] sm:$0xff] }
 0x2c6   :  { %2372 = vmatprep.subr.mxu0 %v6815_v2  ;;  %2443 = vmatprep.subr.mxu1 %v6818_v56  ;;  %9770 = vst [vmem:[#allocation85_spill] sm:$0xff] %v6827_v0  ;;  %9771 = vst [vmem:[#allocation86_spill] sm:$0xff] %v6830_v3  ;;  %v6833_v2 = vld [vmem:[#allocation5 + $0x380] sm:$0xff]  ;;  %v6836_v56 = vld [vmem:[#allocation5 + $0x390] sm:$0xff] }
 0x2c7   :  { %2373 = vmatpush2.msra.mxu0 %v6821_v46  ;;  %2444 = vmatpush2.msra.mxu1 %v6824_v47  ;;  %9772 = vst [vmem:[#allocation87_spill] sm:$0xff] %v6833_v2  ;;  %9773 = vst [vmem:[#allocation88_spill] sm:$0xff] %v6836_v56  ;;  %v6839_v46 = vld [vmem:[#allocation5 + $0x368] sm:$0xff]  ;;  %v6842_v47 = vld [vmem:[#allocation5 + $0x378] sm:$0xff] }
 0x2c8   :  { %2374 = vmatprep.subr.mxu0 %v6827_v0  ;;  %2445 = vmatprep.subr.mxu1 %v6830_v3  ;;  %9774 = vst [vmem:[#allocation89_spill] sm:$0xff] %v6839_v46  ;;  %9775 = vst [vmem:[#allocation90_spill] sm:$0xff] %v6842_v47  ;;  %v6845_v0 = vld [vmem:[#allocation5 + $0x360] sm:$0xff]  ;;  %v6848_v3 = vld [vmem:[#allocation5 + $0x370] sm:$0xff] }
 0x2c9   :  { %2375 = vmatpush2.msra.mxu0 %v6833_v2  ;;  %2446 = vmatpush2.msra.mxu1 %v6836_v56  ;;  %9776 = vst [vmem:[#allocation91_spill] sm:$0xff] %v6845_v0  ;;  %9777 = vst [vmem:[#allocation92_spill] sm:$0xff] %v6848_v3  ;;  %v6851_v2 = vld [vmem:[#allocation5 + $0x348] sm:$0xff]  ;;  %v6854_v56 = vld [vmem:[#allocation5 + $0x358] sm:$0xff] }
 0x2ca   :  { %2376 = vmatprep.subr.mxu0 %v6839_v46  ;;  %2447 = vmatprep.subr.mxu1 %v6842_v47  ;;  %9778 = vst [vmem:[#allocation93_spill] sm:$0xff] %v6851_v2  ;;  %9779 = vst [vmem:[#allocation94_spill] sm:$0xff] %v6854_v56  ;;  %v6857_v46 = vld [vmem:[#allocation5 + $0x340] sm:$0xff]  ;;  %v6860_v47 = vld [vmem:[#allocation5 + $0x350] sm:$0xff] }
 0x2cb   :  { %2377 = vmatpush2.msra.mxu0 %v6845_v0  ;;  %2448 = vmatpush2.msra.mxu1 %v6848_v3  ;;  %9780 = vst [vmem:[#allocation95_spill] sm:$0xff] %v6857_v46  ;;  %9781 = vst [vmem:[#allocation96_spill] sm:$0xff] %v6860_v47  ;;  %v6863_v0 = vld [vmem:[#allocation5 + $0x328] sm:$0xff]  ;;  %v6866_v3 = vld [vmem:[#allocation5 + $0x338] sm:$0xff] }
 0x2cc   :  { %2378 = vmatprep.subr.mxu0 %v6851_v2  ;;  %2449 = vmatprep.subr.mxu1 %v6854_v56  ;;  %9782 = vst [vmem:[#allocation97_spill] sm:$0xff] %v6863_v0  ;;  %9783 = vst [vmem:[#allocation98_spill] sm:$0xff] %v6866_v3  ;;  %v6869_v2 = vld [vmem:[#allocation5 + $0x320] sm:$0xff]  ;;  %v6872_v56 = vld [vmem:[#allocation5 + $0x330] sm:$0xff] }
 0x2cd   :  { %2379 = vmatpush2.msra.mxu0 %v6857_v46  ;;  %2450 = vmatpush2.msra.mxu1 %v6860_v47  ;;  %9784 = vst [vmem:[#allocation99_spill] sm:$0xff] %v6869_v2  ;;  %9785 = vst [vmem:[#allocation100_spill] sm:$0xff] %v6872_v56  ;;  %v6875_v46 = vld [vmem:[#allocation5 + $0x308] sm:$0xff]  ;;  %v6878_v47 = vld [vmem:[#allocation5 + $0x318] sm:$0xff] }
 0x2ce   :  { %2380 = vmatprep.subr.mxu0 %v6863_v0  ;;  %2451 = vmatprep.subr.mxu1 %v6866_v3  ;;  %9786 = vst [vmem:[#allocation101_spill] sm:$0xff] %v6875_v46  ;;  %9787 = vst [vmem:[#allocation102_spill] sm:$0xff] %v6878_v47  ;;  %v6881_v0 = vld [vmem:[#allocation5 + $0x300] sm:$0xff]  ;;  %v6884_v3 = vld [vmem:[#allocation5 + $0x310] sm:$0xff] }
 0x2cf   :  { %2381 = vmatpush2.msra.mxu0 %v6869_v2  ;;  %2452 = vmatpush2.msra.mxu1 %v6872_v56  ;;  %9788 = vst [vmem:[#allocation103_spill] sm:$0xff] %v6881_v0  ;;  %9789 = vst [vmem:[#allocation104_spill] sm:$0xff] %v6884_v3  ;;  %v6887_v2 = vld [vmem:[#allocation5 + $0x2e8] sm:$0xff]  ;;  %v6890_v56 = vld [vmem:[#allocation5 + $0x2f8] sm:$0xff] }
 0x2d0   :  { %2382 = vmatprep.subr.mxu0 %v6875_v46  ;;  %2453 = vmatprep.subr.mxu1 %v6878_v47  ;;  %9790 = vst [vmem:[#allocation105_spill] sm:$0xff] %v6887_v2  ;;  %9791 = vst [vmem:[#allocation106_spill] sm:$0xff] %v6890_v56  ;;  %v6893_v46 = vld [vmem:[#allocation5 + $0x2e0] sm:$0xff]  ;;  %v6896_v47 = vld [vmem:[#allocation5 + $0x2f0] sm:$0xff] }
 0x2d1   :  { %2383 = vmatpush2.msra.mxu0 %v6881_v0  ;;  %2454 = vmatpush2.msra.mxu1 %v6884_v3  ;;  %9792 = vst [vmem:[#allocation107_spill] sm:$0xff] %v6893_v46  ;;  %9793 = vst [vmem:[#allocation108_spill] sm:$0xff] %v6896_v47  ;;  %v6899_v0 = vld [vmem:[#allocation5 + $0x2c8] sm:$0xff]  ;;  %v6902_v3 = vld [vmem:[#allocation5 + $0x2d8] sm:$0xff] }
 0x2d2   :  { %2384 = vmatprep.subr.mxu0 %v6887_v2  ;;  %2455 = vmatprep.subr.mxu1 %v6890_v56  ;;  %9794 = vst [vmem:[#allocation109_spill] sm:$0xff] %v6899_v0  ;;  %9795 = vst [vmem:[#allocation110_spill] sm:$0xff] %v6902_v3  ;;  %v6905_v2 = vld [vmem:[#allocation5 + $0x2c0] sm:$0xff]  ;;  %v6908_v56 = vld [vmem:[#allocation5 + $0x2d0] sm:$0xff] }
 0x2d3   :  { %2385 = vmatpush2.msra.mxu0 %v6893_v46  ;;  %2456 = vmatpush2.msra.mxu1 %v6896_v47  ;;  %9796 = vst [vmem:[#allocation111_spill] sm:$0xff] %v6905_v2  ;;  %9797 = vst [vmem:[#allocation112_spill] sm:$0xff] %v6908_v56  ;;  %v6911_v46 = vld [vmem:[#allocation5 + $0x2a8] sm:$0xff]  ;;  %v6914_v47 = vld [vmem:[#allocation5 + $0x2b8] sm:$0xff] }
 0x2d4   :  { %2386 = vmatprep.subr.mxu0 %v6899_v0  ;;  %2457 = vmatprep.subr.mxu1 %v6902_v3  ;;  %9798 = vst [vmem:[#allocation113_spill] sm:$0xff] %v6911_v46  ;;  %9799 = vst [vmem:[#allocation114_spill] sm:$0xff] %v6914_v47  ;;  %v6917_v0 = vld [vmem:[#allocation5 + $0x2a0] sm:$0xff]  ;;  %v6920_v3 = vld [vmem:[#allocation5 + $0x2b0] sm:$0xff] }
 0x2d5   :  { %2387 = vmatpush2.msra.mxu0 %v6905_v2  ;;  %2458 = vmatpush2.msra.mxu1 %v6908_v56  ;;  %9800 = vst [vmem:[#allocation115_spill] sm:$0xff] %v6917_v0  ;;  %9801 = vst [vmem:[#allocation116_spill] sm:$0xff] %v6920_v3  ;;  %v6923_v2 = vld [vmem:[#allocation5 + $0x288] sm:$0xff]  ;;  %v6926_v56 = vld [vmem:[#allocation5 + $0x298] sm:$0xff] }
 0x2d6   :  { %2388 = vmatprep.subr.mxu0 %v6911_v46  ;;  %2459 = vmatprep.subr.mxu1 %v6914_v47  ;;  %9802 = vst [vmem:[#allocation117_spill] sm:$0xff] %v6923_v2  ;;  %9803 = vst [vmem:[#allocation118_spill] sm:$0xff] %v6926_v56  ;;  %v6929_v46 = vld [vmem:[#allocation5 + $0x280] sm:$0xff]  ;;  %v6932_v47 = vld [vmem:[#allocation5 + $0x290] sm:$0xff] }
 0x2d7   :  { %2389 = vmatpush2.msra.mxu0 %v6917_v0  ;;  %2460 = vmatpush2.msra.mxu1 %v6920_v3  ;;  %9804 = vst [vmem:[#allocation119_spill] sm:$0xff] %v6929_v46  ;;  %9805 = vst [vmem:[#allocation121_spill] sm:$0xff] %v6932_v47  ;;  %v6935_v0 = vld [vmem:[#allocation5 + $0x268] sm:$0xff]  ;;  %v6938_v3 = vld [vmem:[#allocation5 + $0x278] sm:$0xff] }
 0x2d8   :  { %2390 = vmatprep.subr.mxu0 %v6923_v2  ;;  %2461 = vmatprep.subr.mxu1 %v6926_v56  ;;  %9806 = vst [vmem:[#allocation122_spill] sm:$0xff] %v6935_v0  ;;  %9807 = vst [vmem:[#allocation123_spill] sm:$0xff] %v6938_v3  ;;  %v6941_v2 = vld [vmem:[#allocation5 + $0x260] sm:$0xff]  ;;  %v6944_v56 = vld [vmem:[#allocation5 + $0x270] sm:$0xff] }
 0x2d9   :  { %2391 = vmatpush2.msra.mxu0 %v6929_v46  ;;  %2462 = vmatpush2.msra.mxu1 %v6932_v47  ;;  %9808 = vst [vmem:[#allocation124_spill] sm:$0xff] %v6941_v2  ;;  %9809 = vst [vmem:[#allocation125_spill] sm:$0xff] %v6944_v56  ;;  %v6947_v46 = vld [vmem:[#allocation5 + $0x248] sm:$0xff]  ;;  %v6950_v47 = vld [vmem:[#allocation5 + $0x258] sm:$0xff] }
 0x2da   :  { %2392 = vmatprep.subr.mxu0 %v6935_v0  ;;  %2463 = vmatprep.subr.mxu1 %v6938_v3  ;;  %9810 = vst [vmem:[#allocation126_spill] sm:$0xff] %v6947_v46  ;;  %9811 = vst [vmem:[#allocation127_spill] sm:$0xff] %v6950_v47  ;;  %v6953_v0 = vld [vmem:[#allocation5 + $0x240] sm:$0xff]  ;;  %v6956_v3 = vld [vmem:[#allocation5 + $0x250] sm:$0xff] }
 0x2db   :  { %2393 = vmatpush2.msra.mxu0 %v6941_v2  ;;  %2464 = vmatpush2.msra.mxu1 %v6944_v56  ;;  %9812 = vst [vmem:[#allocation128_spill] sm:$0xff] %v6953_v0  ;;  %9813 = vst [vmem:[#allocation129_spill] sm:$0xff] %v6956_v3  ;;  %v6959_v2 = vld [vmem:[#allocation5 + $0x228] sm:$0xff]  ;;  %v6962_v56 = vld [vmem:[#allocation5 + $0x238] sm:$0xff] }
 0x2dc   :  { %2394 = vmatprep.subr.mxu0 %v6947_v46  ;;  %2465 = vmatprep.subr.mxu1 %v6950_v47  ;;  %9814 = vst [vmem:[#allocation130_spill] sm:$0xff] %v6959_v2  ;;  %9815 = vst [vmem:[#allocation131_spill] sm:$0xff] %v6962_v56  ;;  %v6965_v46 = vld [vmem:[#allocation5 + $0x220] sm:$0xff]  ;;  %v6968_v47 = vld [vmem:[#allocation5 + $0x230] sm:$0xff] }
 0x2dd   :  { %2395 = vmatpush2.msra.mxu0 %v6953_v0  ;;  %2466 = vmatpush2.msra.mxu1 %v6956_v3  ;;  %9816 = vst [vmem:[#allocation132_spill] sm:$0xff] %v6965_v46  ;;  %9817 = vst [vmem:[#allocation133_spill] sm:$0xff] %v6968_v47  ;;  %v6971_v0 = vld [vmem:[#allocation5 + $0x208] sm:$0xff]  ;;  %v6974_v3 = vld [vmem:[#allocation5 + $0x218] sm:$0xff] }
 0x2de   :  { %2396 = vmatprep.subr.mxu0 %v6959_v2  ;;  %2467 = vmatprep.subr.mxu1 %v6962_v56  ;;  %9818 = vst [vmem:[#allocation134_spill] sm:$0xff] %v6971_v0  ;;  %9819 = vst [vmem:[#allocation120_spill] sm:$0xff] %v6974_v3  ;;  %v6977_v2 = vld [vmem:[#allocation5 + $0x200] sm:$0xff]  ;;  %v6980_v56 = vld [vmem:[#allocation5 + $0x210] sm:$0xff] }
 0x2df   :  { %2397 = vmatpush2.msra.mxu0 %v6965_v46  ;;  %2468 = vmatpush2.msra.mxu1 %v6968_v47  ;;  %9820 = vst [vmem:[#allocation139_spill] sm:$0xff] %v6977_v2  ;;  %9821 = vst [vmem:[#allocation140_spill] sm:$0xff] %v6980_v56 }
 0x2e0   :  { %2398 = vmatprep.subr.mxu0 %v6971_v0  ;;  %2469 = vmatprep.subr.mxu1 %v6974_v3 }
 0x2e1   :  { %2399 = vmatpush2.msra.mxu0 %v6977_v2  ;;  %2470 = vmatpush2.msra.mxu1 %v6980_v56 }
 0x2e2   :  { %2502 = vmatprep.subr.mxu0 %v6422_v12  ;;  %2573 = vmatprep.subr.mxu1 %v6425_v50 }
 0x340   :  { %v2066_v47 = vpop.f32.mrf.mxu0  ;;  %v2137_v43 = vpop.f32.mrf.mxu1 }
 0x341   :  { %v2067_v46 = vadd.f32 %v2066_v47, %v6430_v62  ;;  %v2138_v2 = vadd.f32 %v2137_v43, %v6440_v59 }
 0x342   :  { %v2068_v0 = vpop.f32.mrf.mxu0  ;;  %v2139_v42 = vpop.f32.mrf.mxu1 }
 0x343   :  { %v4316_v45 = vmul.f32 -1.442695, %v2067_v46  ;;  %v2069_v44 = vadd.f32 %v2068_v0, %v6434_v63  ;;  %v4318_v41 = vmul.f32 -1.442695, %v2138_v2  ;;  %v2140_v12 = vadd.f32 %v2139_v42, %v6445_v10  ;;  %v9823_v2 = vld [vmem:[#allocation148_spill] sm:$0xff] }
 0x345   :  { %4463 = vpow2.f32 %v4316_v45  ;;  %v4317_v3 = vmul.f32 -1.442695, %v2069_v44  ;;  %v9822_v44 = vld [vmem:[#allocation147_spill] sm:$0xff] }
 0x347   :  { %4465 = vpow2.f32 %v4317_v3 }
 0x348   :  { %4467 = vpow2.f32 %v4318_v41 }
 0x352   :  { %v4464_v56 = vpop.eup %4463 }
 0x353   :  { %v2151_v40 = vadd.f32 1.0, %v4464_v56 }
 0x354   :  { %v4466_v50 = vpop.eup %4465 }
 0x355   :  { %4469 = vrcp.f32 %v2151_v40  ;;  %v2152_v47 = vadd.f32 1.0, %v4466_v50  ;;  %v4468_v46 = vpop.eup %4467  ;;  %v9824_v50 = vld [vmem:[#allocation149_spill] sm:$0xff] }
 0x356   :  { %4471 = vtanh.f32 %v2140_v12  ;;  %v2153_v38 = vadd.f32 1.0, %v4468_v46 }
 0x357   :  { %4473 = vrcp.f32 %v2152_v47 }
 0x361   :  { %v2232_v0 = vpop.f32.mrf.mxu0  ;;  %v2303_v12 = vpop.f32.mrf.mxu1 }
 0x362   :  { %v4470_v45 = vpop.eup %4469  ;;  %v2308_v3 = vadd.f32 %v2232_v0, %v9822_v44  ;;  %v2310_v47 = vadd.f32 %v2303_v12, %v9824_v50 }
 0x363   :  { %v4472_v63 = vpop.eup %4471  ;;  %v2234_v62 = vpop.f32.mrf.mxu0 }
 0x364   :  { %v4474_v43 = vpop.eup %4473  ;;  %v4319_v59 = vmul.f32 -1.442695, %v2308_v3  ;;  %v2309_v39 = vadd.f32 %v2234_v62, %v9823_v2  ;;  %v2162_v56 = vmul.f32 %v4472_v63, %v4470_v45  ;;  %v2305_v0 = vpop.f32.mrf.mxu1  ;;  %v4321_v44 = vmul.f32 -1.442695, %v2310_v47  ;;  %v9825_v3 = vld [vmem:[#allocation150_spill] sm:$0xff] }
 0x365   :  { %v2161_v42 = vmul.f32 %v4474_v43, %v6450_v57  ;;  %v2311_v10 = vadd.f32 %v2305_v0, %v9825_v3  ;;  %v7013_v3 = vld [vmem:[#allocation2 + $0x200] sm:$0xff] }
 0x366   :  { %4475 = vpow2.f32 %v4319_v59  ;;  %v4320_v40 = vmul.f32 -1.442695, %v2309_v39 }
 0x367   :  { %v6992_v41 = vadd.f32 %v2162_v56, %v2161_v42 }
 0x368   :  { %4477 = vpow2.f32 %v4320_v40 }
 0x369   :  { %4479 = vrcp.f32 %v2153_v38 }
 0x36a   :  { %4481 = vtanh.f32 %v6992_v41 }
 0x36b   :  { %4483 = vpow2.f32 %v4321_v44  ;;  %v7005_v44 = vld [vmem:[#allocation2 + $0x220] sm:$0xff] }
 0x36c   :  { %4485 = vtanh.f32 %v2311_v10 }
 0x373   :  { %v4476_v62 = vpop.eup %4475 }
 0x374   :  { %v2321_v46 = vadd.f32 1.0, %v4476_v62  ;;  %v7017_v62 = vld [vmem:[#allocation2 + $0x1e8] sm:$0xff] }
 0x375   :  { %v4478_v57 = vpop.eup %4477 }
 0x376   :  { %v4480_v63 = vpop.eup %4479  ;;  %4487 = vrcp.f32 %v2321_v46  ;;  %v2322_v59 = vadd.f32 1.0, %v4478_v57  ;;  %v7021_v46 = vld [vmem:[#allocation2 + $0x1e0] sm:$0xff] }
 0x377   :  { %v4482_v39 = vpop.eup %4481  ;;  %v9845_v57 = vld [vmem:[#allocation34_spill] sm:$0xff] }
 0x378   :  { %4489 = vrcp.f32 %v2322_v59  ;;  %v2165_v38 = vmul.f32 %v4482_v39, %v4480_v63  ;;  %v4484_v45 = vpop.eup %4483  ;;  %v9846_v63 = vld [vmem:[#allocation35_spill] sm:$0xff]  ;;  %v9847_v59 = vld [vmem:[#allocation36_spill] sm:$0xff]  ;;  %v9848_v39 = vld [vmem:[#allocation37_spill] sm:$0xff] }
 0x379   :  { %v4486_v43 = vpop.eup %4485  ;;  %v2323_v40 = vadd.f32 1.0, %v4484_v45  ;;  %v9850_v45 = vld [vmem:[#allocation39_spill] sm:$0xff] }
 0x37a   :  { %2400 = vmatprep.mubr.f32.mxu0 %v2165_v38  ;;  %2471 = vmatprep.mubr.f32.mxu1 %v2165_v38  ;;  %v9849_v38 = vld [vmem:[#allocation38_spill] sm:$0xff] }
 0x37b   :  { %4491 = vrcp.f32 %v2323_v40  ;;  %v9855_v40 = vld [vmem:[#allocation44_spill] sm:$0xff] }
 0x383   :  { %v4488_v2 = vpop.eup %4487 }
 0x384   :  { %v2332_v42 = vmul.f32 %v4488_v2, %v4486_v43  ;;  %v9851_v43 = vld [vmem:[#allocation40_spill] sm:$0xff]  ;;  %v9852_v2 = vld [vmem:[#allocation41_spill] sm:$0xff] }
 0x385   :  { %v4490_v56 = vpop.eup %4489 }
 0x386   :  { %v2331_v12 = vmul.f32 %v4490_v56, %v6456_v4  ;;  %v7009_v4 = vld [vmem:[#allocation2 + $0x208] sm:$0xff] }
 0x387   :  { %v9854_v56 = vld [vmem:[#allocation43_spill] sm:$0xff] }
 0x388   :  { %v6998_v50 = vadd.f32 %v2332_v42, %v2331_v12  ;;  %v4492_v10 = vpop.eup %4491  ;;  %v9853_v42 = vld [vmem:[#allocation42_spill] sm:$0xff]  ;;  %v9856_v12 = vld [vmem:[#allocation45_spill] sm:$0xff] }
 0x38a   :  { %4493 = vtanh.f32 %v6998_v50 }
 0x397   :  { %v4494_v47 = vpop.eup %4493 }
 0x398   :  { %v7001_v0 = vmul.f32 %v4494_v47, %v4492_v10  ;;  %v9857_v10 = vld [vmem:[#allocation46_spill] sm:$0xff]  ;;  %v9858_v47 = vld [vmem:[#allocation47_spill] sm:$0xff] }
 0x39a   :  { %2401 = vmatmul.mubr.f32.vlgmr.msra.gmra.mxu0 %v7001_v0  ;;  %2472 = vmatmul.mubr.f32.vlgmr.msra.gmra.mxu1 %v7001_v0 }
 0x39b   :  { %2503 = vmatpush1.msra.mxu0 %v7005_v44  ;;  %2574 = vmatpush1.msra.mxu1 %v6464_v53  ;;  %v7025_v53 = vld [vmem:[#allocation2 + $0x1c8] sm:$0xff] }
 0x39c   :  { %2504 = vmatprep.subr.mxu0 %v7009_v4  ;;  %2575 = vmatprep.subr.mxu1 %v6468_v61  ;;  %v7029_v61 = vld [vmem:[#allocation2 + $0x1c0] sm:$0xff] }
 0x39d   :  { %2505 = vmatpush1.msra.mxu0 %v7013_v3  ;;  %2576 = vmatpush1.msra.mxu1 %v6472_v58  ;;  %v7033_v58 = vld [vmem:[#allocation2 + $0x1a8] sm:$0xff] }
 0x39e   :  { %2506 = vmatprep.subr.mxu0 %v7017_v62  ;;  %2577 = vmatprep.subr.mxu1 %v6476_v1  ;;  %v7037_v1 = vld [vmem:[#allocation2 + $0x1a0] sm:$0xff] }
 0x39f   :  { %2507 = vmatpush1.msra.mxu0 %v7021_v46  ;;  %2578 = vmatpush1.msra.mxu1 %v6480_v48  ;;  %v7041_v48 = vld [vmem:[#allocation2 + $0x188] sm:$0xff] }
 0x3a0   :  { %2508 = vmatprep.subr.mxu0 %v7025_v53  ;;  %2579 = vmatprep.subr.mxu1 %v6484_v54  ;;  %v7045_v54 = vld [vmem:[#allocation2 + $0x180] sm:$0xff] }
 0x3a1   :  { %2509 = vmatpush1.msra.mxu0 %v7029_v61  ;;  %2580 = vmatpush1.msra.mxu1 %v6488_v52  ;;  %v7049_v52 = vld [vmem:[#allocation2 + $0x168] sm:$0xff] }
 0x3a2   :  { %2510 = vmatprep.subr.mxu0 %v7033_v58  ;;  %2581 = vmatprep.subr.mxu1 %v6492_v51  ;;  %v7053_v51 = vld [vmem:[#allocation2 + $0x160] sm:$0xff] }
 0x3a3   :  { %2511 = vmatpush1.msra.mxu0 %v7037_v1  ;;  %2582 = vmatpush1.msra.mxu1 %v6496_v5  ;;  %v7057_v5 = vld [vmem:[#allocation2 + $0x148] sm:$0xff] }
 0x3a4   :  { %2512 = vmatprep.subr.mxu0 %v7041_v48  ;;  %2583 = vmatprep.subr.mxu1 %v6500_v8  ;;  %v7061_v8 = vld [vmem:[#allocation2 + $0x140] sm:$0xff] }
 0x3a5   :  { %2513 = vmatpush1.msra.mxu0 %v7045_v54  ;;  %2584 = vmatpush1.msra.mxu1 %v6504_v9  ;;  %v7065_v9 = vld [vmem:[#allocation2 + $0x128] sm:$0xff] }
 0x3a6   :  { %2514 = vmatprep.subr.mxu0 %v7049_v52  ;;  %2585 = vmatprep.subr.mxu1 %v6508_v13  ;;  %v7069_v13 = vld [vmem:[#allocation2 + $0x120] sm:$0xff] }
 0x3a7   :  { %2515 = vmatpush1.msra.mxu0 %v7053_v51  ;;  %2586 = vmatpush1.msra.mxu1 %v6512_v14  ;;  %v7073_v14 = vld [vmem:[#allocation2 + $0x108] sm:$0xff] }
 0x3a8   :  { %2516 = vmatprep.subr.mxu0 %v7057_v5  ;;  %2587 = vmatprep.subr.mxu1 %v6516_v15  ;;  %v7077_v15 = vld [vmem:[#allocation2 + $0x100] sm:$0xff] }
 0x3a9   :  { %2517 = vmatpush1.msra.mxu0 %v7061_v8  ;;  %2588 = vmatpush1.msra.mxu1 %v6520_v16  ;;  %v7081_v16 = vld [vmem:[#allocation2 + $0xe8] sm:$0xff] }
 0x3aa   :  { %2518 = vmatprep.subr.mxu0 %v7065_v9  ;;  %2589 = vmatprep.subr.mxu1 %v6524_v17  ;;  %v7085_v17 = vld [vmem:[#allocation2 + $0xe0] sm:$0xff] }
 0x3ab   :  { %2519 = vmatpush1.msra.mxu0 %v7069_v13  ;;  %2590 = vmatpush1.msra.mxu1 %v6528_v18  ;;  %v7089_v18 = vld [vmem:[#allocation2 + $0xc8] sm:$0xff] }
 0x3ac   :  { %2520 = vmatprep.subr.mxu0 %v7073_v14  ;;  %2591 = vmatprep.subr.mxu1 %v6532_v19  ;;  %v7093_v19 = vld [vmem:[#allocation2 + $0xc0] sm:$0xff] }
 0x3ad   :  { %2521 = vmatpush1.msra.mxu0 %v7077_v15  ;;  %2592 = vmatpush1.msra.mxu1 %v6536_v20  ;;  %v7097_v20 = vld [vmem:[#allocation2 + $0xa8] sm:$0xff] }
 0x3ae   :  { %2522 = vmatprep.subr.mxu0 %v7081_v16  ;;  %2593 = vmatprep.subr.mxu1 %v6540_v21  ;;  %v7101_v21 = vld [vmem:[#allocation2 + $0xa0] sm:$0xff] }
 0x3af   :  { %2523 = vmatpush1.msra.mxu0 %v7085_v17  ;;  %2594 = vmatpush1.msra.mxu1 %v6544_v22  ;;  %v7105_v22 = vld [vmem:[#allocation2 + $0x88] sm:$0xff] }
 0x3b0   :  { %2524 = vmatprep.subr.mxu0 %v7089_v18  ;;  %2595 = vmatprep.subr.mxu1 %v6548_v23  ;;  %v7109_v23 = vld [vmem:[#allocation2 + $0x80] sm:$0xff] }
 0x3b1   :  { %2525 = vmatpush1.msra.mxu0 %v7093_v19  ;;  %2596 = vmatpush1.msra.mxu1 %v6552_v24  ;;  %v9826_v24 = vld [vmem:[#allocation15_spill] sm:$0xff] }
 0x3b2   :  { %2526 = vmatprep.subr.mxu0 %v7097_v20  ;;  %2597 = vmatprep.subr.mxu1 %v6556_v25  ;;  %v9827_v25 = vld [vmem:[#allocation16_spill] sm:$0xff] }
 0x3b3   :  { %2527 = vmatpush1.msra.mxu0 %v7101_v21  ;;  %2598 = vmatpush1.msra.mxu1 %v6560_v26  ;;  %v9828_v26 = vld [vmem:[#allocation17_spill] sm:$0xff] }
 0x3b4   :  { %2528 = vmatprep.subr.mxu0 %v7105_v22  ;;  %2599 = vmatprep.subr.mxu1 %v6564_v27  ;;  %v9829_v27 = vld [vmem:[#allocation18_spill] sm:$0xff] }
 0x3b5   :  { %2529 = vmatpush1.msra.mxu0 %v7109_v23  ;;  %2600 = vmatpush1.msra.mxu1 %v6568_v28  ;;  %v9830_v28 = vld [vmem:[#allocation19_spill] sm:$0xff] }
 0x3b6   :  { %2530 = vmatprep.subr.mxu0 %v6571_v29  ;;  %2601 = vmatprep.subr.mxu1 %v6574_v30  ;;  %v9831_v29 = vld [vmem:[#allocation20_spill] sm:$0xff]  ;;  %v9832_v30 = vld [vmem:[#allocation21_spill] sm:$0xff] }
 0x3b7   :  { %2531 = vmatpush1.msra.mxu0 %v6577_v60  ;;  %2602 = vmatpush1.msra.mxu1 %v6580_v31  ;;  %v9833_v60 = vld [vmem:[#allocation22_spill] sm:$0xff]  ;;  %v9834_v31 = vld [vmem:[#allocation23_spill] sm:$0xff] }
 0x3b8   :  { %2532 = vmatprep.subr.mxu0 %v6583_v32  ;;  %2603 = vmatprep.subr.mxu1 %v6586_v55  ;;  %v9835_v32 = vld [vmem:[#allocation24_spill] sm:$0xff]  ;;  %v9836_v55 = vld [vmem:[#allocation25_spill] sm:$0xff] }
 0x3b9   :  { %2533 = vmatpush1.msra.mxu0 %v6589_v49  ;;  %2566 = vmatprep.mubr.f32.mxu0 %v9563_v34  ;;  %v9837_v49 = vld [vmem:[#allocation26_spill] sm:$0xff] }
 0x3ba   :  { %2604 = vmatpush1.msra.mxu1 %v6593_v33  ;;  %2637 = vmatprep.mubr.f32.mxu1 %v9563_v34  ;;  %v9838_v33 = vld [vmem:[#allocation27_spill] sm:$0xff] }
 0x3bb   :  { %2567 = vmatmul.mubr.f32.vlgmr.msra.gmra.mxu0 %v7001_v0  ;;  %2638 = vmatmul.mubr.f32.vlgmr.msra.gmra.mxu1 %v7001_v0  ;;  %v9859_v0 = vld [vmem:[#allocation48_spill] sm:$0xff] }
 0x3bc   :  { %2672 = vmatprep.subr.mxu0 %v6599_v6  ;;  %2743 = vmatprep.subr.mxu1 %v6602_v7  ;;  %v9839_v6 = vld [vmem:[#allocation28_spill] sm:$0xff]  ;;  %v9840_v7 = vld [vmem:[#allocation29_spill] sm:$0xff] }
 0x3bd   :  { %2673 = vmatpush1.msra.mxu0 %v6605_v11  ;;  %2744 = vmatpush1.msra.mxu1 %v6608_v35  ;;  %v9841_v11 = vld [vmem:[#allocation30_spill] sm:$0xff]  ;;  %v9842_v35 = vld [vmem:[#allocation31_spill] sm:$0xff] }
 0x3be   :  { %2674 = vmatprep.subr.mxu0 %v6611_v36  ;;  %2745 = vmatprep.subr.mxu1 %v6614_v37  ;;  %v9843_v36 = vld [vmem:[#allocation32_spill] sm:$0xff]  ;;  %v9844_v37 = vld [vmem:[#allocation33_spill] sm:$0xff] }
 0x3bf   :  { %2675 = vmatpush1.msra.mxu0 %v9826_v24  ;;  %2746 = vmatpush1.msra.mxu1 %v9827_v25  ;;  %v9860_v24 = vld [vmem:[#allocation49_spill] sm:$0xff]  ;;  %v9861_v25 = vld [vmem:[#allocation50_spill] sm:$0xff] }
 0x3c0   :  { %2676 = vmatprep.subr.mxu0 %v9828_v26  ;;  %2747 = vmatprep.subr.mxu1 %v9829_v27  ;;  %v9862_v26 = vld [vmem:[#allocation51_spill] sm:$0xff]  ;;  %v9863_v27 = vld [vmem:[#allocation52_spill] sm:$0xff] }
 0x3c1   :  { %2677 = vmatpush1.msra.mxu0 %v9830_v28  ;;  %2748 = vmatpush1.msra.mxu1 %v9831_v29  ;;  %v9864_v28 = vld [vmem:[#allocation53_spill] sm:$0xff]  ;;  %v9865_v29 = vld [vmem:[#allocation54_spill] sm:$0xff] }
 0x3c2   :  { %2678 = vmatprep.subr.mxu0 %v9832_v30  ;;  %2749 = vmatprep.subr.mxu1 %v9833_v60  ;;  %v9866_v30 = vld [vmem:[#allocation55_spill] sm:$0xff]  ;;  %v9867_v60 = vld [vmem:[#allocation56_spill] sm:$0xff] }
 0x3c3   :  { %2679 = vmatpush1.msra.mxu0 %v9834_v31  ;;  %2750 = vmatpush1.msra.mxu1 %v9835_v32  ;;  %v9868_v31 = vld [vmem:[#allocation57_spill] sm:$0xff]  ;;  %v9869_v32 = vld [vmem:[#allocation58_spill] sm:$0xff] }
 0x3c4   :  { %2680 = vmatprep.subr.mxu0 %v9836_v55  ;;  %2751 = vmatprep.subr.mxu1 %v9837_v49  ;;  %v9870_v55 = vld [vmem:[#allocation59_spill] sm:$0xff]  ;;  %v9871_v49 = vld [vmem:[#allocation60_spill] sm:$0xff] }
 0x3c5   :  { %2681 = vmatpush1.msra.mxu0 %v9838_v33  ;;  %2752 = vmatpush1.msra.mxu1 %v9839_v6  ;;  %v9872_v33 = vld [vmem:[#allocation61_spill] sm:$0xff]  ;;  %v9873_v6 = vld [vmem:[#allocation62_spill] sm:$0xff] }
 0x3c6   :  { %2682 = vmatprep.subr.mxu0 %v9840_v7  ;;  %2753 = vmatprep.subr.mxu1 %v9841_v11  ;;  %v9874_v7 = vld [vmem:[#allocation63_spill] sm:$0xff]  ;;  %v9875_v11 = vld [vmem:[#allocation64_spill] sm:$0xff] }
 0x3c7   :  { %2683 = vmatpush1.msra.mxu0 %v9842_v35  ;;  %2754 = vmatpush1.msra.mxu1 %v9843_v36  ;;  %v9876_v35 = vld [vmem:[#allocation65_spill] sm:$0xff]  ;;  %v9877_v36 = vld [vmem:[#allocation66_spill] sm:$0xff] }
 0x3c8   :  { %2684 = vmatprep.subr.mxu0 %v9844_v37  ;;  %2755 = vmatprep.subr.mxu1 %v9845_v57  ;;  %v9878_v37 = vld [vmem:[#allocation67_spill] sm:$0xff]  ;;  %v9879_v57 = vld [vmem:[#allocation68_spill] sm:$0xff] }
 0x3c9   :  { %2685 = vmatpush1.msra.mxu0 %v9846_v63  ;;  %2756 = vmatpush1.msra.mxu1 %v9847_v59  ;;  %v9880_v63 = vld [vmem:[#allocation69_spill] sm:$0xff]  ;;  %v9881_v59 = vld [vmem:[#allocation70_spill] sm:$0xff] }
 0x3ca   :  { %2686 = vmatprep.subr.mxu0 %v9848_v39  ;;  %2757 = vmatprep.subr.mxu1 %v9849_v38  ;;  %v9882_v39 = vld [vmem:[#allocation71_spill] sm:$0xff]  ;;  %v9883_v38 = vld [vmem:[#allocation72_spill] sm:$0xff] }
 0x3cb   :  { %2687 = vmatpush1.msra.mxu0 %v9850_v45  ;;  %2758 = vmatpush1.msra.mxu1 %v9851_v43  ;;  %v9884_v45 = vld [vmem:[#allocation73_spill] sm:$0xff]  ;;  %v9885_v43 = vld [vmem:[#allocation74_spill] sm:$0xff] }
 0x3cc   :  { %2688 = vmatprep.subr.mxu0 %v9852_v2  ;;  %2759 = vmatprep.subr.mxu1 %v9853_v42  ;;  %v9886_v2 = vld [vmem:[#allocation75_spill] sm:$0xff]  ;;  %v9887_v42 = vld [vmem:[#allocation76_spill] sm:$0xff] }
 0x3cd   :  { %2689 = vmatpush1.msra.mxu0 %v9854_v56  ;;  %2760 = vmatpush1.msra.mxu1 %v9855_v40  ;;  %v9888_v56 = vld [vmem:[#allocation77_spill] sm:$0xff]  ;;  %v9889_v40 = vld [vmem:[#allocation78_spill] sm:$0xff] }
 0x3ce   :  { %2690 = vmatprep.subr.mxu0 %v9856_v12  ;;  %2761 = vmatprep.subr.mxu1 %v9857_v10  ;;  %v9890_v12 = vld [vmem:[#allocation79_spill] sm:$0xff]  ;;  %v9891_v10 = vld [vmem:[#allocation80_spill] sm:$0xff] }
 0x3cf   :  { %2691 = vmatpush1.msra.mxu0 %v9858_v47  ;;  %2762 = vmatpush1.msra.mxu1 %v9859_v0  ;;  %v9892_v47 = vld [vmem:[#allocation81_spill] sm:$0xff]  ;;  %v9893_v0 = vld [vmem:[#allocation82_spill] sm:$0xff] }
 0x3d0   :  { %2692 = vmatprep.subr.mxu0 %v9860_v24  ;;  %2763 = vmatprep.subr.mxu1 %v9861_v25  ;;  %v9894_v24 = vld [vmem:[#allocation83_spill] sm:$0xff]  ;;  %v9895_v25 = vld [vmem:[#allocation84_spill] sm:$0xff] }
 0x3d1   :  { %2693 = vmatpush1.msra.mxu0 %v9862_v26  ;;  %2764 = vmatpush1.msra.mxu1 %v9863_v27  ;;  %v9896_v26 = vld [vmem:[#allocation85_spill] sm:$0xff]  ;;  %v9897_v27 = vld [vmem:[#allocation86_spill] sm:$0xff] }
 0x3d2   :  { %2694 = vmatprep.subr.mxu0 %v9864_v28  ;;  %2765 = vmatprep.subr.mxu1 %v9865_v29  ;;  %v9898_v28 = vld [vmem:[#allocation87_spill] sm:$0xff]  ;;  %v9899_v29 = vld [vmem:[#allocation88_spill] sm:$0xff] }
 0x3d3   :  { %2695 = vmatpush1.msra.mxu0 %v9866_v30  ;;  %2766 = vmatpush1.msra.mxu1 %v9867_v60  ;;  %v9900_v30 = vld [vmem:[#allocation89_spill] sm:$0xff]  ;;  %v9901_v60 = vld [vmem:[#allocation90_spill] sm:$0xff] }
 0x3d4   :  { %2696 = vmatprep.subr.mxu0 %v9868_v31  ;;  %2767 = vmatprep.subr.mxu1 %v9869_v32  ;;  %v9902_v31 = vld [vmem:[#allocation91_spill] sm:$0xff]  ;;  %v9903_v32 = vld [vmem:[#allocation92_spill] sm:$0xff] }
 0x3d5   :  { %2697 = vmatpush1.msra.mxu0 %v9870_v55  ;;  %2768 = vmatpush1.msra.mxu1 %v9871_v49  ;;  %v9904_v55 = vld [vmem:[#allocation93_spill] sm:$0xff]  ;;  %v9905_v49 = vld [vmem:[#allocation94_spill] sm:$0xff] }
 0x3d6   :  { %2698 = vmatprep.subr.mxu0 %v9872_v33  ;;  %2769 = vmatprep.subr.mxu1 %v9873_v6  ;;  %v9906_v33 = vld [vmem:[#allocation95_spill] sm:$0xff]  ;;  %v9907_v6 = vld [vmem:[#allocation96_spill] sm:$0xff] }
 0x3d7   :  { %2699 = vmatpush1.msra.mxu0 %v9874_v7  ;;  %2770 = vmatpush1.msra.mxu1 %v9875_v11  ;;  %v9908_v7 = vld [vmem:[#allocation97_spill] sm:$0xff]  ;;  %v9909_v11 = vld [vmem:[#allocation98_spill] sm:$0xff] }
 0x3d8   :  { %2700 = vmatprep.subr.mxu0 %v9876_v35  ;;  %2771 = vmatprep.subr.mxu1 %v9877_v36  ;;  %v9910_v35 = vld [vmem:[#allocation99_spill] sm:$0xff]  ;;  %v9911_v36 = vld [vmem:[#allocation100_spill] sm:$0xff] }
 0x3d9   :  { %2701 = vmatpush1.msra.mxu0 %v9878_v37  ;;  %2772 = vmatpush1.msra.mxu1 %v9879_v57  ;;  %v9912_v37 = vld [vmem:[#allocation101_spill] sm:$0xff]  ;;  %v9913_v57 = vld [vmem:[#allocation102_spill] sm:$0xff] }
 0x3da   :  { %2702 = vmatprep.subr.mxu0 %v9880_v63  ;;  %2773 = vmatprep.subr.mxu1 %v9881_v59  ;;  %v9914_v63 = vld [vmem:[#allocation103_spill] sm:$0xff]  ;;  %v9915_v59 = vld [vmem:[#allocation104_spill] sm:$0xff] }
 0x3db   :  { %2703 = vmatpush1.msra.mxu0 %v9882_v39  ;;  %2774 = vmatpush1.msra.mxu1 %v9883_v38  ;;  %v9916_v39 = vld [vmem:[#allocation105_spill] sm:$0xff]  ;;  %v9917_v38 = vld [vmem:[#allocation106_spill] sm:$0xff] }
 0x3dc   :  { %2704 = vmatprep.subr.mxu0 %v9884_v45  ;;  %2775 = vmatprep.subr.mxu1 %v9885_v43  ;;  %v9918_v45 = vld [vmem:[#allocation107_spill] sm:$0xff]  ;;  %v9919_v43 = vld [vmem:[#allocation108_spill] sm:$0xff] }
 0x3dd   :  { %2705 = vmatpush2.msra.mxu0 %v9886_v2  ;;  %2776 = vmatpush2.msra.mxu1 %v9887_v42  ;;  %v9920_v2 = vld [vmem:[#allocation109_spill] sm:$0xff]  ;;  %v9921_v42 = vld [vmem:[#allocation110_spill] sm:$0xff] }
 0x3de   :  { %2706 = vmatprep.subr.mxu0 %v9888_v56  ;;  %2777 = vmatprep.subr.mxu1 %v9889_v40  ;;  %v9922_v56 = vld [vmem:[#allocation111_spill] sm:$0xff]  ;;  %v9923_v40 = vld [vmem:[#allocation112_spill] sm:$0xff] }
 0x3df   :  { %2707 = vmatpush2.msra.mxu0 %v9890_v12  ;;  %2778 = vmatpush2.msra.mxu1 %v9891_v10  ;;  %v9924_v12 = vld [vmem:[#allocation113_spill] sm:$0xff]  ;;  %v9925_v10 = vld [vmem:[#allocation114_spill] sm:$0xff] }
 0x3e0   :  { %2708 = vmatprep.subr.mxu0 %v9892_v47  ;;  %2779 = vmatprep.subr.mxu1 %v9893_v0  ;;  %v9926_v47 = vld [vmem:[#allocation115_spill] sm:$0xff]  ;;  %v9927_v0 = vld [vmem:[#allocation116_spill] sm:$0xff] }
 0x3e1   :  { %2709 = vmatpush2.msra.mxu0 %v9894_v24  ;;  %2780 = vmatpush2.msra.mxu1 %v9895_v25  ;;  %v9928_v24 = vld [vmem:[#allocation117_spill] sm:$0xff]  ;;  %v9929_v25 = vld [vmem:[#allocation118_spill] sm:$0xff] }
 0x3e2   :  { %2710 = vmatprep.subr.mxu0 %v9896_v26  ;;  %2781 = vmatprep.subr.mxu1 %v9897_v27  ;;  %v9930_v26 = vld [vmem:[#allocation119_spill] sm:$0xff]  ;;  %v9931_v27 = vld [vmem:[#allocation121_spill] sm:$0xff] }
 0x3e3   :  { %2711 = vmatpush2.msra.mxu0 %v9898_v28  ;;  %2782 = vmatpush2.msra.mxu1 %v9899_v29  ;;  %v9932_v28 = vld [vmem:[#allocation122_spill] sm:$0xff]  ;;  %v9933_v29 = vld [vmem:[#allocation123_spill] sm:$0xff] }
 0x3e4   :  { %2712 = vmatprep.subr.mxu0 %v9900_v30  ;;  %2783 = vmatprep.subr.mxu1 %v9901_v60  ;;  %v9934_v30 = vld [vmem:[#allocation124_spill] sm:$0xff]  ;;  %v9935_v60 = vld [vmem:[#allocation125_spill] sm:$0xff] }
 0x3e5   :  { %2713 = vmatpush2.msra.mxu0 %v9902_v31  ;;  %2784 = vmatpush2.msra.mxu1 %v9903_v32  ;;  %v9936_v31 = vld [vmem:[#allocation126_spill] sm:$0xff]  ;;  %v9937_v32 = vld [vmem:[#allocation127_spill] sm:$0xff] }
 0x3e6   :  { %2714 = vmatprep.subr.mxu0 %v9904_v55  ;;  %2785 = vmatprep.subr.mxu1 %v9905_v49  ;;  %v9938_v55 = vld [vmem:[#allocation128_spill] sm:$0xff]  ;;  %v9939_v49 = vld [vmem:[#allocation129_spill] sm:$0xff] }
 0x3e7   :  { %2715 = vmatpush2.msra.mxu0 %v9906_v33  ;;  %2786 = vmatpush2.msra.mxu1 %v9907_v6  ;;  %v9940_v33 = vld [vmem:[#allocation130_spill] sm:$0xff]  ;;  %v9941_v6 = vld [vmem:[#allocation131_spill] sm:$0xff] }
 0x3e8   :  { %2716 = vmatprep.subr.mxu0 %v9908_v7  ;;  %2787 = vmatprep.subr.mxu1 %v9909_v11  ;;  %v9942_v7 = vld [vmem:[#allocation132_spill] sm:$0xff]  ;;  %v9943_v11 = vld [vmem:[#allocation133_spill] sm:$0xff] }
 0x3e9   :  { %2717 = vmatpush2.msra.mxu0 %v9910_v35  ;;  %2788 = vmatpush2.msra.mxu1 %v9911_v36  ;;  %v9944_v35 = vld [vmem:[#allocation134_spill] sm:$0xff]  ;;  %v9945_v36 = vld [vmem:[#allocation120_spill] sm:$0xff] }
 0x3ea   :  { %2718 = vmatprep.subr.mxu0 %v9912_v37  ;;  %2789 = vmatprep.subr.mxu1 %v9913_v57  ;;  %v9946_v37 = vld [vmem:[#allocation139_spill] sm:$0xff]  ;;  %v9947_v57 = vld [vmem:[#allocation140_spill] sm:$0xff] }
 0x3eb   :  { %2719 = vmatpush2.msra.mxu0 %v9914_v63  ;;  %2790 = vmatpush2.msra.mxu1 %v9915_v59  ;;  %v7253_v63 = vld [vmem:[#allocation2 + $0x228] sm:$0xff]  ;;  %v7256_v59 = vld [vmem:[#allocation2 + $0x238] sm:$0xff] }
 0x3ec   :  { %2720 = vmatprep.subr.mxu0 %v9916_v39  ;;  %2791 = vmatprep.subr.mxu1 %v9917_v38  ;;  %v9948_v38 = vld [vmem:[#allocation11_spill] sm:$0xff] }
 0x3ed   :  { %2721 = vmatpush2.msra.mxu0 %v9918_v45  ;;  %2792 = vmatpush2.msra.mxu1 %v9919_v43 }
 0x3ee   :  { %2722 = vmatprep.subr.mxu0 %v9920_v2  ;;  %2793 = vmatprep.subr.mxu1 %v9921_v42  ;;  %v9949_v42 = vld [vmem:[#allocation12_spill] sm:$0xff] }
 0x3ef   :  { %2723 = vmatpush2.msra.mxu0 %v9922_v56  ;;  %2794 = vmatpush2.msra.mxu1 %v9923_v40 }
 0x3f0   :  { %2724 = vmatprep.subr.mxu0 %v9924_v12  ;;  %2795 = vmatprep.subr.mxu1 %v9925_v10  ;;  %v9950_v10 = vld [vmem:[#allocation13_spill] sm:$0xff] }
 0x3f1   :  { %2725 = vmatpush2.msra.mxu0 %v9926_v47  ;;  %2796 = vmatpush2.msra.mxu1 %v9927_v0 }
 0x3f2   :  { %2726 = vmatprep.subr.mxu0 %v9928_v24  ;;  %2797 = vmatprep.subr.mxu1 %v9929_v25 }
 0x3f3   :  { %2727 = vmatpush2.msra.mxu0 %v9930_v26  ;;  %2798 = vmatpush2.msra.mxu1 %v9931_v27  ;;  %v9951_v26 = vld [vmem:[#allocation14_spill] sm:$0xff] }
 0x3f4   :  { %2728 = vmatprep.subr.mxu0 %v9932_v28  ;;  %2799 = vmatprep.subr.mxu1 %v9933_v29 }
 0x3f5   :  { %2729 = vmatpush2.msra.mxu0 %v9934_v30  ;;  %2800 = vmatpush2.msra.mxu1 %v9935_v60 }
 0x3f6   :  { %2730 = vmatprep.subr.mxu0 %v9936_v31  ;;  %2801 = vmatprep.subr.mxu1 %v9937_v32 }
 0x3f7   :  { %2731 = vmatpush2.msra.mxu0 %v9938_v55  ;;  %2802 = vmatpush2.msra.mxu1 %v9939_v49  ;;  %v9952_v55 = vld [vmem:[#allocation151_spill] sm:$0xff] }
 0x3f8   :  { %2732 = vmatprep.subr.mxu0 %v9940_v33  ;;  %2803 = vmatprep.subr.mxu1 %v9941_v6 }
 0x3f9   :  { %2733 = vmatpush2.msra.mxu0 %v9942_v7  ;;  %2804 = vmatpush2.msra.mxu1 %v9943_v11 }
 0x3fa   :  { %2734 = vmatprep.subr.mxu0 %v9944_v35  ;;  %2805 = vmatprep.subr.mxu1 %v9945_v36  ;;  %v9953_v35 = vld [vmem:[#allocation152_spill] sm:$0xff] }
 0x3fb   :  { %2735 = vmatpush2.msra.mxu0 %v9946_v37  ;;  %2806 = vmatpush2.msra.mxu1 %v9947_v57 }
 0x3fc   :  { %2838 = vmatprep.subr.mxu0 %v7253_v63  ;;  %2909 = vmatprep.subr.mxu1 %v7256_v59 }
 0x45a   :  { %v2402_v39 = vpop.f32.mrf.mxu0  ;;  %v2473_v12 = vpop.f32.mrf.mxu1 }
 0x45b   :  { %v2403_v45 = vadd.f32 %v2402_v39, %v9948_v38  ;;  %v2474_v47 = vadd.f32 %v2473_v12, %v9950_v10 }
 0x45c   :  { %v2404_v43 = vpop.f32.mrf.mxu0  ;;  %v2475_v0 = vpop.f32.mrf.mxu1 }
 0x45d   :  { %v4322_v2 = vmul.f32 -1.442695, %v2403_v45  ;;  %v2405_v56 = vadd.f32 %v2404_v43, %v9949_v42  ;;  %v4324_v24 = vmul.f32 -1.442695, %v2474_v47  ;;  %v2476_v27 = vadd.f32 %v2475_v0, %v9951_v26  ;;  %v9955_v0 = vld [vmem:[#allocation154_spill] sm:$0xff] }
 0x45f   :  { %4495 = vpow2.f32 %v4322_v2  ;;  %v4323_v40 = vmul.f32 -1.442695, %v2405_v56  ;;  %v9954_v56 = vld [vmem:[#allocation153_spill] sm:$0xff] }
 0x461   :  { %4497 = vpow2.f32 %v4323_v40 }
 0x462   :  { %4499 = vpow2.f32 %v4324_v24 }
 0x46c   :  { %v4496_v25 = vpop.eup %4495 }
 0x46d   :  { %v2487_v28 = vadd.f32 1.0, %v4496_v25 }
 0x46e   :  { %v4498_v29 = vpop.eup %4497 }
 0x46f   :  { %4501 = vrcp.f32 %v2487_v28  ;;  %v2488_v30 = vadd.f32 1.0, %v4498_v29  ;;  %v4500_v60 = vpop.eup %4499 }
 0x470   :  { %4503 = vtanh.f32 %v2476_v27  ;;  %v2489_v37 = vadd.f32 1.0, %v4500_v60 }
 0x471   :  { %4505 = vrcp.f32 %v2488_v30 }
 0x47b   :  { %v2568_v31 = vpop.f32.mrf.mxu0  ;;  %v2639_v2 = vpop.f32.mrf.mxu1 }
 0x47c   :  { %v4502_v32 = vpop.eup %4501  ;;  %v2644_v49 = vadd.f32 %v2568_v31, %v9952_v55  ;;  %v2646_v40 = vadd.f32 %v2639_v2, %v9954_v56  ;;  %v7393_v2 = vld [vmem:[#allocation2 + $0x60] sm:$0xff]  ;;  %v7402_v56 = vld [vmem:[#allocation2 + $0x58] sm:$0xff] }
 0x47d   :  { %v4504_v33 = vpop.eup %4503  ;;  %v2570_v6 = vpop.f32.mrf.mxu0 }
 0x47e   :  { %v4506_v7 = vpop.eup %4505  ;;  %v4325_v11 = vmul.f32 -1.442695, %v2644_v49  ;;  %v2645_v36 = vadd.f32 %v2570_v6, %v9953_v35  ;;  %v2498_v39 = vmul.f32 %v4504_v33, %v4502_v32  ;;  %v2641_v12 = vpop.f32.mrf.mxu1  ;;  %v4327_v47 = vmul.f32 -1.442695, %v2646_v40  ;;  %v7405_v40 = vld [vmem:[#allocation2 + $0x40] sm:$0xff] }
 0x47f   :  { %v2497_v57 = vmul.f32 %v4506_v7, %v6992_v41  ;;  %v2647_v24 = vadd.f32 %v2641_v12, %v9955_v0  ;;  %v7409_v12 = vld [vmem:[#allocation2 + $0x50] sm:$0xff]  ;;  %v7418_v0 = vld [vmem:[#allocation5 + $0x1f8] sm:$0xff] }
 0x480   :  { %4507 = vpow2.f32 %v4325_v11  ;;  %v4326_v45 = vmul.f32 -1.442695, %v2645_v36 }
 0x481   :  { %v7266_v43 = vadd.f32 %v2498_v39, %v2497_v57  ;;  %v7280_v57 = vld [vmem:[#allocation2 + $0x230] sm:$0xff] }
 0x482   :  { %4509 = vpow2.f32 %v4326_v45  ;;  %v7288_v39 = vld [vmem:[#allocation2 + $0x210] sm:$0xff]  ;;  %v7292_v45 = vld [vmem:[#allocation2 + $0x1f8] sm:$0xff] }
 0x483   :  { %4511 = vrcp.f32 %v2489_v37 }
 0x484   :  { %4513 = vtanh.f32 %v7266_v43 }
 0x485   :  { %4515 = vpow2.f32 %v4327_v47  ;;  %v7415_v47 = vld [vmem:[#allocation5 + $0x1e8] sm:$0xff] }
 0x486   :  { %4517 = vtanh.f32 %v2647_v24  ;;  %v7421_v24 = vld [vmem:[#allocation5 + $0x1e0] sm:$0xff] }
 0x48d   :  { %v4508_v25 = vpop.eup %4507 }
 0x48e   :  { %v2657_v27 = vadd.f32 1.0, %v4508_v25  ;;  %v7424_v25 = vld [vmem:[#allocation5 + $0x1f0] sm:$0xff] }
 0x48f   :  { %v4510_v41 = vpop.eup %4509 }
 0x490   :  { %v4512_v28 = vpop.eup %4511  ;;  %4519 = vrcp.f32 %v2657_v27  ;;  %v2658_v29 = vadd.f32 1.0, %v4510_v41  ;;  %v7427_v27 = vld [vmem:[#allocation5 + $0x1c8] sm:$0xff]  ;;  %v7430_v41 = vld [vmem:[#allocation5 + $0x1d8] sm:$0xff] }
 0x491   :  { %v4514_v30 = vpop.eup %4513 }
 0x492   :  { %4521 = vrcp.f32 %v2658_v29  ;;  %v2501_v60 = vmul.f32 %v4514_v30, %v4512_v28  ;;  %v4516_v31 = vpop.eup %4515  ;;  %v7433_v28 = vld [vmem:[#allocation5 + $0x1c0] sm:$0xff]  ;;  %v7436_v29 = vld [vmem:[#allocation5 + $0x1d0] sm:$0xff]  ;;  %v7439_v30 = vld [vmem:[#allocation5 + $0x1a8] sm:$0xff] }
 0x493   :  { %v4518_v32 = vpop.eup %4517  ;;  %v2659_v6 = vadd.f32 1.0, %v4516_v31  ;;  %9956 = vst [vmem:[#allocation143_spill] sm:$0xff] %v7433_v28  ;;  %9957 = vst [vmem:[#allocation144_spill] sm:$0xff] %v7436_v29  ;;  %v7445_v31 = vld [vmem:[#allocation5 + $0x1a0] sm:$0xff] }
 0x494   :  { %2736 = vmatprep.mubr.f32.mxu0 %v2501_v60  ;;  %2807 = vmatprep.mubr.f32.mxu1 %v2501_v60  ;;  %9958 = vst [vmem:[#allocation147_spill] sm:$0xff] %v7439_v30  ;;  %v7442_v60 = vld [vmem:[#allocation5 + $0x1b8] sm:$0xff]  ;;  %9960 = vst [vmem:[#allocation149_spill] sm:$0xff] %v7445_v31 }
 0x495   :  { %4523 = vrcp.f32 %v2659_v6  ;;  %9959 = vst [vmem:[#allocation148_spill] sm:$0xff] %v7442_v60  ;;  %v7460_v6 = vld [vmem:[#allocation5 + $0x190] sm:$0xff] }
 0x496   :  { %9965 = vst [vmem:[#allocation18_spill] sm:$0xff] %v7460_v6 }
 0x49d   :  { %v4520_v55 = vpop.eup %4519 }
 0x49e   :  { %v2668_v49 = vmul.f32 %v4520_v55, %v4518_v32  ;;  %v7448_v32 = vld [vmem:[#allocation5 + $0x1b0] sm:$0xff]  ;;  %v7451_v55 = vld [vmem:[#allocation5 + $0x188] sm:$0xff] }
 0x49f   :  { %v4522_v33 = vpop.eup %4521  ;;  %9961 = vst [vmem:[#allocation150_spill] sm:$0xff] %v7448_v32  ;;  %9962 = vst [vmem:[#allocation15_spill] sm:$0xff] %v7451_v55 }
 0x4a0   :  { %v2667_v7 = vmul.f32 %v4522_v33, %v6998_v50  ;;  %v7284_v50 = vld [vmem:[#allocation2 + $0x218] sm:$0xff]  ;;  %v7457_v33 = vld [vmem:[#allocation5 + $0x180] sm:$0xff] }
 0x4a1   :  { %9964 = vst [vmem:[#allocation17_spill] sm:$0xff] %v7457_v33 }
 0x4a2   :  { %v7272_v11 = vadd.f32 %v2668_v49, %v2667_v7  ;;  %v4524_v35 = vpop.eup %4523  ;;  %v7454_v49 = vld [vmem:[#allocation5 + $0x198] sm:$0xff]  ;;  %v7463_v7 = vld [vmem:[#allocation5 + $0x168] sm:$0xff] }
 0x4a3   :  { %9963 = vst [vmem:[#allocation16_spill] sm:$0xff] %v7454_v49  ;;  %9966 = vst [vmem:[#allocation19_spill] sm:$0xff] %v7463_v7 }
 0x4a4   :  { %4525 = vtanh.f32 %v7272_v11 }
 0x4b1   :  { %v4526_v36 = vpop.eup %4525 }
 0x4b2   :  { %v7275_v37 = vmul.f32 %v4526_v36, %v4524_v35  ;;  %v7466_v35 = vld [vmem:[#allocation5 + $0x178] sm:$0xff]  ;;  %v7469_v36 = vld [vmem:[#allocation5 + $0x160] sm:$0xff] }
 0x4b3   :  { %9967 = vst [vmem:[#allocation20_spill] sm:$0xff] %v7466_v35  ;;  %9968 = vst [vmem:[#allocation21_spill] sm:$0xff] %v7469_v36 }
 0x4b4   :  { %2737 = vmatmul.mubr.f32.vlgmr.msra.gmra.mxu0 %v7275_v37  ;;  %2808 = vmatmul.mubr.f32.vlgmr.msra.gmra.mxu1 %v7275_v37 }
 0x4b5   :  { %2839 = vmatpush1.msra.mxu0 %v7005_v44  ;;  %2910 = vmatpush1.msra.mxu1 %v7280_v57  ;;  %v7296_v44 = vld [vmem:[#allocation2 + $0x1f0] sm:$0xff] }
 0x4b6   :  { %2840 = vmatprep.subr.mxu0 %v7009_v4  ;;  %2911 = vmatprep.subr.mxu1 %v7284_v50  ;;  %v7300_v4 = vld [vmem:[#allocation2 + $0x1d8] sm:$0xff] }
 0x4b7   :  { %2841 = vmatpush1.msra.mxu0 %v7013_v3  ;;  %2912 = vmatpush1.msra.mxu1 %v7288_v39  ;;  %v7304_v3 = vld [vmem:[#allocation2 + $0x1d0] sm:$0xff] }
 0x4b8   :  { %2842 = vmatprep.subr.mxu0 %v7017_v62  ;;  %2913 = vmatprep.subr.mxu1 %v7292_v45  ;;  %v7308_v62 = vld [vmem:[#allocation2 + $0x1b8] sm:$0xff] }
 0x4b9   :  { %2843 = vmatpush1.msra.mxu0 %v7021_v46  ;;  %2914 = vmatpush1.msra.mxu1 %v7296_v44  ;;  %v7312_v46 = vld [vmem:[#allocation2 + $0x1b0] sm:$0xff] }
 0x4ba   :  { %2844 = vmatprep.subr.mxu0 %v7025_v53  ;;  %2915 = vmatprep.subr.mxu1 %v7300_v4  ;;  %v7316_v53 = vld [vmem:[#allocation2 + $0x198] sm:$0xff] }
 0x4bb   :  { %2845 = vmatpush1.msra.mxu0 %v7029_v61  ;;  %2916 = vmatpush1.msra.mxu1 %v7304_v3  ;;  %v7320_v61 = vld [vmem:[#allocation2 + $0x190] sm:$0xff] }
 0x4bc   :  { %2846 = vmatprep.subr.mxu0 %v7033_v58  ;;  %2917 = vmatprep.subr.mxu1 %v7308_v62  ;;  %v7324_v58 = vld [vmem:[#allocation2 + $0x178] sm:$0xff] }
 0x4bd   :  { %2847 = vmatpush1.msra.mxu0 %v7037_v1  ;;  %2918 = vmatpush1.msra.mxu1 %v7312_v46  ;;  %v7328_v1 = vld [vmem:[#allocation2 + $0x170] sm:$0xff] }
 0x4be   :  { %2848 = vmatprep.subr.mxu0 %v7041_v48  ;;  %2919 = vmatprep.subr.mxu1 %v7316_v53  ;;  %v7332_v48 = vld [vmem:[#allocation2 + $0x158] sm:$0xff] }
 0x4bf   :  { %2849 = vmatpush1.msra.mxu0 %v7045_v54  ;;  %2920 = vmatpush1.msra.mxu1 %v7320_v61  ;;  %v7336_v54 = vld [vmem:[#allocation2 + $0x150] sm:$0xff] }
 0x4c0   :  { %2850 = vmatprep.subr.mxu0 %v7049_v52  ;;  %2921 = vmatprep.subr.mxu1 %v7324_v58  ;;  %v7340_v52 = vld [vmem:[#allocation2 + $0x138] sm:$0xff] }
 0x4c1   :  { %2851 = vmatpush1.msra.mxu0 %v7053_v51  ;;  %2922 = vmatpush1.msra.mxu1 %v7328_v1  ;;  %v7344_v51 = vld [vmem:[#allocation2 + $0x130] sm:$0xff] }
 0x4c2   :  { %2852 = vmatprep.subr.mxu0 %v7057_v5  ;;  %2923 = vmatprep.subr.mxu1 %v7332_v48  ;;  %v7348_v5 = vld [vmem:[#allocation2 + $0x118] sm:$0xff] }
 0x4c3   :  { %2853 = vmatpush1.msra.mxu0 %v7061_v8  ;;  %2924 = vmatpush1.msra.mxu1 %v7336_v54  ;;  %v7352_v8 = vld [vmem:[#allocation2 + $0x110] sm:$0xff] }
 0x4c4   :  { %2854 = vmatprep.subr.mxu0 %v7065_v9  ;;  %2925 = vmatprep.subr.mxu1 %v7340_v52  ;;  %v7356_v9 = vld [vmem:[#allocation2 + $0xf8] sm:$0xff] }
 0x4c5   :  { %2855 = vmatpush1.msra.mxu0 %v7069_v13  ;;  %2926 = vmatpush1.msra.mxu1 %v7344_v51  ;;  %v7360_v13 = vld [vmem:[#allocation2 + $0xf0] sm:$0xff] }
 0x4c6   :  { %2856 = vmatprep.subr.mxu0 %v7073_v14  ;;  %2927 = vmatprep.subr.mxu1 %v7348_v5  ;;  %v7364_v14 = vld [vmem:[#allocation2 + $0xd8] sm:$0xff] }
 0x4c7   :  { %2857 = vmatpush1.msra.mxu0 %v7077_v15  ;;  %2928 = vmatpush1.msra.mxu1 %v7352_v8  ;;  %v7368_v15 = vld [vmem:[#allocation2 + $0xd0] sm:$0xff] }
 0x4c8   :  { %2858 = vmatprep.subr.mxu0 %v7081_v16  ;;  %2929 = vmatprep.subr.mxu1 %v7356_v9  ;;  %v7372_v16 = vld [vmem:[#allocation2 + $0xb8] sm:$0xff] }
 0x4c9   :  { %2859 = vmatpush1.msra.mxu0 %v7085_v17  ;;  %2930 = vmatpush1.msra.mxu1 %v7360_v13  ;;  %v7376_v17 = vld [vmem:[#allocation2 + $0xb0] sm:$0xff] }
 0x4ca   :  { %2860 = vmatprep.subr.mxu0 %v7089_v18  ;;  %2931 = vmatprep.subr.mxu1 %v7364_v14  ;;  %v7380_v18 = vld [vmem:[#allocation2 + $0x98] sm:$0xff] }
 0x4cb   :  { %2861 = vmatpush1.msra.mxu0 %v7093_v19  ;;  %2932 = vmatpush1.msra.mxu1 %v7368_v15  ;;  %v7384_v19 = vld [vmem:[#allocation2 + $0x90] sm:$0xff] }
 0x4cc   :  { %2862 = vmatprep.subr.mxu0 %v7097_v20  ;;  %2933 = vmatprep.subr.mxu1 %v7372_v16  ;;  %v7387_v20 = vld [vmem:[#allocation2 + $0x68] sm:$0xff] }
 0x4cd   :  { %2863 = vmatpush1.msra.mxu0 %v7101_v21  ;;  %2934 = vmatpush1.msra.mxu1 %v7376_v17  ;;  %v7390_v21 = vld [vmem:[#allocation2 + $0x78] sm:$0xff] }
 0x4ce   :  { %2864 = vmatprep.subr.mxu0 %v7105_v22  ;;  %2935 = vmatprep.subr.mxu1 %v7380_v18  ;;  %v7396_v22 = vld [vmem:[#allocation2 + $0x70] sm:$0xff] }
 0x4cf   :  { %2865 = vmatpush1.msra.mxu0 %v7109_v23  ;;  %2936 = vmatpush1.msra.mxu1 %v7384_v19  ;;  %v7399_v23 = vld [vmem:[#allocation2 + $0x48] sm:$0xff] }
 0x4d0   :  { %2866 = vmatprep.subr.mxu0 %v7387_v20  ;;  %2937 = vmatprep.subr.mxu1 %v7390_v21 }
 0x4d1   :  { %2867 = vmatpush1.msra.mxu0 %v7393_v2  ;;  %2938 = vmatpush1.msra.mxu1 %v7396_v22 }
 0x4d2   :  { %2868 = vmatprep.subr.mxu0 %v7399_v23  ;;  %2939 = vmatprep.subr.mxu1 %v7402_v56 }
 0x4d3   :  { %2869 = vmatpush1.msra.mxu0 %v7405_v40  ;;  %2902 = vmatprep.mubr.f32.mxu0 %v9563_v34 }
 0x4d4   :  { %2940 = vmatpush1.msra.mxu1 %v7409_v12  ;;  %2973 = vmatprep.mubr.f32.mxu1 %v9563_v34 }
 0x4d5   :  { %2903 = vmatmul.mubr.f32.vlgmr.msra.gmra.mxu0 %v7275_v37  ;;  %2974 = vmatmul.mubr.f32.vlgmr.msra.gmra.mxu1 %v7275_v37  ;;  %v7472_v37 = vld [vmem:[#allocation5 + $0x170] sm:$0xff] }
 0x4d6   :  { %3008 = vmatprep.subr.mxu0 %v7415_v47  ;;  %3079 = vmatprep.subr.mxu1 %v7418_v0  ;;  %9969 = vst [vmem:[#allocation22_spill] sm:$0xff] %v7472_v37 }
 0x4d7   :  { %3009 = vmatpush1.msra.mxu0 %v7421_v24  ;;  %3080 = vmatpush1.msra.mxu1 %v7424_v25 }
 0x4d8   :  { %3010 = vmatprep.subr.mxu0 %v7427_v27  ;;  %3081 = vmatprep.subr.mxu1 %v7430_v41 }
 0x4d9   :  { %3011 = vmatpush1.msra.mxu0 %v7433_v28  ;;  %3082 = vmatpush1.msra.mxu1 %v7436_v29 }
 0x4da   :  { %3012 = vmatprep.subr.mxu0 %v7439_v30  ;;  %3083 = vmatprep.subr.mxu1 %v7442_v60 }
 0x4db   :  { %3013 = vmatpush1.msra.mxu0 %v7445_v31  ;;  %3084 = vmatpush1.msra.mxu1 %v7448_v32 }
 0x4dc   :  { %3014 = vmatprep.subr.mxu0 %v7451_v55  ;;  %3085 = vmatprep.subr.mxu1 %v7454_v49 }
 0x4dd   :  { %3015 = vmatpush1.msra.mxu0 %v7457_v33  ;;  %3086 = vmatpush1.msra.mxu1 %v7460_v6  ;;  %v7475_v33 = vld [vmem:[#allocation5 + $0x148] sm:$0xff]  ;;  %v7478_v6 = vld [vmem:[#allocation5 + $0x158] sm:$0xff] }
 0x4de   :  { %3016 = vmatprep.subr.mxu0 %v7463_v7  ;;  %3087 = vmatprep.subr.mxu1 %v7466_v35  ;;  %9970 = vst [vmem:[#allocation23_spill] sm:$0xff] %v7475_v33  ;;  %9971 = vst [vmem:[#allocation24_spill] sm:$0xff] %v7478_v6  ;;  %v7481_v7 = vld [vmem:[#allocation5 + $0x140] sm:$0xff]  ;;  %v7484_v35 = vld [vmem:[#allocation5 + $0x150] sm:$0xff] }
 0x4df   :  { %3017 = vmatpush1.msra.mxu0 %v7469_v36  ;;  %3088 = vmatpush1.msra.mxu1 %v7472_v37  ;;  %9972 = vst [vmem:[#allocation25_spill] sm:$0xff] %v7481_v7  ;;  %9973 = vst [vmem:[#allocation26_spill] sm:$0xff] %v7484_v35  ;;  %v7487_v36 = vld [vmem:[#allocation5 + $0x128] sm:$0xff]  ;;  %v7490_v37 = vld [vmem:[#allocation5 + $0x138] sm:$0xff] }
 0x4e0   :  { %3018 = vmatprep.subr.mxu0 %v7475_v33  ;;  %3089 = vmatprep.subr.mxu1 %v7478_v6  ;;  %9974 = vst [vmem:[#allocation27_spill] sm:$0xff] %v7487_v36  ;;  %9975 = vst [vmem:[#allocation28_spill] sm:$0xff] %v7490_v37  ;;  %v7493_v33 = vld [vmem:[#allocation5 + $0x120] sm:$0xff]  ;;  %v7496_v6 = vld [vmem:[#allocation5 + $0x130] sm:$0xff] }
 0x4e1   :  { %3019 = vmatpush1.msra.mxu0 %v7481_v7  ;;  %3090 = vmatpush1.msra.mxu1 %v7484_v35  ;;  %9976 = vst [vmem:[#allocation29_spill] sm:$0xff] %v7493_v33  ;;  %9977 = vst [vmem:[#allocation30_spill] sm:$0xff] %v7496_v6  ;;  %v7499_v7 = vld [vmem:[#allocation5 + $0x108] sm:$0xff]  ;;  %v7502_v35 = vld [vmem:[#allocation5 + $0x118] sm:$0xff] }
 0x4e2   :  { %3020 = vmatprep.subr.mxu0 %v7487_v36  ;;  %3091 = vmatprep.subr.mxu1 %v7490_v37  ;;  %9978 = vst [vmem:[#allocation31_spill] sm:$0xff] %v7499_v7  ;;  %9979 = vst [vmem:[#allocation32_spill] sm:$0xff] %v7502_v35  ;;  %v7505_v36 = vld [vmem:[#allocation5 + $0x100] sm:$0xff]  ;;  %v7508_v37 = vld [vmem:[#allocation5 + $0x110] sm:$0xff] }
 0x4e3   :  { %3021 = vmatpush1.msra.mxu0 %v7493_v33  ;;  %3092 = vmatpush1.msra.mxu1 %v7496_v6  ;;  %9980 = vst [vmem:[#allocation33_spill] sm:$0xff] %v7505_v36  ;;  %9981 = vst [vmem:[#allocation34_spill] sm:$0xff] %v7508_v37  ;;  %v7511_v33 = vld [vmem:[#allocation5 + $0xe8] sm:$0xff]  ;;  %v7514_v6 = vld [vmem:[#allocation5 + $0xf8] sm:$0xff] }
 0x4e4   :  { %3022 = vmatprep.subr.mxu0 %v7499_v7  ;;  %3093 = vmatprep.subr.mxu1 %v7502_v35  ;;  %9982 = vst [vmem:[#allocation35_spill] sm:$0xff] %v7511_v33  ;;  %9983 = vst [vmem:[#allocation36_spill] sm:$0xff] %v7514_v6  ;;  %v7517_v7 = vld [vmem:[#allocation5 + $0xe0] sm:$0xff]  ;;  %v7520_v35 = vld [vmem:[#allocation5 + $0xf0] sm:$0xff] }
 0x4e5   :  { %3023 = vmatpush1.msra.mxu0 %v7505_v36  ;;  %3094 = vmatpush1.msra.mxu1 %v7508_v37  ;;  %9984 = vst [vmem:[#allocation37_spill] sm:$0xff] %v7517_v7  ;;  %9985 = vst [vmem:[#allocation38_spill] sm:$0xff] %v7520_v35  ;;  %v7523_v36 = vld [vmem:[#allocation5 + $0xc8] sm:$0xff]  ;;  %v7526_v37 = vld [vmem:[#allocation5 + $0xd8] sm:$0xff] }
 0x4e6   :  { %3024 = vmatprep.subr.mxu0 %v7511_v33  ;;  %3095 = vmatprep.subr.mxu1 %v7514_v6  ;;  %9986 = vst [vmem:[#allocation39_spill] sm:$0xff] %v7523_v36  ;;  %9987 = vst [vmem:[#allocation40_spill] sm:$0xff] %v7526_v37  ;;  %v7529_v33 = vld [vmem:[#allocation5 + $0xc0] sm:$0xff]  ;;  %v7532_v6 = vld [vmem:[#allocation5 + $0xd0] sm:$0xff] }
 0x4e7   :  { %3025 = vmatpush1.msra.mxu0 %v7517_v7  ;;  %3096 = vmatpush1.msra.mxu1 %v7520_v35  ;;  %9988 = vst [vmem:[#allocation41_spill] sm:$0xff] %v7529_v33  ;;  %9989 = vst [vmem:[#allocation42_spill] sm:$0xff] %v7532_v6  ;;  %v7535_v7 = vld [vmem:[#allocation5 + $0xa8] sm:$0xff]  ;;  %v7538_v35 = vld [vmem:[#allocation5 + $0xb8] sm:$0xff] }
 0x4e8   :  { %3026 = vmatprep.subr.mxu0 %v7523_v36  ;;  %3097 = vmatprep.subr.mxu1 %v7526_v37  ;;  %9990 = vst [vmem:[#allocation43_spill] sm:$0xff] %v7535_v7  ;;  %9991 = vst [vmem:[#allocation44_spill] sm:$0xff] %v7538_v35  ;;  %v7541_v36 = vld [vmem:[#allocation5 + $0xa0] sm:$0xff]  ;;  %v7544_v37 = vld [vmem:[#allocation5 + $0xb0] sm:$0xff] }
 0x4e9   :  { %3027 = vmatpush1.msra.mxu0 %v7529_v33  ;;  %3098 = vmatpush1.msra.mxu1 %v7532_v6  ;;  %9992 = vst [vmem:[#allocation45_spill] sm:$0xff] %v7541_v36  ;;  %9993 = vst [vmem:[#allocation46_spill] sm:$0xff] %v7544_v37  ;;  %v7547_v33 = vld [vmem:[#allocation5 + $0x88] sm:$0xff]  ;;  %v7550_v6 = vld [vmem:[#allocation5 + $0x98] sm:$0xff] }
 0x4ea   :  { %3028 = vmatprep.subr.mxu0 %v7535_v7  ;;  %3099 = vmatprep.subr.mxu1 %v7538_v35  ;;  %9994 = vst [vmem:[#allocation47_spill] sm:$0xff] %v7547_v33  ;;  %9995 = vst [vmem:[#allocation48_spill] sm:$0xff] %v7550_v6  ;;  %v7553_v7 = vld [vmem:[#allocation5 + $0x80] sm:$0xff]  ;;  %v7556_v35 = vld [vmem:[#allocation5 + $0x90] sm:$0xff] }
 0x4eb   :  { %3029 = vmatpush1.msra.mxu0 %v7541_v36  ;;  %3100 = vmatpush1.msra.mxu1 %v7544_v37  ;;  %9996 = vst [vmem:[#allocation49_spill] sm:$0xff] %v7553_v7  ;;  %9997 = vst [vmem:[#allocation50_spill] sm:$0xff] %v7556_v35  ;;  %v7559_v36 = vld [vmem:[#allocation5 + $0x68] sm:$0xff]  ;;  %v7562_v37 = vld [vmem:[#allocation5 + $0x78] sm:$0xff] }
 0x4ec   :  { %3030 = vmatprep.subr.mxu0 %v7547_v33  ;;  %3101 = vmatprep.subr.mxu1 %v7550_v6  ;;  %9998 = vst [vmem:[#allocation51_spill] sm:$0xff] %v7559_v36  ;;  %9999 = vst [vmem:[#allocation52_spill] sm:$0xff] %v7562_v37  ;;  %v7565_v33 = vld [vmem:[#allocation5 + $0x60] sm:$0xff]  ;;  %v7568_v6 = vld [vmem:[#allocation5 + $0x70] sm:$0xff] }
 0x4ed   :  { %3031 = vmatpush1.msra.mxu0 %v7553_v7  ;;  %3102 = vmatpush1.msra.mxu1 %v7556_v35  ;;  %10000 = vst [vmem:[#allocation53_spill] sm:$0xff] %v7565_v33  ;;  %10001 = vst [vmem:[#allocation54_spill] sm:$0xff] %v7568_v6  ;;  %v7571_v7 = vld [vmem:[#allocation5 + $0x48] sm:$0xff]  ;;  %v7574_v35 = vld [vmem:[#allocation5 + $0x58] sm:$0xff] }
 0x4ee   :  { %3032 = vmatprep.subr.mxu0 %v7559_v36  ;;  %3103 = vmatprep.subr.mxu1 %v7562_v37  ;;  %10002 = vst [vmem:[#allocation55_spill] sm:$0xff] %v7571_v7  ;;  %10003 = vst [vmem:[#allocation56_spill] sm:$0xff] %v7574_v35  ;;  %v7577_v36 = vld [vmem:[#allocation5 + $0x40] sm:$0xff]  ;;  %v7580_v37 = vld [vmem:[#allocation5 + $0x50] sm:$0xff] }
 0x4ef   :  { %3033 = vmatpush1.msra.mxu0 %v7565_v33  ;;  %3104 = vmatpush1.msra.mxu1 %v7568_v6  ;;  %10004 = vst [vmem:[#allocation57_spill] sm:$0xff] %v7577_v36  ;;  %10005 = vst [vmem:[#allocation58_spill] sm:$0xff] %v7580_v37  ;;  %v7583_v33 = vld [vmem:[#allocation5 + $0x28] sm:$0xff]  ;;  %v7586_v6 = vld [vmem:[#allocation5 + $0x38] sm:$0xff] }
 0x4f0   :  { %3034 = vmatprep.subr.mxu0 %v7571_v7  ;;  %3105 = vmatprep.subr.mxu1 %v7574_v35  ;;  %10006 = vst [vmem:[#allocation59_spill] sm:$0xff] %v7583_v33  ;;  %10007 = vst [vmem:[#allocation60_spill] sm:$0xff] %v7586_v6  ;;  %v7589_v7 = vld [vmem:[#allocation5 + $0x20] sm:$0xff]  ;;  %v7592_v35 = vld [vmem:[#allocation5 + $0x30] sm:$0xff] }
 0x4f1   :  { %3035 = vmatpush1.msra.mxu0 %v7577_v36  ;;  %3106 = vmatpush1.msra.mxu1 %v7580_v37  ;;  %10008 = vst [vmem:[#allocation61_spill] sm:$0xff] %v7589_v7  ;;  %10009 = vst [vmem:[#allocation62_spill] sm:$0xff] %v7592_v35  ;;  %v7595_v36 = vld [vmem:[#allocation5 + $0x8] sm:$0xff]  ;;  %v7598_v37 = vld [vmem:[#allocation5 + $0x18] sm:$0xff] }
 0x4f2   :  { %3036 = vmatprep.subr.mxu0 %v7583_v33  ;;  %3107 = vmatprep.subr.mxu1 %v7586_v6  ;;  %10010 = vst [vmem:[#allocation63_spill] sm:$0xff] %v7595_v36  ;;  %10011 = vst [vmem:[#allocation64_spill] sm:$0xff] %v7598_v37  ;;  %v7601_v33 = vld [vmem:[#allocation5] sm:$0xff]  ;;  %v7604_v6 = vld [vmem:[#allocation5 + $0x10] sm:$0xff] }
 0x4f3   :  { %3037 = vmatpush1.msra.mxu0 %v7589_v7  ;;  %3108 = vmatpush1.msra.mxu1 %v7592_v35  ;;  %10012 = vst [vmem:[#allocation65_spill] sm:$0xff] %v7601_v33  ;;  %10013 = vst [vmem:[#allocation66_spill] sm:$0xff] %v7604_v6  ;;  %v7607_v7 = vld [vmem:[#allocation5 + $0x3e8] sm:$0xff]  ;;  %v7610_v35 = vld [vmem:[#allocation5 + $0x3f8] sm:$0xff] }
 0x4f4   :  { %3038 = vmatprep.subr.mxu0 %v7595_v36  ;;  %3109 = vmatprep.subr.mxu1 %v7598_v37  ;;  %10014 = vst [vmem:[#allocation67_spill] sm:$0xff] %v7607_v7  ;;  %10015 = vst [vmem:[#allocation68_spill] sm:$0xff] %v7610_v35  ;;  %v7613_v36 = vld [vmem:[#allocation5 + $0x3e0] sm:$0xff]  ;;  %v7616_v37 = vld [vmem:[#allocation5 + $0x3f0] sm:$0xff] }
 0x4f5   :  { %3039 = vmatpush1.msra.mxu0 %v7601_v33  ;;  %3110 = vmatpush1.msra.mxu1 %v7604_v6  ;;  %10016 = vst [vmem:[#allocation69_spill] sm:$0xff] %v7613_v36  ;;  %10017 = vst [vmem:[#allocation70_spill] sm:$0xff] %v7616_v37  ;;  %v7619_v33 = vld [vmem:[#allocation5 + $0x3c8] sm:$0xff]  ;;  %v7622_v6 = vld [vmem:[#allocation5 + $0x3d8] sm:$0xff] }
 0x4f6   :  { %3040 = vmatprep.subr.mxu0 %v7607_v7  ;;  %3111 = vmatprep.subr.mxu1 %v7610_v35  ;;  %10018 = vst [vmem:[#allocation71_spill] sm:$0xff] %v7619_v33  ;;  %10019 = vst [vmem:[#allocation72_spill] sm:$0xff] %v7622_v6  ;;  %v7625_v7 = vld [vmem:[#allocation5 + $0x3c0] sm:$0xff]  ;;  %v7628_v35 = vld [vmem:[#allocation5 + $0x3d0] sm:$0xff] }
 0x4f7   :  { %3041 = vmatpush2.msra.mxu0 %v7613_v36  ;;  %3112 = vmatpush2.msra.mxu1 %v7616_v37  ;;  %10020 = vst [vmem:[#allocation73_spill] sm:$0xff] %v7625_v7  ;;  %10021 = vst [vmem:[#allocation74_spill] sm:$0xff] %v7628_v35  ;;  %v7631_v36 = vld [vmem:[#allocation5 + $0x3a8] sm:$0xff]  ;;  %v7634_v37 = vld [vmem:[#allocation5 + $0x3b8] sm:$0xff] }
 0x4f8   :  { %3042 = vmatprep.subr.mxu0 %v7619_v33  ;;  %3113 = vmatprep.subr.mxu1 %v7622_v6  ;;  %10022 = vst [vmem:[#allocation75_spill] sm:$0xff] %v7631_v36  ;;  %10023 = vst [vmem:[#allocation76_spill] sm:$0xff] %v7634_v37  ;;  %v7637_v33 = vld [vmem:[#allocation5 + $0x3a0] sm:$0xff]  ;;  %v7640_v6 = vld [vmem:[#allocation5 + $0x3b0] sm:$0xff] }
 0x4f9   :  { %3043 = vmatpush2.msra.mxu0 %v7625_v7  ;;  %3114 = vmatpush2.msra.mxu1 %v7628_v35  ;;  %10024 = vst [vmem:[#allocation77_spill] sm:$0xff] %v7637_v33  ;;  %10025 = vst [vmem:[#allocation78_spill] sm:$0xff] %v7640_v6  ;;  %v7643_v7 = vld [vmem:[#allocation5 + $0x388] sm:$0xff]  ;;  %v7646_v35 = vld [vmem:[#allocation5 + $0x398] sm:$0xff] }
 0x4fa   :  { %3044 = vmatprep.subr.mxu0 %v7631_v36  ;;  %3115 = vmatprep.subr.mxu1 %v7634_v37  ;;  %10026 = vst [vmem:[#allocation79_spill] sm:$0xff] %v7643_v7  ;;  %10027 = vst [vmem:[#allocation80_spill] sm:$0xff] %v7646_v35  ;;  %v7649_v36 = vld [vmem:[#allocation5 + $0x380] sm:$0xff]  ;;  %v7652_v37 = vld [vmem:[#allocation5 + $0x390] sm:$0xff] }
 0x4fb   :  { %3045 = vmatpush2.msra.mxu0 %v7637_v33  ;;  %3116 = vmatpush2.msra.mxu1 %v7640_v6  ;;  %10028 = vst [vmem:[#allocation81_spill] sm:$0xff] %v7649_v36  ;;  %10029 = vst [vmem:[#allocation82_spill] sm:$0xff] %v7652_v37  ;;  %v7655_v33 = vld [vmem:[#allocation5 + $0x368] sm:$0xff]  ;;  %v7658_v6 = vld [vmem:[#allocation5 + $0x378] sm:$0xff] }
 0x4fc   :  { %3046 = vmatprep.subr.mxu0 %v7643_v7  ;;  %3117 = vmatprep.subr.mxu1 %v7646_v35  ;;  %10030 = vst [vmem:[#allocation83_spill] sm:$0xff] %v7655_v33  ;;  %10031 = vst [vmem:[#allocation84_spill] sm:$0xff] %v7658_v6  ;;  %v7661_v7 = vld [vmem:[#allocation5 + $0x360] sm:$0xff]  ;;  %v7664_v35 = vld [vmem:[#allocation5 + $0x370] sm:$0xff] }
 0x4fd   :  { %3047 = vmatpush2.msra.mxu0 %v7649_v36  ;;  %3118 = vmatpush2.msra.mxu1 %v7652_v37  ;;  %10032 = vst [vmem:[#allocation85_spill] sm:$0xff] %v7661_v7  ;;  %10033 = vst [vmem:[#allocation86_spill] sm:$0xff] %v7664_v35  ;;  %v7667_v36 = vld [vmem:[#allocation5 + $0x348] sm:$0xff]  ;;  %v7670_v37 = vld [vmem:[#allocation5 + $0x358] sm:$0xff] }
 0x4fe   :  { %3048 = vmatprep.subr.mxu0 %v7655_v33  ;;  %3119 = vmatprep.subr.mxu1 %v7658_v6  ;;  %10034 = vst [vmem:[#allocation87_spill] sm:$0xff] %v7667_v36  ;;  %10035 = vst [vmem:[#allocation88_spill] sm:$0xff] %v7670_v37  ;;  %v7673_v33 = vld [vmem:[#allocation5 + $0x340] sm:$0xff]  ;;  %v7676_v6 = vld [vmem:[#allocation5 + $0x350] sm:$0xff] }
 0x4ff   :  { %3049 = vmatpush2.msra.mxu0 %v7661_v7  ;;  %3120 = vmatpush2.msra.mxu1 %v7664_v35  ;;  %10036 = vst [vmem:[#allocation89_spill] sm:$0xff] %v7673_v33  ;;  %10037 = vst [vmem:[#allocation90_spill] sm:$0xff] %v7676_v6  ;;  %v7679_v7 = vld [vmem:[#allocation5 + $0x328] sm:$0xff]  ;;  %v7682_v35 = vld [vmem:[#allocation5 + $0x338] sm:$0xff] }
 0x500   :  { %3050 = vmatprep.subr.mxu0 %v7667_v36  ;;  %3121 = vmatprep.subr.mxu1 %v7670_v37  ;;  %10038 = vst [vmem:[#allocation91_spill] sm:$0xff] %v7679_v7  ;;  %10039 = vst [vmem:[#allocation92_spill] sm:$0xff] %v7682_v35  ;;  %v7685_v36 = vld [vmem:[#allocation5 + $0x320] sm:$0xff]  ;;  %v7688_v37 = vld [vmem:[#allocation5 + $0x330] sm:$0xff] }
 0x501   :  { %3051 = vmatpush2.msra.mxu0 %v7673_v33  ;;  %3122 = vmatpush2.msra.mxu1 %v7676_v6  ;;  %10040 = vst [vmem:[#allocation93_spill] sm:$0xff] %v7685_v36  ;;  %10041 = vst [vmem:[#allocation94_spill] sm:$0xff] %v7688_v37  ;;  %v7691_v33 = vld [vmem:[#allocation5 + $0x308] sm:$0xff]  ;;  %v7694_v6 = vld [vmem:[#allocation5 + $0x318] sm:$0xff] }
 0x502   :  { %3052 = vmatprep.subr.mxu0 %v7679_v7  ;;  %3123 = vmatprep.subr.mxu1 %v7682_v35  ;;  %10042 = vst [vmem:[#allocation95_spill] sm:$0xff] %v7691_v33  ;;  %10043 = vst [vmem:[#allocation96_spill] sm:$0xff] %v7694_v6  ;;  %v7697_v7 = vld [vmem:[#allocation5 + $0x300] sm:$0xff]  ;;  %v7700_v35 = vld [vmem:[#allocation5 + $0x310] sm:$0xff] }
 0x503   :  { %3053 = vmatpush2.msra.mxu0 %v7685_v36  ;;  %3124 = vmatpush2.msra.mxu1 %v7688_v37  ;;  %10044 = vst [vmem:[#allocation97_spill] sm:$0xff] %v7697_v7  ;;  %10045 = vst [vmem:[#allocation98_spill] sm:$0xff] %v7700_v35  ;;  %v7703_v36 = vld [vmem:[#allocation5 + $0x2e8] sm:$0xff]  ;;  %v7706_v37 = vld [vmem:[#allocation5 + $0x2f8] sm:$0xff] }
 0x504   :  { %3054 = vmatprep.subr.mxu0 %v7691_v33  ;;  %3125 = vmatprep.subr.mxu1 %v7694_v6  ;;  %10046 = vst [vmem:[#allocation99_spill] sm:$0xff] %v7703_v36  ;;  %10047 = vst [vmem:[#allocation100_spill] sm:$0xff] %v7706_v37  ;;  %v7709_v33 = vld [vmem:[#allocation5 + $0x2e0] sm:$0xff]  ;;  %v7712_v6 = vld [vmem:[#allocation5 + $0x2f0] sm:$0xff] }
 0x505   :  { %3055 = vmatpush2.msra.mxu0 %v7697_v7  ;;  %3126 = vmatpush2.msra.mxu1 %v7700_v35  ;;  %10048 = vst [vmem:[#allocation101_spill] sm:$0xff] %v7709_v33  ;;  %10049 = vst [vmem:[#allocation102_spill] sm:$0xff] %v7712_v6  ;;  %v7715_v7 = vld [vmem:[#allocation5 + $0x2c8] sm:$0xff]  ;;  %v7718_v35 = vld [vmem:[#allocation5 + $0x2d8] sm:$0xff] }
 0x506   :  { %3056 = vmatprep.subr.mxu0 %v7703_v36  ;;  %3127 = vmatprep.subr.mxu1 %v7706_v37  ;;  %10050 = vst [vmem:[#allocation103_spill] sm:$0xff] %v7715_v7  ;;  %10051 = vst [vmem:[#allocation104_spill] sm:$0xff] %v7718_v35  ;;  %v7721_v36 = vld [vmem:[#allocation5 + $0x2c0] sm:$0xff]  ;;  %v7724_v37 = vld [vmem:[#allocation5 + $0x2d0] sm:$0xff] }
 0x507   :  { %3057 = vmatpush2.msra.mxu0 %v7709_v33  ;;  %3128 = vmatpush2.msra.mxu1 %v7712_v6  ;;  %10052 = vst [vmem:[#allocation105_spill] sm:$0xff] %v7721_v36  ;;  %10053 = vst [vmem:[#allocation106_spill] sm:$0xff] %v7724_v37  ;;  %v7727_v33 = vld [vmem:[#allocation5 + $0x2a8] sm:$0xff]  ;;  %v7730_v6 = vld [vmem:[#allocation5 + $0x2b8] sm:$0xff] }
 0x508   :  { %3058 = vmatprep.subr.mxu0 %v7715_v7  ;;  %3129 = vmatprep.subr.mxu1 %v7718_v35  ;;  %10054 = vst [vmem:[#allocation107_spill] sm:$0xff] %v7727_v33  ;;  %10055 = vst [vmem:[#allocation108_spill] sm:$0xff] %v7730_v6  ;;  %v7733_v7 = vld [vmem:[#allocation5 + $0x2a0] sm:$0xff]  ;;  %v7736_v35 = vld [vmem:[#allocation5 + $0x2b0] sm:$0xff] }
 0x509   :  { %3059 = vmatpush2.msra.mxu0 %v7721_v36  ;;  %3130 = vmatpush2.msra.mxu1 %v7724_v37  ;;  %10056 = vst [vmem:[#allocation109_spill] sm:$0xff] %v7733_v7  ;;  %10057 = vst [vmem:[#allocation110_spill] sm:$0xff] %v7736_v35  ;;  %v7739_v36 = vld [vmem:[#allocation5 + $0x288] sm:$0xff]  ;;  %v7742_v37 = vld [vmem:[#allocation5 + $0x298] sm:$0xff] }
 0x50a   :  { %3060 = vmatprep.subr.mxu0 %v7727_v33  ;;  %3131 = vmatprep.subr.mxu1 %v7730_v6  ;;  %10058 = vst [vmem:[#allocation111_spill] sm:$0xff] %v7739_v36  ;;  %10059 = vst [vmem:[#allocation112_spill] sm:$0xff] %v7742_v37  ;;  %v7745_v33 = vld [vmem:[#allocation5 + $0x280] sm:$0xff]  ;;  %v7748_v6 = vld [vmem:[#allocation5 + $0x290] sm:$0xff] }
 0x50b   :  { %3061 = vmatpush2.msra.mxu0 %v7733_v7  ;;  %3132 = vmatpush2.msra.mxu1 %v7736_v35  ;;  %10060 = vst [vmem:[#allocation113_spill] sm:$0xff] %v7745_v33  ;;  %10061 = vst [vmem:[#allocation114_spill] sm:$0xff] %v7748_v6  ;;  %v7751_v7 = vld [vmem:[#allocation5 + $0x268] sm:$0xff]  ;;  %v7754_v35 = vld [vmem:[#allocation5 + $0x278] sm:$0xff] }
 0x50c   :  { %3062 = vmatprep.subr.mxu0 %v7739_v36  ;;  %3133 = vmatprep.subr.mxu1 %v7742_v37  ;;  %10062 = vst [vmem:[#allocation115_spill] sm:$0xff] %v7751_v7  ;;  %10063 = vst [vmem:[#allocation116_spill] sm:$0xff] %v7754_v35  ;;  %v7757_v36 = vld [vmem:[#allocation5 + $0x260] sm:$0xff]  ;;  %v7760_v37 = vld [vmem:[#allocation5 + $0x270] sm:$0xff] }
 0x50d   :  { %3063 = vmatpush2.msra.mxu0 %v7745_v33  ;;  %3134 = vmatpush2.msra.mxu1 %v7748_v6  ;;  %10064 = vst [vmem:[#allocation117_spill] sm:$0xff] %v7757_v36  ;;  %10065 = vst [vmem:[#allocation118_spill] sm:$0xff] %v7760_v37  ;;  %v7763_v33 = vld [vmem:[#allocation5 + $0x248] sm:$0xff]  ;;  %v7766_v6 = vld [vmem:[#allocation5 + $0x258] sm:$0xff] }
 0x50e   :  { %3064 = vmatprep.subr.mxu0 %v7751_v7  ;;  %3135 = vmatprep.subr.mxu1 %v7754_v35  ;;  %10066 = vst [vmem:[#allocation119_spill] sm:$0xff] %v7763_v33  ;;  %10067 = vst [vmem:[#allocation121_spill] sm:$0xff] %v7766_v6  ;;  %v7769_v7 = vld [vmem:[#allocation5 + $0x240] sm:$0xff]  ;;  %v7772_v35 = vld [vmem:[#allocation5 + $0x250] sm:$0xff] }
 0x50f   :  { %3065 = vmatpush2.msra.mxu0 %v7757_v36  ;;  %3136 = vmatpush2.msra.mxu1 %v7760_v37  ;;  %10068 = vst [vmem:[#allocation122_spill] sm:$0xff] %v7769_v7  ;;  %10069 = vst [vmem:[#allocation123_spill] sm:$0xff] %v7772_v35  ;;  %v7775_v36 = vld [vmem:[#allocation5 + $0x228] sm:$0xff]  ;;  %v7778_v37 = vld [vmem:[#allocation5 + $0x238] sm:$0xff] }
 0x510   :  { %3066 = vmatprep.subr.mxu0 %v7763_v33  ;;  %3137 = vmatprep.subr.mxu1 %v7766_v6  ;;  %10070 = vst [vmem:[#allocation124_spill] sm:$0xff] %v7775_v36  ;;  %10071 = vst [vmem:[#allocation125_spill] sm:$0xff] %v7778_v37  ;;  %v7781_v33 = vld [vmem:[#allocation5 + $0x220] sm:$0xff]  ;;  %v7784_v6 = vld [vmem:[#allocation5 + $0x230] sm:$0xff] }
 0x511   :  { %3067 = vmatpush2.msra.mxu0 %v7769_v7  ;;  %3138 = vmatpush2.msra.mxu1 %v7772_v35  ;;  %10072 = vst [vmem:[#allocation126_spill] sm:$0xff] %v7781_v33  ;;  %10073 = vst [vmem:[#allocation127_spill] sm:$0xff] %v7784_v6  ;;  %v7787_v7 = vld [vmem:[#allocation5 + $0x208] sm:$0xff]  ;;  %v7790_v35 = vld [vmem:[#allocation5 + $0x218] sm:$0xff] }
 0x512   :  { %3068 = vmatprep.subr.mxu0 %v7775_v36  ;;  %3139 = vmatprep.subr.mxu1 %v7778_v37  ;;  %10074 = vst [vmem:[#allocation128_spill] sm:$0xff] %v7787_v7  ;;  %10075 = vst [vmem:[#allocation129_spill] sm:$0xff] %v7790_v35  ;;  %v7793_v36 = vld [vmem:[#allocation5 + $0x200] sm:$0xff]  ;;  %v7796_v37 = vld [vmem:[#allocation5 + $0x210] sm:$0xff] }
 0x513   :  { %3069 = vmatpush2.msra.mxu0 %v7781_v33  ;;  %3140 = vmatpush2.msra.mxu1 %v7784_v6  ;;  %10076 = vst [vmem:[#allocation130_spill] sm:$0xff] %v7793_v36  ;;  %10077 = vst [vmem:[#allocation131_spill] sm:$0xff] %v7796_v37 }
 0x514   :  { %3070 = vmatprep.subr.mxu0 %v7787_v7  ;;  %3141 = vmatprep.subr.mxu1 %v7790_v35 }
 0x515   :  { %3071 = vmatpush2.msra.mxu0 %v7793_v36  ;;  %3142 = vmatpush2.msra.mxu1 %v7796_v37 }
 0x516   :  { %3174 = vmatprep.subr.mxu0 %v7253_v63  ;;  %3245 = vmatprep.subr.mxu1 %v7256_v59 }
 0x574   :  { %v2738_v6 = vpop.f32.mrf.mxu0  ;;  %v2809_v32 = vpop.f32.mrf.mxu1 }
 0x575   :  { %v2739_v33 = vadd.f32 %v2738_v6, %v9948_v38  ;;  %v2810_v36 = vadd.f32 %v2809_v32, %v9950_v10 }
 0x576   :  { %v2740_v7 = vpop.f32.mrf.mxu0  ;;  %v2811_v31 = vpop.f32.mrf.mxu1 }
 0x577   :  { %v4328_v49 = vmul.f32 -1.442695, %v2739_v33  ;;  %v2741_v55 = vadd.f32 %v2740_v7, %v9949_v42  ;;  %v4330_v60 = vmul.f32 -1.442695, %v2810_v36  ;;  %v2812_v63 = vadd.f32 %v2811_v31, %v9951_v26  ;;  %v10079_v36 = vld [vmem:[#allocation136_spill] sm:$0xff] }
 0x579   :  { %4527 = vpow2.f32 %v4328_v49  ;;  %v4329_v35 = vmul.f32 -1.442695, %v2741_v55  ;;  %v10078_v55 = vld [vmem:[#allocation135_spill] sm:$0xff] }
 0x57b   :  { %4529 = vpow2.f32 %v4329_v35 }
 0x57c   :  { %4531 = vpow2.f32 %v4330_v60 }
 0x586   :  { %v4528_v37 = vpop.eup %4527 }
 0x587   :  { %v2823_v30 = vadd.f32 1.0, %v4528_v37 }
 0x588   :  { %v4530_v59 = vpop.eup %4529 }
 0x589   :  { %4533 = vrcp.f32 %v2823_v30  ;;  %v2824_v6 = vadd.f32 1.0, %v4530_v59  ;;  %v4532_v33 = vpop.eup %4531  ;;  %v10080_v59 = vld [vmem:[#allocation155_spill] sm:$0xff] }
 0x58a   :  { %4535 = vtanh.f32 %v2812_v63  ;;  %v2825_v28 = vadd.f32 1.0, %v4532_v33 }
 0x58b   :  { %4537 = vrcp.f32 %v2824_v6 }
 0x595   :  { %v2904_v7 = vpop.f32.mrf.mxu0  ;;  %v2975_v63 = vpop.f32.mrf.mxu1 }
 0x596   :  { %v4534_v49 = vpop.eup %4533  ;;  %v2980_v35 = vadd.f32 %v2904_v7, %v10078_v55  ;;  %v2982_v6 = vadd.f32 %v2975_v63, %v10080_v59 }
 0x597   :  { %v4536_v42 = vpop.eup %4535  ;;  %v2906_v38 = vpop.f32.mrf.mxu0 }
 0x598   :  { %v4538_v32 = vpop.eup %4537  ;;  %v4331_v10 = vmul.f32 -1.442695, %v2980_v35  ;;  %v2981_v29 = vadd.f32 %v2906_v38, %v10079_v36  ;;  %v2834_v37 = vmul.f32 %v4536_v42, %v4534_v49  ;;  %v2977_v7 = vpop.f32.mrf.mxu1  ;;  %v4333_v55 = vmul.f32 -1.442695, %v2982_v6  ;;  %v10081_v35 = vld [vmem:[#allocation156_spill] sm:$0xff] }
 0x599   :  { %v2833_v31 = vmul.f32 %v4538_v32, %v7266_v43  ;;  %v2983_v26 = vadd.f32 %v2977_v7, %v10081_v35  ;;  %v7829_v35 = vld [vmem:[#allocation2 + $0x200] sm:$0xff] }
 0x59a   :  { %4539 = vpow2.f32 %v4331_v10  ;;  %v4332_v30 = vmul.f32 -1.442695, %v2981_v29 }
 0x59b   :  { %v7808_v60 = vadd.f32 %v2834_v37, %v2833_v31 }
 0x59c   :  { %4541 = vpow2.f32 %v4332_v30 }
 0x59d   :  { %4543 = vrcp.f32 %v2825_v28 }
 0x59e   :  { %4545 = vtanh.f32 %v7808_v60 }
 0x59f   :  { %4547 = vpow2.f32 %v4333_v55  ;;  %v7821_v55 = vld [vmem:[#allocation2 + $0x220] sm:$0xff] }
 0x5a0   :  { %4549 = vtanh.f32 %v2983_v26 }
 0x5a7   :  { %v4540_v38 = vpop.eup %4539 }
 0x5a8   :  { %v2993_v33 = vadd.f32 1.0, %v4540_v38  ;;  %v7833_v38 = vld [vmem:[#allocation2 + $0x1e8] sm:$0xff] }
 0x5a9   :  { %v4542_v43 = vpop.eup %4541 }
 0x5aa   :  { %v4544_v42 = vpop.eup %4543  ;;  %4551 = vrcp.f32 %v2993_v33  ;;  %v2994_v10 = vadd.f32 1.0, %v4542_v43  ;;  %v7837_v33 = vld [vmem:[#allocation2 + $0x1e0] sm:$0xff]  ;;  %v10101_v43 = vld [vmem:[#allocation28_spill] sm:$0xff] }
 0x5ab   :  { %v4546_v29 = vpop.eup %4545 }
 0x5ac   :  { %4553 = vrcp.f32 %v2994_v10  ;;  %v2837_v28 = vmul.f32 %v4546_v29, %v4544_v42  ;;  %v4548_v49 = vpop.eup %4547  ;;  %v10102_v42 = vld [vmem:[#allocation29_spill] sm:$0xff]  ;;  %v10103_v10 = vld [vmem:[#allocation30_spill] sm:$0xff]  ;;  %v10104_v29 = vld [vmem:[#allocation31_spill] sm:$0xff] }
 0x5ad   :  { %v4550_v32 = vpop.eup %4549  ;;  %v2995_v30 = vadd.f32 1.0, %v4548_v49  ;;  %v10106_v49 = vld [vmem:[#allocation33_spill] sm:$0xff] }
 0x5ae   :  { %3072 = vmatprep.mubr.f32.mxu0 %v2837_v28  ;;  %3143 = vmatprep.mubr.f32.mxu1 %v2837_v28  ;;  %v10105_v28 = vld [vmem:[#allocation32_spill] sm:$0xff] }
 0x5af   :  { %4555 = vrcp.f32 %v2995_v30  ;;  %v10111_v30 = vld [vmem:[#allocation38_spill] sm:$0xff] }
 0x5b7   :  { %v4552_v36 = vpop.eup %4551 }
 0x5b8   :  { %v3004_v31 = vmul.f32 %v4552_v36, %v4550_v32  ;;  %v10107_v32 = vld [vmem:[#allocation34_spill] sm:$0xff]  ;;  %v10108_v36 = vld [vmem:[#allocation35_spill] sm:$0xff] }
 0x5b9   :  { %v4554_v37 = vpop.eup %4553 }
 0x5ba   :  { %v3003_v63 = vmul.f32 %v4554_v37, %v7272_v11  ;;  %v7825_v11 = vld [vmem:[#allocation2 + $0x208] sm:$0xff]  ;;  %v10110_v37 = vld [vmem:[#allocation37_spill] sm:$0xff] }
 0x5bc   :  { %v7814_v59 = vadd.f32 %v3004_v31, %v3003_v63  ;;  %v4556_v26 = vpop.eup %4555  ;;  %v10109_v31 = vld [vmem:[#allocation36_spill] sm:$0xff]  ;;  %v10112_v63 = vld [vmem:[#allocation39_spill] sm:$0xff] }
 0x5be   :  { %4557 = vtanh.f32 %v7814_v59 }
 0x5cb   :  { %v4558_v6 = vpop.eup %4557 }
 0x5cc   :  { %v7817_v7 = vmul.f32 %v4558_v6, %v4556_v26  ;;  %v10113_v26 = vld [vmem:[#allocation40_spill] sm:$0xff]  ;;  %v10114_v6 = vld [vmem:[#allocation41_spill] sm:$0xff] }
 0x5ce   :  { %3073 = vmatmul.mubr.f32.vlgmr.msra.gmra.mxu0 %v7817_v7  ;;  %3144 = vmatmul.mubr.f32.vlgmr.msra.gmra.mxu1 %v7817_v7 }
 0x5cf   :  { %3175 = vmatpush1.msra.mxu0 %v7821_v55  ;;  %3246 = vmatpush1.msra.mxu1 %v7280_v57  ;;  %v7841_v57 = vld [vmem:[#allocation2 + $0x1c8] sm:$0xff] }
 0x5d0   :  { %3176 = vmatprep.subr.mxu0 %v7825_v11  ;;  %3247 = vmatprep.subr.mxu1 %v7284_v50  ;;  %v7845_v50 = vld [vmem:[#allocation2 + $0x1c0] sm:$0xff] }
 0x5d1   :  { %3177 = vmatpush1.msra.mxu0 %v7829_v35  ;;  %3248 = vmatpush1.msra.mxu1 %v7288_v39  ;;  %v7849_v39 = vld [vmem:[#allocation2 + $0x1a8] sm:$0xff] }
 0x5d2   :  { %3178 = vmatprep.subr.mxu0 %v7833_v38  ;;  %3249 = vmatprep.subr.mxu1 %v7292_v45  ;;  %v7853_v45 = vld [vmem:[#allocation2 + $0x1a0] sm:$0xff] }
 0x5d3   :  { %3179 = vmatpush1.msra.mxu0 %v7837_v33  ;;  %3250 = vmatpush1.msra.mxu1 %v7296_v44  ;;  %v7857_v44 = vld [vmem:[#allocation2 + $0x188] sm:$0xff] }
 0x5d4   :  { %3180 = vmatprep.subr.mxu0 %v7841_v57  ;;  %3251 = vmatprep.subr.mxu1 %v7300_v4  ;;  %v7861_v4 = vld [vmem:[#allocation2 + $0x180] sm:$0xff] }
 0x5d5   :  { %3181 = vmatpush1.msra.mxu0 %v7845_v50  ;;  %3252 = vmatpush1.msra.mxu1 %v7304_v3  ;;  %v7865_v3 = vld [vmem:[#allocation2 + $0x168] sm:$0xff] }
 0x5d6   :  { %3182 = vmatprep.subr.mxu0 %v7849_v39  ;;  %3253 = vmatprep.subr.mxu1 %v7308_v62  ;;  %v7869_v62 = vld [vmem:[#allocation2 + $0x160] sm:$0xff] }
 0x5d7   :  { %3183 = vmatpush1.msra.mxu0 %v7853_v45  ;;  %3254 = vmatpush1.msra.mxu1 %v7312_v46  ;;  %v7873_v46 = vld [vmem:[#allocation2 + $0x148] sm:$0xff] }
 0x5d8   :  { %3184 = vmatprep.subr.mxu0 %v7857_v44  ;;  %3255 = vmatprep.subr.mxu1 %v7316_v53  ;;  %v7877_v53 = vld [vmem:[#allocation2 + $0x140] sm:$0xff] }
 0x5d9   :  { %3185 = vmatpush1.msra.mxu0 %v7861_v4  ;;  %3256 = vmatpush1.msra.mxu1 %v7320_v61  ;;  %v7881_v61 = vld [vmem:[#allocation2 + $0x128] sm:$0xff] }
 0x5da   :  { %3186 = vmatprep.subr.mxu0 %v7865_v3  ;;  %3257 = vmatprep.subr.mxu1 %v7324_v58  ;;  %v7885_v58 = vld [vmem:[#allocation2 + $0x120] sm:$0xff] }
 0x5db   :  { %3187 = vmatpush1.msra.mxu0 %v7869_v62  ;;  %3258 = vmatpush1.msra.mxu1 %v7328_v1  ;;  %v7889_v1 = vld [vmem:[#allocation2 + $0x108] sm:$0xff] }
 0x5dc   :  { %3188 = vmatprep.subr.mxu0 %v7873_v46  ;;  %3259 = vmatprep.subr.mxu1 %v7332_v48  ;;  %v7893_v48 = vld [vmem:[#allocation2 + $0x100] sm:$0xff] }
 0x5dd   :  { %3189 = vmatpush1.msra.mxu0 %v7877_v53  ;;  %3260 = vmatpush1.msra.mxu1 %v7336_v54  ;;  %v7897_v54 = vld [vmem:[#allocation2 + $0xe8] sm:$0xff] }
 0x5de   :  { %3190 = vmatprep.subr.mxu0 %v7881_v61  ;;  %3261 = vmatprep.subr.mxu1 %v7340_v52  ;;  %v7901_v52 = vld [vmem:[#allocation2 + $0xe0] sm:$0xff] }
 0x5df   :  { %3191 = vmatpush1.msra.mxu0 %v7885_v58  ;;  %3262 = vmatpush1.msra.mxu1 %v7344_v51  ;;  %v7905_v51 = vld [vmem:[#allocation2 + $0xc8] sm:$0xff] }
 0x5e0   :  { %3192 = vmatprep.subr.mxu0 %v7889_v1  ;;  %3263 = vmatprep.subr.mxu1 %v7348_v5  ;;  %v7909_v5 = vld [vmem:[#allocation2 + $0xc0] sm:$0xff] }
 0x5e1   :  { %3193 = vmatpush1.msra.mxu0 %v7893_v48  ;;  %3264 = vmatpush1.msra.mxu1 %v7352_v8  ;;  %v7913_v8 = vld [vmem:[#allocation2 + $0xa8] sm:$0xff] }
 0x5e2   :  { %3194 = vmatprep.subr.mxu0 %v7897_v54  ;;  %3265 = vmatprep.subr.mxu1 %v7356_v9  ;;  %v7917_v9 = vld [vmem:[#allocation2 + $0xa0] sm:$0xff] }
 0x5e3   :  { %3195 = vmatpush1.msra.mxu0 %v7901_v52  ;;  %3266 = vmatpush1.msra.mxu1 %v7360_v13  ;;  %v7921_v13 = vld [vmem:[#allocation2 + $0x88] sm:$0xff] }
 0x5e4   :  { %3196 = vmatprep.subr.mxu0 %v7905_v51  ;;  %3267 = vmatprep.subr.mxu1 %v7364_v14  ;;  %v7925_v14 = vld [vmem:[#allocation2 + $0x80] sm:$0xff] }
 0x5e5   :  { %3197 = vmatpush1.msra.mxu0 %v7909_v5  ;;  %3268 = vmatpush1.msra.mxu1 %v7368_v15  ;;  %v10082_v15 = vld [vmem:[#allocation143_spill] sm:$0xff] }
 0x5e6   :  { %3198 = vmatprep.subr.mxu0 %v7913_v8  ;;  %3269 = vmatprep.subr.mxu1 %v7372_v16  ;;  %v10083_v16 = vld [vmem:[#allocation144_spill] sm:$0xff] }
 0x5e7   :  { %3199 = vmatpush1.msra.mxu0 %v7917_v9  ;;  %3270 = vmatpush1.msra.mxu1 %v7376_v17  ;;  %v10084_v17 = vld [vmem:[#allocation147_spill] sm:$0xff] }
 0x5e8   :  { %3200 = vmatprep.subr.mxu0 %v7921_v13  ;;  %3271 = vmatprep.subr.mxu1 %v7380_v18  ;;  %v10085_v18 = vld [vmem:[#allocation148_spill] sm:$0xff] }
 0x5e9   :  { %3201 = vmatpush1.msra.mxu0 %v7925_v14  ;;  %3272 = vmatpush1.msra.mxu1 %v7384_v19  ;;  %v10086_v19 = vld [vmem:[#allocation149_spill] sm:$0xff] }
 0x5ea   :  { %3202 = vmatprep.subr.mxu0 %v7387_v20  ;;  %3273 = vmatprep.subr.mxu1 %v7390_v21  ;;  %v10087_v20 = vld [vmem:[#allocation150_spill] sm:$0xff]  ;;  %v10088_v21 = vld [vmem:[#allocation15_spill] sm:$0xff] }
 0x5eb   :  { %3203 = vmatpush1.msra.mxu0 %v7393_v2  ;;  %3274 = vmatpush1.msra.mxu1 %v7396_v22  ;;  %v10089_v2 = vld [vmem:[#allocation16_spill] sm:$0xff]  ;;  %v10090_v22 = vld [vmem:[#allocation17_spill] sm:$0xff] }
 0x5ec   :  { %3204 = vmatprep.subr.mxu0 %v7399_v23  ;;  %3275 = vmatprep.subr.mxu1 %v7402_v56  ;;  %v10091_v23 = vld [vmem:[#allocation18_spill] sm:$0xff]  ;;  %v10092_v56 = vld [vmem:[#allocation19_spill] sm:$0xff] }
 0x5ed   :  { %3205 = vmatpush1.msra.mxu0 %v7405_v40  ;;  %3238 = vmatprep.mubr.f32.mxu0 %v9563_v34  ;;  %v10093_v40 = vld [vmem:[#allocation20_spill] sm:$0xff] }
 0x5ee   :  { %3276 = vmatpush1.msra.mxu1 %v7409_v12  ;;  %3309 = vmatprep.mubr.f32.mxu1 %v9563_v34  ;;  %v10094_v12 = vld [vmem:[#allocation21_spill] sm:$0xff] }
 0x5ef   :  { %3239 = vmatmul.mubr.f32.vlgmr.msra.gmra.mxu0 %v7817_v7  ;;  %3310 = vmatmul.mubr.f32.vlgmr.msra.gmra.mxu1 %v7817_v7  ;;  %v10115_v7 = vld [vmem:[#allocation42_spill] sm:$0xff] }
 0x5f0   :  { %3344 = vmatprep.subr.mxu0 %v7415_v47  ;;  %3415 = vmatprep.subr.mxu1 %v7418_v0  ;;  %v10095_v47 = vld [vmem:[#allocation22_spill] sm:$0xff]  ;;  %v10096_v0 = vld [vmem:[#allocation23_spill] sm:$0xff] }
 0x5f1   :  { %3345 = vmatpush1.msra.mxu0 %v7421_v24  ;;  %3416 = vmatpush1.msra.mxu1 %v7424_v25  ;;  %v10097_v24 = vld [vmem:[#allocation24_spill] sm:$0xff]  ;;  %v10098_v25 = vld [vmem:[#allocation25_spill] sm:$0xff] }
 0x5f2   :  { %3346 = vmatprep.subr.mxu0 %v7427_v27  ;;  %3417 = vmatprep.subr.mxu1 %v7430_v41  ;;  %v10099_v27 = vld [vmem:[#allocation26_spill] sm:$0xff]  ;;  %v10100_v41 = vld [vmem:[#allocation27_spill] sm:$0xff] }
 0x5f3   :  { %3347 = vmatpush1.msra.mxu0 %v10082_v15  ;;  %3418 = vmatpush1.msra.mxu1 %v10083_v16  ;;  %v10116_v15 = vld [vmem:[#allocation43_spill] sm:$0xff]  ;;  %v10117_v16 = vld [vmem:[#allocation44_spill] sm:$0xff] }
 0x5f4   :  { %3348 = vmatprep.subr.mxu0 %v10084_v17  ;;  %3419 = vmatprep.subr.mxu1 %v10085_v18  ;;  %v10118_v17 = vld [vmem:[#allocation45_spill] sm:$0xff]  ;;  %v10119_v18 = vld [vmem:[#allocation46_spill] sm:$0xff] }
 0x5f5   :  { %3349 = vmatpush1.msra.mxu0 %v10086_v19  ;;  %3420 = vmatpush1.msra.mxu1 %v10087_v20  ;;  %v10120_v19 = vld [vmem:[#allocation47_spill] sm:$0xff]  ;;  %v10121_v20 = vld [vmem:[#allocation48_spill] sm:$0xff] }
 0x5f6   :  { %3350 = vmatprep.subr.mxu0 %v10088_v21  ;;  %3421 = vmatprep.subr.mxu1 %v10089_v2  ;;  %v10122_v21 = vld [vmem:[#allocation49_spill] sm:$0xff]  ;;  %v10123_v2 = vld [vmem:[#allocation50_spill] sm:$0xff] }
 0x5f7   :  { %3351 = vmatpush1.msra.mxu0 %v10090_v22  ;;  %3422 = vmatpush1.msra.mxu1 %v10091_v23  ;;  %v10124_v22 = vld [vmem:[#allocation51_spill] sm:$0xff]  ;;  %v10125_v23 = vld [vmem:[#allocation52_spill] sm:$0xff] }
 0x5f8   :  { %3352 = vmatprep.subr.mxu0 %v10092_v56  ;;  %3423 = vmatprep.subr.mxu1 %v10093_v40  ;;  %v10126_v56 = vld [vmem:[#allocation53_spill] sm:$0xff]  ;;  %v10127_v40 = vld [vmem:[#allocation54_spill] sm:$0xff] }
 0x5f9   :  { %3353 = vmatpush1.msra.mxu0 %v10094_v12  ;;  %3424 = vmatpush1.msra.mxu1 %v10095_v47  ;;  %v10128_v12 = vld [vmem:[#allocation55_spill] sm:$0xff]  ;;  %v10129_v47 = vld [vmem:[#allocation56_spill] sm:$0xff] }
 0x5fa   :  { %3354 = vmatprep.subr.mxu0 %v10096_v0  ;;  %3425 = vmatprep.subr.mxu1 %v10097_v24  ;;  %v10130_v0 = vld [vmem:[#allocation57_spill] sm:$0xff]  ;;  %v10131_v24 = vld [vmem:[#allocation58_spill] sm:$0xff] }
 0x5fb   :  { %3355 = vmatpush1.msra.mxu0 %v10098_v25  ;;  %3426 = vmatpush1.msra.mxu1 %v10099_v27  ;;  %v10132_v25 = vld [vmem:[#allocation59_spill] sm:$0xff]  ;;  %v10133_v27 = vld [vmem:[#allocation60_spill] sm:$0xff] }
 0x5fc   :  { %3356 = vmatprep.subr.mxu0 %v10100_v41  ;;  %3427 = vmatprep.subr.mxu1 %v10101_v43  ;;  %v10134_v41 = vld [vmem:[#allocation61_spill] sm:$0xff]  ;;  %v10135_v43 = vld [vmem:[#allocation62_spill] sm:$0xff] }
 0x5fd   :  { %3357 = vmatpush1.msra.mxu0 %v10102_v42  ;;  %3428 = vmatpush1.msra.mxu1 %v10103_v10  ;;  %v10136_v42 = vld [vmem:[#allocation63_spill] sm:$0xff]  ;;  %v10137_v10 = vld [vmem:[#allocation64_spill] sm:$0xff] }
 0x5fe   :  { %3358 = vmatprep.subr.mxu0 %v10104_v29  ;;  %3429 = vmatprep.subr.mxu1 %v10105_v28  ;;  %v10138_v29 = vld [vmem:[#allocation65_spill] sm:$0xff]  ;;  %v10139_v28 = vld [vmem:[#allocation66_spill] sm:$0xff] }
 0x5ff   :  { %3359 = vmatpush1.msra.mxu0 %v10106_v49  ;;  %3430 = vmatpush1.msra.mxu1 %v10107_v32  ;;  %v10140_v49 = vld [vmem:[#allocation67_spill] sm:$0xff]  ;;  %v10141_v32 = vld [vmem:[#allocation68_spill] sm:$0xff] }
 0x600   :  { %3360 = vmatprep.subr.mxu0 %v10108_v36  ;;  %3431 = vmatprep.subr.mxu1 %v10109_v31  ;;  %v10142_v36 = vld [vmem:[#allocation69_spill] sm:$0xff]  ;;  %v10143_v31 = vld [vmem:[#allocation70_spill] sm:$0xff] }
 0x601   :  { %3361 = vmatpush1.msra.mxu0 %v10110_v37  ;;  %3432 = vmatpush1.msra.mxu1 %v10111_v30  ;;  %v10144_v37 = vld [vmem:[#allocation71_spill] sm:$0xff]  ;;  %v10145_v30 = vld [vmem:[#allocation72_spill] sm:$0xff] }
 0x602   :  { %3362 = vmatprep.subr.mxu0 %v10112_v63  ;;  %3433 = vmatprep.subr.mxu1 %v10113_v26  ;;  %v10146_v63 = vld [vmem:[#allocation73_spill] sm:$0xff]  ;;  %v10147_v26 = vld [vmem:[#allocation74_spill] sm:$0xff] }
 0x603   :  { %3363 = vmatpush1.msra.mxu0 %v10114_v6  ;;  %3434 = vmatpush1.msra.mxu1 %v10115_v7  ;;  %v10148_v6 = vld [vmem:[#allocation75_spill] sm:$0xff]  ;;  %v10149_v7 = vld [vmem:[#allocation76_spill] sm:$0xff] }
 0x604   :  { %3364 = vmatprep.subr.mxu0 %v10116_v15  ;;  %3435 = vmatprep.subr.mxu1 %v10117_v16  ;;  %v10150_v15 = vld [vmem:[#allocation77_spill] sm:$0xff]  ;;  %v10151_v16 = vld [vmem:[#allocation78_spill] sm:$0xff] }
 0x605   :  { %3365 = vmatpush1.msra.mxu0 %v10118_v17  ;;  %3436 = vmatpush1.msra.mxu1 %v10119_v18  ;;  %v10152_v17 = vld [vmem:[#allocation79_spill] sm:$0xff]  ;;  %v10153_v18 = vld [vmem:[#allocation80_spill] sm:$0xff] }
 0x606   :  { %3366 = vmatprep.subr.mxu0 %v10120_v19  ;;  %3437 = vmatprep.subr.mxu1 %v10121_v20  ;;  %v10154_v19 = vld [vmem:[#allocation81_spill] sm:$0xff]  ;;  %v10155_v20 = vld [vmem:[#allocation82_spill] sm:$0xff] }
 0x607   :  { %3367 = vmatpush1.msra.mxu0 %v10122_v21  ;;  %3438 = vmatpush1.msra.mxu1 %v10123_v2  ;;  %v10156_v21 = vld [vmem:[#allocation83_spill] sm:$0xff]  ;;  %v10157_v2 = vld [vmem:[#allocation84_spill] sm:$0xff] }
 0x608   :  { %3368 = vmatprep.subr.mxu0 %v10124_v22  ;;  %3439 = vmatprep.subr.mxu1 %v10125_v23  ;;  %v10158_v22 = vld [vmem:[#allocation85_spill] sm:$0xff]  ;;  %v10159_v23 = vld [vmem:[#allocation86_spill] sm:$0xff] }
 0x609   :  { %3369 = vmatpush1.msra.mxu0 %v10126_v56  ;;  %3440 = vmatpush1.msra.mxu1 %v10127_v40  ;;  %v10160_v56 = vld [vmem:[#allocation87_spill] sm:$0xff]  ;;  %v10161_v40 = vld [vmem:[#allocation88_spill] sm:$0xff] }
 0x60a   :  { %3370 = vmatprep.subr.mxu0 %v10128_v12  ;;  %3441 = vmatprep.subr.mxu1 %v10129_v47  ;;  %v10162_v12 = vld [vmem:[#allocation89_spill] sm:$0xff]  ;;  %v10163_v47 = vld [vmem:[#allocation90_spill] sm:$0xff] }
 0x60b   :  { %3371 = vmatpush1.msra.mxu0 %v10130_v0  ;;  %3442 = vmatpush1.msra.mxu1 %v10131_v24  ;;  %v10164_v0 = vld [vmem:[#allocation91_spill] sm:$0xff]  ;;  %v10165_v24 = vld [vmem:[#allocation92_spill] sm:$0xff] }
 0x60c   :  { %3372 = vmatprep.subr.mxu0 %v10132_v25  ;;  %3443 = vmatprep.subr.mxu1 %v10133_v27  ;;  %v10166_v25 = vld [vmem:[#allocation93_spill] sm:$0xff]  ;;  %v10167_v27 = vld [vmem:[#allocation94_spill] sm:$0xff] }
 0x60d   :  { %3373 = vmatpush1.msra.mxu0 %v10134_v41  ;;  %3444 = vmatpush1.msra.mxu1 %v10135_v43  ;;  %v10168_v41 = vld [vmem:[#allocation95_spill] sm:$0xff]  ;;  %v10169_v43 = vld [vmem:[#allocation96_spill] sm:$0xff] }
 0x60e   :  { %3374 = vmatprep.subr.mxu0 %v10136_v42  ;;  %3445 = vmatprep.subr.mxu1 %v10137_v10  ;;  %v10170_v42 = vld [vmem:[#allocation97_spill] sm:$0xff]  ;;  %v10171_v10 = vld [vmem:[#allocation98_spill] sm:$0xff] }
 0x60f   :  { %3375 = vmatpush1.msra.mxu0 %v10138_v29  ;;  %3446 = vmatpush1.msra.mxu1 %v10139_v28  ;;  %v10172_v29 = vld [vmem:[#allocation99_spill] sm:$0xff]  ;;  %v10173_v28 = vld [vmem:[#allocation100_spill] sm:$0xff] }
 0x610   :  { %3376 = vmatprep.subr.mxu0 %v10140_v49  ;;  %3447 = vmatprep.subr.mxu1 %v10141_v32  ;;  %v10174_v49 = vld [vmem:[#allocation101_spill] sm:$0xff]  ;;  %v10175_v32 = vld [vmem:[#allocation102_spill] sm:$0xff] }
 0x611   :  { %3377 = vmatpush2.msra.mxu0 %v10142_v36  ;;  %3448 = vmatpush2.msra.mxu1 %v10143_v31  ;;  %v10176_v36 = vld [vmem:[#allocation103_spill] sm:$0xff]  ;;  %v10177_v31 = vld [vmem:[#allocation104_spill] sm:$0xff] }
 0x612   :  { %3378 = vmatprep.subr.mxu0 %v10144_v37  ;;  %3449 = vmatprep.subr.mxu1 %v10145_v30  ;;  %v10178_v37 = vld [vmem:[#allocation105_spill] sm:$0xff]  ;;  %v10179_v30 = vld [vmem:[#allocation106_spill] sm:$0xff] }
 0x613   :  { %3379 = vmatpush2.msra.mxu0 %v10146_v63  ;;  %3450 = vmatpush2.msra.mxu1 %v10147_v26  ;;  %v10180_v63 = vld [vmem:[#allocation107_spill] sm:$0xff]  ;;  %v10181_v26 = vld [vmem:[#allocation108_spill] sm:$0xff] }
 0x614   :  { %3380 = vmatprep.subr.mxu0 %v10148_v6  ;;  %3451 = vmatprep.subr.mxu1 %v10149_v7  ;;  %v10182_v6 = vld [vmem:[#allocation109_spill] sm:$0xff]  ;;  %v10183_v7 = vld [vmem:[#allocation110_spill] sm:$0xff] }
 0x615   :  { %3381 = vmatpush2.msra.mxu0 %v10150_v15  ;;  %3452 = vmatpush2.msra.mxu1 %v10151_v16  ;;  %v10184_v15 = vld [vmem:[#allocation111_spill] sm:$0xff]  ;;  %v10185_v16 = vld [vmem:[#allocation112_spill] sm:$0xff] }
 0x616   :  { %3382 = vmatprep.subr.mxu0 %v10152_v17  ;;  %3453 = vmatprep.subr.mxu1 %v10153_v18  ;;  %v10186_v17 = vld [vmem:[#allocation113_spill] sm:$0xff]  ;;  %v10187_v18 = vld [vmem:[#allocation114_spill] sm:$0xff] }
 0x617   :  { %3383 = vmatpush2.msra.mxu0 %v10154_v19  ;;  %3454 = vmatpush2.msra.mxu1 %v10155_v20  ;;  %v10188_v19 = vld [vmem:[#allocation115_spill] sm:$0xff]  ;;  %v10189_v20 = vld [vmem:[#allocation116_spill] sm:$0xff] }
 0x618   :  { %3384 = vmatprep.subr.mxu0 %v10156_v21  ;;  %3455 = vmatprep.subr.mxu1 %v10157_v2  ;;  %v10190_v21 = vld [vmem:[#allocation117_spill] sm:$0xff]  ;;  %v10191_v2 = vld [vmem:[#allocation118_spill] sm:$0xff] }
 0x619   :  { %3385 = vmatpush2.msra.mxu0 %v10158_v22  ;;  %3456 = vmatpush2.msra.mxu1 %v10159_v23  ;;  %v10192_v22 = vld [vmem:[#allocation119_spill] sm:$0xff]  ;;  %v10193_v23 = vld [vmem:[#allocation121_spill] sm:$0xff] }
 0x61a   :  { %3386 = vmatprep.subr.mxu0 %v10160_v56  ;;  %3457 = vmatprep.subr.mxu1 %v10161_v40  ;;  %v10194_v56 = vld [vmem:[#allocation122_spill] sm:$0xff]  ;;  %v10195_v40 = vld [vmem:[#allocation123_spill] sm:$0xff] }
 0x61b   :  { %3387 = vmatpush2.msra.mxu0 %v10162_v12  ;;  %3458 = vmatpush2.msra.mxu1 %v10163_v47  ;;  %v10196_v12 = vld [vmem:[#allocation124_spill] sm:$0xff]  ;;  %v10197_v47 = vld [vmem:[#allocation125_spill] sm:$0xff] }
 0x61c   :  { %3388 = vmatprep.subr.mxu0 %v10164_v0  ;;  %3459 = vmatprep.subr.mxu1 %v10165_v24  ;;  %v10198_v0 = vld [vmem:[#allocation126_spill] sm:$0xff]  ;;  %v10199_v24 = vld [vmem:[#allocation127_spill] sm:$0xff] }
 0x61d   :  { %3389 = vmatpush2.msra.mxu0 %v10166_v25  ;;  %3460 = vmatpush2.msra.mxu1 %v10167_v27  ;;  %v10200_v25 = vld [vmem:[#allocation128_spill] sm:$0xff]  ;;  %v10201_v27 = vld [vmem:[#allocation129_spill] sm:$0xff] }
 0x61e   :  { %3390 = vmatprep.subr.mxu0 %v10168_v41  ;;  %3461 = vmatprep.subr.mxu1 %v10169_v43  ;;  %v10202_v41 = vld [vmem:[#allocation130_spill] sm:$0xff]  ;;  %v10203_v43 = vld [vmem:[#allocation131_spill] sm:$0xff] }
 0x61f   :  { %3391 = vmatpush2.msra.mxu0 %v10170_v42  ;;  %3462 = vmatpush2.msra.mxu1 %v10171_v10  ;;  %v8069_v42 = vld [vmem:[#allocation2 + $0x228] sm:$0xff]  ;;  %v8072_v10 = vld [vmem:[#allocation2 + $0x238] sm:$0xff] }
 0x620   :  { %3392 = vmatprep.subr.mxu0 %v10172_v29  ;;  %3463 = vmatprep.subr.mxu1 %v10173_v28  ;;  %v10204_v28 = vld [vmem:[#allocation11_spill] sm:$0xff] }
 0x621   :  { %3393 = vmatpush2.msra.mxu0 %v10174_v49  ;;  %3464 = vmatpush2.msra.mxu1 %v10175_v32 }
 0x622   :  { %3394 = vmatprep.subr.mxu0 %v10176_v36  ;;  %3465 = vmatprep.subr.mxu1 %v10177_v31  ;;  %v10205_v31 = vld [vmem:[#allocation12_spill] sm:$0xff] }
 0x623   :  { %3395 = vmatpush2.msra.mxu0 %v10178_v37  ;;  %3466 = vmatpush2.msra.mxu1 %v10179_v30 }
 0x624   :  { %3396 = vmatprep.subr.mxu0 %v10180_v63  ;;  %3467 = vmatprep.subr.mxu1 %v10181_v26  ;;  %v10206_v26 = vld [vmem:[#allocation13_spill] sm:$0xff] }
 0x625   :  { %3397 = vmatpush2.msra.mxu0 %v10182_v6  ;;  %3468 = vmatpush2.msra.mxu1 %v10183_v7 }
 0x626   :  { %3398 = vmatprep.subr.mxu0 %v10184_v15  ;;  %3469 = vmatprep.subr.mxu1 %v10185_v16 }
 0x627   :  { %3399 = vmatpush2.msra.mxu0 %v10186_v17  ;;  %3470 = vmatpush2.msra.mxu1 %v10187_v18  ;;  %v10207_v17 = vld [vmem:[#allocation14_spill] sm:$0xff] }
 0x628   :  { %3400 = vmatprep.subr.mxu0 %v10188_v19  ;;  %3471 = vmatprep.subr.mxu1 %v10189_v20 }
 0x629   :  { %3401 = vmatpush2.msra.mxu0 %v10190_v21  ;;  %3472 = vmatpush2.msra.mxu1 %v10191_v2 }
 0x62a   :  { %3402 = vmatprep.subr.mxu0 %v10192_v22  ;;  %3473 = vmatprep.subr.mxu1 %v10193_v23 }
 0x62b   :  { %3403 = vmatpush2.msra.mxu0 %v10194_v56  ;;  %3474 = vmatpush2.msra.mxu1 %v10195_v40  ;;  %v10208_v56 = vld [vmem:[#allocation137_spill] sm:$0xff] }
 0x62c   :  { %3404 = vmatprep.subr.mxu0 %v10196_v12  ;;  %3475 = vmatprep.subr.mxu1 %v10197_v47 }
 0x62d   :  { %3405 = vmatpush2.msra.mxu0 %v10198_v0  ;;  %3476 = vmatpush2.msra.mxu1 %v10199_v24 }
 0x62e   :  { %3406 = vmatprep.subr.mxu0 %v10200_v25  ;;  %3477 = vmatprep.subr.mxu1 %v10201_v27  ;;  %v10209_v25 = vld [vmem:[#allocation138_spill] sm:$0xff] }
 0x62f   :  { %3407 = vmatpush2.msra.mxu0 %v10202_v41  ;;  %3478 = vmatpush2.msra.mxu1 %v10203_v43 }
 0x630   :  { %3510 = vmatprep.subr.mxu0 %v8069_v42  ;;  %3581 = vmatprep.subr.mxu1 %v8072_v10 }
 0x68e   :  { %v3074_v29 = vpop.f32.mrf.mxu0  ;;  %v3145_v63 = vpop.f32.mrf.mxu1 }
 0x68f   :  { %v3075_v49 = vadd.f32 %v3074_v29, %v10204_v28  ;;  %v3146_v6 = vadd.f32 %v3145_v63, %v10206_v26 }
 0x690   :  { %v3076_v32 = vpop.f32.mrf.mxu0  ;;  %v3147_v7 = vpop.f32.mrf.mxu1 }
 0x691   :  { %v4334_v36 = vmul.f32 -1.442695, %v3075_v49  ;;  %v3077_v37 = vadd.f32 %v3076_v32, %v10205_v31  ;;  %v4336_v15 = vmul.f32 -1.442695, %v3146_v6  ;;  %v3148_v18 = vadd.f32 %v3147_v7, %v10207_v17  ;;  %v10211_v7 = vld [vmem:[#allocation158_spill] sm:$0xff] }
 0x693   :  { %4559 = vpow2.f32 %v4334_v36  ;;  %v4335_v30 = vmul.f32 -1.442695, %v3077_v37  ;;  %v10210_v37 = vld [vmem:[#allocation157_spill] sm:$0xff] }
 0x695   :  { %4561 = vpow2.f32 %v4335_v30 }
 0x696   :  { %4563 = vpow2.f32 %v4336_v15 }
 0x6a0   :  { %v4560_v16 = vpop.eup %4559 }
 0x6a1   :  { %v3159_v19 = vadd.f32 1.0, %v4560_v16 }
 0x6a2   :  { %v4562_v20 = vpop.eup %4561 }
 0x6a3   :  { %4565 = vrcp.f32 %v3159_v19  ;;  %v3160_v21 = vadd.f32 1.0, %v4562_v20  ;;  %v4564_v2 = vpop.eup %4563 }
 0x6a4   :  { %4567 = vtanh.f32 %v3148_v18  ;;  %v3161_v41 = vadd.f32 1.0, %v4564_v2 }
 0x6a5   :  { %4569 = vrcp.f32 %v3160_v21 }
 0x6af   :  { %v3240_v22 = vpop.f32.mrf.mxu0  ;;  %v3311_v36 = vpop.f32.mrf.mxu1 }
 0x6b0   :  { %v4566_v23 = vpop.eup %4565  ;;  %v3316_v40 = vadd.f32 %v3240_v22, %v10208_v56  ;;  %v3318_v30 = vadd.f32 %v3311_v36, %v10210_v37  ;;  %v8209_v36 = vld [vmem:[#allocation2 + $0x60] sm:$0xff]  ;;  %v8218_v37 = vld [vmem:[#allocation2 + $0x58] sm:$0xff] }
 0x6b1   :  { %v4568_v12 = vpop.eup %4567  ;;  %v3242_v47 = vpop.f32.mrf.mxu0 }
 0x6b2   :  { %v4570_v0 = vpop.eup %4569  ;;  %v4337_v24 = vmul.f32 -1.442695, %v3316_v40  ;;  %v3317_v27 = vadd.f32 %v3242_v47, %v10209_v25  ;;  %v3170_v29 = vmul.f32 %v4568_v12, %v4566_v23  ;;  %v3313_v63 = vpop.f32.mrf.mxu1  ;;  %v4339_v6 = vmul.f32 -1.442695, %v3318_v30  ;;  %v8221_v30 = vld [vmem:[#allocation2 + $0x40] sm:$0xff] }
 0x6b3   :  { %v3169_v43 = vmul.f32 %v4570_v0, %v7808_v60  ;;  %v3319_v15 = vadd.f32 %v3313_v63, %v10211_v7  ;;  %v8225_v63 = vld [vmem:[#allocation2 + $0x50] sm:$0xff]  ;;  %v8234_v7 = vld [vmem:[#allocation5 + $0x1f8] sm:$0xff] }
 0x6b4   :  { %4571 = vpow2.f32 %v4337_v24  ;;  %v4338_v49 = vmul.f32 -1.442695, %v3317_v27 }
 0x6b5   :  { %v8082_v32 = vadd.f32 %v3170_v29, %v3169_v43  ;;  %v8096_v43 = vld [vmem:[#allocation2 + $0x230] sm:$0xff] }
 0x6b6   :  { %4573 = vpow2.f32 %v4338_v49  ;;  %v8104_v29 = vld [vmem:[#allocation2 + $0x210] sm:$0xff]  ;;  %v8108_v49 = vld [vmem:[#allocation2 + $0x1f8] sm:$0xff] }
 0x6b7   :  { %4575 = vrcp.f32 %v3161_v41 }
 0x6b8   :  { %4577 = vtanh.f32 %v8082_v32 }
 0x6b9   :  { %4579 = vpow2.f32 %v4339_v6  ;;  %v8231_v6 = vld [vmem:[#allocation5 + $0x1e8] sm:$0xff] }
 0x6ba   :  { %4581 = vtanh.f32 %v3319_v15  ;;  %v8237_v15 = vld [vmem:[#allocation5 + $0x1e0] sm:$0xff] }
 0x6c1   :  { %v4572_v16 = vpop.eup %4571 }
 0x6c2   :  { %v3329_v18 = vadd.f32 1.0, %v4572_v16  ;;  %v8240_v16 = vld [vmem:[#allocation5 + $0x1f0] sm:$0xff] }
 0x6c3   :  { %v4574_v60 = vpop.eup %4573 }
 0x6c4   :  { %v4576_v19 = vpop.eup %4575  ;;  %4583 = vrcp.f32 %v3329_v18  ;;  %v3330_v20 = vadd.f32 1.0, %v4574_v60  ;;  %v8243_v18 = vld [vmem:[#allocation5 + $0x1c8] sm:$0xff]  ;;  %v8246_v60 = vld [vmem:[#allocation5 + $0x1d8] sm:$0xff] }
 0x6c5   :  { %v4578_v21 = vpop.eup %4577 }
 0x6c6   :  { %4585 = vrcp.f32 %v3330_v20  ;;  %v3173_v2 = vmul.f32 %v4578_v21, %v4576_v19  ;;  %v4580_v22 = vpop.eup %4579  ;;  %v8249_v19 = vld [vmem:[#allocation5 + $0x1c0] sm:$0xff]  ;;  %v8252_v20 = vld [vmem:[#allocation5 + $0x1d0] sm:$0xff]  ;;  %v8255_v21 = vld [vmem:[#allocation5 + $0x1a8] sm:$0xff] }
 0x6c7   :  { %v4582_v23 = vpop.eup %4581  ;;  %v3331_v47 = vadd.f32 1.0, %v4580_v22  ;;  %10212 = vst [vmem:[#allocation132_spill] sm:$0xff] %v8249_v19  ;;  %10213 = vst [vmem:[#allocation133_spill] sm:$0xff] %v8252_v20  ;;  %v8261_v22 = vld [vmem:[#allocation5 + $0x1a0] sm:$0xff] }
 0x6c8   :  { %3408 = vmatprep.mubr.f32.mxu0 %v3173_v2  ;;  %3479 = vmatprep.mubr.f32.mxu1 %v3173_v2  ;;  %10214 = vst [vmem:[#allocation134_spill] sm:$0xff] %v8255_v21  ;;  %v8258_v2 = vld [vmem:[#allocation5 + $0x1b8] sm:$0xff]  ;;  %10216 = vst [vmem:[#allocation139_spill] sm:$0xff] %v8261_v22 }
 0x6c9   :  { %4587 = vrcp.f32 %v3331_v47  ;;  %10215 = vst [vmem:[#allocation120_spill] sm:$0xff] %v8258_v2  ;;  %v8276_v47 = vld [vmem:[#allocation5 + $0x190] sm:$0xff] }
 0x6ca   :  { %10221 = vst [vmem:[#allocation154_spill] sm:$0xff] %v8276_v47 }
 0x6d1   :  { %v4584_v56 = vpop.eup %4583 }
 0x6d2   :  { %v3340_v40 = vmul.f32 %v4584_v56, %v4582_v23  ;;  %v8264_v23 = vld [vmem:[#allocation5 + $0x1b0] sm:$0xff]  ;;  %v8267_v56 = vld [vmem:[#allocation5 + $0x188] sm:$0xff] }
 0x6d3   :  { %v4586_v12 = vpop.eup %4585  ;;  %10217 = vst [vmem:[#allocation140_spill] sm:$0xff] %v8264_v23  ;;  %10218 = vst [vmem:[#allocation151_spill] sm:$0xff] %v8267_v56 }
 0x6d4   :  { %v3339_v0 = vmul.f32 %v4586_v12, %v7814_v59  ;;  %v8100_v59 = vld [vmem:[#allocation2 + $0x218] sm:$0xff]  ;;  %v8273_v12 = vld [vmem:[#allocation5 + $0x180] sm:$0xff] }
 0x6d5   :  { %10220 = vst [vmem:[#allocation153_spill] sm:$0xff] %v8273_v12 }
 0x6d6   :  { %v8088_v24 = vadd.f32 %v3340_v40, %v3339_v0  ;;  %v4588_v25 = vpop.eup %4587  ;;  %v8270_v40 = vld [vmem:[#allocation5 + $0x198] sm:$0xff]  ;;  %v8279_v0 = vld [vmem:[#allocation5 + $0x168] sm:$0xff] }
 0x6d7   :  { %10219 = vst [vmem:[#allocation152_spill] sm:$0xff] %v8270_v40  ;;  %10222 = vst [vmem:[#allocation135_spill] sm:$0xff] %v8279_v0 }
 0x6d8   :  { %4589 = vtanh.f32 %v8088_v24 }
 0x6e5   :  { %v4590_v27 = vpop.eup %4589 }
 0x6e6   :  { %v8091_v41 = vmul.f32 %v4590_v27, %v4588_v25  ;;  %v8282_v25 = vld [vmem:[#allocation5 + $0x178] sm:$0xff]  ;;  %v8285_v27 = vld [vmem:[#allocation5 + $0x160] sm:$0xff] }
 0x6e7   :  { %10223 = vst [vmem:[#allocation136_spill] sm:$0xff] %v8282_v25  ;;  %10224 = vst [vmem:[#allocation155_spill] sm:$0xff] %v8285_v27 }
 0x6e8   :  { %3409 = vmatmul.mubr.f32.vlgmr.msra.gmra.mxu0 %v8091_v41  ;;  %3480 = vmatmul.mubr.f32.vlgmr.msra.gmra.mxu1 %v8091_v41 }
 0x6e9   :  { %3511 = vmatpush1.msra.mxu0 %v7821_v55  ;;  %3582 = vmatpush1.msra.mxu1 %v8096_v43  ;;  %v8112_v55 = vld [vmem:[#allocation2 + $0x1f0] sm:$0xff] }
 0x6ea   :  { %3512 = vmatprep.subr.mxu0 %v7825_v11  ;;  %3583 = vmatprep.subr.mxu1 %v8100_v59  ;;  %v8116_v11 = vld [vmem:[#allocation2 + $0x1d8] sm:$0xff] }
 0x6eb   :  { %3513 = vmatpush1.msra.mxu0 %v7829_v35  ;;  %3584 = vmatpush1.msra.mxu1 %v8104_v29  ;;  %v8120_v35 = vld [vmem:[#allocation2 + $0x1d0] sm:$0xff] }
 0x6ec   :  { %3514 = vmatprep.subr.mxu0 %v7833_v38  ;;  %3585 = vmatprep.subr.mxu1 %v8108_v49  ;;  %v8124_v38 = vld [vmem:[#allocation2 + $0x1b8] sm:$0xff] }
 0x6ed   :  { %3515 = vmatpush1.msra.mxu0 %v7837_v33  ;;  %3586 = vmatpush1.msra.mxu1 %v8112_v55  ;;  %v8128_v33 = vld [vmem:[#allocation2 + $0x1b0] sm:$0xff] }
 0x6ee   :  { %3516 = vmatprep.subr.mxu0 %v7841_v57  ;;  %3587 = vmatprep.subr.mxu1 %v8116_v11  ;;  %v8132_v57 = vld [vmem:[#allocation2 + $0x198] sm:$0xff] }
 0x6ef   :  { %3517 = vmatpush1.msra.mxu0 %v7845_v50  ;;  %3588 = vmatpush1.msra.mxu1 %v8120_v35  ;;  %v8136_v50 = vld [vmem:[#allocation2 + $0x190] sm:$0xff] }
 0x6f0   :  { %3518 = vmatprep.subr.mxu0 %v7849_v39  ;;  %3589 = vmatprep.subr.mxu1 %v8124_v38  ;;  %v8140_v39 = vld [vmem:[#allocation2 + $0x178] sm:$0xff] }
 0x6f1   :  { %3519 = vmatpush1.msra.mxu0 %v7853_v45  ;;  %3590 = vmatpush1.msra.mxu1 %v8128_v33  ;;  %v8144_v45 = vld [vmem:[#allocation2 + $0x170] sm:$0xff] }
 0x6f2   :  { %3520 = vmatprep.subr.mxu0 %v7857_v44  ;;  %3591 = vmatprep.subr.mxu1 %v8132_v57  ;;  %v8148_v44 = vld [vmem:[#allocation2 + $0x158] sm:$0xff] }
 0x6f3   :  { %3521 = vmatpush1.msra.mxu0 %v7861_v4  ;;  %3592 = vmatpush1.msra.mxu1 %v8136_v50  ;;  %v8152_v4 = vld [vmem:[#allocation2 + $0x150] sm:$0xff] }
 0x6f4   :  { %3522 = vmatprep.subr.mxu0 %v7865_v3  ;;  %3593 = vmatprep.subr.mxu1 %v8140_v39  ;;  %v8156_v3 = vld [vmem:[#allocation2 + $0x138] sm:$0xff] }
 0x6f5   :  { %3523 = vmatpush1.msra.mxu0 %v7869_v62  ;;  %3594 = vmatpush1.msra.mxu1 %v8144_v45  ;;  %v8160_v62 = vld [vmem:[#allocation2 + $0x130] sm:$0xff] }
 0x6f6   :  { %3524 = vmatprep.subr.mxu0 %v7873_v46  ;;  %3595 = vmatprep.subr.mxu1 %v8148_v44  ;;  %v8164_v46 = vld [vmem:[#allocation2 + $0x118] sm:$0xff] }
 0x6f7   :  { %3525 = vmatpush1.msra.mxu0 %v7877_v53  ;;  %3596 = vmatpush1.msra.mxu1 %v8152_v4  ;;  %v8168_v53 = vld [vmem:[#allocation2 + $0x110] sm:$0xff] }
 0x6f8   :  { %3526 = vmatprep.subr.mxu0 %v7881_v61  ;;  %3597 = vmatprep.subr.mxu1 %v8156_v3  ;;  %v8172_v61 = vld [vmem:[#allocation2 + $0xf8] sm:$0xff] }
 0x6f9   :  { %3527 = vmatpush1.msra.mxu0 %v7885_v58  ;;  %3598 = vmatpush1.msra.mxu1 %v8160_v62  ;;  %v8176_v58 = vld [vmem:[#allocation2 + $0xf0] sm:$0xff] }
 0x6fa   :  { %3528 = vmatprep.subr.mxu0 %v7889_v1  ;;  %3599 = vmatprep.subr.mxu1 %v8164_v46  ;;  %v8180_v1 = vld [vmem:[#allocation2 + $0xd8] sm:$0xff] }
 0x6fb   :  { %3529 = vmatpush1.msra.mxu0 %v7893_v48  ;;  %3600 = vmatpush1.msra.mxu1 %v8168_v53  ;;  %v8184_v48 = vld [vmem:[#allocation2 + $0xd0] sm:$0xff] }
 0x6fc   :  { %3530 = vmatprep.subr.mxu0 %v7897_v54  ;;  %3601 = vmatprep.subr.mxu1 %v8172_v61  ;;  %v8188_v54 = vld [vmem:[#allocation2 + $0xb8] sm:$0xff] }
 0x6fd   :  { %3531 = vmatpush1.msra.mxu0 %v7901_v52  ;;  %3602 = vmatpush1.msra.mxu1 %v8176_v58  ;;  %v8192_v52 = vld [vmem:[#allocation2 + $0xb0] sm:$0xff] }
 0x6fe   :  { %3532 = vmatprep.subr.mxu0 %v7905_v51  ;;  %3603 = vmatprep.subr.mxu1 %v8180_v1  ;;  %v8196_v51 = vld [vmem:[#allocation2 + $0x98] sm:$0xff] }
 0x6ff   :  { %3533 = vmatpush1.msra.mxu0 %v7909_v5  ;;  %3604 = vmatpush1.msra.mxu1 %v8184_v48  ;;  %v8200_v5 = vld [vmem:[#allocation2 + $0x90] sm:$0xff] }
 0x700   :  { %3534 = vmatprep.subr.mxu0 %v7913_v8  ;;  %3605 = vmatprep.subr.mxu1 %v8188_v54  ;;  %v8203_v8 = vld [vmem:[#allocation2 + $0x68] sm:$0xff] }
 0x701   :  { %3535 = vmatpush1.msra.mxu0 %v7917_v9  ;;  %3606 = vmatpush1.msra.mxu1 %v8192_v52  ;;  %v8206_v9 = vld [vmem:[#allocation2 + $0x78] sm:$0xff] }
 0x702   :  { %3536 = vmatprep.subr.mxu0 %v7921_v13  ;;  %3607 = vmatprep.subr.mxu1 %v8196_v51  ;;  %v8212_v13 = vld [vmem:[#allocation2 + $0x70] sm:$0xff] }
 0x703   :  { %3537 = vmatpush1.msra.mxu0 %v7925_v14  ;;  %3608 = vmatpush1.msra.mxu1 %v8200_v5  ;;  %v8215_v14 = vld [vmem:[#allocation2 + $0x48] sm:$0xff] }
 0x704   :  { %3538 = vmatprep.subr.mxu0 %v8203_v8  ;;  %3609 = vmatprep.subr.mxu1 %v8206_v9 }
 0x705   :  { %3539 = vmatpush1.msra.mxu0 %v8209_v36  ;;  %3610 = vmatpush1.msra.mxu1 %v8212_v13 }
 0x706   :  { %3540 = vmatprep.subr.mxu0 %v8215_v14  ;;  %3611 = vmatprep.subr.mxu1 %v8218_v37 }
 0x707   :  { %3541 = vmatpush1.msra.mxu0 %v8221_v30  ;;  %3574 = vmatprep.mubr.f32.mxu0 %v9563_v34 }
 0x708   :  { %3612 = vmatpush1.msra.mxu1 %v8225_v63  ;;  %3645 = vmatprep.mubr.f32.mxu1 %v9563_v34 }
 0x709   :  { %3575 = vmatmul.mubr.f32.vlgmr.msra.gmra.mxu0 %v8091_v41  ;;  %3646 = vmatmul.mubr.f32.vlgmr.msra.gmra.mxu1 %v8091_v41  ;;  %v8288_v41 = vld [vmem:[#allocation5 + $0x170] sm:$0xff] }
 0x70a   :  { %3680 = vmatprep.subr.mxu0 %v8231_v6  ;;  %3751 = vmatprep.subr.mxu1 %v8234_v7  ;;  %10225 = vst [vmem:[#allocation156_spill] sm:$0xff] %v8288_v41 }
 0x70b   :  { %3681 = vmatpush1.msra.mxu0 %v8237_v15  ;;  %3752 = vmatpush1.msra.mxu1 %v8240_v16 }
 0x70c   :  { %3682 = vmatprep.subr.mxu0 %v8243_v18  ;;  %3753 = vmatprep.subr.mxu1 %v8246_v60 }
 0x70d   :  { %3683 = vmatpush1.msra.mxu0 %v8249_v19  ;;  %3754 = vmatpush1.msra.mxu1 %v8252_v20 }
 0x70e   :  { %3684 = vmatprep.subr.mxu0 %v8255_v21  ;;  %3755 = vmatprep.subr.mxu1 %v8258_v2 }
 0x70f   :  { %3685 = vmatpush1.msra.mxu0 %v8261_v22  ;;  %3756 = vmatpush1.msra.mxu1 %v8264_v23 }
 0x710   :  { %3686 = vmatprep.subr.mxu0 %v8267_v56  ;;  %3757 = vmatprep.subr.mxu1 %v8270_v40 }
 0x711   :  { %3687 = vmatpush1.msra.mxu0 %v8273_v12  ;;  %3758 = vmatpush1.msra.mxu1 %v8276_v47  ;;  %v8291_v12 = vld [vmem:[#allocation5 + $0x148] sm:$0xff]  ;;  %v8294_v47 = vld [vmem:[#allocation5 + $0x158] sm:$0xff] }
 0x712   :  { %3688 = vmatprep.subr.mxu0 %v8279_v0  ;;  %3759 = vmatprep.subr.mxu1 %v8282_v25  ;;  %10226 = vst [vmem:[#allocation143_spill] sm:$0xff] %v8291_v12  ;;  %10227 = vst [vmem:[#allocation144_spill] sm:$0xff] %v8294_v47  ;;  %v8297_v0 = vld [vmem:[#allocation5 + $0x140] sm:$0xff]  ;;  %v8300_v25 = vld [vmem:[#allocation5 + $0x150] sm:$0xff] }
 0x713   :  { %3689 = vmatpush1.msra.mxu0 %v8285_v27  ;;  %3760 = vmatpush1.msra.mxu1 %v8288_v41  ;;  %10228 = vst [vmem:[#allocation147_spill] sm:$0xff] %v8297_v0  ;;  %10229 = vst [vmem:[#allocation148_spill] sm:$0xff] %v8300_v25  ;;  %v8303_v27 = vld [vmem:[#allocation5 + $0x128] sm:$0xff]  ;;  %v8306_v41 = vld [vmem:[#allocation5 + $0x138] sm:$0xff] }
 0x714   :  { %3690 = vmatprep.subr.mxu0 %v8291_v12  ;;  %3761 = vmatprep.subr.mxu1 %v8294_v47  ;;  %10230 = vst [vmem:[#allocation149_spill] sm:$0xff] %v8303_v27  ;;  %10231 = vst [vmem:[#allocation150_spill] sm:$0xff] %v8306_v41  ;;  %v8309_v12 = vld [vmem:[#allocation5 + $0x120] sm:$0xff]  ;;  %v8312_v47 = vld [vmem:[#allocation5 + $0x130] sm:$0xff] }
 0x715   :  { %3691 = vmatpush1.msra.mxu0 %v8297_v0  ;;  %3762 = vmatpush1.msra.mxu1 %v8300_v25  ;;  %10232 = vst [vmem:[#allocation15_spill] sm:$0xff] %v8309_v12  ;;  %10233 = vst [vmem:[#allocation16_spill] sm:$0xff] %v8312_v47  ;;  %v8315_v0 = vld [vmem:[#allocation5 + $0x108] sm:$0xff]  ;;  %v8318_v25 = vld [vmem:[#allocation5 + $0x118] sm:$0xff] }
 0x716   :  { %3692 = vmatprep.subr.mxu0 %v8303_v27  ;;  %3763 = vmatprep.subr.mxu1 %v8306_v41  ;;  %10234 = vst [vmem:[#allocation17_spill] sm:$0xff] %v8315_v0  ;;  %10235 = vst [vmem:[#allocation18_spill] sm:$0xff] %v8318_v25  ;;  %v8321_v27 = vld [vmem:[#allocation5 + $0x100] sm:$0xff]  ;;  %v8324_v41 = vld [vmem:[#allocation5 + $0x110] sm:$0xff] }
 0x717   :  { %3693 = vmatpush1.msra.mxu0 %v8309_v12  ;;  %3764 = vmatpush1.msra.mxu1 %v8312_v47  ;;  %10236 = vst [vmem:[#allocation19_spill] sm:$0xff] %v8321_v27  ;;  %10237 = vst [vmem:[#allocation20_spill] sm:$0xff] %v8324_v41  ;;  %v8327_v12 = vld [vmem:[#allocation5 + $0xe8] sm:$0xff]  ;;  %v8330_v47 = vld [vmem:[#allocation5 + $0xf8] sm:$0xff] }
 0x718   :  { %3694 = vmatprep.subr.mxu0 %v8315_v0  ;;  %3765 = vmatprep.subr.mxu1 %v8318_v25  ;;  %10238 = vst [vmem:[#allocation21_spill] sm:$0xff] %v8327_v12  ;;  %10239 = vst [vmem:[#allocation22_spill] sm:$0xff] %v8330_v47  ;;  %v8333_v0 = vld [vmem:[#allocation5 + $0xe0] sm:$0xff]  ;;  %v8336_v25 = vld [vmem:[#allocation5 + $0xf0] sm:$0xff] }
 0x719   :  { %3695 = vmatpush1.msra.mxu0 %v8321_v27  ;;  %3766 = vmatpush1.msra.mxu1 %v8324_v41  ;;  %10240 = vst [vmem:[#allocation23_spill] sm:$0xff] %v8333_v0  ;;  %10241 = vst [vmem:[#allocation24_spill] sm:$0xff] %v8336_v25  ;;  %v8339_v27 = vld [vmem:[#allocation5 + $0xc8] sm:$0xff]  ;;  %v8342_v41 = vld [vmem:[#allocation5 + $0xd8] sm:$0xff] }
 0x71a   :  { %3696 = vmatprep.subr.mxu0 %v8327_v12  ;;  %3767 = vmatprep.subr.mxu1 %v8330_v47  ;;  %10242 = vst [vmem:[#allocation25_spill] sm:$0xff] %v8339_v27  ;;  %10243 = vst [vmem:[#allocation26_spill] sm:$0xff] %v8342_v41  ;;  %v8345_v12 = vld [vmem:[#allocation5 + $0xc0] sm:$0xff]  ;;  %v8348_v47 = vld [vmem:[#allocation5 + $0xd0] sm:$0xff] }
 0x71b   :  { %3697 = vmatpush1.msra.mxu0 %v8333_v0  ;;  %3768 = vmatpush1.msra.mxu1 %v8336_v25  ;;  %10244 = vst [vmem:[#allocation27_spill] sm:$0xff] %v8345_v12  ;;  %10245 = vst [vmem:[#allocation28_spill] sm:$0xff] %v8348_v47  ;;  %v8351_v0 = vld [vmem:[#allocation5 + $0xa8] sm:$0xff]  ;;  %v8354_v25 = vld [vmem:[#allocation5 + $0xb8] sm:$0xff] }
 0x71c   :  { %3698 = vmatprep.subr.mxu0 %v8339_v27  ;;  %3769 = vmatprep.subr.mxu1 %v8342_v41  ;;  %10246 = vst [vmem:[#allocation29_spill] sm:$0xff] %v8351_v0  ;;  %10247 = vst [vmem:[#allocation30_spill] sm:$0xff] %v8354_v25  ;;  %v8357_v27 = vld [vmem:[#allocation5 + $0xa0] sm:$0xff]  ;;  %v8360_v41 = vld [vmem:[#allocation5 + $0xb0] sm:$0xff] }
 0x71d   :  { %3699 = vmatpush1.msra.mxu0 %v8345_v12  ;;  %3770 = vmatpush1.msra.mxu1 %v8348_v47  ;;  %10248 = vst [vmem:[#allocation31_spill] sm:$0xff] %v8357_v27  ;;  %10249 = vst [vmem:[#allocation32_spill] sm:$0xff] %v8360_v41  ;;  %v8363_v12 = vld [vmem:[#allocation5 + $0x88] sm:$0xff]  ;;  %v8366_v47 = vld [vmem:[#allocation5 + $0x98] sm:$0xff] }
 0x71e   :  { %3700 = vmatprep.subr.mxu0 %v8351_v0  ;;  %3771 = vmatprep.subr.mxu1 %v8354_v25  ;;  %10250 = vst [vmem:[#allocation33_spill] sm:$0xff] %v8363_v12  ;;  %10251 = vst [vmem:[#allocation34_spill] sm:$0xff] %v8366_v47  ;;  %v8369_v0 = vld [vmem:[#allocation5 + $0x80] sm:$0xff]  ;;  %v8372_v25 = vld [vmem:[#allocation5 + $0x90] sm:$0xff] }
 0x71f   :  { %3701 = vmatpush1.msra.mxu0 %v8357_v27  ;;  %3772 = vmatpush1.msra.mxu1 %v8360_v41  ;;  %10252 = vst [vmem:[#allocation35_spill] sm:$0xff] %v8369_v0  ;;  %10253 = vst [vmem:[#allocation36_spill] sm:$0xff] %v8372_v25  ;;  %v8375_v27 = vld [vmem:[#allocation5 + $0x68] sm:$0xff]  ;;  %v8378_v41 = vld [vmem:[#allocation5 + $0x78] sm:$0xff] }
 0x720   :  { %3702 = vmatprep.subr.mxu0 %v8363_v12  ;;  %3773 = vmatprep.subr.mxu1 %v8366_v47  ;;  %10254 = vst [vmem:[#allocation37_spill] sm:$0xff] %v8375_v27  ;;  %10255 = vst [vmem:[#allocation38_spill] sm:$0xff] %v8378_v41  ;;  %v8381_v12 = vld [vmem:[#allocation5 + $0x60] sm:$0xff]  ;;  %v8384_v47 = vld [vmem:[#allocation5 + $0x70] sm:$0xff] }
 0x721   :  { %3703 = vmatpush1.msra.mxu0 %v8369_v0  ;;  %3774 = vmatpush1.msra.mxu1 %v8372_v25  ;;  %10256 = vst [vmem:[#allocation39_spill] sm:$0xff] %v8381_v12  ;;  %10257 = vst [vmem:[#allocation40_spill] sm:$0xff] %v8384_v47  ;;  %v8387_v0 = vld [vmem:[#allocation5 + $0x48] sm:$0xff]  ;;  %v8390_v25 = vld [vmem:[#allocation5 + $0x58] sm:$0xff] }
 0x722   :  { %3704 = vmatprep.subr.mxu0 %v8375_v27  ;;  %3775 = vmatprep.subr.mxu1 %v8378_v41  ;;  %10258 = vst [vmem:[#allocation41_spill] sm:$0xff] %v8387_v0  ;;  %10259 = vst [vmem:[#allocation42_spill] sm:$0xff] %v8390_v25  ;;  %v8393_v27 = vld [vmem:[#allocation5 + $0x40] sm:$0xff]  ;;  %v8396_v41 = vld [vmem:[#allocation5 + $0x50] sm:$0xff] }
 0x723   :  { %3705 = vmatpush1.msra.mxu0 %v8381_v12  ;;  %3776 = vmatpush1.msra.mxu1 %v8384_v47  ;;  %10260 = vst [vmem:[#allocation43_spill] sm:$0xff] %v8393_v27  ;;  %10261 = vst [vmem:[#allocation44_spill] sm:$0xff] %v8396_v41  ;;  %v8399_v12 = vld [vmem:[#allocation5 + $0x28] sm:$0xff]  ;;  %v8402_v47 = vld [vmem:[#allocation5 + $0x38] sm:$0xff] }
 0x724   :  { %3706 = vmatprep.subr.mxu0 %v8387_v0  ;;  %3777 = vmatprep.subr.mxu1 %v8390_v25  ;;  %10262 = vst [vmem:[#allocation45_spill] sm:$0xff] %v8399_v12  ;;  %10263 = vst [vmem:[#allocation46_spill] sm:$0xff] %v8402_v47  ;;  %v8405_v0 = vld [vmem:[#allocation5 + $0x20] sm:$0xff]  ;;  %v8408_v25 = vld [vmem:[#allocation5 + $0x30] sm:$0xff] }
 0x725   :  { %3707 = vmatpush1.msra.mxu0 %v8393_v27  ;;  %3778 = vmatpush1.msra.mxu1 %v8396_v41  ;;  %10264 = vst [vmem:[#allocation47_spill] sm:$0xff] %v8405_v0  ;;  %10265 = vst [vmem:[#allocation48_spill] sm:$0xff] %v8408_v25  ;;  %v8411_v27 = vld [vmem:[#allocation5 + $0x8] sm:$0xff]  ;;  %v8414_v41 = vld [vmem:[#allocation5 + $0x18] sm:$0xff] }
 0x726   :  { %3708 = vmatprep.subr.mxu0 %v8399_v12  ;;  %3779 = vmatprep.subr.mxu1 %v8402_v47  ;;  %10266 = vst [vmem:[#allocation49_spill] sm:$0xff] %v8411_v27  ;;  %10267 = vst [vmem:[#allocation50_spill] sm:$0xff] %v8414_v41  ;;  %v8417_v12 = vld [vmem:[#allocation5] sm:$0xff]  ;;  %v8420_v47 = vld [vmem:[#allocation5 + $0x10] sm:$0xff] }
 0x727   :  { %3709 = vmatpush1.msra.mxu0 %v8405_v0  ;;  %3780 = vmatpush1.msra.mxu1 %v8408_v25  ;;  %10268 = vst [vmem:[#allocation51_spill] sm:$0xff] %v8417_v12  ;;  %10269 = vst [vmem:[#allocation52_spill] sm:$0xff] %v8420_v47  ;;  %v8423_v0 = vld [vmem:[#allocation5 + $0x3e8] sm:$0xff]  ;;  %v8426_v25 = vld [vmem:[#allocation5 + $0x3f8] sm:$0xff] }
 0x728   :  { %3710 = vmatprep.subr.mxu0 %v8411_v27  ;;  %3781 = vmatprep.subr.mxu1 %v8414_v41  ;;  %10270 = vst [vmem:[#allocation53_spill] sm:$0xff] %v8423_v0  ;;  %10271 = vst [vmem:[#allocation54_spill] sm:$0xff] %v8426_v25  ;;  %v8429_v27 = vld [vmem:[#allocation5 + $0x3e0] sm:$0xff]  ;;  %v8432_v41 = vld [vmem:[#allocation5 + $0x3f0] sm:$0xff] }
 0x729   :  { %3711 = vmatpush1.msra.mxu0 %v8417_v12  ;;  %3782 = vmatpush1.msra.mxu1 %v8420_v47  ;;  %10272 = vst [vmem:[#allocation55_spill] sm:$0xff] %v8429_v27  ;;  %10273 = vst [vmem:[#allocation56_spill] sm:$0xff] %v8432_v41  ;;  %v8435_v12 = vld [vmem:[#allocation5 + $0x3c8] sm:$0xff]  ;;  %v8438_v47 = vld [vmem:[#allocation5 + $0x3d8] sm:$0xff] }
 0x72a   :  { %3712 = vmatprep.subr.mxu0 %v8423_v0  ;;  %3783 = vmatprep.subr.mxu1 %v8426_v25  ;;  %10274 = vst [vmem:[#allocation57_spill] sm:$0xff] %v8435_v12  ;;  %10275 = vst [vmem:[#allocation58_spill] sm:$0xff] %v8438_v47  ;;  %v8441_v0 = vld [vmem:[#allocation5 + $0x3c0] sm:$0xff]  ;;  %v8444_v25 = vld [vmem:[#allocation5 + $0x3d0] sm:$0xff] }
 0x72b   :  { %3713 = vmatpush2.msra.mxu0 %v8429_v27  ;;  %3784 = vmatpush2.msra.mxu1 %v8432_v41  ;;  %10276 = vst [vmem:[#allocation59_spill] sm:$0xff] %v8441_v0  ;;  %10277 = vst [vmem:[#allocation60_spill] sm:$0xff] %v8444_v25  ;;  %v8447_v27 = vld [vmem:[#allocation5 + $0x3a8] sm:$0xff]  ;;  %v8450_v41 = vld [vmem:[#allocation5 + $0x3b8] sm:$0xff] }
 0x72c   :  { %3714 = vmatprep.subr.mxu0 %v8435_v12  ;;  %3785 = vmatprep.subr.mxu1 %v8438_v47  ;;  %10278 = vst [vmem:[#allocation61_spill] sm:$0xff] %v8447_v27  ;;  %10279 = vst [vmem:[#allocation62_spill] sm:$0xff] %v8450_v41  ;;  %v8453_v12 = vld [vmem:[#allocation5 + $0x3a0] sm:$0xff]  ;;  %v8456_v47 = vld [vmem:[#allocation5 + $0x3b0] sm:$0xff] }
 0x72d   :  { %3715 = vmatpush2.msra.mxu0 %v8441_v0  ;;  %3786 = vmatpush2.msra.mxu1 %v8444_v25  ;;  %10280 = vst [vmem:[#allocation63_spill] sm:$0xff] %v8453_v12  ;;  %10281 = vst [vmem:[#allocation64_spill] sm:$0xff] %v8456_v47  ;;  %v8459_v0 = vld [vmem:[#allocation5 + $0x388] sm:$0xff]  ;;  %v8462_v25 = vld [vmem:[#allocation5 + $0x398] sm:$0xff] }
 0x72e   :  { %3716 = vmatprep.subr.mxu0 %v8447_v27  ;;  %3787 = vmatprep.subr.mxu1 %v8450_v41  ;;  %10282 = vst [vmem:[#allocation65_spill] sm:$0xff] %v8459_v0  ;;  %10283 = vst [vmem:[#allocation66_spill] sm:$0xff] %v8462_v25  ;;  %v8465_v27 = vld [vmem:[#allocation5 + $0x380] sm:$0xff]  ;;  %v8468_v41 = vld [vmem:[#allocation5 + $0x390] sm:$0xff] }
 0x72f   :  { %3717 = vmatpush2.msra.mxu0 %v8453_v12  ;;  %3788 = vmatpush2.msra.mxu1 %v8456_v47  ;;  %10284 = vst [vmem:[#allocation67_spill] sm:$0xff] %v8465_v27  ;;  %10285 = vst [vmem:[#allocation68_spill] sm:$0xff] %v8468_v41  ;;  %v8471_v12 = vld [vmem:[#allocation5 + $0x368] sm:$0xff]  ;;  %v8474_v47 = vld [vmem:[#allocation5 + $0x378] sm:$0xff] }
 0x730   :  { %3718 = vmatprep.subr.mxu0 %v8459_v0  ;;  %3789 = vmatprep.subr.mxu1 %v8462_v25  ;;  %10286 = vst [vmem:[#allocation69_spill] sm:$0xff] %v8471_v12  ;;  %10287 = vst [vmem:[#allocation70_spill] sm:$0xff] %v8474_v47  ;;  %v8477_v0 = vld [vmem:[#allocation5 + $0x360] sm:$0xff]  ;;  %v8480_v25 = vld [vmem:[#allocation5 + $0x370] sm:$0xff] }
 0x731   :  { %3719 = vmatpush2.msra.mxu0 %v8465_v27  ;;  %3790 = vmatpush2.msra.mxu1 %v8468_v41  ;;  %10288 = vst [vmem:[#allocation71_spill] sm:$0xff] %v8477_v0  ;;  %10289 = vst [vmem:[#allocation72_spill] sm:$0xff] %v8480_v25  ;;  %v8483_v27 = vld [vmem:[#allocation5 + $0x348] sm:$0xff]  ;;  %v8486_v41 = vld [vmem:[#allocation5 + $0x358] sm:$0xff] }
 0x732   :  { %3720 = vmatprep.subr.mxu0 %v8471_v12  ;;  %3791 = vmatprep.subr.mxu1 %v8474_v47  ;;  %10290 = vst [vmem:[#allocation73_spill] sm:$0xff] %v8483_v27  ;;  %10291 = vst [vmem:[#allocation74_spill] sm:$0xff] %v8486_v41  ;;  %v8489_v12 = vld [vmem:[#allocation5 + $0x340] sm:$0xff]  ;;  %v8492_v47 = vld [vmem:[#allocation5 + $0x350] sm:$0xff] }
 0x733   :  { %3721 = vmatpush2.msra.mxu0 %v8477_v0  ;;  %3792 = vmatpush2.msra.mxu1 %v8480_v25  ;;  %10292 = vst [vmem:[#allocation75_spill] sm:$0xff] %v8489_v12  ;;  %10293 = vst [vmem:[#allocation76_spill] sm:$0xff] %v8492_v47  ;;  %v8495_v0 = vld [vmem:[#allocation5 + $0x328] sm:$0xff]  ;;  %v8498_v25 = vld [vmem:[#allocation5 + $0x338] sm:$0xff] }
 0x734   :  { %3722 = vmatprep.subr.mxu0 %v8483_v27  ;;  %3793 = vmatprep.subr.mxu1 %v8486_v41  ;;  %10294 = vst [vmem:[#allocation77_spill] sm:$0xff] %v8495_v0  ;;  %10295 = vst [vmem:[#allocation78_spill] sm:$0xff] %v8498_v25  ;;  %v8501_v27 = vld [vmem:[#allocation5 + $0x320] sm:$0xff]  ;;  %v8504_v41 = vld [vmem:[#allocation5 + $0x330] sm:$0xff] }
 0x735   :  { %3723 = vmatpush2.msra.mxu0 %v8489_v12  ;;  %3794 = vmatpush2.msra.mxu1 %v8492_v47  ;;  %10296 = vst [vmem:[#allocation79_spill] sm:$0xff] %v8501_v27  ;;  %10297 = vst [vmem:[#allocation80_spill] sm:$0xff] %v8504_v41  ;;  %v8507_v12 = vld [vmem:[#allocation5 + $0x308] sm:$0xff]  ;;  %v8510_v47 = vld [vmem:[#allocation5 + $0x318] sm:$0xff] }
 0x736   :  { %3724 = vmatprep.subr.mxu0 %v8495_v0  ;;  %3795 = vmatprep.subr.mxu1 %v8498_v25  ;;  %10298 = vst [vmem:[#allocation81_spill] sm:$0xff] %v8507_v12  ;;  %10299 = vst [vmem:[#allocation82_spill] sm:$0xff] %v8510_v47  ;;  %v8513_v0 = vld [vmem:[#allocation5 + $0x300] sm:$0xff]  ;;  %v8516_v25 = vld [vmem:[#allocation5 + $0x310] sm:$0xff] }
 0x737   :  { %3725 = vmatpush2.msra.mxu0 %v8501_v27  ;;  %3796 = vmatpush2.msra.mxu1 %v8504_v41  ;;  %10300 = vst [vmem:[#allocation83_spill] sm:$0xff] %v8513_v0  ;;  %10301 = vst [vmem:[#allocation84_spill] sm:$0xff] %v8516_v25  ;;  %v8519_v27 = vld [vmem:[#allocation5 + $0x2e8] sm:$0xff]  ;;  %v8522_v41 = vld [vmem:[#allocation5 + $0x2f8] sm:$0xff] }
 0x738   :  { %3726 = vmatprep.subr.mxu0 %v8507_v12  ;;  %3797 = vmatprep.subr.mxu1 %v8510_v47  ;;  %10302 = vst [vmem:[#allocation85_spill] sm:$0xff] %v8519_v27  ;;  %10303 = vst [vmem:[#allocation86_spill] sm:$0xff] %v8522_v41  ;;  %v8525_v12 = vld [vmem:[#allocation5 + $0x2e0] sm:$0xff]  ;;  %v8528_v47 = vld [vmem:[#allocation5 + $0x2f0] sm:$0xff] }
 0x739   :  { %3727 = vmatpush2.msra.mxu0 %v8513_v0  ;;  %3798 = vmatpush2.msra.mxu1 %v8516_v25  ;;  %10304 = vst [vmem:[#allocation87_spill] sm:$0xff] %v8525_v12  ;;  %10305 = vst [vmem:[#allocation88_spill] sm:$0xff] %v8528_v47  ;;  %v8531_v0 = vld [vmem:[#allocation5 + $0x2c8] sm:$0xff]  ;;  %v8534_v25 = vld [vmem:[#allocation5 + $0x2d8] sm:$0xff] }
 0x73a   :  { %3728 = vmatprep.subr.mxu0 %v8519_v27  ;;  %3799 = vmatprep.subr.mxu1 %v8522_v41  ;;  %10306 = vst [vmem:[#allocation89_spill] sm:$0xff] %v8531_v0  ;;  %10307 = vst [vmem:[#allocation90_spill] sm:$0xff] %v8534_v25  ;;  %v8537_v27 = vld [vmem:[#allocation5 + $0x2c0] sm:$0xff]  ;;  %v8540_v41 = vld [vmem:[#allocation5 + $0x2d0] sm:$0xff] }
 0x73b   :  { %3729 = vmatpush2.msra.mxu0 %v8525_v12  ;;  %3800 = vmatpush2.msra.mxu1 %v8528_v47  ;;  %10308 = vst [vmem:[#allocation91_spill] sm:$0xff] %v8537_v27  ;;  %10309 = vst [vmem:[#allocation92_spill] sm:$0xff] %v8540_v41  ;;  %v8543_v12 = vld [vmem:[#allocation5 + $0x2a8] sm:$0xff]  ;;  %v8546_v47 = vld [vmem:[#allocation5 + $0x2b8] sm:$0xff] }
 0x73c   :  { %3730 = vmatprep.subr.mxu0 %v8531_v0  ;;  %3801 = vmatprep.subr.mxu1 %v8534_v25  ;;  %10310 = vst [vmem:[#allocation93_spill] sm:$0xff] %v8543_v12  ;;  %10311 = vst [vmem:[#allocation94_spill] sm:$0xff] %v8546_v47  ;;  %v8549_v0 = vld [vmem:[#allocation5 + $0x2a0] sm:$0xff]  ;;  %v8552_v25 = vld [vmem:[#allocation5 + $0x2b0] sm:$0xff] }
 0x73d   :  { %3731 = vmatpush2.msra.mxu0 %v8537_v27  ;;  %3802 = vmatpush2.msra.mxu1 %v8540_v41  ;;  %10312 = vst [vmem:[#allocation95_spill] sm:$0xff] %v8549_v0  ;;  %10313 = vst [vmem:[#allocation96_spill] sm:$0xff] %v8552_v25  ;;  %v8555_v27 = vld [vmem:[#allocation5 + $0x288] sm:$0xff]  ;;  %v8558_v41 = vld [vmem:[#allocation5 + $0x298] sm:$0xff] }
 0x73e   :  { %3732 = vmatprep.subr.mxu0 %v8543_v12  ;;  %3803 = vmatprep.subr.mxu1 %v8546_v47  ;;  %10314 = vst [vmem:[#allocation97_spill] sm:$0xff] %v8555_v27  ;;  %10315 = vst [vmem:[#allocation98_spill] sm:$0xff] %v8558_v41  ;;  %v8561_v12 = vld [vmem:[#allocation5 + $0x280] sm:$0xff]  ;;  %v8564_v47 = vld [vmem:[#allocation5 + $0x290] sm:$0xff] }
 0x73f   :  { %3733 = vmatpush2.msra.mxu0 %v8549_v0  ;;  %3804 = vmatpush2.msra.mxu1 %v8552_v25  ;;  %10316 = vst [vmem:[#allocation99_spill] sm:$0xff] %v8561_v12  ;;  %10317 = vst [vmem:[#allocation100_spill] sm:$0xff] %v8564_v47  ;;  %v8567_v0 = vld [vmem:[#allocation5 + $0x268] sm:$0xff]  ;;  %v8570_v25 = vld [vmem:[#allocation5 + $0x278] sm:$0xff] }
 0x740   :  { %3734 = vmatprep.subr.mxu0 %v8555_v27  ;;  %3805 = vmatprep.subr.mxu1 %v8558_v41  ;;  %10318 = vst [vmem:[#allocation101_spill] sm:$0xff] %v8567_v0  ;;  %10319 = vst [vmem:[#allocation102_spill] sm:$0xff] %v8570_v25  ;;  %v8573_v27 = vld [vmem:[#allocation5 + $0x260] sm:$0xff]  ;;  %v8576_v41 = vld [vmem:[#allocation5 + $0x270] sm:$0xff] }
 0x741   :  { %3735 = vmatpush2.msra.mxu0 %v8561_v12  ;;  %3806 = vmatpush2.msra.mxu1 %v8564_v47  ;;  %10320 = vst [vmem:[#allocation103_spill] sm:$0xff] %v8573_v27  ;;  %10321 = vst [vmem:[#allocation104_spill] sm:$0xff] %v8576_v41  ;;  %v8579_v12 = vld [vmem:[#allocation5 + $0x248] sm:$0xff]  ;;  %v8582_v47 = vld [vmem:[#allocation5 + $0x258] sm:$0xff] }
 0x742   :  { %3736 = vmatprep.subr.mxu0 %v8567_v0  ;;  %3807 = vmatprep.subr.mxu1 %v8570_v25  ;;  %10322 = vst [vmem:[#allocation105_spill] sm:$0xff] %v8579_v12  ;;  %10323 = vst [vmem:[#allocation106_spill] sm:$0xff] %v8582_v47  ;;  %v8585_v0 = vld [vmem:[#allocation5 + $0x240] sm:$0xff]  ;;  %v8588_v25 = vld [vmem:[#allocation5 + $0x250] sm:$0xff] }
 0x743   :  { %3737 = vmatpush2.msra.mxu0 %v8573_v27  ;;  %3808 = vmatpush2.msra.mxu1 %v8576_v41  ;;  %10324 = vst [vmem:[#allocation107_spill] sm:$0xff] %v8585_v0  ;;  %10325 = vst [vmem:[#allocation108_spill] sm:$0xff] %v8588_v25  ;;  %v8591_v27 = vld [vmem:[#allocation5 + $0x228] sm:$0xff]  ;;  %v8594_v41 = vld [vmem:[#allocation5 + $0x238] sm:$0xff] }
 0x744   :  { %3738 = vmatprep.subr.mxu0 %v8579_v12  ;;  %3809 = vmatprep.subr.mxu1 %v8582_v47  ;;  %10326 = vst [vmem:[#allocation109_spill] sm:$0xff] %v8591_v27  ;;  %10327 = vst [vmem:[#allocation110_spill] sm:$0xff] %v8594_v41  ;;  %v8597_v12 = vld [vmem:[#allocation5 + $0x220] sm:$0xff]  ;;  %v8600_v47 = vld [vmem:[#allocation5 + $0x230] sm:$0xff] }
 0x745   :  { %3739 = vmatpush2.msra.mxu0 %v8585_v0  ;;  %3810 = vmatpush2.msra.mxu1 %v8588_v25  ;;  %10328 = vst [vmem:[#allocation111_spill] sm:$0xff] %v8597_v12  ;;  %10329 = vst [vmem:[#allocation112_spill] sm:$0xff] %v8600_v47  ;;  %v8603_v0 = vld [vmem:[#allocation5 + $0x208] sm:$0xff]  ;;  %v8606_v25 = vld [vmem:[#allocation5 + $0x218] sm:$0xff] }
 0x746   :  { %3740 = vmatprep.subr.mxu0 %v8591_v27  ;;  %3811 = vmatprep.subr.mxu1 %v8594_v41  ;;  %10330 = vst [vmem:[#allocation113_spill] sm:$0xff] %v8603_v0  ;;  %10331 = vst [vmem:[#allocation114_spill] sm:$0xff] %v8606_v25  ;;  %v8609_v27 = vld [vmem:[#allocation5 + $0x200] sm:$0xff]  ;;  %v8612_v41 = vld [vmem:[#allocation5 + $0x210] sm:$0xff] }
 0x747   :  { %3741 = vmatpush2.msra.mxu0 %v8597_v12  ;;  %3812 = vmatpush2.msra.mxu1 %v8600_v47  ;;  %10332 = vst [vmem:[#allocation115_spill] sm:$0xff] %v8609_v27  ;;  %10333 = vst [vmem:[#allocation116_spill] sm:$0xff] %v8612_v41 }
 0x748   :  { %3742 = vmatprep.subr.mxu0 %v8603_v0  ;;  %3813 = vmatprep.subr.mxu1 %v8606_v25 }
 0x749   :  { %3743 = vmatpush2.msra.mxu0 %v8609_v27  ;;  %3814 = vmatpush2.msra.mxu1 %v8612_v41 }
 0x74a   :  { %3846 = vmatprep.subr.mxu0 %v8069_v42  ;;  %3917 = vmatprep.subr.mxu1 %v8072_v10 }
 0x7a8   :  { %v3410_v47 = vpop.f32.mrf.mxu0  ;;  %v3481_v23 = vpop.f32.mrf.mxu1 }
 0x7a9   :  { %v3411_v12 = vadd.f32 %v3410_v47, %v10204_v28  ;;  %v3482_v27 = vadd.f32 %v3481_v23, %v10206_v26 }
 0x7aa   :  { %v3412_v0 = vpop.f32.mrf.mxu0  ;;  %v3483_v22 = vpop.f32.mrf.mxu1 }
 0x7ab   :  { %v4340_v40 = vmul.f32 -1.442695, %v3411_v12  ;;  %v3413_v56 = vadd.f32 %v3412_v0, %v10205_v31  ;;  %v4342_v2 = vmul.f32 -1.442695, %v3482_v27  ;;  %v3484_v42 = vadd.f32 %v3483_v22, %v10207_v17  ;;  %v10335_v27 = vld [vmem:[#allocation142_spill] sm:$0xff] }
 0x7ad   :  { %4591 = vpow2.f32 %v4340_v40  ;;  %v4341_v25 = vmul.f32 -1.442695, %v3413_v56  ;;  %v10334_v56 = vld [vmem:[#allocation141_spill] sm:$0xff] }
 0x7af   :  { %4593 = vpow2.f32 %v4341_v25 }
 0x7b0   :  { %4595 = vpow2.f32 %v4342_v2 }
 0x7ba   :  { %v4592_v41 = vpop.eup %4591 }
 0x7bb   :  { %v3495_v21 = vadd.f32 1.0, %v4592_v41 }
 0x7bc   :  { %v4594_v10 = vpop.eup %4593 }
 0x7bd   :  { %4597 = vrcp.f32 %v3495_v21  ;;  %v3496_v47 = vadd.f32 1.0, %v4594_v10  ;;  %v4596_v12 = vpop.eup %4595  ;;  %v10336_v10 = vld [vmem:[#allocation159_spill] sm:$0xff] }
 0x7be   :  { %4599 = vtanh.f32 %v3484_v42  ;;  %v3497_v19 = vadd.f32 1.0, %v4596_v12 }
 0x7bf   :  { %4601 = vrcp.f32 %v3496_v47 }
 0x7c9   :  { %v3576_v0 = vpop.f32.mrf.mxu0  ;;  %v3647_v42 = vpop.f32.mrf.mxu1 }
 0x7ca   :  { %v4598_v40 = vpop.eup %4597  ;;  %v3652_v25 = vadd.f32 %v3576_v0, %v10334_v56  ;;  %v3654_v47 = vadd.f32 %v3647_v42, %v10336_v10 }
 0x7cb   :  { %v4600_v31 = vpop.eup %4599  ;;  %v3578_v28 = vpop.f32.mrf.mxu0 }
 0x7cc   :  { %v4602_v23 = vpop.eup %4601  ;;  %v4343_v26 = vmul.f32 -1.442695, %v3652_v25  ;;  %v3653_v20 = vadd.f32 %v3578_v28, %v10335_v27  ;;  %v3506_v41 = vmul.f32 %v4600_v31, %v4598_v40  ;;  %v3649_v0 = vpop.f32.mrf.mxu1  ;;  %v4345_v56 = vmul.f32 -1.442695, %v3654_v47  ;;  %v10337_v25 = vld [vmem:[#allocation160_spill] sm:$0xff] }
 0x7cd   :  { %v3505_v22 = vmul.f32 %v4602_v23, %v8082_v32  ;;  %v3655_v17 = vadd.f32 %v3649_v0, %v10337_v25  ;;  %v5248_v25 = vld [vmem:[#allocation2 + $0x208] sm:$0xff] }
 0x7ce   :  { %4603 = vpow2.f32 %v4343_v26  ;;  %v4344_v21 = vmul.f32 -1.442695, %v3653_v20 }
 0x7cf   :  { %v8624_v2 = vadd.f32 %v3506_v41, %v3505_v22 }
 0x7d0   :  { %4605 = vpow2.f32 %v4344_v21 }
 0x7d1   :  { %4607 = vrcp.f32 %v3497_v19 }
 0x7d2   :  { %4609 = vtanh.f32 %v8624_v2 }
 0x7d3   :  { %4611 = vpow2.f32 %v4345_v56  ;;  %v5247_v56 = vld [vmem:[#allocation2 + $0x220] sm:$0xff] }
 0x7d4   :  { %4613 = vtanh.f32 %v3655_v17 }
 0x7db   :  { %v4604_v28 = vpop.eup %4603 }
 0x7dc   :  { %v3665_v12 = vadd.f32 1.0, %v4604_v28  ;;  %v5250_v28 = vld [vmem:[#allocation2 + $0x1e8] sm:$0xff] }
 0x7dd   :  { %v4606_v32 = vpop.eup %4605 }
 0x7de   :  { %v4608_v31 = vpop.eup %4607  ;;  %4615 = vrcp.f32 %v3665_v12  ;;  %v3666_v26 = vadd.f32 1.0, %v4606_v32  ;;  %v5251_v12 = vld [vmem:[#allocation2 + $0x1e0] sm:$0xff]  ;;  %v5252_v32 = vld [vmem:[#allocation2 + $0x1c8] sm:$0xff] }
 0x7df   :  { %v4610_v20 = vpop.eup %4609 }
 0x7e0   :  { %4617 = vrcp.f32 %v3666_v26  ;;  %v3509_v19 = vmul.f32 %v4610_v20, %v4608_v31  ;;  %v4612_v40 = vpop.eup %4611  ;;  %v10358_v31 = vld [vmem:[#allocation15_spill] sm:$0xff]  ;;  %v10359_v26 = vld [vmem:[#allocation16_spill] sm:$0xff]  ;;  %v10360_v20 = vld [vmem:[#allocation17_spill] sm:$0xff] }
 0x7e1   :  { %v4614_v23 = vpop.eup %4613  ;;  %v3667_v21 = vadd.f32 1.0, %v4612_v40  ;;  %v10362_v40 = vld [vmem:[#allocation19_spill] sm:$0xff] }
 0x7e2   :  { %3744 = vmatprep.mubr.f32.mxu0 %v3509_v19  ;;  %3815 = vmatprep.mubr.f32.mxu1 %v3509_v19  ;;  %v10361_v19 = vld [vmem:[#allocation18_spill] sm:$0xff] }
 0x7e3   :  { %4619 = vrcp.f32 %v3667_v21  ;;  %v10367_v21 = vld [vmem:[#allocation24_spill] sm:$0xff] }
 0x7eb   :  { %v4616_v27 = vpop.eup %4615 }
 0x7ec   :  { %v3676_v22 = vmul.f32 %v4616_v27, %v4614_v23  ;;  %v10363_v23 = vld [vmem:[#allocation20_spill] sm:$0xff]  ;;  %v10364_v27 = vld [vmem:[#allocation21_spill] sm:$0xff] }
 0x7ed   :  { %v4618_v41 = vpop.eup %4617 }
 0x7ee   :  { %v3675_v42 = vmul.f32 %v4618_v41, %v8088_v24  ;;  %v5249_v24 = vld [vmem:[#allocation2 + $0x200] sm:$0xff] }
 0x7ef   :  { %v10366_v41 = vld [vmem:[#allocation23_spill] sm:$0xff] }
 0x7f0   :  { %v8630_v10 = vadd.f32 %v3676_v22, %v3675_v42  ;;  %v4620_v17 = vpop.eup %4619  ;;  %v10365_v22 = vld [vmem:[#allocation22_spill] sm:$0xff]  ;;  %v10368_v42 = vld [vmem:[#allocation25_spill] sm:$0xff] }
 0x7f2   :  { %4621 = vtanh.f32 %v8630_v10 }
 0x7ff   :  { %v4622_v47 = vpop.eup %4621 }
 0x800   :  { %v8633_v0 = vmul.f32 %v4622_v47, %v4620_v17  ;;  %v10369_v17 = vld [vmem:[#allocation26_spill] sm:$0xff]  ;;  %v10370_v47 = vld [vmem:[#allocation27_spill] sm:$0xff] }
 0x802   :  { %3745 = vmatmul.mubr.f32.vlgmr.msra.gmra.mxu0 %v8633_v0  ;;  %3816 = vmatmul.mubr.f32.vlgmr.msra.gmra.mxu1 %v8633_v0 }
 0x803   :  { %3847 = vmatpush1.msra.mxu0 %v5247_v56  ;;  %3918 = vmatpush1.msra.mxu1 %v8096_v43  ;;  %v5253_v43 = vld [vmem:[#allocation2 + $0x1c0] sm:$0xff]  ;;  %v10372_v56 = vld [vmem:[#allocation29_spill] sm:$0xff] }
 0x804   :  { %3848 = vmatprep.subr.mxu0 %v5248_v25  ;;  %3919 = vmatprep.subr.mxu1 %v8100_v59  ;;  %v5254_v59 = vld [vmem:[#allocation2 + $0x1a8] sm:$0xff]  ;;  %v10373_v25 = vld [vmem:[#allocation30_spill] sm:$0xff] }
 0x805   :  { %3849 = vmatpush1.msra.mxu0 %v5249_v24  ;;  %3920 = vmatpush1.msra.mxu1 %v8104_v29  ;;  %v5255_v29 = vld [vmem:[#allocation2 + $0x1a0] sm:$0xff] }
 0x806   :  { %3850 = vmatprep.subr.mxu0 %v5250_v28  ;;  %3921 = vmatprep.subr.mxu1 %v8108_v49  ;;  %v5256_v49 = vld [vmem:[#allocation2 + $0x188] sm:$0xff] }
 0x807   :  { %3851 = vmatpush1.msra.mxu0 %v5251_v12  ;;  %3922 = vmatpush1.msra.mxu1 %v8112_v55  ;;  %v5257_v55 = vld [vmem:[#allocation2 + $0x180] sm:$0xff]  ;;  %v10375_v28 = vld [vmem:[#allocation32_spill] sm:$0xff]  ;;  %v10376_v12 = vld [vmem:[#allocation33_spill] sm:$0xff] }
 0x808   :  { %3852 = vmatprep.subr.mxu0 %v5252_v32  ;;  %3923 = vmatprep.subr.mxu1 %v8116_v11  ;;  %v5258_v11 = vld [vmem:[#allocation2 + $0x168] sm:$0xff]  ;;  %v10377_v32 = vld [vmem:[#allocation34_spill] sm:$0xff] }
 0x809   :  { %3853 = vmatpush1.msra.mxu0 %v5253_v43  ;;  %3924 = vmatpush1.msra.mxu1 %v8120_v35  ;;  %v5259_v35 = vld [vmem:[#allocation2 + $0x160] sm:$0xff] }
 0x80a   :  { %3854 = vmatprep.subr.mxu0 %v5254_v59  ;;  %3925 = vmatprep.subr.mxu1 %v8124_v38  ;;  %v5260_v38 = vld [vmem:[#allocation2 + $0x148] sm:$0xff] }
 0x80b   :  { %3855 = vmatpush1.msra.mxu0 %v5255_v29  ;;  %3926 = vmatpush1.msra.mxu1 %v8128_v33  ;;  %v5261_v33 = vld [vmem:[#allocation2 + $0x140] sm:$0xff]  ;;  %v10379_v59 = vld [vmem:[#allocation36_spill] sm:$0xff]  ;;  %v10380_v29 = vld [vmem:[#allocation37_spill] sm:$0xff] }
 0x80c   :  { %3856 = vmatprep.subr.mxu0 %v5256_v49  ;;  %3927 = vmatprep.subr.mxu1 %v8132_v57  ;;  %v5262_v57 = vld [vmem:[#allocation2 + $0x128] sm:$0xff]  ;;  %v10381_v49 = vld [vmem:[#allocation38_spill] sm:$0xff] }
 0x80d   :  { %3857 = vmatpush1.msra.mxu0 %v5257_v55  ;;  %3928 = vmatpush1.msra.mxu1 %v8136_v50  ;;  %v5263_v50 = vld [vmem:[#allocation2 + $0x120] sm:$0xff] }
 0x80e   :  { %3858 = vmatprep.subr.mxu0 %v5258_v11  ;;  %3929 = vmatprep.subr.mxu1 %v8140_v39  ;;  %v5264_v39 = vld [vmem:[#allocation2 + $0x108] sm:$0xff] }
 0x80f   :  { %3859 = vmatpush1.msra.mxu0 %v5259_v35  ;;  %3930 = vmatpush1.msra.mxu1 %v8144_v45  ;;  %v5265_v45 = vld [vmem:[#allocation2 + $0x100] sm:$0xff]  ;;  %v10383_v11 = vld [vmem:[#allocation40_spill] sm:$0xff]  ;;  %v10384_v35 = vld [vmem:[#allocation41_spill] sm:$0xff] }
 0x810   :  { %3860 = vmatprep.subr.mxu0 %v5260_v38  ;;  %3931 = vmatprep.subr.mxu1 %v8148_v44  ;;  %v5266_v44 = vld [vmem:[#allocation2 + $0xe8] sm:$0xff]  ;;  %v10385_v38 = vld [vmem:[#allocation42_spill] sm:$0xff] }
 0x811   :  { %3861 = vmatpush1.msra.mxu0 %v5261_v33  ;;  %3932 = vmatpush1.msra.mxu1 %v8152_v4  ;;  %v5267_v4 = vld [vmem:[#allocation2 + $0xe0] sm:$0xff] }
 0x812   :  { %3862 = vmatprep.subr.mxu0 %v5262_v57  ;;  %3933 = vmatprep.subr.mxu1 %v8156_v3  ;;  %v5268_v3 = vld [vmem:[#allocation2 + $0xc8] sm:$0xff] }
 0x813   :  { %3863 = vmatpush1.msra.mxu0 %v5263_v50  ;;  %3934 = vmatpush1.msra.mxu1 %v8160_v62  ;;  %v5269_v62 = vld [vmem:[#allocation2 + $0xc0] sm:$0xff]  ;;  %v10387_v57 = vld [vmem:[#allocation44_spill] sm:$0xff]  ;;  %v10388_v50 = vld [vmem:[#allocation45_spill] sm:$0xff] }
 0x814   :  { %3864 = vmatprep.subr.mxu0 %v5264_v39  ;;  %3935 = vmatprep.subr.mxu1 %v8164_v46  ;;  %v5270_v46 = vld [vmem:[#allocation2 + $0xa8] sm:$0xff]  ;;  %v10389_v39 = vld [vmem:[#allocation46_spill] sm:$0xff] }
 0x815   :  { %3865 = vmatpush1.msra.mxu0 %v5265_v45  ;;  %3936 = vmatpush1.msra.mxu1 %v8168_v53  ;;  %v5271_v53 = vld [vmem:[#allocation2 + $0xa0] sm:$0xff] }
 0x816   :  { %3866 = vmatprep.subr.mxu0 %v5266_v44  ;;  %3937 = vmatprep.subr.mxu1 %v8172_v61  ;;  %v5272_v61 = vld [vmem:[#allocation2 + $0x88] sm:$0xff] }
 0x817   :  { %3867 = vmatpush1.msra.mxu0 %v5267_v4  ;;  %3938 = vmatpush1.msra.mxu1 %v8176_v58  ;;  %v5273_v58 = vld [vmem:[#allocation2 + $0x80] sm:$0xff]  ;;  %v10391_v44 = vld [vmem:[#allocation48_spill] sm:$0xff]  ;;  %v10392_v4 = vld [vmem:[#allocation49_spill] sm:$0xff] }
 0x818   :  { %3868 = vmatprep.subr.mxu0 %v5268_v3  ;;  %3939 = vmatprep.subr.mxu1 %v8180_v1  ;;  %v10338_v1 = vld [vmem:[#allocation132_spill] sm:$0xff]  ;;  %v10374_v24 = vld [vmem:[#allocation31_spill] sm:$0xff]  ;;  %v10393_v3 = vld [vmem:[#allocation50_spill] sm:$0xff] }
 0x819   :  { %3869 = vmatpush1.msra.mxu0 %v5269_v62  ;;  %3940 = vmatpush1.msra.mxu1 %v8184_v48  ;;  %v10339_v48 = vld [vmem:[#allocation133_spill] sm:$0xff]  ;;  %v10378_v43 = vld [vmem:[#allocation35_spill] sm:$0xff] }
 0x81a   :  { %3870 = vmatprep.subr.mxu0 %v5270_v46  ;;  %3941 = vmatprep.subr.mxu1 %v8188_v54  ;;  %v10340_v54 = vld [vmem:[#allocation134_spill] sm:$0xff]  ;;  %v10382_v55 = vld [vmem:[#allocation39_spill] sm:$0xff]  ;;  %v10395_v46 = vld [vmem:[#allocation52_spill] sm:$0xff] }
 0x81b   :  { %3871 = vmatpush1.msra.mxu0 %v5271_v53  ;;  %3942 = vmatpush1.msra.mxu1 %v8192_v52  ;;  %v10341_v52 = vld [vmem:[#allocation120_spill] sm:$0xff]  ;;  %v10386_v33 = vld [vmem:[#allocation43_spill] sm:$0xff]  ;;  %v10396_v53 = vld [vmem:[#allocation53_spill] sm:$0xff] }
 0x81c   :  { %3872 = vmatprep.subr.mxu0 %v5272_v61  ;;  %3943 = vmatprep.subr.mxu1 %v8196_v51  ;;  %v10342_v51 = vld [vmem:[#allocation139_spill] sm:$0xff]  ;;  %v10397_v61 = vld [vmem:[#allocation54_spill] sm:$0xff] }
 0x81d   :  { %3873 = vmatpush1.msra.mxu0 %v5273_v58  ;;  %3944 = vmatpush1.msra.mxu1 %v8200_v5  ;;  %v10343_v5 = vld [vmem:[#allocation140_spill] sm:$0xff]  ;;  %v10390_v45 = vld [vmem:[#allocation47_spill] sm:$0xff] }
 0x81e   :  { %3874 = vmatprep.subr.mxu0 %v8203_v8  ;;  %3945 = vmatprep.subr.mxu1 %v8206_v9  ;;  %v10344_v8 = vld [vmem:[#allocation151_spill] sm:$0xff]  ;;  %v10345_v9 = vld [vmem:[#allocation152_spill] sm:$0xff] }
 0x81f   :  { %3875 = vmatpush1.msra.mxu0 %v8209_v36  ;;  %3946 = vmatpush1.msra.mxu1 %v8212_v13  ;;  %v10346_v36 = vld [vmem:[#allocation153_spill] sm:$0xff]  ;;  %v10347_v13 = vld [vmem:[#allocation154_spill] sm:$0xff]  ;;  %v10394_v62 = vld [vmem:[#allocation51_spill] sm:$0xff] }
 0x820   :  { %3876 = vmatprep.subr.mxu0 %v8215_v14  ;;  %3947 = vmatprep.subr.mxu1 %v8218_v37  ;;  %v10348_v14 = vld [vmem:[#allocation135_spill] sm:$0xff]  ;;  %v10349_v37 = vld [vmem:[#allocation136_spill] sm:$0xff] }
 0x821   :  { %3877 = vmatpush1.msra.mxu0 %v8221_v30  ;;  %3910 = vmatprep.mubr.f32.mxu0 %v9563_v34  ;;  %v10350_v30 = vld [vmem:[#allocation155_spill] sm:$0xff] }
 0x822   :  { %3948 = vmatpush1.msra.mxu1 %v8225_v63  ;;  %3981 = vmatprep.mubr.f32.mxu1 %v9563_v34  ;;  %v10351_v63 = vld [vmem:[#allocation156_spill] sm:$0xff]  ;;  %v10398_v58 = vld [vmem:[#allocation55_spill] sm:$0xff] }
 0x823   :  { %3911 = vmatmul.mubr.f32.vlgmr.msra.gmra.mxu0 %v8633_v0  ;;  %3982 = vmatmul.mubr.f32.vlgmr.msra.gmra.mxu1 %v8633_v0  ;;  %v10371_v0 = vld [vmem:[#allocation28_spill] sm:$0xff] }
 0x824   :  { %4016 = vmatprep.subr.mxu0 %v8231_v6  ;;  %4087 = vmatprep.subr.mxu1 %v8234_v7  ;;  %v10352_v6 = vld [vmem:[#allocation143_spill] sm:$0xff]  ;;  %v10353_v7 = vld [vmem:[#allocation144_spill] sm:$0xff] }
 0x825   :  { %4017 = vmatpush1.msra.mxu0 %v8237_v15  ;;  %4088 = vmatpush1.msra.mxu1 %v8240_v16  ;;  %v10354_v15 = vld [vmem:[#allocation147_spill] sm:$0xff]  ;;  %v10355_v16 = vld [vmem:[#allocation148_spill] sm:$0xff] }
 0x826   :  { %4018 = vmatprep.subr.mxu0 %v8243_v18  ;;  %4089 = vmatprep.subr.mxu1 %v8246_v60  ;;  %v10356_v18 = vld [vmem:[#allocation149_spill] sm:$0xff]  ;;  %v10357_v60 = vld [vmem:[#allocation150_spill] sm:$0xff] }
 0x827   :  { %4019 = vmatpush1.msra.mxu0 %v10338_v1  ;;  %4090 = vmatpush1.msra.mxu1 %v10339_v48  ;;  %v10399_v1 = vld [vmem:[#allocation56_spill] sm:$0xff]  ;;  %v10400_v48 = vld [vmem:[#allocation57_spill] sm:$0xff] }
 0x828   :  { %4020 = vmatprep.subr.mxu0 %v10340_v54  ;;  %4091 = vmatprep.subr.mxu1 %v10341_v52  ;;  %v10401_v54 = vld [vmem:[#allocation58_spill] sm:$0xff]  ;;  %v10402_v52 = vld [vmem:[#allocation59_spill] sm:$0xff] }
 0x829   :  { %4021 = vmatpush1.msra.mxu0 %v10342_v51  ;;  %4092 = vmatpush1.msra.mxu1 %v10343_v5  ;;  %v10403_v51 = vld [vmem:[#allocation60_spill] sm:$0xff]  ;;  %v10404_v5 = vld [vmem:[#allocation61_spill] sm:$0xff] }
 0x82a   :  { %4022 = vmatprep.subr.mxu0 %v10344_v8  ;;  %4093 = vmatprep.subr.mxu1 %v10345_v9  ;;  %v10405_v8 = vld [vmem:[#allocation62_spill] sm:$0xff]  ;;  %v10406_v9 = vld [vmem:[#allocation63_spill] sm:$0xff] }
 0x82b   :  { %4023 = vmatpush1.msra.mxu0 %v10346_v36  ;;  %4094 = vmatpush1.msra.mxu1 %v10347_v13  ;;  %v10407_v36 = vld [vmem:[#allocation64_spill] sm:$0xff]  ;;  %v10408_v13 = vld [vmem:[#allocation65_spill] sm:$0xff] }
 0x82c   :  { %4024 = vmatprep.subr.mxu0 %v10348_v14  ;;  %4095 = vmatprep.subr.mxu1 %v10349_v37  ;;  %v10409_v14 = vld [vmem:[#allocation66_spill] sm:$0xff]  ;;  %v10410_v37 = vld [vmem:[#allocation67_spill] sm:$0xff] }
 0x82d   :  { %4025 = vmatpush1.msra.mxu0 %v10350_v30  ;;  %4096 = vmatpush1.msra.mxu1 %v10351_v63  ;;  %v10411_v30 = vld [vmem:[#allocation68_spill] sm:$0xff]  ;;  %v10412_v63 = vld [vmem:[#allocation69_spill] sm:$0xff] }
 0x82e   :  { %4026 = vmatprep.subr.mxu0 %v10352_v6  ;;  %4097 = vmatprep.subr.mxu1 %v10353_v7  ;;  %v10413_v6 = vld [vmem:[#allocation70_spill] sm:$0xff]  ;;  %v10414_v7 = vld [vmem:[#allocation71_spill] sm:$0xff] }
 0x82f   :  { %4027 = vmatpush1.msra.mxu0 %v10354_v15  ;;  %4098 = vmatpush1.msra.mxu1 %v10355_v16  ;;  %v10415_v15 = vld [vmem:[#allocation72_spill] sm:$0xff]  ;;  %v10416_v16 = vld [vmem:[#allocation73_spill] sm:$0xff] }
 0x830   :  { %4028 = vmatprep.subr.mxu0 %v10356_v18  ;;  %4099 = vmatprep.subr.mxu1 %v10357_v60  ;;  %v10417_v18 = vld [vmem:[#allocation74_spill] sm:$0xff]  ;;  %v10418_v60 = vld [vmem:[#allocation75_spill] sm:$0xff] }
 0x831   :  { %4029 = vmatpush1.msra.mxu0 %v10358_v31  ;;  %4100 = vmatpush1.msra.mxu1 %v10359_v26  ;;  %v10419_v31 = vld [vmem:[#allocation76_spill] sm:$0xff]  ;;  %v10420_v26 = vld [vmem:[#allocation77_spill] sm:$0xff] }
 0x832   :  { %4030 = vmatprep.subr.mxu0 %v10360_v20  ;;  %4101 = vmatprep.subr.mxu1 %v10361_v19  ;;  %v10421_v20 = vld [vmem:[#allocation78_spill] sm:$0xff]  ;;  %v10422_v19 = vld [vmem:[#allocation79_spill] sm:$0xff] }
 0x833   :  { %4031 = vmatpush1.msra.mxu0 %v10362_v40  ;;  %4102 = vmatpush1.msra.mxu1 %v10363_v23  ;;  %v10423_v40 = vld [vmem:[#allocation80_spill] sm:$0xff]  ;;  %v10424_v23 = vld [vmem:[#allocation81_spill] sm:$0xff] }
 0x834   :  { %4032 = vmatprep.subr.mxu0 %v10364_v27  ;;  %4103 = vmatprep.subr.mxu1 %v10365_v22  ;;  %v10425_v27 = vld [vmem:[#allocation82_spill] sm:$0xff]  ;;  %v10426_v22 = vld [vmem:[#allocation83_spill] sm:$0xff] }
 0x835   :  { %4033 = vmatpush1.msra.mxu0 %v10366_v41  ;;  %4104 = vmatpush1.msra.mxu1 %v10367_v21  ;;  %v10427_v41 = vld [vmem:[#allocation84_spill] sm:$0xff]  ;;  %v10428_v21 = vld [vmem:[#allocation85_spill] sm:$0xff] }
 0x836   :  { %4034 = vmatprep.subr.mxu0 %v10368_v42  ;;  %4105 = vmatprep.subr.mxu1 %v10369_v17  ;;  %v10429_v42 = vld [vmem:[#allocation86_spill] sm:$0xff]  ;;  %v10430_v17 = vld [vmem:[#allocation87_spill] sm:$0xff] }
 0x837   :  { %4035 = vmatpush1.msra.mxu0 %v10370_v47  ;;  %4106 = vmatpush1.msra.mxu1 %v10371_v0  ;;  %v10431_v47 = vld [vmem:[#allocation88_spill] sm:$0xff]  ;;  %v10432_v0 = vld [vmem:[#allocation89_spill] sm:$0xff] }
 0x838   :  { %4036 = vmatprep.subr.mxu0 %v10372_v56  ;;  %4107 = vmatprep.subr.mxu1 %v10373_v25  ;;  %v10433_v56 = vld [vmem:[#allocation90_spill] sm:$0xff]  ;;  %v10434_v25 = vld [vmem:[#allocation91_spill] sm:$0xff] }
 0x839   :  { %4037 = vmatpush1.msra.mxu0 %v10374_v24  ;;  %4108 = vmatpush1.msra.mxu1 %v10375_v28  ;;  %v10435_v24 = vld [vmem:[#allocation92_spill] sm:$0xff]  ;;  %v10436_v28 = vld [vmem:[#allocation93_spill] sm:$0xff] }
 0x83a   :  { %4038 = vmatprep.subr.mxu0 %v10376_v12  ;;  %4109 = vmatprep.subr.mxu1 %v10377_v32  ;;  %v10437_v12 = vld [vmem:[#allocation94_spill] sm:$0xff]  ;;  %v10438_v32 = vld [vmem:[#allocation95_spill] sm:$0xff] }
 0x83b   :  { %4039 = vmatpush1.msra.mxu0 %v10378_v43  ;;  %4110 = vmatpush1.msra.mxu1 %v10379_v59  ;;  %v10439_v43 = vld [vmem:[#allocation96_spill] sm:$0xff]  ;;  %v10440_v59 = vld [vmem:[#allocation97_spill] sm:$0xff] }
 0x83c   :  { %4040 = vmatprep.subr.mxu0 %v10380_v29  ;;  %4111 = vmatprep.subr.mxu1 %v10381_v49  ;;  %v10441_v29 = vld [vmem:[#allocation98_spill] sm:$0xff]  ;;  %v10442_v49 = vld [vmem:[#allocation99_spill] sm:$0xff] }
 0x83d   :  { %4041 = vmatpush1.msra.mxu0 %v10382_v55  ;;  %4112 = vmatpush1.msra.mxu1 %v10383_v11  ;;  %v10443_v55 = vld [vmem:[#allocation100_spill] sm:$0xff]  ;;  %v10444_v11 = vld [vmem:[#allocation101_spill] sm:$0xff] }
 0x83e   :  { %4042 = vmatprep.subr.mxu0 %v10384_v35  ;;  %4113 = vmatprep.subr.mxu1 %v10385_v38  ;;  %v10445_v35 = vld [vmem:[#allocation102_spill] sm:$0xff]  ;;  %v10446_v38 = vld [vmem:[#allocation103_spill] sm:$0xff] }
 0x83f   :  { %4043 = vmatpush1.msra.mxu0 %v10386_v33  ;;  %4114 = vmatpush1.msra.mxu1 %v10387_v57  ;;  %v10447_v33 = vld [vmem:[#allocation104_spill] sm:$0xff]  ;;  %v10448_v57 = vld [vmem:[#allocation105_spill] sm:$0xff] }
 0x840   :  { %4044 = vmatprep.subr.mxu0 %v10388_v50  ;;  %4115 = vmatprep.subr.mxu1 %v10389_v39  ;;  %v10449_v50 = vld [vmem:[#allocation106_spill] sm:$0xff]  ;;  %v10450_v39 = vld [vmem:[#allocation107_spill] sm:$0xff] }
 0x841   :  { %4045 = vmatpush1.msra.mxu0 %v10390_v45  ;;  %4116 = vmatpush1.msra.mxu1 %v10391_v44  ;;  %v10451_v45 = vld [vmem:[#allocation108_spill] sm:$0xff]  ;;  %v10452_v44 = vld [vmem:[#allocation109_spill] sm:$0xff] }
 0x842   :  { %4046 = vmatprep.subr.mxu0 %v10392_v4  ;;  %4117 = vmatprep.subr.mxu1 %v10393_v3  ;;  %v10453_v4 = vld [vmem:[#allocation110_spill] sm:$0xff]  ;;  %v10454_v3 = vld [vmem:[#allocation111_spill] sm:$0xff] }
 0x843   :  { %4047 = vmatpush1.msra.mxu0 %v10394_v62  ;;  %4118 = vmatpush1.msra.mxu1 %v10395_v46  ;;  %v10455_v62 = vld [vmem:[#allocation112_spill] sm:$0xff]  ;;  %v10456_v46 = vld [vmem:[#allocation113_spill] sm:$0xff] }
 0x844   :  { %4048 = vmatprep.subr.mxu0 %v10396_v53  ;;  %4119 = vmatprep.subr.mxu1 %v10397_v61  ;;  %v10457_v53 = vld [vmem:[#allocation114_spill] sm:$0xff]  ;;  %v10458_v61 = vld [vmem:[#allocation115_spill] sm:$0xff] }
 0x845   :  { %4049 = vmatpush2.msra.mxu0 %v10398_v58  ;;  %4120 = vmatpush2.msra.mxu1 %v10399_v1  ;;  %v10459_v58 = vld [vmem:[#allocation116_spill] sm:$0xff] }
 0x846   :  { %4050 = vmatprep.subr.mxu0 %v10400_v48  ;;  %4121 = vmatprep.subr.mxu1 %v10401_v54  ;;  %v10460_v48 = vld [vmem:[#allocation11_spill] sm:$0xff] }
 0x847   :  { %4051 = vmatpush2.msra.mxu0 %v10402_v52  ;;  %4122 = vmatpush2.msra.mxu1 %v10403_v51 }
 0x848   :  { %4052 = vmatprep.subr.mxu0 %v10404_v5  ;;  %4123 = vmatprep.subr.mxu1 %v10405_v8  ;;  %v10461_v5 = vld [vmem:[#allocation12_spill] sm:$0xff] }
 0x849   :  { %4053 = vmatpush2.msra.mxu0 %v10406_v9  ;;  %4124 = vmatpush2.msra.mxu1 %v10407_v36 }
 0x84a   :  { %4054 = vmatprep.subr.mxu0 %v10408_v13  ;;  %4125 = vmatprep.subr.mxu1 %v10409_v14  ;;  %v10462_v13 = vld [vmem:[#allocation13_spill] sm:$0xff] }
 0x84b   :  { %4055 = vmatpush2.msra.mxu0 %v10410_v37  ;;  %4126 = vmatpush2.msra.mxu1 %v10411_v30 }
 0x84c   :  { %4056 = vmatprep.subr.mxu0 %v10412_v63  ;;  %4127 = vmatprep.subr.mxu1 %v10413_v6  ;;  %v10463_v6 = vld [vmem:[#allocation14_spill] sm:$0xff] }
 0x84d   :  { %4057 = vmatpush2.msra.mxu0 %v10414_v7  ;;  %4128 = vmatpush2.msra.mxu1 %v10415_v15 }
 0x84e   :  { %4058 = vmatprep.subr.mxu0 %v10416_v16  ;;  %4129 = vmatprep.subr.mxu1 %v10417_v18 }
 0x84f   :  { %4059 = vmatpush2.msra.mxu0 %v10418_v60  ;;  %4130 = vmatpush2.msra.mxu1 %v10419_v31 }
 0x850   :  { %4060 = vmatprep.subr.mxu0 %v10420_v26  ;;  %4131 = vmatprep.subr.mxu1 %v10421_v20  ;;  %v10464_v20 = vld [vmem:[#allocation145_spill] sm:$0xff] }
 0x851   :  { %4061 = vmatpush2.msra.mxu0 %v10422_v19  ;;  %4132 = vmatpush2.msra.mxu1 %v10423_v40 }
 0x852   :  { %4062 = vmatprep.subr.mxu0 %v10424_v23  ;;  %4133 = vmatprep.subr.mxu1 %v10425_v27 }
 0x853   :  { %4063 = vmatpush2.msra.mxu0 %v10426_v22  ;;  %4134 = vmatpush2.msra.mxu1 %v10427_v41  ;;  %v10465_v41 = vld [vmem:[#allocation146_spill] sm:$0xff] }
 0x854   :  { %4064 = vmatprep.subr.mxu0 %v10428_v21  ;;  %4135 = vmatprep.subr.mxu1 %v10429_v42 }
 0x855   :  { %4065 = vmatpush2.msra.mxu0 %v10430_v17  ;;  %4136 = vmatpush2.msra.mxu1 %v10431_v47 }
 0x856   :  { %4066 = vmatprep.subr.mxu0 %v10432_v0  ;;  %4137 = vmatprep.subr.mxu1 %v10433_v56 }
 0x857   :  { %4067 = vmatpush2.msra.mxu0 %v10434_v25  ;;  %4138 = vmatpush2.msra.mxu1 %v10435_v24  ;;  %v10466_v24 = vld [vmem:[#allocation161_spill] sm:$0xff] }
 0x858   :  { %4068 = vmatprep.subr.mxu0 %v10436_v28  ;;  %4139 = vmatprep.subr.mxu1 %v10437_v12 }
 0x859   :  { %4069 = vmatpush2.msra.mxu0 %v10438_v32  ;;  %4140 = vmatpush2.msra.mxu1 %v10439_v43  ;;  %v10467_v43 = vld [vmem:[#allocation162_spill] sm:$0xff] }
 0x85a   :  { %4070 = vmatprep.subr.mxu0 %v10440_v59  ;;  %4141 = vmatprep.subr.mxu1 %v10441_v29 }
 0x85b   :  { %4071 = vmatpush2.msra.mxu0 %v10442_v49  ;;  %4142 = vmatpush2.msra.mxu1 %v10443_v55 }
 0x85c   :  { %4072 = vmatprep.subr.mxu0 %v10444_v11  ;;  %4143 = vmatprep.subr.mxu1 %v10445_v35 }
 0x85d   :  { %4073 = vmatpush2.msra.mxu0 %v10446_v38  ;;  %4144 = vmatpush2.msra.mxu1 %v10447_v33 }
 0x85e   :  { %4074 = vmatprep.subr.mxu0 %v10448_v57  ;;  %4145 = vmatprep.subr.mxu1 %v10449_v50 }
 0x85f   :  { %4075 = vmatpush2.msra.mxu0 %v10450_v39  ;;  %4146 = vmatpush2.msra.mxu1 %v10451_v45 }
 0x860   :  { %4076 = vmatprep.subr.mxu0 %v10452_v44  ;;  %4147 = vmatprep.subr.mxu1 %v10453_v4 }
 0x861   :  { %4077 = vmatpush2.msra.mxu0 %v10454_v3  ;;  %4148 = vmatpush2.msra.mxu1 %v10455_v62 }
 0x862   :  { %4078 = vmatprep.subr.mxu0 %v10456_v46  ;;  %4149 = vmatprep.subr.mxu1 %v10457_v53 }
 0x863   :  { %4079 = vmatpush2.msra.mxu0 %v10458_v61  ;;  %4150 = vmatpush2.msra.mxu1 %v10459_v58  ;;  %v4197_v61 = vld [vmem:[%s8896_s3 + $0x78] sm:$0xff]  ;;  %v4196_v58 = vld [vmem:[%s8896_s3 + $0x70] sm:$0xff] }
 0x864   :  { %4373 = vmatprep.subr.mxu0 %v9563_v34 }
 0x8c2   :  { %v3746_v1 = vpop.f32.mrf.mxu0  ;;  %v3817_v36 = vpop.f32.mrf.mxu1 }
 0x8c3   :  { %v3747_v54 = vadd.f32 %v3746_v1, %v10460_v48  ;;  %v3818_v14 = vadd.f32 %v3817_v36, %v10462_v13  ;;  %v4194_v1 = vld [vmem:[%s8896_s3 + $0x60] sm:$0xff]  ;;  %v4188_v36 = vld [vmem:[%s8896_s3 + $0x30] sm:$0xff] }
 0x8c4   :  { %v3748_v52 = vpop.f32.mrf.mxu0  ;;  %v3819_v37 = vpop.f32.mrf.mxu1 }
 0x8c5   :  { %v4346_v51 = vmul.f32 -1.442695, %v3747_v54  ;;  %v3749_v8 = vadd.f32 %v3748_v52, %v10461_v5  ;;  %v4348_v30 = vmul.f32 -1.442695, %v3818_v14  ;;  %v3820_v7 = vadd.f32 %v3819_v37, %v10463_v6  ;;  %v4193_v54 = vld [vmem:[%s8896_s3 + $0x58] sm:$0xff]  ;;  %v4192_v52 = vld [vmem:[%s8896_s3 + $0x50] sm:$0xff] }
 0x8c6   :  { %v4187_v14 = vld [vmem:[%s8896_s3 + $0x28] sm:$0xff]  ;;  %v4186_v37 = vld [vmem:[%s8896_s3 + $0x20] sm:$0xff] }
 0x8c7   :  { %4623 = vpow2.f32 %v4346_v51  ;;  %v4347_v9 = vmul.f32 -1.442695, %v3749_v8  ;;  %v4191_v51 = vld [vmem:[%s8896_s3 + $0x48] sm:$0xff]  ;;  %v4190_v8 = vld [vmem:[%s8896_s3 + $0x40] sm:$0xff] }
 0x8c9   :  { %4625 = vpow2.f32 %v4347_v9  ;;  %v4189_v9 = vld [vmem:[%s8896_s3 + $0x38] sm:$0xff] }
 0x8ca   :  { %4627 = vpow2.f32 %v4348_v30  ;;  %v4185_v30 = vld [vmem:[%s8896_s3 + $0x18] sm:$0xff] }
 0x8d4   :  { %v4624_v63 = vpop.eup %4623 }
 0x8d5   :  { %v3831_v15 = vadd.f32 1.0, %v4624_v63  ;;  %v4184_v63 = vld [vmem:[%s8896_s3 + $0x10] sm:$0xff] }
 0x8d6   :  { %v4626_v16 = vpop.eup %4625 }
 0x8d7   :  { %4629 = vrcp.f32 %v3831_v15  ;;  %v3832_v18 = vadd.f32 1.0, %v4626_v16  ;;  %v4628_v60 = vpop.eup %4627  ;;  %v4182_v15 = vld [vmem:[%s8896_s3] sm:$0xff] }
 0x8d8   :  { %4631 = vtanh.f32 %v3820_v7  ;;  %v3833_v42 = vadd.f32 1.0, %v4628_v60  ;;  %v4183_v7 = vld [vmem:[%s8896_s3 + $0x8] sm:$0xff] }
 0x8d9   :  { %4633 = vrcp.f32 %v3832_v18 }
 0x8e3   :  { %v3912_v31 = vpop.f32.mrf.mxu0  ;;  %v3983_v25 = vpop.f32.mrf.mxu1 }
 0x8e4   :  { %v4630_v26 = vpop.eup %4629  ;;  %v3988_v19 = vadd.f32 %v3912_v31, %v10464_v20  ;;  %v3990_v28 = vadd.f32 %v3983_v25, %v10466_v24 }
 0x8e5   :  { %v4632_v40 = vpop.eup %4631  ;;  %v3914_v23 = vpop.f32.mrf.mxu0 }
 0x8e6   :  { %v4634_v27 = vpop.eup %4633  ;;  %v4349_v22 = vmul.f32 -1.442695, %v3988_v19  ;;  %v3989_v21 = vadd.f32 %v3914_v23, %v10465_v41  ;;  %v3842_v47 = vmul.f32 %v4632_v40, %v4630_v26  ;;  %v3985_v12 = vpop.f32.mrf.mxu1  ;;  %v4351_v32 = vmul.f32 -1.442695, %v3990_v28 }
 0x8e7   :  { %v3841_v17 = vmul.f32 %v4634_v27, %v8624_v2  ;;  %v3991_v59 = vadd.f32 %v3985_v12, %v10467_v43 }
 0x8e8   :  { %4635 = vpow2.f32 %v4349_v22  ;;  %v4350_v0 = vmul.f32 -1.442695, %v3989_v21 }
 0x8e9   :  { %v8812_v56 = vadd.f32 %v3842_v47, %v3841_v17 }
 0x8ea   :  { %4637 = vpow2.f32 %v4350_v0 }
 0x8eb   :  { %4639 = vrcp.f32 %v3833_v42 }
 0x8ec   :  { %4641 = vtanh.f32 %v8812_v56 }
 0x8ed   :  { %4643 = vpow2.f32 %v4351_v32  ;;  %v4355_v32 = vld [vmem:[%s8896_s3 + $0x80] ss:$0 sm:$0xff] }
 0x8ee   :  { %4645 = vtanh.f32 %v3991_v59 }
 0x8f5   :  { %v4636_v29 = vpop.eup %4635 }
 0x8f6   :  { %v4001_v49 = vadd.f32 1.0, %v4636_v29 }
 0x8f7   :  { %v4638_v2 = vpop.eup %4637 }
 0x8f8   :  { %v4640_v55 = vpop.eup %4639  ;;  %4647 = vrcp.f32 %v4001_v49  ;;  %v4002_v11 = vadd.f32 1.0, %v4638_v2 }
 0x8f9   :  { %v4642_v35 = vpop.eup %4641 }
 0x8fa   :  { %4649 = vrcp.f32 %v4002_v11  ;;  %v3845_v38 = vmul.f32 %v4642_v35, %v4640_v55  ;;  %v4644_v33 = vpop.eup %4643 }
 0x8fb   :  { %v4646_v57 = vpop.eup %4645  ;;  %v4003_v44 = vadd.f32 1.0, %v4644_v33 }
 0x8fc   :  { %4080 = vmatprep.mubr.f32.mxu0 %v3845_v38  ;;  %4151 = vmatprep.mubr.f32.mxu1 %v3845_v38 }
 0x8fd   :  { %4651 = vrcp.f32 %v4003_v44 }
 0x905   :  { %v4648_v50 = vpop.eup %4647 }
 0x906   :  { %v4012_v39 = vmul.f32 %v4648_v50, %v4646_v57 }
 0x907   :  { %v4650_v45 = vpop.eup %4649 }
 0x908   :  { %v4011_v4 = vmul.f32 %v4650_v45, %v8630_v10  ;;  %v4195_v10 = vld [vmem:[%s8896_s3 + $0x68] sm:$0xff] }
 0x90a   :  { %v4013_v3 = vadd.f32 %v4012_v39, %v4011_v4  ;;  %v4652_v62 = vpop.eup %4651 }
 0x90c   :  { %4653 = vtanh.f32 %v4013_v3 }
 0x919   :  { %v4654_v46 = vpop.eup %4653 }
 0x91a   :  { %v4015_v53 = vmul.f32 %v4654_v46, %v4652_v62 }
 0x91c   :  { %4081 = vmatmul.mubr.f32.vlgmr.msra.gmra.mxu0 %v4015_v53  ;;  %4152 = vmatmul.mubr.f32.vlgmr.msra.gmra.mxu1 %v4015_v53 }
 0x91d   :  { %4374 = vmatpush3.msra.mxu0 %v4197_v61  ;;  %4405 = vmatprep.mubr.msk.f32.mxu0 %vm5345_vm2, %v9563_v34 }
 0x91e   :  { %4375 = vmatprep.subr.mxu0 %v9563_v34 }
 0x91f   :  { %4376 = vmatpush3.msra.mxu0 %v4196_v58 }
 0x920   :  { %4377 = vmatprep.subr.mxu0 %v9563_v34 }
 0x921   :  { %4378 = vmatpush3.msra.mxu0 %v4195_v10 }
 0x922   :  { %4379 = vmatprep.subr.mxu0 %v9563_v34 }
 0x923   :  { %4380 = vmatpush3.msra.mxu0 %v4194_v1 }
 0x924   :  { %4381 = vmatprep.subr.mxu0 %v9563_v34 }
 0x925   :  { %4382 = vmatpush3.msra.mxu0 %v4193_v54 }
 0x926   :  { %4383 = vmatprep.subr.mxu0 %v9563_v34 }
 0x927   :  { %4384 = vmatpush3.msra.mxu0 %v4192_v52 }
 0x928   :  { %4385 = vmatprep.subr.mxu0 %v9563_v34 }
 0x929   :  { %4386 = vmatpush3.msra.mxu0 %v4191_v51 }
 0x92a   :  { %4387 = vmatprep.subr.mxu0 %v9563_v34 }
 0x92b   :  { %4388 = vmatpush3.msra.mxu0 %v4190_v8 }
 0x92c   :  { %4389 = vmatprep.subr.mxu0 %v9563_v34 }
 0x92d   :  { %4390 = vmatpush3.msra.mxu0 %v4189_v9 }
 0x92e   :  { %4391 = vmatprep.subr.mxu0 %v9563_v34 }
 0x92f   :  { %4392 = vmatpush3.msra.mxu0 %v4188_v36 }
 0x930   :  { %4393 = vmatprep.subr.mxu0 %v9563_v34 }
 0x931   :  { %4394 = vmatpush3.msra.mxu0 %v4187_v14 }
 0x932   :  { %4395 = vmatprep.subr.mxu0 %v9563_v34 }
 0x933   :  { %4396 = vmatpush3.msra.mxu0 %v4186_v37 }
 0x934   :  { %4397 = vmatprep.subr.mxu0 %v9563_v34 }
 0x935   :  { %4398 = vmatpush3.msra.mxu0 %v4185_v30 }
 0x936   :  { %4399 = vmatprep.subr.mxu0 %v9563_v34 }
 0x937   :  { %4400 = vmatpush3.msra.mxu0 %v4184_v63 }
 0x938   :  { %4401 = vmatprep.subr.mxu0 %v9563_v34 }
 0x939   :  { %4402 = vmatpush3.msra.mxu0 %v4183_v7 }
 0x93a   :  { %4403 = vmatprep.subr.mxu0 %v9563_v34 }
 0x93b   :  { %4404 = vmatpush3.msra.mxu0 %v4182_v15 }
 0x9dc   :  { %v4082_v16 = vpop.f32.mrf.mxu0  ;;  %v4153_v19 = vpop.f32.mrf.mxu1 }
 0x9dd   :  { %v4083_v18 = vadd.f32 %v4082_v16, %v10460_v48  ;;  %v4154_v40 = vadd.f32 %v4153_v19, %v10462_v13 }
 0x9de   :  { %v4084_v60 = vpop.f32.mrf.mxu0  ;;  %v4155_v23 = vpop.f32.mrf.mxu1 }
 0x9df   :  { %v4352_v31 = vmul.f32 -1.442695, %v4083_v18  ;;  %v4085_v26 = vadd.f32 %v4084_v60, %v10461_v5  ;;  %v4354_v27 = vmul.f32 -1.442695, %v4154_v40  ;;  %v4156_v41 = vadd.f32 %v4155_v23, %v10463_v6 }
 0x9e1   :  { %4655 = vpow2.f32 %v4352_v31  ;;  %v4353_v20 = vmul.f32 -1.442695, %v4085_v26 }
 0x9e3   :  { %4657 = vpow2.f32 %v4353_v20 }
 0x9e4   :  { %4659 = vpow2.f32 %v4354_v27 }
 0x9ee   :  { %v4656_v22 = vpop.eup %4655 }
 0x9ef   :  { %v4167_v34 = vadd.f32 1.0, %v4656_v22 }
 0x9f0   :  { %v4658_v21 = vpop.eup %4657 }
 0x9f1   :  { %4661 = vrcp.f32 %v4167_v34  ;;  %v4168_v48 = vadd.f32 1.0, %v4658_v21  ;;  %v4660_v42 = vpop.eup %4659 }
 0x9f2   :  { %4663 = vtanh.f32 %v4156_v41  ;;  %v4169_v0 = vadd.f32 1.0, %v4660_v42 }
 0x9f3   :  { %4665 = vrcp.f32 %v4168_v48 }
 0x9f4   :  { %4667 = vrcp.f32 %v4169_v0 }
 0x9fe   :  { %v4662_v5 = vpop.eup %4661 }
 0x9ff   :  { %v4664_v17 = vpop.eup %4663 }
 0xa00   :  { %v4666_v47 = vpop.eup %4665  ;;  %v4178_v13 = vmul.f32 %v4664_v17, %v4662_v5 }
 0xa01   :  { %v4177_v25 = vmul.f32 %v4666_v47, %v8812_v56  ;;  %v4668_v28 = vpop.eup %4667 }
 0xa03   :  { %v4179_v24 = vadd.f32 %v4178_v13, %v4177_v25 }
 0xa05   :  { %4669 = vtanh.f32 %v4179_v24 }
 0xa12   :  { %v4670_v6 = vpop.eup %4669 }
 0xa13   :  { %v4181_v12 = vmul.f32 %v4670_v6, %v4668_v28 }
 0xa15   :  { %4406 = vmatmul.mubr.f32.vlgmr.msra.gmra.mxu0 %v4181_v12 }
 0xad5   :  { %v4269_v43 = vpop.f32.mrf.mxu0 }
 0xad6   :  { %v4270_v59 = vadd.f32 %v4355_v32, %v4269_v43 }
 0xad7   :  { %v4407_v29 = vpop.f32.mrf.mxu0 }
 0xad8   :  { %4274 = vst.msk [vmem:[#allocation7] sm:$0x3] %vm4273_vm3, %v4270_v59 }
 0xad9   :  { %5325 = shalt.err (!%p5322_p0)
}
 0xada   :  { %4284 = dma.vmem_to_hbm [thread:$0]  %s4282_s8, 32, %s8897_s4, [#allocation4]  }
 0xadb   :  { %5338 = dma.done.wait [#allocation4], 32  }
 0xadc   :  { %5339 = vsyncadd [#allocation4], 4294967264 }
 0xadd   :  { %4288 = vsyncpa [#allocation3], 1 }
 0xade   :  { %4289 = vsyncpa [#allocation6], 1 }
 0xadf   :  { %4290 = vsyncpa [#allocation4], 1 }

</bundles_post_ra>
